<compile_context>
chip_gen: v5e
topology: v5e:2x2
jax: 0.10.0
libtpu: 0.0.40
codegen_flags: <defaults>
</compile_context>

<pallas_src>
import functools
import math

import numpy as np
import jax
import jax.numpy as jnp
from jax.experimental import pallas as pl
from jax.experimental.pallas import tpu as pltpu


# ----------------------------------------------------------------------------
# Fused Pallas kernel: the entire autoencoder forward in one call.
# ----------------------------------------------------------------------------
def _autoencoder_fused_kernel(*refs):
    """refs = (x_T, [G, W, b] * 6 layers, out_T).

    x_T:  (C_in, B*H*W)          activations kept as (channels, batch*spatial)
    G:    (taps, cols_in, cols_out)   0/1 spatial gather per kernel tap
    W:    (taps, C_out, C_in)         per-tap channel-mixing weights
    b:    (C_out, 1) or (C_out, cols_out)
    """
    x_ref = refs[0]
    out_ref = refs[-1]
    layer_refs = refs[1:-1]
    activations = ("relu", "relu", "none", "none", "relu", "sigmoid")

    y = x_ref[...]
    for idx, act in enumerate(activations):
        g_ref = layer_refs[3 * idx + 0]
        w_ref = layer_refs[3 * idx + 1]
        b_ref = layer_refs[3 * idx + 2]
        num_taps = g_ref.shape[0]

        acc = None
        for k in range(num_taps):                      # unrolled, static
            gathered = jnp.dot(y, g_ref[k],            # (C_in, cols_out)
                               preferred_element_type=jnp.float32)
            mixed = jnp.dot(w_ref[k], gathered,        # (C_out, cols_out)
                            preferred_element_type=jnp.float32)
            acc = mixed if acc is None else acc + mixed

        acc = acc + b_ref[...]
        if act == "relu":
            acc = jnp.maximum(acc, 0.0)
        elif act == "sigmoid":
            acc = jax.nn.sigmoid(acc)
        y = acc

    out_ref[...] = y.astype(out_ref.dtype)


def autoencoder_forward(packed, x):
    """x: (B, C, H, W) NCHW -> reconstruction (B, C, H, W)."""
    b, c_in, h, w = x.shape
    # channels x (batch, h, w): large dim goes to lanes (lane-dense layout).
    x_t = x.transpose(1, 0, 2, 3).reshape(c_in, b * h * w)

    operands = (x_t,) + tuple(packed)
    out_t = pl.pallas_call(
        _autoencoder_fused_kernel,
        out_shape=jax.ShapeDtypeStruct((c_in, b * h * w), jnp.float32),
        in_specs=[pl.BlockSpec(memory_space=pltpu.MemorySpace.VMEM)]
        * len(operands),
        out_specs=pl.BlockSpec(memory_space=pltpu.MemorySpace.VMEM),
        compiler_params=pltpu.CompilerParams(
            vmem_limit_bytes=32 * 1024 * 1024),
    )(*operands)

    return out_t.reshape(c_in, b, h, w).transpose(1, 0, 2, 3)


# ----------------------------------------------------------------------------
# Host-side packing: gather matrices + per-tap weights (built once).
# ----------------------------------------------------------------------------
def _build_gather_t(batch, h_in, w_in, h_out, w_out, kh, kw, stride, pad,
                    transposed):
    """Returns G of shape (kh*kw, batch*h_in*w_in, batch*h_out*w_out)."""
    sp_in = h_in * w_in
    sp_out = h_out * w_out
    g = np.zeros((kh * kw, batch * sp_in, batch * sp_out), np.float32)
    for i in range(kh):
        for j in range(kw):
            k = i * kw + j
            for ho in range(h_out):
                for wo in range(w_out):
                    if transposed:
                        nh, nw = ho + pad - i, wo + pad - j
                        if nh % stride != 0 or nw % stride != 0:
                            continue
                        hi, wi = nh // stride, nw // stride
                    else:
                        hi = stride * ho + i - pad
                        wi = stride * wo + j - pad
                    if 0 <= hi < h_in and 0 <= wi < w_in:
                        for n in range(batch):
                            g[k,
                              n * sp_in + hi * w_in + wi,
                              n * sp_out + ho * w_out + wo] = 1.0
    return jnp.asarray(g)


def pack_operands(params, image_size, embedding_size, batch):
    h, w, c_in = image_size
    c1, c2 = 32, 64
    h2, w2 = h // 2, w // 2
    h4, w4 = h // 4, w // 4
    f32 = jnp.float32
    ops = []

    def add(g, wt, b):
        ops.extend([g.astype(f32), wt.astype(f32), b.astype(f32)])

    # 1) Conv2d(c_in -> c1, k3 s2 p1) + relu
    add(_build_gather_t(batch, h, w, h2, w2, 3, 3, 2, 1, False),
        params["enc_conv1_w"].transpose(2, 3, 0, 1).reshape(9, c1, c_in),
        params["enc_conv1_b"].reshape(c1, 1))
    # 2) Conv2d(c1 -> c2, k3 s2 p1) + relu
    add(_build_gather_t(batch, h2, w2, h4, w4, 3, 3, 2, 1, False),
        params["enc_conv2_w"].transpose(2, 3, 0, 1).reshape(9, c2, c1),
        params["enc_conv2_b"].reshape(c2, 1))
    # 3) enc fc == Conv2d(c2 -> emb, kernel (h4,w4)) down to a 1x1 map.
    add(_build_gather_t(batch, h4, w4, 1, 1, h4, w4, 1, 0, False),
        params["enc_fc_w"].reshape(embedding_size, c2, h4, w4)
        .transpose(2, 3, 0, 1).reshape(h4 * w4, embedding_size, c2),
        params["enc_fc_b"].reshape(embedding_size, 1))
    # 4) dec fc == ConvTranspose2d(emb -> c2, kernel (h4,w4)) from 1x1 map.
    #    Bias depends on (channel, spatial) so pass the full (c2, B*h4*w4) map.
    add(_build_gather_t(batch, 1, 1, h4, w4, h4, w4, 1, 0, True),
        params["dec_fc_w"].reshape(c2, h4, w4, embedding_size)
        .transpose(1, 2, 0, 3).reshape(h4 * w4, c2, embedding_size),
        jnp.tile(params["dec_fc_b"].reshape(c2, h4 * w4), (1, batch)))
    # 5) ConvTranspose2d(c2 -> c1, k3 s2 p1 op1) + relu
    add(_build_gather_t(batch, h4, w4, h2, w2, 3, 3, 2, 1, True),
        params["dec_conv1_w"].transpose(2, 3, 1, 0).reshape(9, c1, c2),
        params["dec_conv1_b"].reshape(c1, 1))
    # 6) ConvTranspose2d(c1 -> c_in, k3 s2 p1 op1) + sigmoid
    add(_build_gather_t(batch, h2, w2, h, w, 3, 3, 2, 1, True),
        params["dec_conv2_w"].transpose(2, 3, 1, 0).reshape(9, c_in, c1),
        params["dec_conv2_b"].reshape(c_in, 1))
    return tuple(ops)


# ----------------------------------------------------------------------------
# Parameters (PyTorch layouts).  Init is normal/sqrt(fan_in).
# TODO(synk): PyTorch's default init is kaiming-uniform; only forward semantics
# are matched here, not the init distribution.
# ----------------------------------------------------------------------------
def init_params(key, image_size, embedding_size):
    h, w, c_in = image_size
    c1, c2 = 32, 64
    flat = c2 * (h // 4) * (w // 4)
    ks = jax.random.split(key, 12)

    def winit(k, shape, fan_in):
        return jax.random.normal(k, shape, jnp.float32) / math.sqrt(fan_in)

    return {
        "enc_conv1_w": winit(ks[0], (c1, c_in, 3, 3), c_in * 9),
        "enc_conv1_b": winit(ks[1], (c1,), c_in * 9),
        "enc_conv2_w": winit(ks[2], (c2, c1, 3, 3), c1 * 9),
        "enc_conv2_b": winit(ks[3], (c2,), c1 * 9),
        "enc_fc_w": winit(ks[4], (embedding_size, flat), flat),
        "enc_fc_b": winit(ks[5], (embedding_size,), flat),
        "dec_fc_w": winit(ks[6], (flat, embedding_size), embedding_size),
        "dec_fc_b": winit(ks[7], (flat,), embedding_size),
        "dec_conv1_w": winit(ks[8], (c2, c1, 3, 3), c2 * 9),
        "dec_conv1_b": winit(ks[9], (c1,), c2 * 9),
        "dec_conv2_w": winit(ks[10], (c1, c_in, 3, 3), c1 * 9),
        "dec_conv2_b": winit(ks[11], (c_in,), c1 * 9),
    }


# ----------------------------------------------------------------------------
# Pure-JAX reference (im2col based) used only for a correctness check.
# ----------------------------------------------------------------------------
def _ref_act(y, activation):
    if activation == "relu":
        return jnp.maximum(y, 0.0)
    if activation == "sigmoid":
        return jax.nn.sigmoid(y)
    return y


def _ref_conv2d(x, w, bias, stride, padding, activation):
    xp = jnp.pad(x, ((0, 0), (0, 0), (padding, padding), (padding, padding)))
    n, c, hp, wp = xp.shape
    cout, cin, kh, kw = w.shape
    ho = (hp - kh) // stride + 1
    wo = (wp - kw) // stride + 1
    patches = []
    for i in range(kh):
        for j in range(kw):
            patches.append(
                xp[:, :, i:i + stride * ho:stride, j:j + stride * wo:stride])
    patches = jnp.stack(patches, axis=2)                 # (n, c, kh*kw, ho, wo)
    a = patches.transpose(0, 3, 4, 1, 2).reshape(n * ho * wo, c * kh * kw)
    b = w.reshape(cout, cin * kh * kw).T
    out = jnp.dot(a, b, precision=jax.lax.Precision.HIGHEST) + bias
    out = _ref_act(out, activation)
    return out.reshape(n, ho, wo, cout).transpose(0, 3, 1, 2)


def _ref_conv_transpose2d(x, w, bias, stride, padding, output_padding,
                          activation):
    n, c, h, w_sp = x.shape
    cin, cout, kh, kw = w.shape
    hd = (h - 1) * stride + 1
    wd = (w_sp - 1) * stride + 1
    xd = jnp.zeros((n, c, hd, wd), x.dtype).at[:, :, ::stride, ::stride].set(x)
    lo = kh - 1 - padding
    hi = kh - 1 - padding + output_padding
    xp = jnp.pad(xd, ((0, 0), (0, 0), (lo, hi), (lo, hi)))
    w_eq = jnp.flip(w, axis=(2, 3)).transpose(1, 0, 2, 3)
    return _ref_conv2d(xp, w_eq, bias, 1, 0, activation)


def reference_forward(params, x, image_size, embedding_size):
    h, w, c_in = image_size
    c2 = 64
    b = x.shape[0]
    y = _ref_conv2d(x, params["enc_conv1_w"], params["enc_conv1_b"],
                    2, 1, "relu")
    y = _ref_conv2d(y, params["enc_conv2_w"], params["enc_conv2_b"],
                    2, 1, "relu")
    y = y.reshape(b, c2 * (h // 4) * (w // 4))
    emb = jnp.dot(y, params["enc_fc_w"].T,
                  precision=jax.lax.Precision.HIGHEST) + params["enc_fc_b"]
    z = jnp.dot(emb, params["dec_fc_w"].T,
                precision=jax.lax.Precision.HIGHEST) + params["dec_fc_b"]
    z = z.reshape(b, c2, h // 4, w // 4)
    z = _ref_conv_transpose2d(z, params["dec_conv1_w"], params["dec_conv1_b"],
                              2, 1, 1, "relu")
    z = _ref_conv_transpose2d(z, params["dec_conv2_w"], params["dec_conv2_b"],
                              2, 1, 1, "sigmoid")
    return z


# ----------------------------------------------------------------------------
if __name__ == "__main__":
    image_size = (16, 16, 1)        # (H, W, C) as the PyTorch ctor expects
    embedding_size = 32
    batch = 2

    key = jax.random.PRNGKey(0)
    pkey, xkey = jax.random.split(key)
    params = init_params(pkey, image_size, embedding_size)

    # PyTorch conv input layout: NCHW
    x = jax.random.normal(
        xkey, (batch, image_size[2], image_size[0], image_size[1]),
        jnp.float32)

    packed = pack_operands(params, image_size, embedding_size, batch)

    fwd = jax.jit(autoencoder_forward)
    out = fwd(packed, x)
    jax.block_until_ready(out)

    assert out.shape == (batch, image_size[2], image_size[0], image_size[1])
    assert bool(jnp.all((out >= 0.0) & (out <= 1.0)))    # sigmoid range

    ref = reference_forward(params, x, image_size, embedding_size)
    max_err = float(jnp.max(jnp.abs(out - ref)))
    assert max_err < 5e-2, f"kernel mismatch vs reference: {max_err}"

    print("KERNEL_OK")
</pallas_src>

<mosaic_0001>
module attributes {stable_mosaic.version = 11 : i64} {
  func.func @_autoencoder_fused_kernel(%arg0: memref<1x512xf32, #tpu.memory_space<vmem>>, %arg1: memref<9x512x128xf32, #tpu.memory_space<vmem>>, %arg2: memref<9x32x1xf32, #tpu.memory_space<vmem>>, %arg3: memref<32x1xf32, #tpu.memory_space<vmem>>, %arg4: memref<9x128x32xf32, #tpu.memory_space<vmem>>, %arg5: memref<9x64x32xf32, #tpu.memory_space<vmem>>, %arg6: memref<64x1xf32, #tpu.memory_space<vmem>>, %arg7: memref<16x32x2xf32, #tpu.memory_space<vmem>>, %arg8: memref<16x32x64xf32, #tpu.memory_space<vmem>>, %arg9: memref<32x1xf32, #tpu.memory_space<vmem>>, %arg10: memref<16x2x32xf32, #tpu.memory_space<vmem>>, %arg11: memref<16x64x32xf32, #tpu.memory_space<vmem>>, %arg12: memref<64x32xf32, #tpu.memory_space<vmem>>, %arg13: memref<9x32x128xf32, #tpu.memory_space<vmem>>, %arg14: memref<9x32x64xf32, #tpu.memory_space<vmem>>, %arg15: memref<32x1xf32, #tpu.memory_space<vmem>>, %arg16: memref<9x128x512xf32, #tpu.memory_space<vmem>>, %arg17: memref<9x1x32xf32, #tpu.memory_space<vmem>>, %arg18: memref<1x1xf32, #tpu.memory_space<vmem>>, %arg19: memref<1x512xf32, #tpu.memory_space<vmem>>) attributes {dimension_semantics = [], scalar_prefetch = 0 : i64, scratch_operands = 0 : i64, tpu.core_type = #tpu.core_type<tc>} {
    %c0 = arith.constant 0 : index
    %c0_0 = arith.constant 0 : index
    %0 = vector.load %arg0[%c0, %c0_0] : memref<1x512xf32, #tpu.memory_space<vmem>>, vector<1x512xf32>
    %c0_1 = arith.constant 0 : index
    %c0_2 = arith.constant 0 : index
    %c0_3 = arith.constant 0 : index
    %1 = vector.load %arg1[%c0_1, %c0_2, %c0_3] : memref<9x512x128xf32, #tpu.memory_space<vmem>>, vector<1x512x128xf32>
    %2 = vector.shape_cast %1 : vector<1x512x128xf32> to vector<512x128xf32>
    %cst = arith.constant dense<0.000000e+00> : vector<1x128xf32>
    %3 = tpu.matmul %0, %2, %cst {dimension_numbers = #tpu.dot_dimension_numbers<[1], [0], [0], [1], [0, 0, 1, 1], [], []>} : vector<1x512xf32>, vector<512x128xf32>, vector<1x128xf32> -> vector<1x128xf32>
    %c0_4 = arith.constant 0 : index
    %c0_5 = arith.constant 0 : index
    %c0_6 = arith.constant 0 : index
    %4 = vector.load %arg2[%c0_4, %c0_5, %c0_6] : memref<9x32x1xf32, #tpu.memory_space<vmem>>, vector<1x32x1xf32>
    %5 = vector.shape_cast %4 : vector<1x32x1xf32> to vector<32x1xf32>
    %cst_7 = arith.constant dense<0.000000e+00> : vector<32x128xf32>
    %6 = tpu.matmul %5, %3, %cst_7 {dimension_numbers = #tpu.dot_dimension_numbers<[1], [0], [0], [1], [0, 0, 1, 1], [], []>} : vector<32x1xf32>, vector<1x128xf32>, vector<32x128xf32> -> vector<32x128xf32>
    %c1 = arith.constant 1 : index
    %c0_8 = arith.constant 0 : index
    %c0_9 = arith.constant 0 : index
    %7 = vector.load %arg1[%c1, %c0_8, %c0_9] : memref<9x512x128xf32, #tpu.memory_space<vmem>>, vector<1x512x128xf32>
    %8 = vector.shape_cast %7 : vector<1x512x128xf32> to vector<512x128xf32>
    %cst_10 = arith.constant dense<0.000000e+00> : vector<1x128xf32>
    %9 = tpu.matmul %0, %8, %cst_10 {dimension_numbers = #tpu.dot_dimension_numbers<[1], [0], [0], [1], [0, 0, 1, 1], [], []>} : vector<1x512xf32>, vector<512x128xf32>, vector<1x128xf32> -> vector<1x128xf32>
    %c1_11 = arith.constant 1 : index
    %c0_12 = arith.constant 0 : index
    %c0_13 = arith.constant 0 : index
    %10 = vector.load %arg2[%c1_11, %c0_12, %c0_13] : memref<9x32x1xf32, #tpu.memory_space<vmem>>, vector<1x32x1xf32>
    %11 = vector.shape_cast %10 : vector<1x32x1xf32> to vector<32x1xf32>
    %cst_14 = arith.constant dense<0.000000e+00> : vector<32x128xf32>
    %12 = tpu.matmul %11, %9, %cst_14 {dimension_numbers = #tpu.dot_dimension_numbers<[1], [0], [0], [1], [0, 0, 1, 1], [], []>} : vector<32x1xf32>, vector<1x128xf32>, vector<32x128xf32> -> vector<32x128xf32>
    %13 = arith.addf %6, %12 : vector<32x128xf32>
    %c2 = arith.constant 2 : index
    %c0_15 = arith.constant 0 : index
    %c0_16 = arith.constant 0 : index
    %14 = vector.load %arg1[%c2, %c0_15, %c0_16] : memref<9x512x128xf32, #tpu.memory_space<vmem>>, vector<1x512x128xf32>
    %15 = vector.shape_cast %14 : vector<1x512x128xf32> to vector<512x128xf32>
    %cst_17 = arith.constant dense<0.000000e+00> : vector<1x128xf32>
    %16 = tpu.matmul %0, %15, %cst_17 {dimension_numbers = #tpu.dot_dimension_numbers<[1], [0], [0], [1], [0, 0, 1, 1], [], []>} : vector<1x512xf32>, vector<512x128xf32>, vector<1x128xf32> -> vector<1x128xf32>
    %c2_18 = arith.constant 2 : index
    %c0_19 = arith.constant 0 : index
    %c0_20 = arith.constant 0 : index
    %17 = vector.load %arg2[%c2_18, %c0_19, %c0_20] : memref<9x32x1xf32, #tpu.memory_space<vmem>>, vector<1x32x1xf32>
    %18 = vector.shape_cast %17 : vector<1x32x1xf32> to vector<32x1xf32>
    %cst_21 = arith.constant dense<0.000000e+00> : vector<32x128xf32>
    %19 = tpu.matmul %18, %16, %cst_21 {dimension_numbers = #tpu.dot_dimension_numbers<[1], [0], [0], [1], [0, 0, 1, 1], [], []>} : vector<32x1xf32>, vector<1x128xf32>, vector<32x128xf32> -> vector<32x128xf32>
    %20 = arith.addf %13, %19 : vector<32x128xf32>
    %c3 = arith.constant 3 : index
    %c0_22 = arith.constant 0 : index
    %c0_23 = arith.constant 0 : index
    %21 = vector.load %arg1[%c3, %c0_22, %c0_23] : memref<9x512x128xf32, #tpu.memory_space<vmem>>, vector<1x512x128xf32>
    %22 = vector.shape_cast %21 : vector<1x512x128xf32> to vector<512x128xf32>
    %cst_24 = arith.constant dense<0.000000e+00> : vector<1x128xf32>
    %23 = tpu.matmul %0, %22, %cst_24 {dimension_numbers = #tpu.dot_dimension_numbers<[1], [0], [0], [1], [0, 0, 1, 1], [], []>} : vector<1x512xf32>, vector<512x128xf32>, vector<1x128xf32> -> vector<1x128xf32>
    %c3_25 = arith.constant 3 : index
    %c0_26 = arith.constant 0 : index
    %c0_27 = arith.constant 0 : index
    %24 = vector.load %arg2[%c3_25, %c0_26, %c0_27] : memref<9x32x1xf32, #tpu.memory_space<vmem>>, vector<1x32x1xf32>
    %25 = vector.shape_cast %24 : vector<1x32x1xf32> to vector<32x1xf32>
    %cst_28 = arith.constant dense<0.000000e+00> : vector<32x128xf32>
    %26 = tpu.matmul %25, %23, %cst_28 {dimension_numbers = #tpu.dot_dimension_numbers<[1], [0], [0], [1], [0, 0, 1, 1], [], []>} : vector<32x1xf32>, vector<1x128xf32>, vector<32x128xf32> -> vector<32x128xf32>
    %27 = arith.addf %20, %26 : vector<32x128xf32>
    %c4 = arith.constant 4 : index
    %c0_29 = arith.constant 0 : index
    %c0_30 = arith.constant 0 : index
    %28 = vector.load %arg1[%c4, %c0_29, %c0_30] : memref<9x512x128xf32, #tpu.memory_space<vmem>>, vector<1x512x128xf32>
    %29 = vector.shape_cast %28 : vector<1x512x128xf32> to vector<512x128xf32>
    %cst_31 = arith.constant dense<0.000000e+00> : vector<1x128xf32>
    %30 = tpu.matmul %0, %29, %cst_31 {dimension_numbers = #tpu.dot_dimension_numbers<[1], [0], [0], [1], [0, 0, 1, 1], [], []>} : vector<1x512xf32>, vector<512x128xf32>, vector<1x128xf32> -> vector<1x128xf32>
    %c4_32 = arith.constant 4 : index
    %c0_33 = arith.constant 0 : index
    %c0_34 = arith.constant 0 : index
    %31 = vector.load %arg2[%c4_32, %c0_33, %c0_34] : memref<9x32x1xf32, #tpu.memory_space<vmem>>, vector<1x32x1xf32>
    %32 = vector.shape_cast %31 : vector<1x32x1xf32> to vector<32x1xf32>
    %cst_35 = arith.constant dense<0.000000e+00> : vector<32x128xf32>
    %33 = tpu.matmul %32, %30, %cst_35 {dimension_numbers = #tpu.dot_dimension_numbers<[1], [0], [0], [1], [0, 0, 1, 1], [], []>} : vector<32x1xf32>, vector<1x128xf32>, vector<32x128xf32> -> vector<32x128xf32>
    %34 = arith.addf %27, %33 : vector<32x128xf32>
    %c5 = arith.constant 5 : index
    %c0_36 = arith.constant 0 : index
    %c0_37 = arith.constant 0 : index
    %35 = vector.load %arg1[%c5, %c0_36, %c0_37] : memref<9x512x128xf32, #tpu.memory_space<vmem>>, vector<1x512x128xf32>
    %36 = vector.shape_cast %35 : vector<1x512x128xf32> to vector<512x128xf32>
    %cst_38 = arith.constant dense<0.000000e+00> : vector<1x128xf32>
    %37 = tpu.matmul %0, %36, %cst_38 {dimension_numbers = #tpu.dot_dimension_numbers<[1], [0], [0], [1], [0, 0, 1, 1], [], []>} : vector<1x512xf32>, vector<512x128xf32>, vector<1x128xf32> -> vector<1x128xf32>
    %c5_39 = arith.constant 5 : index
    %c0_40 = arith.constant 0 : index
    %c0_41 = arith.constant 0 : index
    %38 = vector.load %arg2[%c5_39, %c0_40, %c0_41] : memref<9x32x1xf32, #tpu.memory_space<vmem>>, vector<1x32x1xf32>
    %39 = vector.shape_cast %38 : vector<1x32x1xf32> to vector<32x1xf32>
    %cst_42 = arith.constant dense<0.000000e+00> : vector<32x128xf32>
    %40 = tpu.matmul %39, %37, %cst_42 {dimension_numbers = #tpu.dot_dimension_numbers<[1], [0], [0], [1], [0, 0, 1, 1], [], []>} : vector<32x1xf32>, vector<1x128xf32>, vector<32x128xf32> -> vector<32x128xf32>
    %41 = arith.addf %34, %40 : vector<32x128xf32>
    %c6 = arith.constant 6 : index
    %c0_43 = arith.constant 0 : index
    %c0_44 = arith.constant 0 : index
    %42 = vector.load %arg1[%c6, %c0_43, %c0_44] : memref<9x512x128xf32, #tpu.memory_space<vmem>>, vector<1x512x128xf32>
    %43 = vector.shape_cast %42 : vector<1x512x128xf32> to vector<512x128xf32>
    %cst_45 = arith.constant dense<0.000000e+00> : vector<1x128xf32>
    %44 = tpu.matmul %0, %43, %cst_45 {dimension_numbers = #tpu.dot_dimension_numbers<[1], [0], [0], [1], [0, 0, 1, 1], [], []>} : vector<1x512xf32>, vector<512x128xf32>, vector<1x128xf32> -> vector<1x128xf32>
    %c6_46 = arith.constant 6 : index
    %c0_47 = arith.constant 0 : index
    %c0_48 = arith.constant 0 : index
    %45 = vector.load %arg2[%c6_46, %c0_47, %c0_48] : memref<9x32x1xf32, #tpu.memory_space<vmem>>, vector<1x32x1xf32>
    %46 = vector.shape_cast %45 : vector<1x32x1xf32> to vector<32x1xf32>
    %cst_49 = arith.constant dense<0.000000e+00> : vector<32x128xf32>
    %47 = tpu.matmul %46, %44, %cst_49 {dimension_numbers = #tpu.dot_dimension_numbers<[1], [0], [0], [1], [0, 0, 1, 1], [], []>} : vector<32x1xf32>, vector<1x128xf32>, vector<32x128xf32> -> vector<32x128xf32>
    %48 = arith.addf %41, %47 : vector<32x128xf32>
    %c7 = arith.constant 7 : index
    %c0_50 = arith.constant 0 : index
    %c0_51 = arith.constant 0 : index
    %49 = vector.load %arg1[%c7, %c0_50, %c0_51] : memref<9x512x128xf32, #tpu.memory_space<vmem>>, vector<1x512x128xf32>
    %50 = vector.shape_cast %49 : vector<1x512x128xf32> to vector<512x128xf32>
    %cst_52 = arith.constant dense<0.000000e+00> : vector<1x128xf32>
    %51 = tpu.matmul %0, %50, %cst_52 {dimension_numbers = #tpu.dot_dimension_numbers<[1], [0], [0], [1], [0, 0, 1, 1], [], []>} : vector<1x512xf32>, vector<512x128xf32>, vector<1x128xf32> -> vector<1x128xf32>
    %c7_53 = arith.constant 7 : index
    %c0_54 = arith.constant 0 : index
    %c0_55 = arith.constant 0 : index
    %52 = vector.load %arg2[%c7_53, %c0_54, %c0_55] : memref<9x32x1xf32, #tpu.memory_space<vmem>>, vector<1x32x1xf32>
    %53 = vector.shape_cast %52 : vector<1x32x1xf32> to vector<32x1xf32>
    %cst_56 = arith.constant dense<0.000000e+00> : vector<32x128xf32>
    %54 = tpu.matmul %53, %51, %cst_56 {dimension_numbers = #tpu.dot_dimension_numbers<[1], [0], [0], [1], [0, 0, 1, 1], [], []>} : vector<32x1xf32>, vector<1x128xf32>, vector<32x128xf32> -> vector<32x128xf32>
    %55 = arith.addf %48, %54 : vector<32x128xf32>
    %c8 = arith.constant 8 : index
    %c0_57 = arith.constant 0 : index
    %c0_58 = arith.constant 0 : index
    %56 = vector.load %arg1[%c8, %c0_57, %c0_58] : memref<9x512x128xf32, #tpu.memory_space<vmem>>, vector<1x512x128xf32>
    %57 = vector.shape_cast %56 : vector<1x512x128xf32> to vector<512x128xf32>
    %cst_59 = arith.constant dense<0.000000e+00> : vector<1x128xf32>
    %58 = tpu.matmul %0, %57, %cst_59 {dimension_numbers = #tpu.dot_dimension_numbers<[1], [0], [0], [1], [0, 0, 1, 1], [], []>} : vector<1x512xf32>, vector<512x128xf32>, vector<1x128xf32> -> vector<1x128xf32>
    %c8_60 = arith.constant 8 : index
    %c0_61 = arith.constant 0 : index
    %c0_62 = arith.constant 0 : index
    %59 = vector.load %arg2[%c8_60, %c0_61, %c0_62] : memref<9x32x1xf32, #tpu.memory_space<vmem>>, vector<1x32x1xf32>
    %60 = vector.shape_cast %59 : vector<1x32x1xf32> to vector<32x1xf32>
    %cst_63 = arith.constant dense<0.000000e+00> : vector<32x128xf32>
    %61 = tpu.matmul %60, %58, %cst_63 {dimension_numbers = #tpu.dot_dimension_numbers<[1], [0], [0], [1], [0, 0, 1, 1], [], []>} : vector<32x1xf32>, vector<1x128xf32>, vector<32x128xf32> -> vector<32x128xf32>
    %62 = arith.addf %55, %61 : vector<32x128xf32>
    %c0_64 = arith.constant 0 : index
    %c0_65 = arith.constant 0 : index
    %63 = vector.load %arg3[%c0_64, %c0_65] : memref<32x1xf32, #tpu.memory_space<vmem>>, vector<32x1xf32>
    %64 = vector.broadcast %63 : vector<32x1xf32> to vector<32x128xf32>
    %65 = arith.addf %62, %64 : vector<32x128xf32>
    %cst_66 = arith.constant 0.000000e+00 : f32
    %66 = vector.broadcast %cst_66 : f32 to vector<32x128xf32>
    %67 = arith.maximumf %65, %66 : vector<32x128xf32>
    %c0_67 = arith.constant 0 : index
    %c0_68 = arith.constant 0 : index
    %c0_69 = arith.constant 0 : index
    %68 = vector.load %arg4[%c0_67, %c0_68, %c0_69] : memref<9x128x32xf32, #tpu.memory_space<vmem>>, vector<1x128x32xf32>
    %69 = vector.shape_cast %68 : vector<1x128x32xf32> to vector<128x32xf32>
    %cst_70 = arith.constant dense<0.000000e+00> : vector<32x32xf32>
    %70 = tpu.matmul %67, %69, %cst_70 {dimension_numbers = #tpu.dot_dimension_numbers<[1], [0], [0], [1], [0, 0, 1, 1], [], []>} : vector<32x128xf32>, vector<128x32xf32>, vector<32x32xf32> -> vector<32x32xf32>
    %c0_71 = arith.constant 0 : index
    %c0_72 = arith.constant 0 : index
    %c0_73 = arith.constant 0 : index
    %71 = vector.load %arg5[%c0_71, %c0_72, %c0_73] : memref<9x64x32xf32, #tpu.memory_space<vmem>>, vector<1x64x32xf32>
    %72 = vector.shape_cast %71 : vector<1x64x32xf32> to vector<64x32xf32>
    %cst_74 = arith.constant dense<0.000000e+00> : vector<64x32xf32>
    %73 = tpu.matmul %72, %70, %cst_74 {dimension_numbers = #tpu.dot_dimension_numbers<[1], [0], [0], [1], [0, 0, 1, 1], [], []>} : vector<64x32xf32>, vector<32x32xf32>, vector<64x32xf32> -> vector<64x32xf32>
    %c1_75 = arith.constant 1 : index
    %c0_76 = arith.constant 0 : index
    %c0_77 = arith.constant 0 : index
    %74 = vector.load %arg4[%c1_75, %c0_76, %c0_77] : memref<9x128x32xf32, #tpu.memory_space<vmem>>, vector<1x128x32xf32>
    %75 = vector.shape_cast %74 : vector<1x128x32xf32> to vector<128x32xf32>
    %cst_78 = arith.constant dense<0.000000e+00> : vector<32x32xf32>
    %76 = tpu.matmul %67, %75, %cst_78 {dimension_numbers = #tpu.dot_dimension_numbers<[1], [0], [0], [1], [0, 0, 1, 1], [], []>} : vector<32x128xf32>, vector<128x32xf32>, vector<32x32xf32> -> vector<32x32xf32>
    %c1_79 = arith.constant 1 : index
    %c0_80 = arith.constant 0 : index
    %c0_81 = arith.constant 0 : index
    %77 = vector.load %arg5[%c1_79, %c0_80, %c0_81] : memref<9x64x32xf32, #tpu.memory_space<vmem>>, vector<1x64x32xf32>
    %78 = vector.shape_cast %77 : vector<1x64x32xf32> to vector<64x32xf32>
    %cst_82 = arith.constant dense<0.000000e+00> : vector<64x32xf32>
    %79 = tpu.matmul %78, %76, %cst_82 {dimension_numbers = #tpu.dot_dimension_numbers<[1], [0], [0], [1], [0, 0, 1, 1], [], []>} : vector<64x32xf32>, vector<32x32xf32>, vector<64x32xf32> -> vector<64x32xf32>
    %80 = arith.addf %73, %79 : vector<64x32xf32>
    %c2_83 = arith.constant 2 : index
    %c0_84 = arith.constant 0 : index
    %c0_85 = arith.constant 0 : index
    %81 = vector.load %arg4[%c2_83, %c0_84, %c0_85] : memref<9x128x32xf32, #tpu.memory_space<vmem>>, vector<1x128x32xf32>
    %82 = vector.shape_cast %81 : vector<1x128x32xf32> to vector<128x32xf32>
    %cst_86 = arith.constant dense<0.000000e+00> : vector<32x32xf32>
    %83 = tpu.matmul %67, %82, %cst_86 {dimension_numbers = #tpu.dot_dimension_numbers<[1], [0], [0], [1], [0, 0, 1, 1], [], []>} : vector<32x128xf32>, vector<128x32xf32>, vector<32x32xf32> -> vector<32x32xf32>
    %c2_87 = arith.constant 2 : index
    %c0_88 = arith.constant 0 : index
    %c0_89 = arith.constant 0 : index
    %84 = vector.load %arg5[%c2_87, %c0_88, %c0_89] : memref<9x64x32xf32, #tpu.memory_space<vmem>>, vector<1x64x32xf32>
    %85 = vector.shape_cast %84 : vector<1x64x32xf32> to vector<64x32xf32>
    %cst_90 = arith.constant dense<0.000000e+00> : vector<64x32xf32>
    %86 = tpu.matmul %85, %83, %cst_90 {dimension_numbers = #tpu.dot_dimension_numbers<[1], [0], [0], [1], [0, 0, 1, 1], [], []>} : vector<64x32xf32>, vector<32x32xf32>, vector<64x32xf32> -> vector<64x32xf32>
    %87 = arith.addf %80, %86 : vector<64x32xf32>
    %c3_91 = arith.constant 3 : index
    %c0_92 = arith.constant 0 : index
    %c0_93 = arith.constant 0 : index
    %88 = vector.load %arg4[%c3_91, %c0_92, %c0_93] : memref<9x128x32xf32, #tpu.memory_space<vmem>>, vector<1x128x32xf32>
    %89 = vector.shape_cast %88 : vector<1x128x32xf32> to vector<128x32xf32>
    %cst_94 = arith.constant dense<0.000000e+00> : vector<32x32xf32>
    %90 = tpu.matmul %67, %89, %cst_94 {dimension_numbers = #tpu.dot_dimension_numbers<[1], [0], [0], [1], [0, 0, 1, 1], [], []>} : vector<32x128xf32>, vector<128x32xf32>, vector<32x32xf32> -> vector<32x32xf32>
    %c3_95 = arith.constant 3 : index
    %c0_96 = arith.constant 0 : index
    %c0_97 = arith.constant 0 : index
    %91 = vector.load %arg5[%c3_95, %c0_96, %c0_97] : memref<9x64x32xf32, #tpu.memory_space<vmem>>, vector<1x64x32xf32>
    %92 = vector.shape_cast %91 : vector<1x64x32xf32> to vector<64x32xf32>
    %cst_98 = arith.constant dense<0.000000e+00> : vector<64x32xf32>
    %93 = tpu.matmul %92, %90, %cst_98 {dimension_numbers = #tpu.dot_dimension_numbers<[1], [0], [0], [1], [0, 0, 1, 1], [], []>} : vector<64x32xf32>, vector<32x32xf32>, vector<64x32xf32> -> vector<64x32xf32>
    %94 = arith.addf %87, %93 : vector<64x32xf32>
    %c4_99 = arith.constant 4 : index
    %c0_100 = arith.constant 0 : index
    %c0_101 = arith.constant 0 : index
    %95 = vector.load %arg4[%c4_99, %c0_100, %c0_101] : memref<9x128x32xf32, #tpu.memory_space<vmem>>, vector<1x128x32xf32>
    %96 = vector.shape_cast %95 : vector<1x128x32xf32> to vector<128x32xf32>
    %cst_102 = arith.constant dense<0.000000e+00> : vector<32x32xf32>
    %97 = tpu.matmul %67, %96, %cst_102 {dimension_numbers = #tpu.dot_dimension_numbers<[1], [0], [0], [1], [0, 0, 1, 1], [], []>} : vector<32x128xf32>, vector<128x32xf32>, vector<32x32xf32> -> vector<32x32xf32>
    %c4_103 = arith.constant 4 : index
    %c0_104 = arith.constant 0 : index
    %c0_105 = arith.constant 0 : index
    %98 = vector.load %arg5[%c4_103, %c0_104, %c0_105] : memref<9x64x32xf32, #tpu.memory_space<vmem>>, vector<1x64x32xf32>
    %99 = vector.shape_cast %98 : vector<1x64x32xf32> to vector<64x32xf32>
    %cst_106 = arith.constant dense<0.000000e+00> : vector<64x32xf32>
    %100 = tpu.matmul %99, %97, %cst_106 {dimension_numbers = #tpu.dot_dimension_numbers<[1], [0], [0], [1], [0, 0, 1, 1], [], []>} : vector<64x32xf32>, vector<32x32xf32>, vector<64x32xf32> -> vector<64x32xf32>
    %101 = arith.addf %94, %100 : vector<64x32xf32>
    %c5_107 = arith.constant 5 : index
    %c0_108 = arith.constant 0 : index
    %c0_109 = arith.constant 0 : index
    %102 = vector.load %arg4[%c5_107, %c0_108, %c0_109] : memref<9x128x32xf32, #tpu.memory_space<vmem>>, vector<1x128x32xf32>
    %103 = vector.shape_cast %102 : vector<1x128x32xf32> to vector<128x32xf32>
    %cst_110 = arith.constant dense<0.000000e+00> : vector<32x32xf32>
    %104 = tpu.matmul %67, %103, %cst_110 {dimension_numbers = #tpu.dot_dimension_numbers<[1], [0], [0], [1], [0, 0, 1, 1], [], []>} : vector<32x128xf32>, vector<128x32xf32>, vector<32x32xf32> -> vector<32x32xf32>
    %c5_111 = arith.constant 5 : index
    %c0_112 = arith.constant 0 : index
    %c0_113 = arith.constant 0 : index
    %105 = vector.load %arg5[%c5_111, %c0_112, %c0_113] : memref<9x64x32xf32, #tpu.memory_space<vmem>>, vector<1x64x32xf32>
    %106 = vector.shape_cast %105 : vector<1x64x32xf32> to vector<64x32xf32>
    %cst_114 = arith.constant dense<0.000000e+00> : vector<64x32xf32>
    %107 = tpu.matmul %106, %104, %cst_114 {dimension_numbers = #tpu.dot_dimension_numbers<[1], [0], [0], [1], [0, 0, 1, 1], [], []>} : vector<64x32xf32>, vector<32x32xf32>, vector<64x32xf32> -> vector<64x32xf32>
    %108 = arith.addf %101, %107 : vector<64x32xf32>
    %c6_115 = arith.constant 6 : index
    %c0_116 = arith.constant 0 : index
    %c0_117 = arith.constant 0 : index
    %109 = vector.load %arg4[%c6_115, %c0_116, %c0_117] : memref<9x128x32xf32, #tpu.memory_space<vmem>>, vector<1x128x32xf32>
    %110 = vector.shape_cast %109 : vector<1x128x32xf32> to vector<128x32xf32>
    %cst_118 = arith.constant dense<0.000000e+00> : vector<32x32xf32>
    %111 = tpu.matmul %67, %110, %cst_118 {dimension_numbers = #tpu.dot_dimension_numbers<[1], [0], [0], [1], [0, 0, 1, 1], [], []>} : vector<32x128xf32>, vector<128x32xf32>, vector<32x32xf32> -> vector<32x32xf32>
    %c6_119 = arith.constant 6 : index
    %c0_120 = arith.constant 0 : index
    %c0_121 = arith.constant 0 : index
    %112 = vector.load %arg5[%c6_119, %c0_120, %c0_121] : memref<9x64x32xf32, #tpu.memory_space<vmem>>, vector<1x64x32xf32>
    %113 = vector.shape_cast %112 : vector<1x64x32xf32> to vector<64x32xf32>
    %cst_122 = arith.constant dense<0.000000e+00> : vector<64x32xf32>
    %114 = tpu.matmul %113, %111, %cst_122 {dimension_numbers = #tpu.dot_dimension_numbers<[1], [0], [0], [1], [0, 0, 1, 1], [], []>} : vector<64x32xf32>, vector<32x32xf32>, vector<64x32xf32> -> vector<64x32xf32>
    %115 = arith.addf %108, %114 : vector<64x32xf32>
    %c7_123 = arith.constant 7 : index
    %c0_124 = arith.constant 0 : index
    %c0_125 = arith.constant 0 : index
    %116 = vector.load %arg4[%c7_123, %c0_124, %c0_125] : memref<9x128x32xf32, #tpu.memory_space<vmem>>, vector<1x128x32xf32>
    %117 = vector.shape_cast %116 : vector<1x128x32xf32> to vector<128x32xf32>
    %cst_126 = arith.constant dense<0.000000e+00> : vector<32x32xf32>
    %118 = tpu.matmul %67, %117, %cst_126 {dimension_numbers = #tpu.dot_dimension_numbers<[1], [0], [0], [1], [0, 0, 1, 1], [], []>} : vector<32x128xf32>, vector<128x32xf32>, vector<32x32xf32> -> vector<32x32xf32>
    %c7_127 = arith.constant 7 : index
    %c0_128 = arith.constant 0 : index
    %c0_129 = arith.constant 0 : index
    %119 = vector.load %arg5[%c7_127, %c0_128, %c0_129] : memref<9x64x32xf32, #tpu.memory_space<vmem>>, vector<1x64x32xf32>
    %120 = vector.shape_cast %119 : vector<1x64x32xf32> to vector<64x32xf32>
    %cst_130 = arith.constant dense<0.000000e+00> : vector<64x32xf32>
    %121 = tpu.matmul %120, %118, %cst_130 {dimension_numbers = #tpu.dot_dimension_numbers<[1], [0], [0], [1], [0, 0, 1, 1], [], []>} : vector<64x32xf32>, vector<32x32xf32>, vector<64x32xf32> -> vector<64x32xf32>
    %122 = arith.addf %115, %121 : vector<64x32xf32>
    %c8_131 = arith.constant 8 : index
    %c0_132 = arith.constant 0 : index
    %c0_133 = arith.constant 0 : index
    %123 = vector.load %arg4[%c8_131, %c0_132, %c0_133] : memref<9x128x32xf32, #tpu.memory_space<vmem>>, vector<1x128x32xf32>
    %124 = vector.shape_cast %123 : vector<1x128x32xf32> to vector<128x32xf32>
    %cst_134 = arith.constant dense<0.000000e+00> : vector<32x32xf32>
    %125 = tpu.matmul %67, %124, %cst_134 {dimension_numbers = #tpu.dot_dimension_numbers<[1], [0], [0], [1], [0, 0, 1, 1], [], []>} : vector<32x128xf32>, vector<128x32xf32>, vector<32x32xf32> -> vector<32x32xf32>
    %c8_135 = arith.constant 8 : index
    %c0_136 = arith.constant 0 : index
    %c0_137 = arith.constant 0 : index
    %126 = vector.load %arg5[%c8_135, %c0_136, %c0_137] : memref<9x64x32xf32, #tpu.memory_space<vmem>>, vector<1x64x32xf32>
    %127 = vector.shape_cast %126 : vector<1x64x32xf32> to vector<64x32xf32>
    %cst_138 = arith.constant dense<0.000000e+00> : vector<64x32xf32>
    %128 = tpu.matmul %127, %125, %cst_138 {dimension_numbers = #tpu.dot_dimension_numbers<[1], [0], [0], [1], [0, 0, 1, 1], [], []>} : vector<64x32xf32>, vector<32x32xf32>, vector<64x32xf32> -> vector<64x32xf32>
    %129 = arith.addf %122, %128 : vector<64x32xf32>
    %c0_139 = arith.constant 0 : index
    %c0_140 = arith.constant 0 : index
    %130 = vector.load %arg6[%c0_139, %c0_140] : memref<64x1xf32, #tpu.memory_space<vmem>>, vector<64x1xf32>
    %131 = vector.broadcast %130 : vector<64x1xf32> to vector<64x32xf32>
    %132 = arith.addf %129, %131 : vector<64x32xf32>
    %cst_141 = arith.constant 0.000000e+00 : f32
    %133 = vector.broadcast %cst_141 : f32 to vector<64x32xf32>
    %134 = arith.maximumf %132, %133 : vector<64x32xf32>
    %c0_142 = arith.constant 0 : index
    %c0_143 = arith.constant 0 : index
    %c0_144 = arith.constant 0 : index
    %135 = vector.load %arg7[%c0_142, %c0_143, %c0_144] : memref<16x32x2xf32, #tpu.memory_space<vmem>>, vector<1x32x2xf32>
    %136 = vector.shape_cast %135 : vector<1x32x2xf32> to vector<32x2xf32>
    %cst_145 = arith.constant dense<0.000000e+00> : vector<64x2xf32>
    %137 = tpu.matmul %134, %136, %cst_145 {dimension_numbers = #tpu.dot_dimension_numbers<[1], [0], [0], [1], [0, 0, 1, 1], [], []>} : vector<64x32xf32>, vector<32x2xf32>, vector<64x2xf32> -> vector<64x2xf32>
    %c0_146 = arith.constant 0 : index
    %c0_147 = arith.constant 0 : index
    %c0_148 = arith.constant 0 : index
    %138 = vector.load %arg8[%c0_146, %c0_147, %c0_148] : memref<16x32x64xf32, #tpu.memory_space<vmem>>, vector<1x32x64xf32>
    %139 = vector.shape_cast %138 : vector<1x32x64xf32> to vector<32x64xf32>
    %cst_149 = arith.constant dense<0.000000e+00> : vector<32x2xf32>
    %140 = tpu.matmul %139, %137, %cst_149 {dimension_numbers = #tpu.dot_dimension_numbers<[1], [0], [0], [1], [0, 0, 1, 1], [], []>} : vector<32x64xf32>, vector<64x2xf32>, vector<32x2xf32> -> vector<32x2xf32>
    %c1_150 = arith.constant 1 : index
    %c0_151 = arith.constant 0 : index
    %c0_152 = arith.constant 0 : index
    %141 = vector.load %arg7[%c1_150, %c0_151, %c0_152] : memref<16x32x2xf32, #tpu.memory_space<vmem>>, vector<1x32x2xf32>
    %142 = vector.shape_cast %141 : vector<1x32x2xf32> to vector<32x2xf32>
    %cst_153 = arith.constant dense<0.000000e+00> : vector<64x2xf32>
    %143 = tpu.matmul %134, %142, %cst_153 {dimension_numbers = #tpu.dot_dimension_numbers<[1], [0], [0], [1], [0, 0, 1, 1], [], []>} : vector<64x32xf32>, vector<32x2xf32>, vector<64x2xf32> -> vector<64x2xf32>
    %c1_154 = arith.constant 1 : index
    %c0_155 = arith.constant 0 : index
    %c0_156 = arith.constant 0 : index
    %144 = vector.load %arg8[%c1_154, %c0_155, %c0_156] : memref<16x32x64xf32, #tpu.memory_space<vmem>>, vector<1x32x64xf32>
    %145 = vector.shape_cast %144 : vector<1x32x64xf32> to vector<32x64xf32>
    %cst_157 = arith.constant dense<0.000000e+00> : vector<32x2xf32>
    %146 = tpu.matmul %145, %143, %cst_157 {dimension_numbers = #tpu.dot_dimension_numbers<[1], [0], [0], [1], [0, 0, 1, 1], [], []>} : vector<32x64xf32>, vector<64x2xf32>, vector<32x2xf32> -> vector<32x2xf32>
    %147 = arith.addf %140, %146 : vector<32x2xf32>
    %c2_158 = arith.constant 2 : index
    %c0_159 = arith.constant 0 : index
    %c0_160 = arith.constant 0 : index
    %148 = vector.load %arg7[%c2_158, %c0_159, %c0_160] : memref<16x32x2xf32, #tpu.memory_space<vmem>>, vector<1x32x2xf32>
    %149 = vector.shape_cast %148 : vector<1x32x2xf32> to vector<32x2xf32>
    %cst_161 = arith.constant dense<0.000000e+00> : vector<64x2xf32>
    %150 = tpu.matmul %134, %149, %cst_161 {dimension_numbers = #tpu.dot_dimension_numbers<[1], [0], [0], [1], [0, 0, 1, 1], [], []>} : vector<64x32xf32>, vector<32x2xf32>, vector<64x2xf32> -> vector<64x2xf32>
    %c2_162 = arith.constant 2 : index
    %c0_163 = arith.constant 0 : index
    %c0_164 = arith.constant 0 : index
    %151 = vector.load %arg8[%c2_162, %c0_163, %c0_164] : memref<16x32x64xf32, #tpu.memory_space<vmem>>, vector<1x32x64xf32>
    %152 = vector.shape_cast %151 : vector<1x32x64xf32> to vector<32x64xf32>
    %cst_165 = arith.constant dense<0.000000e+00> : vector<32x2xf32>
    %153 = tpu.matmul %152, %150, %cst_165 {dimension_numbers = #tpu.dot_dimension_numbers<[1], [0], [0], [1], [0, 0, 1, 1], [], []>} : vector<32x64xf32>, vector<64x2xf32>, vector<32x2xf32> -> vector<32x2xf32>
    %154 = arith.addf %147, %153 : vector<32x2xf32>
    %c3_166 = arith.constant 3 : index
    %c0_167 = arith.constant 0 : index
    %c0_168 = arith.constant 0 : index
    %155 = vector.load %arg7[%c3_166, %c0_167, %c0_168] : memref<16x32x2xf32, #tpu.memory_space<vmem>>, vector<1x32x2xf32>
    %156 = vector.shape_cast %155 : vector<1x32x2xf32> to vector<32x2xf32>
    %cst_169 = arith.constant dense<0.000000e+00> : vector<64x2xf32>
    %157 = tpu.matmul %134, %156, %cst_169 {dimension_numbers = #tpu.dot_dimension_numbers<[1], [0], [0], [1], [0, 0, 1, 1], [], []>} : vector<64x32xf32>, vector<32x2xf32>, vector<64x2xf32> -> vector<64x2xf32>
    %c3_170 = arith.constant 3 : index
    %c0_171 = arith.constant 0 : index
    %c0_172 = arith.constant 0 : index
    %158 = vector.load %arg8[%c3_170, %c0_171, %c0_172] : memref<16x32x64xf32, #tpu.memory_space<vmem>>, vector<1x32x64xf32>
    %159 = vector.shape_cast %158 : vector<1x32x64xf32> to vector<32x64xf32>
    %cst_173 = arith.constant dense<0.000000e+00> : vector<32x2xf32>
    %160 = tpu.matmul %159, %157, %cst_173 {dimension_numbers = #tpu.dot_dimension_numbers<[1], [0], [0], [1], [0, 0, 1, 1], [], []>} : vector<32x64xf32>, vector<64x2xf32>, vector<32x2xf32> -> vector<32x2xf32>
    %161 = arith.addf %154, %160 : vector<32x2xf32>
    %c4_174 = arith.constant 4 : index
    %c0_175 = arith.constant 0 : index
    %c0_176 = arith.constant 0 : index
    %162 = vector.load %arg7[%c4_174, %c0_175, %c0_176] : memref<16x32x2xf32, #tpu.memory_space<vmem>>, vector<1x32x2xf32>
    %163 = vector.shape_cast %162 : vector<1x32x2xf32> to vector<32x2xf32>
    %cst_177 = arith.constant dense<0.000000e+00> : vector<64x2xf32>
    %164 = tpu.matmul %134, %163, %cst_177 {dimension_numbers = #tpu.dot_dimension_numbers<[1], [0], [0], [1], [0, 0, 1, 1], [], []>} : vector<64x32xf32>, vector<32x2xf32>, vector<64x2xf32> -> vector<64x2xf32>
    %c4_178 = arith.constant 4 : index
    %c0_179 = arith.constant 0 : index
    %c0_180 = arith.constant 0 : index
    %165 = vector.load %arg8[%c4_178, %c0_179, %c0_180] : memref<16x32x64xf32, #tpu.memory_space<vmem>>, vector<1x32x64xf32>
    %166 = vector.shape_cast %165 : vector<1x32x64xf32> to vector<32x64xf32>
    %cst_181 = arith.constant dense<0.000000e+00> : vector<32x2xf32>
    %167 = tpu.matmul %166, %164, %cst_181 {dimension_numbers = #tpu.dot_dimension_numbers<[1], [0], [0], [1], [0, 0, 1, 1], [], []>} : vector<32x64xf32>, vector<64x2xf32>, vector<32x2xf32> -> vector<32x2xf32>
    %168 = arith.addf %161, %167 : vector<32x2xf32>
    %c5_182 = arith.constant 5 : index
    %c0_183 = arith.constant 0 : index
    %c0_184 = arith.constant 0 : index
    %169 = vector.load %arg7[%c5_182, %c0_183, %c0_184] : memref<16x32x2xf32, #tpu.memory_space<vmem>>, vector<1x32x2xf32>
    %170 = vector.shape_cast %169 : vector<1x32x2xf32> to vector<32x2xf32>
    %cst_185 = arith.constant dense<0.000000e+00> : vector<64x2xf32>
    %171 = tpu.matmul %134, %170, %cst_185 {dimension_numbers = #tpu.dot_dimension_numbers<[1], [0], [0], [1], [0, 0, 1, 1], [], []>} : vector<64x32xf32>, vector<32x2xf32>, vector<64x2xf32> -> vector<64x2xf32>
    %c5_186 = arith.constant 5 : index
    %c0_187 = arith.constant 0 : index
    %c0_188 = arith.constant 0 : index
    %172 = vector.load %arg8[%c5_186, %c0_187, %c0_188] : memref<16x32x64xf32, #tpu.memory_space<vmem>>, vector<1x32x64xf32>
    %173 = vector.shape_cast %172 : vector<1x32x64xf32> to vector<32x64xf32>
    %cst_189 = arith.constant dense<0.000000e+00> : vector<32x2xf32>
    %174 = tpu.matmul %173, %171, %cst_189 {dimension_numbers = #tpu.dot_dimension_numbers<[1], [0], [0], [1], [0, 0, 1, 1], [], []>} : vector<32x64xf32>, vector<64x2xf32>, vector<32x2xf32> -> vector<32x2xf32>
    %175 = arith.addf %168, %174 : vector<32x2xf32>
    %c6_190 = arith.constant 6 : index
    %c0_191 = arith.constant 0 : index
    %c0_192 = arith.constant 0 : index
    %176 = vector.load %arg7[%c6_190, %c0_191, %c0_192] : memref<16x32x2xf32, #tpu.memory_space<vmem>>, vector<1x32x2xf32>
    %177 = vector.shape_cast %176 : vector<1x32x2xf32> to vector<32x2xf32>
    %cst_193 = arith.constant dense<0.000000e+00> : vector<64x2xf32>
    %178 = tpu.matmul %134, %177, %cst_193 {dimension_numbers = #tpu.dot_dimension_numbers<[1], [0], [0], [1], [0, 0, 1, 1], [], []>} : vector<64x32xf32>, vector<32x2xf32>, vector<64x2xf32> -> vector<64x2xf32>
    %c6_194 = arith.constant 6 : index
    %c0_195 = arith.constant 0 : index
    %c0_196 = arith.constant 0 : index
    %179 = vector.load %arg8[%c6_194, %c0_195, %c0_196] : memref<16x32x64xf32, #tpu.memory_space<vmem>>, vector<1x32x64xf32>
    %180 = vector.shape_cast %179 : vector<1x32x64xf32> to vector<32x64xf32>
    %cst_197 = arith.constant dense<0.000000e+00> : vector<32x2xf32>
    %181 = tpu.matmul %180, %178, %cst_197 {dimension_numbers = #tpu.dot_dimension_numbers<[1], [0], [0], [1], [0, 0, 1, 1], [], []>} : vector<32x64xf32>, vector<64x2xf32>, vector<32x2xf32> -> vector<32x2xf32>
    %182 = arith.addf %175, %181 : vector<32x2xf32>
    %c7_198 = arith.constant 7 : index
    %c0_199 = arith.constant 0 : index
    %c0_200 = arith.constant 0 : index
    %183 = vector.load %arg7[%c7_198, %c0_199, %c0_200] : memref<16x32x2xf32, #tpu.memory_space<vmem>>, vector<1x32x2xf32>
    %184 = vector.shape_cast %183 : vector<1x32x2xf32> to vector<32x2xf32>
    %cst_201 = arith.constant dense<0.000000e+00> : vector<64x2xf32>
    %185 = tpu.matmul %134, %184, %cst_201 {dimension_numbers = #tpu.dot_dimension_numbers<[1], [0], [0], [1], [0, 0, 1, 1], [], []>} : vector<64x32xf32>, vector<32x2xf32>, vector<64x2xf32> -> vector<64x2xf32>
    %c7_202 = arith.constant 7 : index
    %c0_203 = arith.constant 0 : index
    %c0_204 = arith.constant 0 : index
    %186 = vector.load %arg8[%c7_202, %c0_203, %c0_204] : memref<16x32x64xf32, #tpu.memory_space<vmem>>, vector<1x32x64xf32>
    %187 = vector.shape_cast %186 : vector<1x32x64xf32> to vector<32x64xf32>
    %cst_205 = arith.constant dense<0.000000e+00> : vector<32x2xf32>
    %188 = tpu.matmul %187, %185, %cst_205 {dimension_numbers = #tpu.dot_dimension_numbers<[1], [0], [0], [1], [0, 0, 1, 1], [], []>} : vector<32x64xf32>, vector<64x2xf32>, vector<32x2xf32> -> vector<32x2xf32>
    %189 = arith.addf %182, %188 : vector<32x2xf32>
    %c8_206 = arith.constant 8 : index
    %c0_207 = arith.constant 0 : index
    %c0_208 = arith.constant 0 : index
    %190 = vector.load %arg7[%c8_206, %c0_207, %c0_208] : memref<16x32x2xf32, #tpu.memory_space<vmem>>, vector<1x32x2xf32>
    %191 = vector.shape_cast %190 : vector<1x32x2xf32> to vector<32x2xf32>
    %cst_209 = arith.constant dense<0.000000e+00> : vector<64x2xf32>
    %192 = tpu.matmul %134, %191, %cst_209 {dimension_numbers = #tpu.dot_dimension_numbers<[1], [0], [0], [1], [0, 0, 1, 1], [], []>} : vector<64x32xf32>, vector<32x2xf32>, vector<64x2xf32> -> vector<64x2xf32>
    %c8_210 = arith.constant 8 : index
    %c0_211 = arith.constant 0 : index
    %c0_212 = arith.constant 0 : index
    %193 = vector.load %arg8[%c8_210, %c0_211, %c0_212] : memref<16x32x64xf32, #tpu.memory_space<vmem>>, vector<1x32x64xf32>
    %194 = vector.shape_cast %193 : vector<1x32x64xf32> to vector<32x64xf32>
    %cst_213 = arith.constant dense<0.000000e+00> : vector<32x2xf32>
    %195 = tpu.matmul %194, %192, %cst_213 {dimension_numbers = #tpu.dot_dimension_numbers<[1], [0], [0], [1], [0, 0, 1, 1], [], []>} : vector<32x64xf32>, vector<64x2xf32>, vector<32x2xf32> -> vector<32x2xf32>
    %196 = arith.addf %189, %195 : vector<32x2xf32>
    %c9 = arith.constant 9 : index
    %c0_214 = arith.constant 0 : index
    %c0_215 = arith.constant 0 : index
    %197 = vector.load %arg7[%c9, %c0_214, %c0_215] : memref<16x32x2xf32, #tpu.memory_space<vmem>>, vector<1x32x2xf32>
    %198 = vector.shape_cast %197 : vector<1x32x2xf32> to vector<32x2xf32>
    %cst_216 = arith.constant dense<0.000000e+00> : vector<64x2xf32>
    %199 = tpu.matmul %134, %198, %cst_216 {dimension_numbers = #tpu.dot_dimension_numbers<[1], [0], [0], [1], [0, 0, 1, 1], [], []>} : vector<64x32xf32>, vector<32x2xf32>, vector<64x2xf32> -> vector<64x2xf32>
    %c9_217 = arith.constant 9 : index
    %c0_218 = arith.constant 0 : index
    %c0_219 = arith.constant 0 : index
    %200 = vector.load %arg8[%c9_217, %c0_218, %c0_219] : memref<16x32x64xf32, #tpu.memory_space<vmem>>, vector<1x32x64xf32>
    %201 = vector.shape_cast %200 : vector<1x32x64xf32> to vector<32x64xf32>
    %cst_220 = arith.constant dense<0.000000e+00> : vector<32x2xf32>
    %202 = tpu.matmul %201, %199, %cst_220 {dimension_numbers = #tpu.dot_dimension_numbers<[1], [0], [0], [1], [0, 0, 1, 1], [], []>} : vector<32x64xf32>, vector<64x2xf32>, vector<32x2xf32> -> vector<32x2xf32>
    %203 = arith.addf %196, %202 : vector<32x2xf32>
    %c10 = arith.constant 10 : index
    %c0_221 = arith.constant 0 : index
    %c0_222 = arith.constant 0 : index
    %204 = vector.load %arg7[%c10, %c0_221, %c0_222] : memref<16x32x2xf32, #tpu.memory_space<vmem>>, vector<1x32x2xf32>
    %205 = vector.shape_cast %204 : vector<1x32x2xf32> to vector<32x2xf32>
    %cst_223 = arith.constant dense<0.000000e+00> : vector<64x2xf32>
    %206 = tpu.matmul %134, %205, %cst_223 {dimension_numbers = #tpu.dot_dimension_numbers<[1], [0], [0], [1], [0, 0, 1, 1], [], []>} : vector<64x32xf32>, vector<32x2xf32>, vector<64x2xf32> -> vector<64x2xf32>
    %c10_224 = arith.constant 10 : index
    %c0_225 = arith.constant 0 : index
    %c0_226 = arith.constant 0 : index
    %207 = vector.load %arg8[%c10_224, %c0_225, %c0_226] : memref<16x32x64xf32, #tpu.memory_space<vmem>>, vector<1x32x64xf32>
    %208 = vector.shape_cast %207 : vector<1x32x64xf32> to vector<32x64xf32>
    %cst_227 = arith.constant dense<0.000000e+00> : vector<32x2xf32>
    %209 = tpu.matmul %208, %206, %cst_227 {dimension_numbers = #tpu.dot_dimension_numbers<[1], [0], [0], [1], [0, 0, 1, 1], [], []>} : vector<32x64xf32>, vector<64x2xf32>, vector<32x2xf32> -> vector<32x2xf32>
    %210 = arith.addf %203, %209 : vector<32x2xf32>
    %c11 = arith.constant 11 : index
    %c0_228 = arith.constant 0 : index
    %c0_229 = arith.constant 0 : index
    %211 = vector.load %arg7[%c11, %c0_228, %c0_229] : memref<16x32x2xf32, #tpu.memory_space<vmem>>, vector<1x32x2xf32>
    %212 = vector.shape_cast %211 : vector<1x32x2xf32> to vector<32x2xf32>
    %cst_230 = arith.constant dense<0.000000e+00> : vector<64x2xf32>
    %213 = tpu.matmul %134, %212, %cst_230 {dimension_numbers = #tpu.dot_dimension_numbers<[1], [0], [0], [1], [0, 0, 1, 1], [], []>} : vector<64x32xf32>, vector<32x2xf32>, vector<64x2xf32> -> vector<64x2xf32>
    %c11_231 = arith.constant 11 : index
    %c0_232 = arith.constant 0 : index
    %c0_233 = arith.constant 0 : index
    %214 = vector.load %arg8[%c11_231, %c0_232, %c0_233] : memref<16x32x64xf32, #tpu.memory_space<vmem>>, vector<1x32x64xf32>
    %215 = vector.shape_cast %214 : vector<1x32x64xf32> to vector<32x64xf32>
    %cst_234 = arith.constant dense<0.000000e+00> : vector<32x2xf32>
    %216 = tpu.matmul %215, %213, %cst_234 {dimension_numbers = #tpu.dot_dimension_numbers<[1], [0], [0], [1], [0, 0, 1, 1], [], []>} : vector<32x64xf32>, vector<64x2xf32>, vector<32x2xf32> -> vector<32x2xf32>
    %217 = arith.addf %210, %216 : vector<32x2xf32>
    %c12 = arith.constant 12 : index
    %c0_235 = arith.constant 0 : index
    %c0_236 = arith.constant 0 : index
    %218 = vector.load %arg7[%c12, %c0_235, %c0_236] : memref<16x32x2xf32, #tpu.memory_space<vmem>>, vector<1x32x2xf32>
    %219 = vector.shape_cast %218 : vector<1x32x2xf32> to vector<32x2xf32>
    %cst_237 = arith.constant dense<0.000000e+00> : vector<64x2xf32>
    %220 = tpu.matmul %134, %219, %cst_237 {dimension_numbers = #tpu.dot_dimension_numbers<[1], [0], [0], [1], [0, 0, 1, 1], [], []>} : vector<64x32xf32>, vector<32x2xf32>, vector<64x2xf32> -> vector<64x2xf32>
    %c12_238 = arith.constant 12 : index
    %c0_239 = arith.constant 0 : index
    %c0_240 = arith.constant 0 : index
    %221 = vector.load %arg8[%c12_238, %c0_239, %c0_240] : memref<16x32x64xf32, #tpu.memory_space<vmem>>, vector<1x32x64xf32>
    %222 = vector.shape_cast %221 : vector<1x32x64xf32> to vector<32x64xf32>
    %cst_241 = arith.constant dense<0.000000e+00> : vector<32x2xf32>
    %223 = tpu.matmul %222, %220, %cst_241 {dimension_numbers = #tpu.dot_dimension_numbers<[1], [0], [0], [1], [0, 0, 1, 1], [], []>} : vector<32x64xf32>, vector<64x2xf32>, vector<32x2xf32> -> vector<32x2xf32>
    %224 = arith.addf %217, %223 : vector<32x2xf32>
    %c13 = arith.constant 13 : index
    %c0_242 = arith.constant 0 : index
    %c0_243 = arith.constant 0 : index
    %225 = vector.load %arg7[%c13, %c0_242, %c0_243] : memref<16x32x2xf32, #tpu.memory_space<vmem>>, vector<1x32x2xf32>
    %226 = vector.shape_cast %225 : vector<1x32x2xf32> to vector<32x2xf32>
    %cst_244 = arith.constant dense<0.000000e+00> : vector<64x2xf32>
    %227 = tpu.matmul %134, %226, %cst_244 {dimension_numbers = #tpu.dot_dimension_numbers<[1], [0], [0], [1], [0, 0, 1, 1], [], []>} : vector<64x32xf32>, vector<32x2xf32>, vector<64x2xf32> -> vector<64x2xf32>
    %c13_245 = arith.constant 13 : index
    %c0_246 = arith.constant 0 : index
    %c0_247 = arith.constant 0 : index
    %228 = vector.load %arg8[%c13_245, %c0_246, %c0_247] : memref<16x32x64xf32, #tpu.memory_space<vmem>>, vector<1x32x64xf32>
    %229 = vector.shape_cast %228 : vector<1x32x64xf32> to vector<32x64xf32>
    %cst_248 = arith.constant dense<0.000000e+00> : vector<32x2xf32>
    %230 = tpu.matmul %229, %227, %cst_248 {dimension_numbers = #tpu.dot_dimension_numbers<[1], [0], [0], [1], [0, 0, 1, 1], [], []>} : vector<32x64xf32>, vector<64x2xf32>, vector<32x2xf32> -> vector<32x2xf32>
    %231 = arith.addf %224, %230 : vector<32x2xf32>
    %c14 = arith.constant 14 : index
    %c0_249 = arith.constant 0 : index
    %c0_250 = arith.constant 0 : index
    %232 = vector.load %arg7[%c14, %c0_249, %c0_250] : memref<16x32x2xf32, #tpu.memory_space<vmem>>, vector<1x32x2xf32>
    %233 = vector.shape_cast %232 : vector<1x32x2xf32> to vector<32x2xf32>
    %cst_251 = arith.constant dense<0.000000e+00> : vector<64x2xf32>
    %234 = tpu.matmul %134, %233, %cst_251 {dimension_numbers = #tpu.dot_dimension_numbers<[1], [0], [0], [1], [0, 0, 1, 1], [], []>} : vector<64x32xf32>, vector<32x2xf32>, vector<64x2xf32> -> vector<64x2xf32>
    %c14_252 = arith.constant 14 : index
    %c0_253 = arith.constant 0 : index
    %c0_254 = arith.constant 0 : index
    %235 = vector.load %arg8[%c14_252, %c0_253, %c0_254] : memref<16x32x64xf32, #tpu.memory_space<vmem>>, vector<1x32x64xf32>
    %236 = vector.shape_cast %235 : vector<1x32x64xf32> to vector<32x64xf32>
    %cst_255 = arith.constant dense<0.000000e+00> : vector<32x2xf32>
    %237 = tpu.matmul %236, %234, %cst_255 {dimension_numbers = #tpu.dot_dimension_numbers<[1], [0], [0], [1], [0, 0, 1, 1], [], []>} : vector<32x64xf32>, vector<64x2xf32>, vector<32x2xf32> -> vector<32x2xf32>
    %238 = arith.addf %231, %237 : vector<32x2xf32>
    %c15 = arith.constant 15 : index
    %c0_256 = arith.constant 0 : index
    %c0_257 = arith.constant 0 : index
    %239 = vector.load %arg7[%c15, %c0_256, %c0_257] : memref<16x32x2xf32, #tpu.memory_space<vmem>>, vector<1x32x2xf32>
    %240 = vector.shape_cast %239 : vector<1x32x2xf32> to vector<32x2xf32>
    %cst_258 = arith.constant dense<0.000000e+00> : vector<64x2xf32>
    %241 = tpu.matmul %134, %240, %cst_258 {dimension_numbers = #tpu.dot_dimension_numbers<[1], [0], [0], [1], [0, 0, 1, 1], [], []>} : vector<64x32xf32>, vector<32x2xf32>, vector<64x2xf32> -> vector<64x2xf32>
    %c15_259 = arith.constant 15 : index
    %c0_260 = arith.constant 0 : index
    %c0_261 = arith.constant 0 : index
    %242 = vector.load %arg8[%c15_259, %c0_260, %c0_261] : memref<16x32x64xf32, #tpu.memory_space<vmem>>, vector<1x32x64xf32>
    %243 = vector.shape_cast %242 : vector<1x32x64xf32> to vector<32x64xf32>
    %cst_262 = arith.constant dense<0.000000e+00> : vector<32x2xf32>
    %244 = tpu.matmul %243, %241, %cst_262 {dimension_numbers = #tpu.dot_dimension_numbers<[1], [0], [0], [1], [0, 0, 1, 1], [], []>} : vector<32x64xf32>, vector<64x2xf32>, vector<32x2xf32> -> vector<32x2xf32>
    %245 = arith.addf %238, %244 : vector<32x2xf32>
    %c0_263 = arith.constant 0 : index
    %c0_264 = arith.constant 0 : index
    %246 = vector.load %arg9[%c0_263, %c0_264] : memref<32x1xf32, #tpu.memory_space<vmem>>, vector<32x1xf32>
    %247 = vector.broadcast %246 : vector<32x1xf32> to vector<32x2xf32>
    %248 = arith.addf %245, %247 : vector<32x2xf32>
    %c0_265 = arith.constant 0 : index
    %c0_266 = arith.constant 0 : index
    %c0_267 = arith.constant 0 : index
    %249 = vector.load %arg10[%c0_265, %c0_266, %c0_267] : memref<16x2x32xf32, #tpu.memory_space<vmem>>, vector<1x2x32xf32>
    %250 = vector.shape_cast %249 : vector<1x2x32xf32> to vector<2x32xf32>
    %cst_268 = arith.constant dense<0.000000e+00> : vector<32x32xf32>
    %251 = tpu.matmul %248, %250, %cst_268 {dimension_numbers = #tpu.dot_dimension_numbers<[1], [0], [0], [1], [0, 0, 1, 1], [], []>} : vector<32x2xf32>, vector<2x32xf32>, vector<32x32xf32> -> vector<32x32xf32>
    %c0_269 = arith.constant 0 : index
    %c0_270 = arith.constant 0 : index
    %c0_271 = arith.constant 0 : index
    %252 = vector.load %arg11[%c0_269, %c0_270, %c0_271] : memref<16x64x32xf32, #tpu.memory_space<vmem>>, vector<1x64x32xf32>
    %253 = vector.shape_cast %252 : vector<1x64x32xf32> to vector<64x32xf32>
    %cst_272 = arith.constant dense<0.000000e+00> : vector<64x32xf32>
    %254 = tpu.matmul %253, %251, %cst_272 {dimension_numbers = #tpu.dot_dimension_numbers<[1], [0], [0], [1], [0, 0, 1, 1], [], []>} : vector<64x32xf32>, vector<32x32xf32>, vector<64x32xf32> -> vector<64x32xf32>
    %c1_273 = arith.constant 1 : index
    %c0_274 = arith.constant 0 : index
    %c0_275 = arith.constant 0 : index
    %255 = vector.load %arg10[%c1_273, %c0_274, %c0_275] : memref<16x2x32xf32, #tpu.memory_space<vmem>>, vector<1x2x32xf32>
    %256 = vector.shape_cast %255 : vector<1x2x32xf32> to vector<2x32xf32>
    %cst_276 = arith.constant dense<0.000000e+00> : vector<32x32xf32>
    %257 = tpu.matmul %248, %256, %cst_276 {dimension_numbers = #tpu.dot_dimension_numbers<[1], [0], [0], [1], [0, 0, 1, 1], [], []>} : vector<32x2xf32>, vector<2x32xf32>, vector<32x32xf32> -> vector<32x32xf32>
    %c1_277 = arith.constant 1 : index
    %c0_278 = arith.constant 0 : index
    %c0_279 = arith.constant 0 : index
    %258 = vector.load %arg11[%c1_277, %c0_278, %c0_279] : memref<16x64x32xf32, #tpu.memory_space<vmem>>, vector<1x64x32xf32>
    %259 = vector.shape_cast %258 : vector<1x64x32xf32> to vector<64x32xf32>
    %cst_280 = arith.constant dense<0.000000e+00> : vector<64x32xf32>
    %260 = tpu.matmul %259, %257, %cst_280 {dimension_numbers = #tpu.dot_dimension_numbers<[1], [0], [0], [1], [0, 0, 1, 1], [], []>} : vector<64x32xf32>, vector<32x32xf32>, vector<64x32xf32> -> vector<64x32xf32>
    %261 = arith.addf %254, %260 : vector<64x32xf32>
    %c2_281 = arith.constant 2 : index
    %c0_282 = arith.constant 0 : index
    %c0_283 = arith.constant 0 : index
    %262 = vector.load %arg10[%c2_281, %c0_282, %c0_283] : memref<16x2x32xf32, #tpu.memory_space<vmem>>, vector<1x2x32xf32>
    %263 = vector.shape_cast %262 : vector<1x2x32xf32> to vector<2x32xf32>
    %cst_284 = arith.constant dense<0.000000e+00> : vector<32x32xf32>
    %264 = tpu.matmul %248, %263, %cst_284 {dimension_numbers = #tpu.dot_dimension_numbers<[1], [0], [0], [1], [0, 0, 1, 1], [], []>} : vector<32x2xf32>, vector<2x32xf32>, vector<32x32xf32> -> vector<32x32xf32>
    %c2_285 = arith.constant 2 : index
    %c0_286 = arith.constant 0 : index
    %c0_287 = arith.constant 0 : index
    %265 = vector.load %arg11[%c2_285, %c0_286, %c0_287] : memref<16x64x32xf32, #tpu.memory_space<vmem>>, vector<1x64x32xf32>
    %266 = vector.shape_cast %265 : vector<1x64x32xf32> to vector<64x32xf32>
    %cst_288 = arith.constant dense<0.000000e+00> : vector<64x32xf32>
    %267 = tpu.matmul %266, %264, %cst_288 {dimension_numbers = #tpu.dot_dimension_numbers<[1], [0], [0], [1], [0, 0, 1, 1], [], []>} : vector<64x32xf32>, vector<32x32xf32>, vector<64x32xf32> -> vector<64x32xf32>
    %268 = arith.addf %261, %267 : vector<64x32xf32>
    %c3_289 = arith.constant 3 : index
    %c0_290 = arith.constant 0 : index
    %c0_291 = arith.constant 0 : index
    %269 = vector.load %arg10[%c3_289, %c0_290, %c0_291] : memref<16x2x32xf32, #tpu.memory_space<vmem>>, vector<1x2x32xf32>
    %270 = vector.shape_cast %269 : vector<1x2x32xf32> to vector<2x32xf32>
    %cst_292 = arith.constant dense<0.000000e+00> : vector<32x32xf32>
    %271 = tpu.matmul %248, %270, %cst_292 {dimension_numbers = #tpu.dot_dimension_numbers<[1], [0], [0], [1], [0, 0, 1, 1], [], []>} : vector<32x2xf32>, vector<2x32xf32>, vector<32x32xf32> -> vector<32x32xf32>
    %c3_293 = arith.constant 3 : index
    %c0_294 = arith.constant 0 : index
    %c0_295 = arith.constant 0 : index
    %272 = vector.load %arg11[%c3_293, %c0_294, %c0_295] : memref<16x64x32xf32, #tpu.memory_space<vmem>>, vector<1x64x32xf32>
    %273 = vector.shape_cast %272 : vector<1x64x32xf32> to vector<64x32xf32>
    %cst_296 = arith.constant dense<0.000000e+00> : vector<64x32xf32>
    %274 = tpu.matmul %273, %271, %cst_296 {dimension_numbers = #tpu.dot_dimension_numbers<[1], [0], [0], [1], [0, 0, 1, 1], [], []>} : vector<64x32xf32>, vector<32x32xf32>, vector<64x32xf32> -> vector<64x32xf32>
    %275 = arith.addf %268, %274 : vector<64x32xf32>
    %c4_297 = arith.constant 4 : index
    %c0_298 = arith.constant 0 : index
    %c0_299 = arith.constant 0 : index
    %276 = vector.load %arg10[%c4_297, %c0_298, %c0_299] : memref<16x2x32xf32, #tpu.memory_space<vmem>>, vector<1x2x32xf32>
    %277 = vector.shape_cast %276 : vector<1x2x32xf32> to vector<2x32xf32>
    %cst_300 = arith.constant dense<0.000000e+00> : vector<32x32xf32>
    %278 = tpu.matmul %248, %277, %cst_300 {dimension_numbers = #tpu.dot_dimension_numbers<[1], [0], [0], [1], [0, 0, 1, 1], [], []>} : vector<32x2xf32>, vector<2x32xf32>, vector<32x32xf32> -> vector<32x32xf32>
    %c4_301 = arith.constant 4 : index
    %c0_302 = arith.constant 0 : index
    %c0_303 = arith.constant 0 : index
    %279 = vector.load %arg11[%c4_301, %c0_302, %c0_303] : memref<16x64x32xf32, #tpu.memory_space<vmem>>, vector<1x64x32xf32>
    %280 = vector.shape_cast %279 : vector<1x64x32xf32> to vector<64x32xf32>
    %cst_304 = arith.constant dense<0.000000e+00> : vector<64x32xf32>
    %281 = tpu.matmul %280, %278, %cst_304 {dimension_numbers = #tpu.dot_dimension_numbers<[1], [0], [0], [1], [0, 0, 1, 1], [], []>} : vector<64x32xf32>, vector<32x32xf32>, vector<64x32xf32> -> vector<64x32xf32>
    %282 = arith.addf %275, %281 : vector<64x32xf32>
    %c5_305 = arith.constant 5 : index
    %c0_306 = arith.constant 0 : index
    %c0_307 = arith.constant 0 : index
    %283 = vector.load %arg10[%c5_305, %c0_306, %c0_307] : memref<16x2x32xf32, #tpu.memory_space<vmem>>, vector<1x2x32xf32>
    %284 = vector.shape_cast %283 : vector<1x2x32xf32> to vector<2x32xf32>
    %cst_308 = arith.constant dense<0.000000e+00> : vector<32x32xf32>
    %285 = tpu.matmul %248, %284, %cst_308 {dimension_numbers = #tpu.dot_dimension_numbers<[1], [0], [0], [1], [0, 0, 1, 1], [], []>} : vector<32x2xf32>, vector<2x32xf32>, vector<32x32xf32> -> vector<32x32xf32>
    %c5_309 = arith.constant 5 : index
    %c0_310 = arith.constant 0 : index
    %c0_311 = arith.constant 0 : index
    %286 = vector.load %arg11[%c5_309, %c0_310, %c0_311] : memref<16x64x32xf32, #tpu.memory_space<vmem>>, vector<1x64x32xf32>
    %287 = vector.shape_cast %286 : vector<1x64x32xf32> to vector<64x32xf32>
    %cst_312 = arith.constant dense<0.000000e+00> : vector<64x32xf32>
    %288 = tpu.matmul %287, %285, %cst_312 {dimension_numbers = #tpu.dot_dimension_numbers<[1], [0], [0], [1], [0, 0, 1, 1], [], []>} : vector<64x32xf32>, vector<32x32xf32>, vector<64x32xf32> -> vector<64x32xf32>
    %289 = arith.addf %282, %288 : vector<64x32xf32>
    %c6_313 = arith.constant 6 : index
    %c0_314 = arith.constant 0 : index
    %c0_315 = arith.constant 0 : index
    %290 = vector.load %arg10[%c6_313, %c0_314, %c0_315] : memref<16x2x32xf32, #tpu.memory_space<vmem>>, vector<1x2x32xf32>
    %291 = vector.shape_cast %290 : vector<1x2x32xf32> to vector<2x32xf32>
    %cst_316 = arith.constant dense<0.000000e+00> : vector<32x32xf32>
    %292 = tpu.matmul %248, %291, %cst_316 {dimension_numbers = #tpu.dot_dimension_numbers<[1], [0], [0], [1], [0, 0, 1, 1], [], []>} : vector<32x2xf32>, vector<2x32xf32>, vector<32x32xf32> -> vector<32x32xf32>
    %c6_317 = arith.constant 6 : index
    %c0_318 = arith.constant 0 : index
    %c0_319 = arith.constant 0 : index
    %293 = vector.load %arg11[%c6_317, %c0_318, %c0_319] : memref<16x64x32xf32, #tpu.memory_space<vmem>>, vector<1x64x32xf32>
    %294 = vector.shape_cast %293 : vector<1x64x32xf32> to vector<64x32xf32>
    %cst_320 = arith.constant dense<0.000000e+00> : vector<64x32xf32>
    %295 = tpu.matmul %294, %292, %cst_320 {dimension_numbers = #tpu.dot_dimension_numbers<[1], [0], [0], [1], [0, 0, 1, 1], [], []>} : vector<64x32xf32>, vector<32x32xf32>, vector<64x32xf32> -> vector<64x32xf32>
    %296 = arith.addf %289, %295 : vector<64x32xf32>
    %c7_321 = arith.constant 7 : index
    %c0_322 = arith.constant 0 : index
    %c0_323 = arith.constant 0 : index
    %297 = vector.load %arg10[%c7_321, %c0_322, %c0_323] : memref<16x2x32xf32, #tpu.memory_space<vmem>>, vector<1x2x32xf32>
    %298 = vector.shape_cast %297 : vector<1x2x32xf32> to vector<2x32xf32>
    %cst_324 = arith.constant dense<0.000000e+00> : vector<32x32xf32>
    %299 = tpu.matmul %248, %298, %cst_324 {dimension_numbers = #tpu.dot_dimension_numbers<[1], [0], [0], [1], [0, 0, 1, 1], [], []>} : vector<32x2xf32>, vector<2x32xf32>, vector<32x32xf32> -> vector<32x32xf32>
    %c7_325 = arith.constant 7 : index
    %c0_326 = arith.constant 0 : index
    %c0_327 = arith.constant 0 : index
    %300 = vector.load %arg11[%c7_325, %c0_326, %c0_327] : memref<16x64x32xf32, #tpu.memory_space<vmem>>, vector<1x64x32xf32>
    %301 = vector.shape_cast %300 : vector<1x64x32xf32> to vector<64x32xf32>
    %cst_328 = arith.constant dense<0.000000e+00> : vector<64x32xf32>
    %302 = tpu.matmul %301, %299, %cst_328 {dimension_numbers = #tpu.dot_dimension_numbers<[1], [0], [0], [1], [0, 0, 1, 1], [], []>} : vector<64x32xf32>, vector<32x32xf32>, vector<64x32xf32> -> vector<64x32xf32>
    %303 = arith.addf %296, %302 : vector<64x32xf32>
    %c8_329 = arith.constant 8 : index
    %c0_330 = arith.constant 0 : index
    %c0_331 = arith.constant 0 : index
    %304 = vector.load %arg10[%c8_329, %c0_330, %c0_331] : memref<16x2x32xf32, #tpu.memory_space<vmem>>, vector<1x2x32xf32>
    %305 = vector.shape_cast %304 : vector<1x2x32xf32> to vector<2x32xf32>
    %cst_332 = arith.constant dense<0.000000e+00> : vector<32x32xf32>
    %306 = tpu.matmul %248, %305, %cst_332 {dimension_numbers = #tpu.dot_dimension_numbers<[1], [0], [0], [1], [0, 0, 1, 1], [], []>} : vector<32x2xf32>, vector<2x32xf32>, vector<32x32xf32> -> vector<32x32xf32>
    %c8_333 = arith.constant 8 : index
    %c0_334 = arith.constant 0 : index
    %c0_335 = arith.constant 0 : index
    %307 = vector.load %arg11[%c8_333, %c0_334, %c0_335] : memref<16x64x32xf32, #tpu.memory_space<vmem>>, vector<1x64x32xf32>
    %308 = vector.shape_cast %307 : vector<1x64x32xf32> to vector<64x32xf32>
    %cst_336 = arith.constant dense<0.000000e+00> : vector<64x32xf32>
    %309 = tpu.matmul %308, %306, %cst_336 {dimension_numbers = #tpu.dot_dimension_numbers<[1], [0], [0], [1], [0, 0, 1, 1], [], []>} : vector<64x32xf32>, vector<32x32xf32>, vector<64x32xf32> -> vector<64x32xf32>
    %310 = arith.addf %303, %309 : vector<64x32xf32>
    %c9_337 = arith.constant 9 : index
    %c0_338 = arith.constant 0 : index
    %c0_339 = arith.constant 0 : index
    %311 = vector.load %arg10[%c9_337, %c0_338, %c0_339] : memref<16x2x32xf32, #tpu.memory_space<vmem>>, vector<1x2x32xf32>
    %312 = vector.shape_cast %311 : vector<1x2x32xf32> to vector<2x32xf32>
    %cst_340 = arith.constant dense<0.000000e+00> : vector<32x32xf32>
    %313 = tpu.matmul %248, %312, %cst_340 {dimension_numbers = #tpu.dot_dimension_numbers<[1], [0], [0], [1], [0, 0, 1, 1], [], []>} : vector<32x2xf32>, vector<2x32xf32>, vector<32x32xf32> -> vector<32x32xf32>
    %c9_341 = arith.constant 9 : index
    %c0_342 = arith.constant 0 : index
    %c0_343 = arith.constant 0 : index
    %314 = vector.load %arg11[%c9_341, %c0_342, %c0_343] : memref<16x64x32xf32, #tpu.memory_space<vmem>>, vector<1x64x32xf32>
    %315 = vector.shape_cast %314 : vector<1x64x32xf32> to vector<64x32xf32>
    %cst_344 = arith.constant dense<0.000000e+00> : vector<64x32xf32>
    %316 = tpu.matmul %315, %313, %cst_344 {dimension_numbers = #tpu.dot_dimension_numbers<[1], [0], [0], [1], [0, 0, 1, 1], [], []>} : vector<64x32xf32>, vector<32x32xf32>, vector<64x32xf32> -> vector<64x32xf32>
    %317 = arith.addf %310, %316 : vector<64x32xf32>
    %c10_345 = arith.constant 10 : index
    %c0_346 = arith.constant 0 : index
    %c0_347 = arith.constant 0 : index
    %318 = vector.load %arg10[%c10_345, %c0_346, %c0_347] : memref<16x2x32xf32, #tpu.memory_space<vmem>>, vector<1x2x32xf32>
    %319 = vector.shape_cast %318 : vector<1x2x32xf32> to vector<2x32xf32>
    %cst_348 = arith.constant dense<0.000000e+00> : vector<32x32xf32>
    %320 = tpu.matmul %248, %319, %cst_348 {dimension_numbers = #tpu.dot_dimension_numbers<[1], [0], [0], [1], [0, 0, 1, 1], [], []>} : vector<32x2xf32>, vector<2x32xf32>, vector<32x32xf32> -> vector<32x32xf32>
    %c10_349 = arith.constant 10 : index
    %c0_350 = arith.constant 0 : index
    %c0_351 = arith.constant 0 : index
    %321 = vector.load %arg11[%c10_349, %c0_350, %c0_351] : memref<16x64x32xf32, #tpu.memory_space<vmem>>, vector<1x64x32xf32>
    %322 = vector.shape_cast %321 : vector<1x64x32xf32> to vector<64x32xf32>
    %cst_352 = arith.constant dense<0.000000e+00> : vector<64x32xf32>
    %323 = tpu.matmul %322, %320, %cst_352 {dimension_numbers = #tpu.dot_dimension_numbers<[1], [0], [0], [1], [0, 0, 1, 1], [], []>} : vector<64x32xf32>, vector<32x32xf32>, vector<64x32xf32> -> vector<64x32xf32>
    %324 = arith.addf %317, %323 : vector<64x32xf32>
    %c11_353 = arith.constant 11 : index
    %c0_354 = arith.constant 0 : index
    %c0_355 = arith.constant 0 : index
    %325 = vector.load %arg10[%c11_353, %c0_354, %c0_355] : memref<16x2x32xf32, #tpu.memory_space<vmem>>, vector<1x2x32xf32>
    %326 = vector.shape_cast %325 : vector<1x2x32xf32> to vector<2x32xf32>
    %cst_356 = arith.constant dense<0.000000e+00> : vector<32x32xf32>
    %327 = tpu.matmul %248, %326, %cst_356 {dimension_numbers = #tpu.dot_dimension_numbers<[1], [0], [0], [1], [0, 0, 1, 1], [], []>} : vector<32x2xf32>, vector<2x32xf32>, vector<32x32xf32> -> vector<32x32xf32>
    %c11_357 = arith.constant 11 : index
    %c0_358 = arith.constant 0 : index
    %c0_359 = arith.constant 0 : index
    %328 = vector.load %arg11[%c11_357, %c0_358, %c0_359] : memref<16x64x32xf32, #tpu.memory_space<vmem>>, vector<1x64x32xf32>
    %329 = vector.shape_cast %328 : vector<1x64x32xf32> to vector<64x32xf32>
    %cst_360 = arith.constant dense<0.000000e+00> : vector<64x32xf32>
    %330 = tpu.matmul %329, %327, %cst_360 {dimension_numbers = #tpu.dot_dimension_numbers<[1], [0], [0], [1], [0, 0, 1, 1], [], []>} : vector<64x32xf32>, vector<32x32xf32>, vector<64x32xf32> -> vector<64x32xf32>
    %331 = arith.addf %324, %330 : vector<64x32xf32>
    %c12_361 = arith.constant 12 : index
    %c0_362 = arith.constant 0 : index
    %c0_363 = arith.constant 0 : index
    %332 = vector.load %arg10[%c12_361, %c0_362, %c0_363] : memref<16x2x32xf32, #tpu.memory_space<vmem>>, vector<1x2x32xf32>
    %333 = vector.shape_cast %332 : vector<1x2x32xf32> to vector<2x32xf32>
    %cst_364 = arith.constant dense<0.000000e+00> : vector<32x32xf32>
    %334 = tpu.matmul %248, %333, %cst_364 {dimension_numbers = #tpu.dot_dimension_numbers<[1], [0], [0], [1], [0, 0, 1, 1], [], []>} : vector<32x2xf32>, vector<2x32xf32>, vector<32x32xf32> -> vector<32x32xf32>
    %c12_365 = arith.constant 12 : index
    %c0_366 = arith.constant 0 : index
    %c0_367 = arith.constant 0 : index
    %335 = vector.load %arg11[%c12_365, %c0_366, %c0_367] : memref<16x64x32xf32, #tpu.memory_space<vmem>>, vector<1x64x32xf32>
    %336 = vector.shape_cast %335 : vector<1x64x32xf32> to vector<64x32xf32>
    %cst_368 = arith.constant dense<0.000000e+00> : vector<64x32xf32>
    %337 = tpu.matmul %336, %334, %cst_368 {dimension_numbers = #tpu.dot_dimension_numbers<[1], [0], [0], [1], [0, 0, 1, 1], [], []>} : vector<64x32xf32>, vector<32x32xf32>, vector<64x32xf32> -> vector<64x32xf32>
    %338 = arith.addf %331, %337 : vector<64x32xf32>
    %c13_369 = arith.constant 13 : index
    %c0_370 = arith.constant 0 : index
    %c0_371 = arith.constant 0 : index
    %339 = vector.load %arg10[%c13_369, %c0_370, %c0_371] : memref<16x2x32xf32, #tpu.memory_space<vmem>>, vector<1x2x32xf32>
    %340 = vector.shape_cast %339 : vector<1x2x32xf32> to vector<2x32xf32>
    %cst_372 = arith.constant dense<0.000000e+00> : vector<32x32xf32>
    %341 = tpu.matmul %248, %340, %cst_372 {dimension_numbers = #tpu.dot_dimension_numbers<[1], [0], [0], [1], [0, 0, 1, 1], [], []>} : vector<32x2xf32>, vector<2x32xf32>, vector<32x32xf32> -> vector<32x32xf32>
    %c13_373 = arith.constant 13 : index
    %c0_374 = arith.constant 0 : index
    %c0_375 = arith.constant 0 : index
    %342 = vector.load %arg11[%c13_373, %c0_374, %c0_375] : memref<16x64x32xf32, #tpu.memory_space<vmem>>, vector<1x64x32xf32>
    %343 = vector.shape_cast %342 : vector<1x64x32xf32> to vector<64x32xf32>
    %cst_376 = arith.constant dense<0.000000e+00> : vector<64x32xf32>
    %344 = tpu.matmul %343, %341, %cst_376 {dimension_numbers = #tpu.dot_dimension_numbers<[1], [0], [0], [1], [0, 0, 1, 1], [], []>} : vector<64x32xf32>, vector<32x32xf32>, vector<64x32xf32> -> vector<64x32xf32>
    %345 = arith.addf %338, %344 : vector<64x32xf32>
    %c14_377 = arith.constant 14 : index
    %c0_378 = arith.constant 0 : index
    %c0_379 = arith.constant 0 : index
    %346 = vector.load %arg10[%c14_377, %c0_378, %c0_379] : memref<16x2x32xf32, #tpu.memory_space<vmem>>, vector<1x2x32xf32>
    %347 = vector.shape_cast %346 : vector<1x2x32xf32> to vector<2x32xf32>
    %cst_380 = arith.constant dense<0.000000e+00> : vector<32x32xf32>
    %348 = tpu.matmul %248, %347, %cst_380 {dimension_numbers = #tpu.dot_dimension_numbers<[1], [0], [0], [1], [0, 0, 1, 1], [], []>} : vector<32x2xf32>, vector<2x32xf32>, vector<32x32xf32> -> vector<32x32xf32>
    %c14_381 = arith.constant 14 : index
    %c0_382 = arith.constant 0 : index
    %c0_383 = arith.constant 0 : index
    %349 = vector.load %arg11[%c14_381, %c0_382, %c0_383] : memref<16x64x32xf32, #tpu.memory_space<vmem>>, vector<1x64x32xf32>
    %350 = vector.shape_cast %349 : vector<1x64x32xf32> to vector<64x32xf32>
    %cst_384 = arith.constant dense<0.000000e+00> : vector<64x32xf32>
    %351 = tpu.matmul %350, %348, %cst_384 {dimension_numbers = #tpu.dot_dimension_numbers<[1], [0], [0], [1], [0, 0, 1, 1], [], []>} : vector<64x32xf32>, vector<32x32xf32>, vector<64x32xf32> -> vector<64x32xf32>
    %352 = arith.addf %345, %351 : vector<64x32xf32>
    %c15_385 = arith.constant 15 : index
    %c0_386 = arith.constant 0 : index
    %c0_387 = arith.constant 0 : index
    %353 = vector.load %arg10[%c15_385, %c0_386, %c0_387] : memref<16x2x32xf32, #tpu.memory_space<vmem>>, vector<1x2x32xf32>
    %354 = vector.shape_cast %353 : vector<1x2x32xf32> to vector<2x32xf32>
    %cst_388 = arith.constant dense<0.000000e+00> : vector<32x32xf32>
    %355 = tpu.matmul %248, %354, %cst_388 {dimension_numbers = #tpu.dot_dimension_numbers<[1], [0], [0], [1], [0, 0, 1, 1], [], []>} : vector<32x2xf32>, vector<2x32xf32>, vector<32x32xf32> -> vector<32x32xf32>
    %c15_389 = arith.constant 15 : index
    %c0_390 = arith.constant 0 : index
    %c0_391 = arith.constant 0 : index
    %356 = vector.load %arg11[%c15_389, %c0_390, %c0_391] : memref<16x64x32xf32, #tpu.memory_space<vmem>>, vector<1x64x32xf32>
    %357 = vector.shape_cast %356 : vector<1x64x32xf32> to vector<64x32xf32>
    %cst_392 = arith.constant dense<0.000000e+00> : vector<64x32xf32>
    %358 = tpu.matmul %357, %355, %cst_392 {dimension_numbers = #tpu.dot_dimension_numbers<[1], [0], [0], [1], [0, 0, 1, 1], [], []>} : vector<64x32xf32>, vector<32x32xf32>, vector<64x32xf32> -> vector<64x32xf32>
    %359 = arith.addf %352, %358 : vector<64x32xf32>
    %c0_393 = arith.constant 0 : index
    %c0_394 = arith.constant 0 : index
    %360 = vector.load %arg12[%c0_393, %c0_394] : memref<64x32xf32, #tpu.memory_space<vmem>>, vector<64x32xf32>
    %361 = arith.addf %359, %360 : vector<64x32xf32>
    %c0_395 = arith.constant 0 : index
    %c0_396 = arith.constant 0 : index
    %c0_397 = arith.constant 0 : index
    %362 = vector.load %arg13[%c0_395, %c0_396, %c0_397] : memref<9x32x128xf32, #tpu.memory_space<vmem>>, vector<1x32x128xf32>
    %363 = vector.shape_cast %362 : vector<1x32x128xf32> to vector<32x128xf32>
    %cst_398 = arith.constant dense<0.000000e+00> : vector<64x128xf32>
    %364 = tpu.matmul %361, %363, %cst_398 {dimension_numbers = #tpu.dot_dimension_numbers<[1], [0], [0], [1], [0, 0, 1, 1], [], []>} : vector<64x32xf32>, vector<32x128xf32>, vector<64x128xf32> -> vector<64x128xf32>
    %c0_399 = arith.constant 0 : index
    %c0_400 = arith.constant 0 : index
    %c0_401 = arith.constant 0 : index
    %365 = vector.load %arg14[%c0_399, %c0_400, %c0_401] : memref<9x32x64xf32, #tpu.memory_space<vmem>>, vector<1x32x64xf32>
    %366 = vector.shape_cast %365 : vector<1x32x64xf32> to vector<32x64xf32>
    %cst_402 = arith.constant dense<0.000000e+00> : vector<32x128xf32>
    %367 = tpu.matmul %366, %364, %cst_402 {dimension_numbers = #tpu.dot_dimension_numbers<[1], [0], [0], [1], [0, 0, 1, 1], [], []>} : vector<32x64xf32>, vector<64x128xf32>, vector<32x128xf32> -> vector<32x128xf32>
    %c1_403 = arith.constant 1 : index
    %c0_404 = arith.constant 0 : index
    %c0_405 = arith.constant 0 : index
    %368 = vector.load %arg13[%c1_403, %c0_404, %c0_405] : memref<9x32x128xf32, #tpu.memory_space<vmem>>, vector<1x32x128xf32>
    %369 = vector.shape_cast %368 : vector<1x32x128xf32> to vector<32x128xf32>
    %cst_406 = arith.constant dense<0.000000e+00> : vector<64x128xf32>
    %370 = tpu.matmul %361, %369, %cst_406 {dimension_numbers = #tpu.dot_dimension_numbers<[1], [0], [0], [1], [0, 0, 1, 1], [], []>} : vector<64x32xf32>, vector<32x128xf32>, vector<64x128xf32> -> vector<64x128xf32>
    %c1_407 = arith.constant 1 : index
    %c0_408 = arith.constant 0 : index
    %c0_409 = arith.constant 0 : index
    %371 = vector.load %arg14[%c1_407, %c0_408, %c0_409] : memref<9x32x64xf32, #tpu.memory_space<vmem>>, vector<1x32x64xf32>
    %372 = vector.shape_cast %371 : vector<1x32x64xf32> to vector<32x64xf32>
    %cst_410 = arith.constant dense<0.000000e+00> : vector<32x128xf32>
    %373 = tpu.matmul %372, %370, %cst_410 {dimension_numbers = #tpu.dot_dimension_numbers<[1], [0], [0], [1], [0, 0, 1, 1], [], []>} : vector<32x64xf32>, vector<64x128xf32>, vector<32x128xf32> -> vector<32x128xf32>
    %374 = arith.addf %367, %373 : vector<32x128xf32>
    %c2_411 = arith.constant 2 : index
    %c0_412 = arith.constant 0 : index
    %c0_413 = arith.constant 0 : index
    %375 = vector.load %arg13[%c2_411, %c0_412, %c0_413] : memref<9x32x128xf32, #tpu.memory_space<vmem>>, vector<1x32x128xf32>
    %376 = vector.shape_cast %375 : vector<1x32x128xf32> to vector<32x128xf32>
    %cst_414 = arith.constant dense<0.000000e+00> : vector<64x128xf32>
    %377 = tpu.matmul %361, %376, %cst_414 {dimension_numbers = #tpu.dot_dimension_numbers<[1], [0], [0], [1], [0, 0, 1, 1], [], []>} : vector<64x32xf32>, vector<32x128xf32>, vector<64x128xf32> -> vector<64x128xf32>
    %c2_415 = arith.constant 2 : index
    %c0_416 = arith.constant 0 : index
    %c0_417 = arith.constant 0 : index
    %378 = vector.load %arg14[%c2_415, %c0_416, %c0_417] : memref<9x32x64xf32, #tpu.memory_space<vmem>>, vector<1x32x64xf32>
    %379 = vector.shape_cast %378 : vector<1x32x64xf32> to vector<32x64xf32>
    %cst_418 = arith.constant dense<0.000000e+00> : vector<32x128xf32>
    %380 = tpu.matmul %379, %377, %cst_418 {dimension_numbers = #tpu.dot_dimension_numbers<[1], [0], [0], [1], [0, 0, 1, 1], [], []>} : vector<32x64xf32>, vector<64x128xf32>, vector<32x128xf32> -> vector<32x128xf32>
    %381 = arith.addf %374, %380 : vector<32x128xf32>
    %c3_419 = arith.constant 3 : index
    %c0_420 = arith.constant 0 : index
    %c0_421 = arith.constant 0 : index
    %382 = vector.load %arg13[%c3_419, %c0_420, %c0_421] : memref<9x32x128xf32, #tpu.memory_space<vmem>>, vector<1x32x128xf32>
    %383 = vector.shape_cast %382 : vector<1x32x128xf32> to vector<32x128xf32>
    %cst_422 = arith.constant dense<0.000000e+00> : vector<64x128xf32>
    %384 = tpu.matmul %361, %383, %cst_422 {dimension_numbers = #tpu.dot_dimension_numbers<[1], [0], [0], [1], [0, 0, 1, 1], [], []>} : vector<64x32xf32>, vector<32x128xf32>, vector<64x128xf32> -> vector<64x128xf32>
    %c3_423 = arith.constant 3 : index
    %c0_424 = arith.constant 0 : index
    %c0_425 = arith.constant 0 : index
    %385 = vector.load %arg14[%c3_423, %c0_424, %c0_425] : memref<9x32x64xf32, #tpu.memory_space<vmem>>, vector<1x32x64xf32>
    %386 = vector.shape_cast %385 : vector<1x32x64xf32> to vector<32x64xf32>
    %cst_426 = arith.constant dense<0.000000e+00> : vector<32x128xf32>
    %387 = tpu.matmul %386, %384, %cst_426 {dimension_numbers = #tpu.dot_dimension_numbers<[1], [0], [0], [1], [0, 0, 1, 1], [], []>} : vector<32x64xf32>, vector<64x128xf32>, vector<32x128xf32> -> vector<32x128xf32>
    %388 = arith.addf %381, %387 : vector<32x128xf32>
    %c4_427 = arith.constant 4 : index
    %c0_428 = arith.constant 0 : index
    %c0_429 = arith.constant 0 : index
    %389 = vector.load %arg13[%c4_427, %c0_428, %c0_429] : memref<9x32x128xf32, #tpu.memory_space<vmem>>, vector<1x32x128xf32>
    %390 = vector.shape_cast %389 : vector<1x32x128xf32> to vector<32x128xf32>
    %cst_430 = arith.constant dense<0.000000e+00> : vector<64x128xf32>
    %391 = tpu.matmul %361, %390, %cst_430 {dimension_numbers = #tpu.dot_dimension_numbers<[1], [0], [0], [1], [0, 0, 1, 1], [], []>} : vector<64x32xf32>, vector<32x128xf32>, vector<64x128xf32> -> vector<64x128xf32>
    %c4_431 = arith.constant 4 : index
    %c0_432 = arith.constant 0 : index
    %c0_433 = arith.constant 0 : index
    %392 = vector.load %arg14[%c4_431, %c0_432, %c0_433] : memref<9x32x64xf32, #tpu.memory_space<vmem>>, vector<1x32x64xf32>
    %393 = vector.shape_cast %392 : vector<1x32x64xf32> to vector<32x64xf32>
    %cst_434 = arith.constant dense<0.000000e+00> : vector<32x128xf32>
    %394 = tpu.matmul %393, %391, %cst_434 {dimension_numbers = #tpu.dot_dimension_numbers<[1], [0], [0], [1], [0, 0, 1, 1], [], []>} : vector<32x64xf32>, vector<64x128xf32>, vector<32x128xf32> -> vector<32x128xf32>
    %395 = arith.addf %388, %394 : vector<32x128xf32>
    %c5_435 = arith.constant 5 : index
    %c0_436 = arith.constant 0 : index
    %c0_437 = arith.constant 0 : index
    %396 = vector.load %arg13[%c5_435, %c0_436, %c0_437] : memref<9x32x128xf32, #tpu.memory_space<vmem>>, vector<1x32x128xf32>
    %397 = vector.shape_cast %396 : vector<1x32x128xf32> to vector<32x128xf32>
    %cst_438 = arith.constant dense<0.000000e+00> : vector<64x128xf32>
    %398 = tpu.matmul %361, %397, %cst_438 {dimension_numbers = #tpu.dot_dimension_numbers<[1], [0], [0], [1], [0, 0, 1, 1], [], []>} : vector<64x32xf32>, vector<32x128xf32>, vector<64x128xf32> -> vector<64x128xf32>
    %c5_439 = arith.constant 5 : index
    %c0_440 = arith.constant 0 : index
    %c0_441 = arith.constant 0 : index
    %399 = vector.load %arg14[%c5_439, %c0_440, %c0_441] : memref<9x32x64xf32, #tpu.memory_space<vmem>>, vector<1x32x64xf32>
    %400 = vector.shape_cast %399 : vector<1x32x64xf32> to vector<32x64xf32>
    %cst_442 = arith.constant dense<0.000000e+00> : vector<32x128xf32>
    %401 = tpu.matmul %400, %398, %cst_442 {dimension_numbers = #tpu.dot_dimension_numbers<[1], [0], [0], [1], [0, 0, 1, 1], [], []>} : vector<32x64xf32>, vector<64x128xf32>, vector<32x128xf32> -> vector<32x128xf32>
    %402 = arith.addf %395, %401 : vector<32x128xf32>
    %c6_443 = arith.constant 6 : index
    %c0_444 = arith.constant 0 : index
    %c0_445 = arith.constant 0 : index
    %403 = vector.load %arg13[%c6_443, %c0_444, %c0_445] : memref<9x32x128xf32, #tpu.memory_space<vmem>>, vector<1x32x128xf32>
    %404 = vector.shape_cast %403 : vector<1x32x128xf32> to vector<32x128xf32>
    %cst_446 = arith.constant dense<0.000000e+00> : vector<64x128xf32>
    %405 = tpu.matmul %361, %404, %cst_446 {dimension_numbers = #tpu.dot_dimension_numbers<[1], [0], [0], [1], [0, 0, 1, 1], [], []>} : vector<64x32xf32>, vector<32x128xf32>, vector<64x128xf32> -> vector<64x128xf32>
    %c6_447 = arith.constant 6 : index
    %c0_448 = arith.constant 0 : index
    %c0_449 = arith.constant 0 : index
    %406 = vector.load %arg14[%c6_447, %c0_448, %c0_449] : memref<9x32x64xf32, #tpu.memory_space<vmem>>, vector<1x32x64xf32>
    %407 = vector.shape_cast %406 : vector<1x32x64xf32> to vector<32x64xf32>
    %cst_450 = arith.constant dense<0.000000e+00> : vector<32x128xf32>
    %408 = tpu.matmul %407, %405, %cst_450 {dimension_numbers = #tpu.dot_dimension_numbers<[1], [0], [0], [1], [0, 0, 1, 1], [], []>} : vector<32x64xf32>, vector<64x128xf32>, vector<32x128xf32> -> vector<32x128xf32>
    %409 = arith.addf %402, %408 : vector<32x128xf32>
    %c7_451 = arith.constant 7 : index
    %c0_452 = arith.constant 0 : index
    %c0_453 = arith.constant 0 : index
    %410 = vector.load %arg13[%c7_451, %c0_452, %c0_453] : memref<9x32x128xf32, #tpu.memory_space<vmem>>, vector<1x32x128xf32>
    %411 = vector.shape_cast %410 : vector<1x32x128xf32> to vector<32x128xf32>
    %cst_454 = arith.constant dense<0.000000e+00> : vector<64x128xf32>
    %412 = tpu.matmul %361, %411, %cst_454 {dimension_numbers = #tpu.dot_dimension_numbers<[1], [0], [0], [1], [0, 0, 1, 1], [], []>} : vector<64x32xf32>, vector<32x128xf32>, vector<64x128xf32> -> vector<64x128xf32>
    %c7_455 = arith.constant 7 : index
    %c0_456 = arith.constant 0 : index
    %c0_457 = arith.constant 0 : index
    %413 = vector.load %arg14[%c7_455, %c0_456, %c0_457] : memref<9x32x64xf32, #tpu.memory_space<vmem>>, vector<1x32x64xf32>
    %414 = vector.shape_cast %413 : vector<1x32x64xf32> to vector<32x64xf32>
    %cst_458 = arith.constant dense<0.000000e+00> : vector<32x128xf32>
    %415 = tpu.matmul %414, %412, %cst_458 {dimension_numbers = #tpu.dot_dimension_numbers<[1], [0], [0], [1], [0, 0, 1, 1], [], []>} : vector<32x64xf32>, vector<64x128xf32>, vector<32x128xf32> -> vector<32x128xf32>
    %416 = arith.addf %409, %415 : vector<32x128xf32>
    %c8_459 = arith.constant 8 : index
    %c0_460 = arith.constant 0 : index
    %c0_461 = arith.constant 0 : index
    %417 = vector.load %arg13[%c8_459, %c0_460, %c0_461] : memref<9x32x128xf32, #tpu.memory_space<vmem>>, vector<1x32x128xf32>
    %418 = vector.shape_cast %417 : vector<1x32x128xf32> to vector<32x128xf32>
    %cst_462 = arith.constant dense<0.000000e+00> : vector<64x128xf32>
    %419 = tpu.matmul %361, %418, %cst_462 {dimension_numbers = #tpu.dot_dimension_numbers<[1], [0], [0], [1], [0, 0, 1, 1], [], []>} : vector<64x32xf32>, vector<32x128xf32>, vector<64x128xf32> -> vector<64x128xf32>
    %c8_463 = arith.constant 8 : index
    %c0_464 = arith.constant 0 : index
    %c0_465 = arith.constant 0 : index
    %420 = vector.load %arg14[%c8_463, %c0_464, %c0_465] : memref<9x32x64xf32, #tpu.memory_space<vmem>>, vector<1x32x64xf32>
    %421 = vector.shape_cast %420 : vector<1x32x64xf32> to vector<32x64xf32>
    %cst_466 = arith.constant dense<0.000000e+00> : vector<32x128xf32>
    %422 = tpu.matmul %421, %419, %cst_466 {dimension_numbers = #tpu.dot_dimension_numbers<[1], [0], [0], [1], [0, 0, 1, 1], [], []>} : vector<32x64xf32>, vector<64x128xf32>, vector<32x128xf32> -> vector<32x128xf32>
    %423 = arith.addf %416, %422 : vector<32x128xf32>
    %c0_467 = arith.constant 0 : index
    %c0_468 = arith.constant 0 : index
    %424 = vector.load %arg15[%c0_467, %c0_468] : memref<32x1xf32, #tpu.memory_space<vmem>>, vector<32x1xf32>
    %425 = vector.broadcast %424 : vector<32x1xf32> to vector<32x128xf32>
    %426 = arith.addf %423, %425 : vector<32x128xf32>
    %cst_469 = arith.constant 0.000000e+00 : f32
    %427 = vector.broadcast %cst_469 : f32 to vector<32x128xf32>
    %428 = arith.maximumf %426, %427 : vector<32x128xf32>
    %c0_470 = arith.constant 0 : index
    %c0_471 = arith.constant 0 : index
    %c0_472 = arith.constant 0 : index
    %429 = vector.load %arg16[%c0_470, %c0_471, %c0_472] : memref<9x128x512xf32, #tpu.memory_space<vmem>>, vector<1x128x512xf32>
    %430 = vector.shape_cast %429 : vector<1x128x512xf32> to vector<128x512xf32>
    %cst_473 = arith.constant dense<0.000000e+00> : vector<32x512xf32>
    %431 = tpu.matmul %428, %430, %cst_473 {dimension_numbers = #tpu.dot_dimension_numbers<[1], [0], [0], [1], [0, 0, 1, 1], [], []>} : vector<32x128xf32>, vector<128x512xf32>, vector<32x512xf32> -> vector<32x512xf32>
    %c0_474 = arith.constant 0 : index
    %c0_475 = arith.constant 0 : index
    %c0_476 = arith.constant 0 : index
    %432 = vector.load %arg17[%c0_474, %c0_475, %c0_476] : memref<9x1x32xf32, #tpu.memory_space<vmem>>, vector<1x1x32xf32>
    %433 = vector.shape_cast %432 : vector<1x1x32xf32> to vector<1x32xf32>
    %cst_477 = arith.constant dense<0.000000e+00> : vector<1x512xf32>
    %434 = tpu.matmul %433, %431, %cst_477 {dimension_numbers = #tpu.dot_dimension_numbers<[1], [0], [0], [1], [0, 0, 1, 1], [], []>} : vector<1x32xf32>, vector<32x512xf32>, vector<1x512xf32> -> vector<1x512xf32>
    %c1_478 = arith.constant 1 : index
    %c0_479 = arith.constant 0 : index
    %c0_480 = arith.constant 0 : index
    %435 = vector.load %arg16[%c1_478, %c0_479, %c0_480] : memref<9x128x512xf32, #tpu.memory_space<vmem>>, vector<1x128x512xf32>
    %436 = vector.shape_cast %435 : vector<1x128x512xf32> to vector<128x512xf32>
    %cst_481 = arith.constant dense<0.000000e+00> : vector<32x512xf32>
    %437 = tpu.matmul %428, %436, %cst_481 {dimension_numbers = #tpu.dot_dimension_numbers<[1], [0], [0], [1], [0, 0, 1, 1], [], []>} : vector<32x128xf32>, vector<128x512xf32>, vector<32x512xf32> -> vector<32x512xf32>
    %c1_482 = arith.constant 1 : index
    %c0_483 = arith.constant 0 : index
    %c0_484 = arith.constant 0 : index
    %438 = vector.load %arg17[%c1_482, %c0_483, %c0_484] : memref<9x1x32xf32, #tpu.memory_space<vmem>>, vector<1x1x32xf32>
    %439 = vector.shape_cast %438 : vector<1x1x32xf32> to vector<1x32xf32>
    %cst_485 = arith.constant dense<0.000000e+00> : vector<1x512xf32>
    %440 = tpu.matmul %439, %437, %cst_485 {dimension_numbers = #tpu.dot_dimension_numbers<[1], [0], [0], [1], [0, 0, 1, 1], [], []>} : vector<1x32xf32>, vector<32x512xf32>, vector<1x512xf32> -> vector<1x512xf32>
    %441 = arith.addf %434, %440 : vector<1x512xf32>
    %c2_486 = arith.constant 2 : index
    %c0_487 = arith.constant 0 : index
    %c0_488 = arith.constant 0 : index
    %442 = vector.load %arg16[%c2_486, %c0_487, %c0_488] : memref<9x128x512xf32, #tpu.memory_space<vmem>>, vector<1x128x512xf32>
    %443 = vector.shape_cast %442 : vector<1x128x512xf32> to vector<128x512xf32>
    %cst_489 = arith.constant dense<0.000000e+00> : vector<32x512xf32>
    %444 = tpu.matmul %428, %443, %cst_489 {dimension_numbers = #tpu.dot_dimension_numbers<[1], [0], [0], [1], [0, 0, 1, 1], [], []>} : vector<32x128xf32>, vector<128x512xf32>, vector<32x512xf32> -> vector<32x512xf32>
    %c2_490 = arith.constant 2 : index
    %c0_491 = arith.constant 0 : index
    %c0_492 = arith.constant 0 : index
    %445 = vector.load %arg17[%c2_490, %c0_491, %c0_492] : memref<9x1x32xf32, #tpu.memory_space<vmem>>, vector<1x1x32xf32>
    %446 = vector.shape_cast %445 : vector<1x1x32xf32> to vector<1x32xf32>
    %cst_493 = arith.constant dense<0.000000e+00> : vector<1x512xf32>
    %447 = tpu.matmul %446, %444, %cst_493 {dimension_numbers = #tpu.dot_dimension_numbers<[1], [0], [0], [1], [0, 0, 1, 1], [], []>} : vector<1x32xf32>, vector<32x512xf32>, vector<1x512xf32> -> vector<1x512xf32>
    %448 = arith.addf %441, %447 : vector<1x512xf32>
    %c3_494 = arith.constant 3 : index
    %c0_495 = arith.constant 0 : index
    %c0_496 = arith.constant 0 : index
    %449 = vector.load %arg16[%c3_494, %c0_495, %c0_496] : memref<9x128x512xf32, #tpu.memory_space<vmem>>, vector<1x128x512xf32>
    %450 = vector.shape_cast %449 : vector<1x128x512xf32> to vector<128x512xf32>
    %cst_497 = arith.constant dense<0.000000e+00> : vector<32x512xf32>
    %451 = tpu.matmul %428, %450, %cst_497 {dimension_numbers = #tpu.dot_dimension_numbers<[1], [0], [0], [1], [0, 0, 1, 1], [], []>} : vector<32x128xf32>, vector<128x512xf32>, vector<32x512xf32> -> vector<32x512xf32>
    %c3_498 = arith.constant 3 : index
    %c0_499 = arith.constant 0 : index
    %c0_500 = arith.constant 0 : index
    %452 = vector.load %arg17[%c3_498, %c0_499, %c0_500] : memref<9x1x32xf32, #tpu.memory_space<vmem>>, vector<1x1x32xf32>
    %453 = vector.shape_cast %452 : vector<1x1x32xf32> to vector<1x32xf32>
    %cst_501 = arith.constant dense<0.000000e+00> : vector<1x512xf32>
    %454 = tpu.matmul %453, %451, %cst_501 {dimension_numbers = #tpu.dot_dimension_numbers<[1], [0], [0], [1], [0, 0, 1, 1], [], []>} : vector<1x32xf32>, vector<32x512xf32>, vector<1x512xf32> -> vector<1x512xf32>
    %455 = arith.addf %448, %454 : vector<1x512xf32>
    %c4_502 = arith.constant 4 : index
    %c0_503 = arith.constant 0 : index
    %c0_504 = arith.constant 0 : index
    %456 = vector.load %arg16[%c4_502, %c0_503, %c0_504] : memref<9x128x512xf32, #tpu.memory_space<vmem>>, vector<1x128x512xf32>
    %457 = vector.shape_cast %456 : vector<1x128x512xf32> to vector<128x512xf32>
    %cst_505 = arith.constant dense<0.000000e+00> : vector<32x512xf32>
    %458 = tpu.matmul %428, %457, %cst_505 {dimension_numbers = #tpu.dot_dimension_numbers<[1], [0], [0], [1], [0, 0, 1, 1], [], []>} : vector<32x128xf32>, vector<128x512xf32>, vector<32x512xf32> -> vector<32x512xf32>
    %c4_506 = arith.constant 4 : index
    %c0_507 = arith.constant 0 : index
    %c0_508 = arith.constant 0 : index
    %459 = vector.load %arg17[%c4_506, %c0_507, %c0_508] : memref<9x1x32xf32, #tpu.memory_space<vmem>>, vector<1x1x32xf32>
    %460 = vector.shape_cast %459 : vector<1x1x32xf32> to vector<1x32xf32>
    %cst_509 = arith.constant dense<0.000000e+00> : vector<1x512xf32>
    %461 = tpu.matmul %460, %458, %cst_509 {dimension_numbers = #tpu.dot_dimension_numbers<[1], [0], [0], [1], [0, 0, 1, 1], [], []>} : vector<1x32xf32>, vector<32x512xf32>, vector<1x512xf32> -> vector<1x512xf32>
    %462 = arith.addf %455, %461 : vector<1x512xf32>
    %c5_510 = arith.constant 5 : index
    %c0_511 = arith.constant 0 : index
    %c0_512 = arith.constant 0 : index
    %463 = vector.load %arg16[%c5_510, %c0_511, %c0_512] : memref<9x128x512xf32, #tpu.memory_space<vmem>>, vector<1x128x512xf32>
    %464 = vector.shape_cast %463 : vector<1x128x512xf32> to vector<128x512xf32>
    %cst_513 = arith.constant dense<0.000000e+00> : vector<32x512xf32>
    %465 = tpu.matmul %428, %464, %cst_513 {dimension_numbers = #tpu.dot_dimension_numbers<[1], [0], [0], [1], [0, 0, 1, 1], [], []>} : vector<32x128xf32>, vector<128x512xf32>, vector<32x512xf32> -> vector<32x512xf32>
    %c5_514 = arith.constant 5 : index
    %c0_515 = arith.constant 0 : index
    %c0_516 = arith.constant 0 : index
    %466 = vector.load %arg17[%c5_514, %c0_515, %c0_516] : memref<9x1x32xf32, #tpu.memory_space<vmem>>, vector<1x1x32xf32>
    %467 = vector.shape_cast %466 : vector<1x1x32xf32> to vector<1x32xf32>
    %cst_517 = arith.constant dense<0.000000e+00> : vector<1x512xf32>
    %468 = tpu.matmul %467, %465, %cst_517 {dimension_numbers = #tpu.dot_dimension_numbers<[1], [0], [0], [1], [0, 0, 1, 1], [], []>} : vector<1x32xf32>, vector<32x512xf32>, vector<1x512xf32> -> vector<1x512xf32>
    %469 = arith.addf %462, %468 : vector<1x512xf32>
    %c6_518 = arith.constant 6 : index
    %c0_519 = arith.constant 0 : index
    %c0_520 = arith.constant 0 : index
    %470 = vector.load %arg16[%c6_518, %c0_519, %c0_520] : memref<9x128x512xf32, #tpu.memory_space<vmem>>, vector<1x128x512xf32>
    %471 = vector.shape_cast %470 : vector<1x128x512xf32> to vector<128x512xf32>
    %cst_521 = arith.constant dense<0.000000e+00> : vector<32x512xf32>
    %472 = tpu.matmul %428, %471, %cst_521 {dimension_numbers = #tpu.dot_dimension_numbers<[1], [0], [0], [1], [0, 0, 1, 1], [], []>} : vector<32x128xf32>, vector<128x512xf32>, vector<32x512xf32> -> vector<32x512xf32>
    %c6_522 = arith.constant 6 : index
    %c0_523 = arith.constant 0 : index
    %c0_524 = arith.constant 0 : index
    %473 = vector.load %arg17[%c6_522, %c0_523, %c0_524] : memref<9x1x32xf32, #tpu.memory_space<vmem>>, vector<1x1x32xf32>
    %474 = vector.shape_cast %473 : vector<1x1x32xf32> to vector<1x32xf32>
    %cst_525 = arith.constant dense<0.000000e+00> : vector<1x512xf32>
    %475 = tpu.matmul %474, %472, %cst_525 {dimension_numbers = #tpu.dot_dimension_numbers<[1], [0], [0], [1], [0, 0, 1, 1], [], []>} : vector<1x32xf32>, vector<32x512xf32>, vector<1x512xf32> -> vector<1x512xf32>
    %476 = arith.addf %469, %475 : vector<1x512xf32>
    %c7_526 = arith.constant 7 : index
    %c0_527 = arith.constant 0 : index
    %c0_528 = arith.constant 0 : index
    %477 = vector.load %arg16[%c7_526, %c0_527, %c0_528] : memref<9x128x512xf32, #tpu.memory_space<vmem>>, vector<1x128x512xf32>
    %478 = vector.shape_cast %477 : vector<1x128x512xf32> to vector<128x512xf32>
    %cst_529 = arith.constant dense<0.000000e+00> : vector<32x512xf32>
    %479 = tpu.matmul %428, %478, %cst_529 {dimension_numbers = #tpu.dot_dimension_numbers<[1], [0], [0], [1], [0, 0, 1, 1], [], []>} : vector<32x128xf32>, vector<128x512xf32>, vector<32x512xf32> -> vector<32x512xf32>
    %c7_530 = arith.constant 7 : index
    %c0_531 = arith.constant 0 : index
    %c0_532 = arith.constant 0 : index
    %480 = vector.load %arg17[%c7_530, %c0_531, %c0_532] : memref<9x1x32xf32, #tpu.memory_space<vmem>>, vector<1x1x32xf32>
    %481 = vector.shape_cast %480 : vector<1x1x32xf32> to vector<1x32xf32>
    %cst_533 = arith.constant dense<0.000000e+00> : vector<1x512xf32>
    %482 = tpu.matmul %481, %479, %cst_533 {dimension_numbers = #tpu.dot_dimension_numbers<[1], [0], [0], [1], [0, 0, 1, 1], [], []>} : vector<1x32xf32>, vector<32x512xf32>, vector<1x512xf32> -> vector<1x512xf32>
    %483 = arith.addf %476, %482 : vector<1x512xf32>
    %c8_534 = arith.constant 8 : index
    %c0_535 = arith.constant 0 : index
    %c0_536 = arith.constant 0 : index
    %484 = vector.load %arg16[%c8_534, %c0_535, %c0_536] : memref<9x128x512xf32, #tpu.memory_space<vmem>>, vector<1x128x512xf32>
    %485 = vector.shape_cast %484 : vector<1x128x512xf32> to vector<128x512xf32>
    %cst_537 = arith.constant dense<0.000000e+00> : vector<32x512xf32>
    %486 = tpu.matmul %428, %485, %cst_537 {dimension_numbers = #tpu.dot_dimension_numbers<[1], [0], [0], [1], [0, 0, 1, 1], [], []>} : vector<32x128xf32>, vector<128x512xf32>, vector<32x512xf32> -> vector<32x512xf32>
    %c8_538 = arith.constant 8 : index
    %c0_539 = arith.constant 0 : index
    %c0_540 = arith.constant 0 : index
    %487 = vector.load %arg17[%c8_538, %c0_539, %c0_540] : memref<9x1x32xf32, #tpu.memory_space<vmem>>, vector<1x1x32xf32>
    %488 = vector.shape_cast %487 : vector<1x1x32xf32> to vector<1x32xf32>
    %cst_541 = arith.constant dense<0.000000e+00> : vector<1x512xf32>
    %489 = tpu.matmul %488, %486, %cst_541 {dimension_numbers = #tpu.dot_dimension_numbers<[1], [0], [0], [1], [0, 0, 1, 1], [], []>} : vector<1x32xf32>, vector<32x512xf32>, vector<1x512xf32> -> vector<1x512xf32>
    %490 = arith.addf %483, %489 : vector<1x512xf32>
    %c0_542 = arith.constant 0 : index
    %c0_543 = arith.constant 0 : index
    %491 = vector.load %arg18[%c0_542, %c0_543] : memref<1x1xf32, #tpu.memory_space<vmem>>, vector<1x1xf32>
    %492 = vector.broadcast %491 : vector<1x1xf32> to vector<1x512xf32>
    %493 = arith.addf %490, %492 : vector<1x512xf32>
    %494 = arith.negf %493 : vector<1x512xf32>
    %495 = math.exp %494 : vector<1x512xf32>
    %cst_544 = arith.constant 1.000000e+00 : f32
    %496 = vector.broadcast %cst_544 : f32 to vector<1x512xf32>
    %497 = arith.addf %496, %495 : vector<1x512xf32>
    %498 = arith.divf %496, %497 : vector<1x512xf32>
    %c0_545 = arith.constant 0 : index
    %c0_546 = arith.constant 0 : index
    %499 = vector.load %arg19[%c0_545, %c0_546] : memref<1x512xf32, #tpu.memory_space<vmem>>, vector<1x512xf32>
    tpu.vector_store %arg19[%c0_545, %c0_546], %498 {strides = array<i32>} : memref<1x512xf32, #tpu.memory_space<vmem>>, vector<1x512xf32>,
    return
  }
}

</mosaic_0001>

<bundles_post_ra>
// kernel: autoencoder_forward.1
= control target key start
LH: loop header
LB: loop body
LE: loop exit
PB: predicated region body
PF: predicated region fallthrough
CT: control target
= control target key end

     0   :  { %s17400_s0 = inlined_call_operand.vmem [shape: f32[1,512], index: 0, kind: input, shape index: {}]   ;;  %s17401_s1 = inlined_call_operand.vmem [shape: f32[9,512,128], index: 1, kind: input, shape index: {}]   ;;  %s17402_s2 = inlined_call_operand.vmem [shape: f32[9,32,1], index: 2, kind: input, shape index: {}]   ;;  %s17403_s3 = inlined_call_operand.vmem [shape: f32[32,1], index: 3, kind: input, shape index: {}]   ;;  %s17404_s4 = inlined_call_operand.vmem [shape: f32[9,128,32], index: 4, kind: input, shape index: {}]   ;;  %s17405_s5 = inlined_call_operand.vmem [shape: f32[9,64,32], index: 5, kind: input, shape index: {}]   ;;  %s17406_s6 = inlined_call_operand.vmem [shape: f32[64,1], index: 6, kind: input, shape index: {}]   ;;  %s17407_s7 = inlined_call_operand.vmem [shape: f32[16,32,2], index: 7, kind: input, shape index: {}]   ;;  %s17408_s8 = inlined_call_operand.hbm [shape: f32[16,32,64], index: 8, kind: input, shape index: {}]   ;;  %s17409_s9 = inlined_call_operand.vmem [shape: f32[32,1], index: 9, kind: input, shape index: {}]   ;;  %s17410_s10 = inlined_call_operand.hbm [shape: f32[16,2,32], index: 10, kind: input, shape index: {}]   ;;  %s17411_s11 = inlined_call_operand.vmem [shape: f32[16,64,32], index: 11, kind: input, shape index: {}]   ;;  %s17412_s12 = inlined_call_operand.vmem [shape: f32[64,32], index: 12, kind: input, shape index: {}]   ;;  %s17413_s13 = inlined_call_operand.vmem [shape: f32[9,32,128], index: 13, kind: input, shape index: {}]   ;;  %s17414_s14 = inlined_call_operand.hbm [shape: f32[9,32,64], index: 14, kind: input, shape index: {}]   ;;  %s17415_s15 = inlined_call_operand.vmem [shape: f32[32,1], index: 15, kind: input, shape index: {}]   ;;  %s17416_s16 = inlined_call_operand.hbm [shape: f32[9,128,512], index: 16, kind: input, shape index: {}]   ;;  %s17417_s17 = inlined_call_operand.vmem [shape: f32[9,1,32], index: 17, kind: input, shape index: {}]   ;;  %s17418_s18 = inlined_call_operand.<no memory space> [shape: f32[1,1], index: 18, kind: input, shape index: {}]   ;;  %s17419_s19 = inlined_call_operand.vmem [shape: f32[1,512], index: 19, kind: output, shape index: {}]  }
   0x1   :  { %17423 = sst [smem:[#allocation64_spill]] %s17400_s0  ;;  %v24_v0 = vstv %s17418_s18 }
   0x2   :  { %17424 = sst [smem:[#allocation65_spill]] %s17401_s1  ;;  %25 = vst [vmem:[#allocation2] sm:$0x1] %v24_v0 }
   0x3   :  { %17425 = sst [smem:[#allocation66_spill]] %s17402_s2 }
   0x4   :  { %17426 = sst [smem:[#allocation67_spill]] %s17403_s3 }
   0x5   :  { %26 = vsyncpa [#allocation4], 0 }
   0x6   :  { %27 = vsyncpa [#allocation6], 0  ;;  %s64_s1 = sshll.u32 %s17410_s10, 4  ;;  %s65_s1 = int_to_ptr.hbm [resolvable:$true] %s64_s1 }
   0x7   :  { %28 = vsyncpa [#allocation9], 0  ;;  %s11782_s22 = smov [#allocation5]   ;;  %s49_s25 = sshll.u32 %s17408_s8, 4  ;;  %s50_s25 = int_to_ptr.hbm [resolvable:$true] %s49_s25 }
   0x8   :  { %s66_s2 = sshll.u32 %s11782_s22, 4  ;;  %s11783_s3 = smov 32   ;;  %s67_s2 = int_to_ptr.vmem [resolvable:$true] %s66_s2 }
   0x9   :  { %s11784_s26 = smov 2   ;;  %s11785_s18 = smov [#allocation3]  }
   0xa   :  { %72 = dma.hbm_to_vmem [thread:$0]  %s65_s1, 512, %s67_s2, [#allocation6], %s11783_s3, %s11783_s3, %s11784_s26  }
   0xb   :  { %s51_s27 = sshll.u32 %s11785_s18, 4  ;;  %s11786_s28 = smov 128   ;;  %s52_s27 = int_to_ptr.vmem [resolvable:$true] %s51_s27 }
   0xc   :  { %s11787_s29 = smov 8   ;;  %s83_s30 = sshll.u32 %s17414_s14, 4  ;;  %s84_s30 = int_to_ptr.hbm [resolvable:$true] %s83_s30 }
   0xd   :  { %57 = dma.hbm_to_vmem [thread:$0]  %s50_s25, 8192, %s52_s27, [#allocation4], %s11786_s28, %s11786_s28, %s11787_s29  }
   0xe   :  { %s11788_s20 = smov [#allocation7]   ;;  %s98_s23 = sshll.u32 %s17416_s16, 4  ;;  %s99_s23 = int_to_ptr.hbm [resolvable:$true] %s98_s23 }
   0xf   :  { %s85_s21 = sshll.u32 %s11788_s20, 4  ;;  %s11789_s1 = smov [#allocation8]   ;;  %s86_s21 = int_to_ptr.vmem [resolvable:$true] %s85_s21 }
  0x10   :  { %91 = dma.hbm_to_vmem [thread:$0]  %s84_s30, 4608, %s86_s21, [#allocation6], %s11786_s28, %s11786_s28, %s11787_s29  }
  0x11   :  { %s100_s2 = sshll.u32 %s11789_s1, 4  ;;  %s11790_s24 = smov 512   ;;  %s101_s2 = int_to_ptr.vmem [resolvable:$true] %s100_s2 }
  0x12   :  { %106 = dma.hbm_to_vmem [thread:$0]  %s99_s23, 73728, %s101_s2, [#allocation9], %s11790_s24, %s11790_s24, %s11783_s3  }
  0x13   :  { %11776 = dma.done.wait [#allocation4], 8192  }
  0x14   :  { %11777 = vsyncadd [#allocation4], 4294959104 }
  0x15   :  { %11778 = dma.done.wait [#allocation6], 5120  }
  0x16   :  { %11779 = vsyncadd [#allocation6], 4294962176 }
  0x17   :  { %11780 = dma.done.wait [#allocation9], 73728  }
  0x18   :  { %11781 = vsyncadd [#allocation9], 4294893568  ;;  %s17427_s26 = sld [smem:[#allocation65_spill]]  ;;  %vm448_vm0 = vcmask 1040384   ;;  %vm435_vm1 = vcmask 7168   ;;  %vm2051_vm2 = vcmask 261120  }
  0x19   :  { %s17428_s1 = sld [smem:[#allocation64_spill]]  ;;  %vm3266_vm3 = vcmask 523264   ;;  %vm4735_vm4 = vcmask 1041408   ;;  %vm4722_vm5 = vcmask 15360  }
  0x1a   :  { %s17429_s2 = sld [smem:[#allocation66_spill]] }
  0x1b   :  { %s17430_s24 = sld [smem:[#allocation67_spill]] }
  0x1e   :  { %v175_v1 = vld [vmem:[%s17427_s26 + $0x178] sm:$0xff]  ;;  %v174_v2 = vld [vmem:[%s17427_s26 + $0x170] sm:$0xff]  ;;  %v173_v6 = vld [vmem:[%s17427_s26 + $0x168] sm:$0xff] }
  0x1f   :  { %v191_v3 = vld [vmem:[%s17427_s26 + $0x1f8] sm:$0xff]  ;;  %241 = vmatpush.msra.mxu2 %v175_v1  ;;  %v190_v7 = vld [vmem:[%s17427_s26 + $0x1f0] sm:$0xff]  ;;  %v189_v10 = vld [vmem:[%s17427_s26 + $0x1e8] sm:$0xff] }
  0x20   :  { %261 = vmatpush.msra.mxu3 %v191_v3  ;;  %v143_v4 = vld [vmem:[%s17427_s26 + $0x78] sm:$0xff]  ;;  %v142_v8 = vld [vmem:[%s17427_s26 + $0x70] sm:$0xff]  ;;  %v141_v11 = vld [vmem:[%s17427_s26 + $0x68] sm:$0xff] }
  0x21   :  { %v159_v5 = vld [vmem:[%s17427_s26 + $0xf8] sm:$0xff]  ;;  %201 = vmatpush.msra.mxu0 %v143_v4  ;;  %v158_v9 = vld [vmem:[%s17427_s26 + $0xf0] sm:$0xff]  ;;  %242 = vmatpush.msra.mxu2 %v174_v2  ;;  %v172_v12 = vld [vmem:[%s17427_s26 + $0x160] sm:$0xff] }
  0x22   :  { %221 = vmatpush.msra.mxu1 %v159_v5  ;;  %262 = vmatpush.msra.mxu3 %v190_v7  ;;  %v157_v13 = vld [vmem:[%s17427_s26 + $0xe8] sm:$0xff]  ;;  %v188_v14 = vld [vmem:[%s17427_s26 + $0x1e0] sm:$0xff]  ;;  %v171_v17 = vld [vmem:[%s17427_s26 + $0x158] sm:$0xff] }
  0x23   :  { %202 = vmatpush.msra.mxu0 %v142_v8  ;;  %243 = vmatpush.msra.mxu2 %v173_v6  ;;  %v140_v15 = vld [vmem:[%s17427_s26 + $0x60] sm:$0xff]  ;;  %v187_v18 = vld [vmem:[%s17427_s26 + $0x1d8] sm:$0xff]  ;;  %v170_v21 = vld [vmem:[%s17427_s26 + $0x150] sm:$0xff] }
  0x24   :  { %222 = vmatpush.msra.mxu1 %v158_v9  ;;  %263 = vmatpush.msra.mxu3 %v189_v10  ;;  %v156_v16 = vld [vmem:[%s17427_s26 + $0xe0] sm:$0xff]  ;;  %v139_v19 = vld [vmem:[%s17427_s26 + $0x58] sm:$0xff]  ;;  %v186_v22 = vld [vmem:[%s17427_s26 + $0x1d0] sm:$0xff] }
  0x25   :  { %203 = vmatpush.msra.mxu0 %v141_v11  ;;  %244 = vmatpush.msra.mxu2 %v172_v12  ;;  %v155_v20 = vld [vmem:[%s17427_s26 + $0xd8] sm:$0xff]  ;;  %v138_v23 = vld [vmem:[%s17427_s26 + $0x50] sm:$0xff]  ;;  %v169_v25 = vld [vmem:[%s17427_s26 + $0x148] sm:$0xff] }
  0x26   :  { %223 = vmatpush.msra.mxu1 %v157_v13  ;;  %264 = vmatpush.msra.mxu3 %v188_v14  ;;  %v154_v24 = vld [vmem:[%s17427_s26 + $0xd0] sm:$0xff]  ;;  %v185_v26 = vld [vmem:[%s17427_s26 + $0x1c8] sm:$0xff]  ;;  %v168_v29 = vld [vmem:[%s17427_s26 + $0x140] sm:$0xff] }
  0x27   :  { %204 = vmatpush.msra.mxu0 %v140_v15  ;;  %245 = vmatpush.msra.mxu2 %v171_v17  ;;  %v137_v27 = vld [vmem:[%s17427_s26 + $0x48] sm:$0xff]  ;;  %v184_v30 = vld [vmem:[%s17427_s26 + $0x1c0] sm:$0xff]  ;;  %v167_v33 = vld [vmem:[%s17427_s26 + $0x138] sm:$0xff] }
  0x28   :  { %224 = vmatpush.msra.mxu1 %v156_v16  ;;  %265 = vmatpush.msra.mxu3 %v187_v18  ;;  %v153_v28 = vld [vmem:[%s17427_s26 + $0xc8] sm:$0xff]  ;;  %v136_v31 = vld [vmem:[%s17427_s26 + $0x40] sm:$0xff]  ;;  %v183_v34 = vld [vmem:[%s17427_s26 + $0x1b8] sm:$0xff] }
  0x29   :  { %205 = vmatpush.msra.mxu0 %v139_v19  ;;  %246 = vmatpush.msra.mxu2 %v170_v21  ;;  %v152_v32 = vld [vmem:[%s17427_s26 + $0xc0] sm:$0xff]  ;;  %v135_v35 = vld [vmem:[%s17427_s26 + $0x38] sm:$0xff]  ;;  %v166_v37 = vld [vmem:[%s17427_s26 + $0x130] sm:$0xff] }
  0x2a   :  { %225 = vmatpush.msra.mxu1 %v155_v20  ;;  %266 = vmatpush.msra.mxu3 %v186_v22  ;;  %v151_v36 = vld [vmem:[%s17427_s26 + $0xb8] sm:$0xff]  ;;  %v182_v38 = vld [vmem:[%s17427_s26 + $0x1b0] sm:$0xff]  ;;  %v165_v41 = vld [vmem:[%s17427_s26 + $0x128] sm:$0xff] }
  0x2b   :  { %206 = vmatpush.msra.mxu0 %v138_v23  ;;  %247 = vmatpush.msra.mxu2 %v169_v25  ;;  %v134_v39 = vld [vmem:[%s17427_s26 + $0x30] sm:$0xff]  ;;  %v181_v42 = vld [vmem:[%s17427_s26 + $0x1a8] sm:$0xff]  ;;  %v164_v45 = vld [vmem:[%s17427_s26 + $0x120] sm:$0xff] }
  0x2c   :  { %226 = vmatpush.msra.mxu1 %v154_v24  ;;  %267 = vmatpush.msra.mxu3 %v185_v26  ;;  %v150_v40 = vld [vmem:[%s17427_s26 + $0xb0] sm:$0xff]  ;;  %v133_v43 = vld [vmem:[%s17427_s26 + $0x28] sm:$0xff]  ;;  %v180_v46 = vld [vmem:[%s17427_s26 + $0x1a0] sm:$0xff] }
  0x2d   :  { %207 = vmatpush.msra.mxu0 %v137_v27  ;;  %248 = vmatpush.msra.mxu2 %v168_v29  ;;  %v149_v44 = vld [vmem:[%s17427_s26 + $0xa8] sm:$0xff]  ;;  %v132_v47 = vld [vmem:[%s17427_s26 + $0x20] sm:$0xff]  ;;  %v163_v49 = vld [vmem:[%s17427_s26 + $0x118] sm:$0xff] }
  0x2e   :  { %227 = vmatpush.msra.mxu1 %v153_v28  ;;  %268 = vmatpush.msra.mxu3 %v184_v30  ;;  %v148_v48 = vld [vmem:[%s17427_s26 + $0xa0] sm:$0xff]  ;;  %v179_v50 = vld [vmem:[%s17427_s26 + $0x198] sm:$0xff]  ;;  %v162_v53 = vld [vmem:[%s17427_s26 + $0x110] sm:$0xff] }
  0x2f   :  { %208 = vmatpush.msra.mxu0 %v136_v31  ;;  %249 = vmatpush.msra.mxu2 %v167_v33  ;;  %v131_v51 = vld [vmem:[%s17427_s26 + $0x18] sm:$0xff]  ;;  %v178_v54 = vld [vmem:[%s17427_s26 + $0x190] sm:$0xff]  ;;  %v161_v57 = vld [vmem:[%s17427_s26 + $0x108] sm:$0xff] }
  0x30   :  { %228 = vmatpush.msra.mxu1 %v152_v32  ;;  %269 = vmatpush.msra.mxu3 %v183_v34  ;;  %v147_v52 = vld [vmem:[%s17427_s26 + $0x98] sm:$0xff]  ;;  %v130_v55 = vld [vmem:[%s17427_s26 + $0x10] sm:$0xff]  ;;  %v177_v58 = vld [vmem:[%s17427_s26 + $0x188] sm:$0xff] }
  0x31   :  { %209 = vmatpush.msra.mxu0 %v135_v35  ;;  %250 = vmatpush.msra.mxu2 %v166_v37  ;;  %v146_v56 = vld [vmem:[%s17427_s26 + $0x90] sm:$0xff]  ;;  %v129_v59 = vld [vmem:[%s17427_s26 + $0x8] sm:$0xff]  ;;  %v160_v61 = vld [vmem:[%s17427_s26 + $0x100] sm:$0xff] }
  0x32   :  { %229 = vmatpush.msra.mxu1 %v151_v36  ;;  %270 = vmatpush.msra.mxu3 %v182_v38  ;;  %v145_v60 = vld [vmem:[%s17427_s26 + $0x88] sm:$0xff]  ;;  %v176_v62 = vld [vmem:[%s17427_s26 + $0x180] sm:$0xff]  ;;  %v10077_v63 = vld [vmem:[%s17427_s26 + $0x378] sm:$0xff] }
  0x33   :  { %210 = vmatpush.msra.mxu0 %v134_v39  ;;  %251 = vmatpush.msra.mxu2 %v165_v41  ;;  %v10093_v0 = vld [vmem:[%s17427_s26 + $0x3f8] sm:$0xff]  ;;  %v128_v1 = vld [vmem:[%s17427_s26] sm:$0xff]  ;;  %v10076_v3 = vld [vmem:[%s17427_s26 + $0x370] sm:$0xff] }
  0x34   :  { %230 = vmatpush.msra.mxu1 %v150_v40  ;;  %271 = vmatpush.msra.mxu3 %v181_v42  ;;  %v144_v2 = vld [vmem:[%s17427_s26 + $0x80] sm:$0xff]  ;;  %v10045_v4 = vld [vmem:[%s17427_s26 + $0x278] sm:$0xff]  ;;  %v10092_v6 = vld [vmem:[%s17427_s26 + $0x3f0] sm:$0xff] }
  0x35   :  { %211 = vmatpush.msra.mxu0 %v133_v43  ;;  %252 = vmatpush.msra.mxu2 %v164_v45  ;;  %v10061_v5 = vld [vmem:[%s17427_s26 + $0x2f8] sm:$0xff]  ;;  %v10075_v7 = vld [vmem:[%s17427_s26 + $0x368] sm:$0xff]  ;;  %v10044_v8 = vld [vmem:[%s17427_s26 + $0x270] sm:$0xff] }
  0x36   :  { %231 = vmatpush.msra.mxu1 %v149_v44  ;;  %272 = vmatpush.msra.mxu3 %v180_v46  ;;  %v10060_v9 = vld [vmem:[%s17427_s26 + $0x2f0] sm:$0xff]  ;;  %v10091_v10 = vld [vmem:[%s17427_s26 + $0x3e8] sm:$0xff]  ;;  %v10074_v11 = vld [vmem:[%s17427_s26 + $0x360] sm:$0xff] }
  0x37   :  { %212 = vmatpush.msra.mxu0 %v132_v47  ;;  %253 = vmatpush.msra.mxu2 %v163_v49  ;;  %v10043_v12 = vld [vmem:[%s17427_s26 + $0x268] sm:$0xff]  ;;  %v10090_v14 = vld [vmem:[%s17427_s26 + $0x3e0] sm:$0xff]  ;;  %v10073_v15 = vld [vmem:[%s17427_s26 + $0x358] sm:$0xff] }
  0x38   :  { %232 = vmatpush.msra.mxu1 %v148_v48  ;;  %273 = vmatpush.msra.mxu3 %v179_v50  ;;  %v10059_v13 = vld [vmem:[%s17427_s26 + $0x2e8] sm:$0xff]  ;;  %v10042_v16 = vld [vmem:[%s17427_s26 + $0x260] sm:$0xff]  ;;  %v10089_v18 = vld [vmem:[%s17427_s26 + $0x3d8] sm:$0xff] }
  0x39   :  { %213 = vmatpush.msra.mxu0 %v131_v51  ;;  %254 = vmatpush.msra.mxu2 %v162_v53  ;;  %v10058_v17 = vld [vmem:[%s17427_s26 + $0x2e0] sm:$0xff]  ;;  %v10072_v19 = vld [vmem:[%s17427_s26 + $0x350] sm:$0xff]  ;;  %v10041_v20 = vld [vmem:[%s17427_s26 + $0x258] sm:$0xff] }
  0x3a   :  { %233 = vmatpush.msra.mxu1 %v147_v52  ;;  %274 = vmatpush.msra.mxu3 %v178_v54  ;;  %v10057_v21 = vld [vmem:[%s17427_s26 + $0x2d8] sm:$0xff]  ;;  %v10088_v22 = vld [vmem:[%s17427_s26 + $0x3d0] sm:$0xff]  ;;  %v10071_v23 = vld [vmem:[%s17427_s26 + $0x348] sm:$0xff] }
  0x3b   :  { %214 = vmatpush.msra.mxu0 %v130_v55  ;;  %255 = vmatpush.msra.mxu2 %v161_v57  ;;  %v10040_v24 = vld [vmem:[%s17427_s26 + $0x250] sm:$0xff]  ;;  %v10087_v26 = vld [vmem:[%s17427_s26 + $0x3c8] sm:$0xff]  ;;  %v10070_v27 = vld [vmem:[%s17427_s26 + $0x340] sm:$0xff] }
  0x3c   :  { %234 = vmatpush.msra.mxu1 %v146_v56  ;;  %275 = vmatpush.msra.mxu3 %v177_v58  ;;  %v10056_v25 = vld [vmem:[%s17427_s26 + $0x2d0] sm:$0xff]  ;;  %v10039_v28 = vld [vmem:[%s17427_s26 + $0x248] sm:$0xff]  ;;  %v10086_v30 = vld [vmem:[%s17427_s26 + $0x3c0] sm:$0xff] }
  0x3d   :  { %215 = vmatpush.msra.mxu0 %v129_v59  ;;  %256 = vmatpush.msra.mxu2 %v160_v61  ;;  %v10055_v29 = vld [vmem:[%s17427_s26 + $0x2c8] sm:$0xff]  ;;  %v10069_v31 = vld [vmem:[%s17427_s26 + $0x338] sm:$0xff]  ;;  %v10038_v32 = vld [vmem:[%s17427_s26 + $0x240] sm:$0xff] }
  0x3e   :  { %235 = vmatpush.msra.mxu1 %v145_v60  ;;  %276 = vmatpush.msra.mxu3 %v176_v62  ;;  %v10054_v33 = vld [vmem:[%s17427_s26 + $0x2c0] sm:$0xff]  ;;  %v10085_v34 = vld [vmem:[%s17427_s26 + $0x3b8] sm:$0xff]  ;;  %v10068_v35 = vld [vmem:[%s17427_s26 + $0x330] sm:$0xff] }
  0x3f   :  { %390 = vmatpush.msrb.mxu2 %v10077_v63  ;;  %216 = vmatpush.msra.mxu0 %v128_v1  ;;  %v10037_v36 = vld [vmem:[%s17427_s26 + $0x238] sm:$0xff]  ;;  %v10084_v38 = vld [vmem:[%s17427_s26 + $0x3b0] sm:$0xff]  ;;  %v127_v39 = vld [vmem:[%s17428_s1] sm:$0xf] }
  0x40   :  { %410 = vmatpush.msrb.mxu3 %v10093_v0  ;;  %236 = vmatpush.msra.mxu1 %v144_v2  ;;  %v10053_v37 = vld [vmem:[%s17427_s26 + $0x2b8] sm:$0xff]  ;;  %v10067_v40 = vld [vmem:[%s17427_s26 + $0x328] sm:$0xff]  ;;  %v10036_v41 = vld [vmem:[%s17427_s26 + $0x230] sm:$0xff]  ;;  %v12231_v45 = vperm.slane %v127_v39, 2  ;;  %v12245_v50 = vperm.slane %v127_v39, 3  ;;  %v12257_v54 = vperm.slane %v127_v39, 0 }
  0x41   :  { %391 = vmatpush.msrb.mxu2 %v10076_v3  ;;  %350 = vmatpush.msrb.mxu0 %v10045_v4  ;;  %v10052_v42 = vld [vmem:[%s17427_s26 + $0x2b0] sm:$0xff]  ;;  %v10083_v43 = vld [vmem:[%s17427_s26 + $0x3a8] sm:$0xff]  ;;  %v10066_v44 = vld [vmem:[%s17427_s26 + $0x320] sm:$0xff]  ;;  %v12262_v56 = vperm.slane %v127_v39, 1 }
  0x42   :  { %370 = vmatpush.msrb.mxu1 %v10061_v5  ;;  %411 = vmatpush.msrb.mxu3 %v10092_v6  ;;  %v10035_v46 = vld [vmem:[%s17427_s26 + $0x228] sm:$0xff]  ;;  %v10065_v48 = vld [vmem:[%s17427_s26 + $0x318] sm:$0xff]  ;;  %v10082_v49 = vld [vmem:[%s17427_s26 + $0x3a0] sm:$0xff] }
  0x43   :  { %392 = vmatpush.msrb.mxu2 %v10075_v7  ;;  %351 = vmatpush.msrb.mxu0 %v10044_v8  ;;  %v10051_v47 = vld [vmem:[%s17427_s26 + $0x2a8] sm:$0xff]  ;;  %v10034_v51 = vld [vmem:[%s17427_s26 + $0x220] sm:$0xff]  ;;  %v10064_v53 = vld [vmem:[%s17427_s26 + $0x310] sm:$0xff] }
  0x44   :  { %371 = vmatpush.msrb.mxu1 %v10060_v9  ;;  %412 = vmatpush.msrb.mxu3 %v10091_v10  ;;  %v10050_v52 = vld [vmem:[%s17427_s26 + $0x2a0] sm:$0xff]  ;;  %v10081_v55 = vld [vmem:[%s17427_s26 + $0x398] sm:$0xff]  ;;  %v10063_v59 = vld [vmem:[%s17427_s26 + $0x308] sm:$0xff] }
  0x45   :  { %393 = vmatpush.msrb.mxu2 %v10074_v11  ;;  %352 = vmatpush.msrb.mxu0 %v10043_v12  ;;  %v10033_v57 = vld [vmem:[%s17427_s26 + $0x218] sm:$0xff]  ;;  %v10080_v60 = vld [vmem:[%s17427_s26 + $0x390] sm:$0xff]  ;;  %v10062_v63 = vld [vmem:[%s17427_s26 + $0x300] sm:$0xff] }
  0x46   :  { %372 = vmatpush.msrb.mxu1 %v10059_v13  ;;  %413 = vmatpush.msrb.mxu3 %v10090_v14  ;;  %v10049_v58 = vld [vmem:[%s17427_s26 + $0x298] sm:$0xff]  ;;  %v10032_v61 = vld [vmem:[%s17427_s26 + $0x210] sm:$0xff]  ;;  %v10079_v0 = vld [vmem:[%s17427_s26 + $0x388] sm:$0xff] }
  0x47   :  { %394 = vmatpush.msrb.mxu2 %v10073_v15  ;;  %353 = vmatpush.msrb.mxu0 %v10042_v16  ;;  %v10048_v62 = vld [vmem:[%s17427_s26 + $0x290] sm:$0xff]  ;;  %v10031_v1 = vld [vmem:[%s17427_s26 + $0x208] sm:$0xff]  ;;  %v10078_v3 = vld [vmem:[%s17427_s26 + $0x380] sm:$0xff] }
  0x48   :  { %373 = vmatpush.msrb.mxu1 %v10058_v17  ;;  %414 = vmatpush.msrb.mxu3 %v10089_v18  ;;  %v10047_v2 = vld [vmem:[%s17427_s26 + $0x288] sm:$0xff]  ;;  %v10030_v4 = vld [vmem:[%s17427_s26 + $0x200] sm:$0xff]  ;;  %v10123_v6 = vld [vmem:[%s17427_s26 + $0x478] sm:$0xff] }
  0x49   :  { %395 = vmatpush.msrb.mxu2 %v10072_v19  ;;  %354 = vmatpush.msrb.mxu0 %v10041_v20  ;;  %v10046_v5 = vld [vmem:[%s17427_s26 + $0x280] sm:$0xff]  ;;  %v10139_v7 = vld [vmem:[%s17427_s26 + $0x4f8] sm:$0xff]  ;;  %v10122_v8 = vld [vmem:[%s17427_s26 + $0x470] sm:$0xff] }
  0x4a   :  { %374 = vmatpush.msrb.mxu1 %v10057_v21  ;;  %415 = vmatpush.msrb.mxu3 %v10088_v22  ;;  %v10138_v9 = vld [vmem:[%s17427_s26 + $0x4f0] sm:$0xff]  ;;  %v10121_v10 = vld [vmem:[%s17427_s26 + $0x468] sm:$0xff]  ;;  %v10120_v12 = vld [vmem:[%s17427_s26 + $0x460] sm:$0xff] }
  0x4b   :  { %396 = vmatpush.msrb.mxu2 %v10071_v23  ;;  %355 = vmatpush.msrb.mxu0 %v10040_v24  ;;  %v10137_v11 = vld [vmem:[%s17427_s26 + $0x4e8] sm:$0xff]  ;;  %v10136_v13 = vld [vmem:[%s17427_s26 + $0x4e0] sm:$0xff]  ;;  %v10119_v14 = vld [vmem:[%s17427_s26 + $0x458] sm:$0xff] }
  0x4c   :  { %375 = vmatpush.msrb.mxu1 %v10056_v25  ;;  %416 = vmatpush.msrb.mxu3 %v10087_v26  ;;  %v10135_v15 = vld [vmem:[%s17427_s26 + $0x4d8] sm:$0xff]  ;;  %v10118_v16 = vld [vmem:[%s17427_s26 + $0x450] sm:$0xff]  ;;  %v10117_v18 = vld [vmem:[%s17427_s26 + $0x448] sm:$0xff] }
  0x4d   :  { %397 = vmatpush.msrb.mxu2 %v10070_v27  ;;  %356 = vmatpush.msrb.mxu0 %v10039_v28  ;;  %v10134_v17 = vld [vmem:[%s17427_s26 + $0x4d0] sm:$0xff]  ;;  %v10133_v19 = vld [vmem:[%s17427_s26 + $0x4c8] sm:$0xff]  ;;  %v10116_v20 = vld [vmem:[%s17427_s26 + $0x440] sm:$0xff] }
  0x4e   :  { %376 = vmatpush.msrb.mxu1 %v10055_v29  ;;  %417 = vmatpush.msrb.mxu3 %v10086_v30  ;;  %v10132_v21 = vld [vmem:[%s17427_s26 + $0x4c0] sm:$0xff]  ;;  %v10115_v22 = vld [vmem:[%s17427_s26 + $0x438] sm:$0xff]  ;;  %v10114_v24 = vld [vmem:[%s17427_s26 + $0x430] sm:$0xff] }
  0x4f   :  { %398 = vmatpush.msrb.mxu2 %v10069_v31  ;;  %357 = vmatpush.msrb.mxu0 %v10038_v32  ;;  %v10131_v23 = vld [vmem:[%s17427_s26 + $0x4b8] sm:$0xff]  ;;  %v10130_v25 = vld [vmem:[%s17427_s26 + $0x4b0] sm:$0xff]  ;;  %v10113_v26 = vld [vmem:[%s17427_s26 + $0x428] sm:$0xff] }
  0x50   :  { %377 = vmatpush.msrb.mxu1 %v10054_v33  ;;  %418 = vmatpush.msrb.mxu3 %v10085_v34  ;;  %v10129_v27 = vld [vmem:[%s17427_s26 + $0x4a8] sm:$0xff]  ;;  %v10112_v28 = vld [vmem:[%s17427_s26 + $0x420] sm:$0xff]  ;;  %v10111_v34 = vld [vmem:[%s17427_s26 + $0x418] sm:$0xff] }
  0x51   :  { %399 = vmatpush.msrb.mxu2 %v10068_v35  ;;  %358 = vmatpush.msrb.mxu0 %v10037_v36  ;;  %v10128_v29 = vld [vmem:[%s17427_s26 + $0x4a0] sm:$0xff]  ;;  %v10127_v35 = vld [vmem:[%s17427_s26 + $0x498] sm:$0xff]  ;;  %v10110_v36 = vld [vmem:[%s17427_s26 + $0x410] sm:$0xff] }
  0x52   :  { %378 = vmatpush.msrb.mxu1 %v10053_v37  ;;  %419 = vmatpush.msrb.mxu3 %v10084_v38  ;;  %v10126_v37 = vld [vmem:[%s17427_s26 + $0x490] sm:$0xff] }
  0x53   :  { %400 = vmatpush.msrb.mxu2 %v10067_v40  ;;  %359 = vmatpush.msrb.mxu0 %v10036_v41  ;;  %v10109_v40 = vld [vmem:[%s17427_s26 + $0x408] sm:$0xff] }
  0x54   :  { %379 = vmatpush.msrb.mxu1 %v10052_v42  ;;  %420 = vmatpush.msrb.mxu3 %v10083_v43  ;;  %v10125_v41 = vld [vmem:[%s17427_s26 + $0x488] sm:$0xff]  ;;  %v281_v43 = vld [vmem:[%s17429_s2] sm:$0xff] }
  0x55   :  { %401 = vmatpush.msrb.mxu2 %v10066_v44  ;;  %360 = vmatpush.msrb.mxu0 %v10035_v46  ;;  %v10171_v44 = vld [vmem:[%s17427_s26 + $0x5f8] sm:$0xff]  ;;  %v10108_v46 = vld [vmem:[%s17427_s26 + $0x400] sm:$0xff] }
  0x56   :  { %257 = vmatmul.f32.vlgmr.msra.gmra.mxu2 %v12231_v45  ;;  %380 = vmatpush.msrb.mxu1 %v10051_v47  ;;  %v10124_v47 = vld [vmem:[%s17427_s26 + $0x480] sm:$0xff] }
  0x57   :  { %402 = vmatpush.msrb.mxu2 %v10065_v48  ;;  %421 = vmatpush.msrb.mxu3 %v10082_v49  ;;  %v10170_v49 = vld [vmem:[%s17427_s26 + $0x5f0] sm:$0xff] }
  0x58   :  { %277 = vmatmul.f32.vlgmr.msra.gmra.mxu3 %v12245_v50  ;;  %361 = vmatpush.msrb.mxu0 %v10034_v51 }
  0x59   :  { %381 = vmatpush.msrb.mxu1 %v10050_v52  ;;  %403 = vmatpush.msrb.mxu2 %v10064_v53 }
  0x5a   :  { %422 = vmatpush.msrb.mxu3 %v10081_v55  ;;  %217 = vmatmul.f32.vlgmr.msra.gmra.mxu0 %v12257_v54  ;;  %v10169_v55 = vld [vmem:[%s17427_s26 + $0x5e8] sm:$0xff] }
  0x5b   :  { %237 = vmatmul.f32.vlgmr.msra.gmra.mxu1 %v12262_v56  ;;  %362 = vmatpush.msrb.mxu0 %v10033_v57 }
  0x5c   :  { %382 = vmatpush.msrb.mxu1 %v10049_v58  ;;  %404 = vmatpush.msrb.mxu2 %v10063_v59  ;;  %v10168_v58 = vld [vmem:[%s17427_s26 + $0x5e0] sm:$0xff] }
  0x5d   :  { %423 = vmatpush.msrb.mxu3 %v10080_v60  ;;  %363 = vmatpush.msrb.mxu0 %v10032_v61  ;;  %v282_v60 = vld [vmem:[%s17429_s2 + $0x8] sm:$0xff] }
  0x5e   :  { %383 = vmatpush.msrb.mxu1 %v10048_v62  ;;  %405 = vmatpush.msrb.mxu2 %v10062_v63  ;;  %v10094_v62 = vld [vmem:[%s17429_s2 + $0x20] sm:$0xff]  ;;  %v10167_v63 = vld [vmem:[%s17427_s26 + $0x5d8] sm:$0xff] }
  0x5f   :  { %424 = vmatpush.msrb.mxu3 %v10079_v0  ;;  %406 = vmatmul.f32.vlgmr.msrb.gmra.mxu2 %v12231_v45  ;;  %v10155_v0 = vld [vmem:[%s17427_s26 + $0x578] sm:$0xff] }
  0x60   :  { %364 = vmatpush.msrb.mxu0 %v10031_v1  ;;  %384 = vmatpush.msrb.mxu1 %v10047_v2  ;;  %v10166_v1 = vld [vmem:[%s17427_s26 + $0x5d0] sm:$0xff] }
  0x61   :  { %425 = vmatpush.msrb.mxu3 %v10078_v3  ;;  %590 = vmatpush.msra.mxu2 %v10123_v6  ;;  %v10154_v2 = vld [vmem:[%s17427_s26 + $0x570] sm:$0xff]  ;;  %v10165_v3 = vld [vmem:[%s17427_s26 + $0x5c8] sm:$0xff]  ;;  %v10152_v6 = vld [vmem:[%s17427_s26 + $0x560] sm:$0xff] }
  0x62   :  { %426 = vmatmul.f32.vlgmr.msrb.gmra.mxu3 %v12245_v50  ;;  %365 = vmatpush.msrb.mxu0 %v10030_v4  ;;  %v10153_v4 = vld [vmem:[%s17427_s26 + $0x568] sm:$0xff] }
  0x63   :  { %385 = vmatpush.msrb.mxu1 %v10046_v5  ;;  %366 = vmatmul.f32.vlgmr.msrb.gmra.mxu0 %v12257_v54  ;;  %v10164_v5 = vld [vmem:[%s17427_s26 + $0x5c0] sm:$0xff] }
  0x64   :  { %386 = vmatmul.f32.vlgmr.msrb.gmra.mxu1 %v12262_v56  ;;  %610 = vmatpush.msra.mxu3 %v10139_v7  ;;  %v283_v7 = vld [vmem:[%s17429_s2 + $0x10] sm:$0xff] }
  0x65   :  { %591 = vmatpush.msra.mxu2 %v10122_v8  ;;  %v10095_v8 = vld [vmem:[%s17429_s2 + $0x28] sm:$0xff] }
  0x66   :  { %611 = vmatpush.msra.mxu3 %v10138_v9  ;;  %v10163_v9 = vld [vmem:[%s17427_s26 + $0x5b8] sm:$0xff] }
  0x67   :  { %592 = vmatpush.msra.mxu2 %v10121_v10  ;;  %v10151_v10 = vld [vmem:[%s17427_s26 + $0x558] sm:$0xff] }
  0x68   :  { %612 = vmatpush.msra.mxu3 %v10137_v11  ;;  %v10162_v11 = vld [vmem:[%s17427_s26 + $0x5b0] sm:$0xff] }
  0x69   :  { %593 = vmatpush.msra.mxu2 %v10120_v12  ;;  %v10150_v12 = vld [vmem:[%s17427_s26 + $0x550] sm:$0xff] }
  0x6a   :  { %613 = vmatpush.msra.mxu3 %v10136_v13  ;;  %v10161_v13 = vld [vmem:[%s17427_s26 + $0x5a8] sm:$0xff] }
  0x6b   :  { %594 = vmatpush.msra.mxu2 %v10119_v14  ;;  %v10149_v14 = vld [vmem:[%s17427_s26 + $0x548] sm:$0xff] }
  0x6c   :  { %614 = vmatpush.msra.mxu3 %v10135_v15  ;;  %v10160_v15 = vld [vmem:[%s17427_s26 + $0x5a0] sm:$0xff] }
  0x6d   :  { %595 = vmatpush.msra.mxu2 %v10118_v16  ;;  %v10148_v16 = vld [vmem:[%s17427_s26 + $0x540] sm:$0xff] }
  0x6e   :  { %615 = vmatpush.msra.mxu3 %v10134_v17  ;;  %v284_v17 = vld [vmem:[%s17429_s2 + $0x18] sm:$0xff] }
  0x6f   :  { %596 = vmatpush.msra.mxu2 %v10117_v18  ;;  %v10096_v18 = vld [vmem:[%s17429_s2 + $0x30] sm:$0xff] }
  0x70   :  { %616 = vmatpush.msra.mxu3 %v10133_v19  ;;  %v10159_v19 = vld [vmem:[%s17427_s26 + $0x598] sm:$0xff] }
  0x71   :  { %597 = vmatpush.msra.mxu2 %v10116_v20  ;;  %v10147_v20 = vld [vmem:[%s17427_s26 + $0x538] sm:$0xff] }
  0x72   :  { %617 = vmatpush.msra.mxu3 %v10132_v21  ;;  %v10158_v21 = vld [vmem:[%s17427_s26 + $0x590] sm:$0xff] }
  0x73   :  { %598 = vmatpush.msra.mxu2 %v10115_v22  ;;  %v10146_v22 = vld [vmem:[%s17427_s26 + $0x530] sm:$0xff] }
  0x74   :  { %618 = vmatpush.msra.mxu3 %v10131_v23  ;;  %v10157_v23 = vld [vmem:[%s17427_s26 + $0x588] sm:$0xff] }
  0x75   :  { %599 = vmatpush.msra.mxu2 %v10114_v24  ;;  %v10145_v24 = vld [vmem:[%s17427_s26 + $0x528] sm:$0xff] }
  0x76   :  { %619 = vmatpush.msra.mxu3 %v10130_v25  ;;  %v10156_v25 = vld [vmem:[%s17427_s26 + $0x580] sm:$0xff] }
  0x77   :  { %600 = vmatpush.msra.mxu2 %v10113_v26  ;;  %v10144_v26 = vld [vmem:[%s17427_s26 + $0x520] sm:$0xff] }
  0x78   :  { %620 = vmatpush.msra.mxu3 %v10129_v27  ;;  %v10097_v27 = vld [vmem:[%s17429_s2 + $0x38] sm:$0xff] }
  0x79   :  { %601 = vmatpush.msra.mxu2 %v10112_v28  ;;  %v10143_v28 = vld [vmem:[%s17427_s26 + $0x518] sm:$0xff] }
  0x7a   :  { %621 = vmatpush.msra.mxu3 %v10128_v29  ;;  %v10142_v29 = vld [vmem:[%s17427_s26 + $0x510] sm:$0xff] }
  0x7b   :  { %602 = vmatpush.msra.mxu2 %v10111_v34  ;;  %v10196_v34 = vld [vmem:[%s17427_s26 + $0x678] sm:$0xff] }
  0x7c   :  { %622 = vmatpush.msra.mxu3 %v10127_v35 }
  0x7d   :  { %603 = vmatpush.msra.mxu2 %v10110_v36  ;;  %v10195_v36 = vld [vmem:[%s17427_s26 + $0x670] sm:$0xff] }
  0x7e   :  { %623 = vmatpush.msra.mxu3 %v10126_v37  ;;  %v10194_v37 = vld [vmem:[%s17427_s26 + $0x668] sm:$0xff] }
  0x7f   :  { %604 = vmatpush.msra.mxu2 %v10109_v40 }
  0x80   :  { %624 = vmatpush.msra.mxu3 %v10125_v41  ;;  %v10192_v41 = vld [vmem:[%s17427_s26 + $0x658] sm:$0xff] }
  0x81   :  { %605 = vmatpush.msra.mxu2 %v10108_v46  ;;  %v10210_v46 = vld [vmem:[%s17427_s26 + $0x6e8] sm:$0xff] }
  0x82   :  { %625 = vmatpush.msra.mxu3 %v10124_v47  ;;  %606 = vmatmul.f32.vlgmr.msra.gmra.mxu2 %v12257_v54  ;;  %v10227_v47 = vld [vmem:[%s17427_s26 + $0x770] sm:$0xff] }
  0x83   :  { %626 = vmatmul.f32.vlgmr.msra.gmra.mxu3 %v12262_v56 }
  0x84   :  { %788 = vmatpush.msrb.mxu3 %v10196_v34  ;;  %v10215_v34 = vld [vmem:[%s17427_s26 + $0x710] sm:$0xff] }
  0x86   :  { %789 = vmatpush.msrb.mxu3 %v10195_v36  ;;  %v10244_v36 = vld [vmem:[%s17427_s26 + $0x7f8] sm:$0xff] }
  0x88   :  { %790 = vmatpush.msrb.mxu3 %v10194_v37  ;;  %v10243_v37 = vld [vmem:[%s17427_s26 + $0x7f0] sm:$0xff] }
  0xd7   :  { %v218_v30 = vpop.f32.mrf.mxu0 }
  0xd8   :  { %v238_v31 = vpop.f32.mrf.mxu1 }
  0xd9   :  { %v239_v32 = vadd.f32 %v238_v31, %v218_v30  ;;  %v258_v33 = vpop.f32.mrf.mxu2  ;;  %v10141_v30 = vld [vmem:[%s17427_s26 + $0x508] sm:$0xff]  ;;  %v10140_v31 = vld [vmem:[%s17427_s26 + $0x500] sm:$0xff] }
  0xdb   :  { %v259_v38 = vadd.f32 %v258_v33, %v239_v32  ;;  %v278_v39 = vpop.f32.mrf.mxu3 }
  0xdd   :  { %v279_v42 = vadd.f32 %v278_v39, %v259_v38  ;;  %v10193_v38 = vld [vmem:[%s17427_s26 + $0x660] sm:$0xff]  ;;  %v10212_v39 = vld [vmem:[%s17427_s26 + $0x6f8] sm:$0xff] }
  0xde   :  { %791 = vmatpush.msrb.mxu3 %v10193_v38  ;;  %v10197_v38 = vld [vmem:[%s17427_s26 + $0x680] sm:$0xff] }
  0xdf   :  { %10103 = vmatpush.msk.msra.mxu1 %vm448_vm0, %v279_v42  ;;  %v10211_v42 = vld [vmem:[%s17427_s26 + $0x6f0] sm:$0xff] }
  0xe0   :  { %v367_v48 = vpop.f32.mrf.mxu0  ;;  %10104 = vmatmul.msk.f32.vlgmr.msra.gmra.mxu1 %vm435_vm1, %v281_v43  ;;  %v10228_v43 = vld [vmem:[%s17427_s26 + $0x778] sm:$0xff]  ;;  %792 = vmatpush.msrb.mxu3 %v10192_v41  ;;  %v10213_v41 = vld [vmem:[%s17427_s26 + $0x700] sm:$0xff] }
  0xe1   :  { %v387_v51 = vpop.f32.mrf.mxu1  ;;  %650 = vmatpush.msrb.mxu1 %v10171_v44  ;;  %v10191_v44 = vld [vmem:[%s17427_s26 + $0x650] sm:$0xff] }
  0xe2   :  { %v388_v52 = vadd.f32 %v387_v51, %v367_v48  ;;  %v407_v53 = vpop.f32.mrf.mxu2  ;;  %793 = vmatpush.msrb.mxu3 %v10191_v44  ;;  %v10209_v51 = vld [vmem:[%s17427_s26 + $0x6e0] sm:$0xff]  ;;  %v10173_v44 = vld [vmem:[%s17429_s2 + $0x48] sm:$0xff] }
  0xe3   :  { %651 = vmatpush.msrb.mxu1 %v10170_v49  ;;  %v10190_v49 = vld [vmem:[%s17427_s26 + $0x648] sm:$0xff] }
  0xe4   :  { %v408_v57 = vadd.f32 %v407_v53, %v388_v52  ;;  %v10226_v52 = vld [vmem:[%s17427_s26 + $0x768] sm:$0xff]  ;;  %794 = vmatpush.msrb.mxu3 %v10190_v49  ;;  %v10189_v53 = vld [vmem:[%s17427_s26 + $0x640] sm:$0xff] }
  0xe5   :  { %v427_v59 = vpop.f32.mrf.mxu3  ;;  %652 = vmatpush.msrb.mxu1 %v10169_v55  ;;  %v10208_v55 = vld [vmem:[%s17427_s26 + $0x6d8] sm:$0xff]  ;;  %v10238_v49 = vld [vmem:[%s17427_s26 + $0x7c8] sm:$0xff] }
  0xe6   :  { %v428_v61 = vadd.f32 %v427_v59, %v408_v57  ;;  %795 = vmatpush.msrb.mxu3 %v10189_v53  ;;  %v10188_v59 = vld [vmem:[%s17427_s26 + $0x638] sm:$0xff] }
  0xe7   :  { %653 = vmatpush.msrb.mxu1 %v10168_v58  ;;  %v10225_v58 = vld [vmem:[%s17427_s26 + $0x760] sm:$0xff]  ;;  %v10236_v53 = vld [vmem:[%s17427_s26 + $0x7b8] sm:$0xff] }
  0xe8   :  { %10098 = vmatpush.msk.msra.mxu0 %vm448_vm0, %v428_v61  ;;  %10105 = vmatmul.msk.f32.gmra.mxu1 %vm435_vm1, %v282_v60  ;;  %v10207_v60 = vld [vmem:[%s17427_s26 + $0x6d0] sm:$0xff]  ;;  %v10224_v61 = vld [vmem:[%s17427_s26 + $0x758] sm:$0xff] }
  0xe9   :  { %10099 = vmatmul.msk.f32.vlgmr.msra.gmra.mxu0 %vm435_vm1, %v10094_v62  ;;  %654 = vmatpush.msrb.mxu1 %v10167_v63  ;;  %v10187_v62 = vld [vmem:[%s17427_s26 + $0x630] sm:$0xff]  ;;  %v10206_v63 = vld [vmem:[%s17427_s26 + $0x6c8] sm:$0xff] }
  0xea   :  { %630 = vmatpush.msrb.mxu0 %v10155_v0  ;;  %796 = vmatpush.msrb.mxu3 %v10188_v59  ;;  %v10223_v0 = vld [vmem:[%s17427_s26 + $0x750] sm:$0xff]  ;;  %v10233_v59 = vld [vmem:[%s17427_s26 + $0x7a0] sm:$0xff] }
  0xeb   :  { %655 = vmatpush.msrb.mxu1 %v10166_v1  ;;  %v10186_v1 = vld [vmem:[%s17427_s26 + $0x628] sm:$0xff] }
  0xec   :  { %631 = vmatpush.msrb.mxu0 %v10154_v2  ;;  %797 = vmatpush.msrb.mxu3 %v10187_v62  ;;  %v10205_v2 = vld [vmem:[%s17427_s26 + $0x6c0] sm:$0xff]  ;;  %v10231_v62 = vld [vmem:[%s17427_s26 + $0x790] sm:$0xff] }
  0xed   :  { %656 = vmatpush.msrb.mxu1 %v10165_v3  ;;  %v10222_v3 = vld [vmem:[%s17427_s26 + $0x748] sm:$0xff] }
  0xee   :  { %632 = vmatpush.msrb.mxu0 %v10153_v4  ;;  %798 = vmatpush.msrb.mxu3 %v10186_v1  ;;  %v10185_v4 = vld [vmem:[%s17427_s26 + $0x620] sm:$0xff] }
  0xef   :  { %657 = vmatpush.msrb.mxu1 %v10164_v5  ;;  %v10204_v5 = vld [vmem:[%s17427_s26 + $0x6b8] sm:$0xff] }
  0xf0   :  { %633 = vmatpush.msrb.mxu0 %v10152_v6  ;;  %10106 = vmatmul.msk.f32.gmra.mxu1 %vm435_vm1, %v283_v7 }
  0xf1   :  { %10100 = vmatmul.msk.f32.gmra.mxu0 %vm435_vm1, %v10095_v8  ;;  %658 = vmatpush.msrb.mxu1 %v10163_v9  ;;  %v10221_v8 = vld [vmem:[%s17427_s26 + $0x740] sm:$0xff]  ;;  %v10184_v9 = vld [vmem:[%s17427_s26 + $0x618] sm:$0xff] }
  0xf2   :  { %634 = vmatpush.msrb.mxu0 %v10151_v10  ;;  %799 = vmatpush.msrb.mxu3 %v10185_v4  ;;  %v10203_v10 = vld [vmem:[%s17427_s26 + $0x6b0] sm:$0xff]  ;;  %v10269_v4 = vld [vmem:[%s17427_s26 + $0x878] sm:$0xff] }
  0xf3   :  { %659 = vmatpush.msrb.mxu1 %v10162_v11  ;;  %v10220_v11 = vld [vmem:[%s17427_s26 + $0x738] sm:$0xff] }
  0xf4   :  { %635 = vmatpush.msrb.mxu0 %v10150_v12  ;;  %800 = vmatpush.msrb.mxu3 %v10184_v9  ;;  %v10268_v9 = vld [vmem:[%s17427_s26 + $0x870] sm:$0xff] }
  0xf5   :  { %660 = vmatpush.msrb.mxu1 %v10161_v13 }
  0xf6   :  { %636 = vmatpush.msrb.mxu0 %v10149_v14  ;;  %v10183_v14 = vld [vmem:[%s17427_s26 + $0x610] sm:$0xff] }
  0xf7   :  { %661 = vmatpush.msrb.mxu1 %v10160_v15  ;;  %v10202_v15 = vld [vmem:[%s17427_s26 + $0x6a8] sm:$0xff]  ;;  %801 = vmatpush.msrb.mxu3 %v10183_v14 }
  0xf8   :  { %637 = vmatpush.msrb.mxu0 %v10148_v16  ;;  %10107 = vmatmul.msk.f32.gmra.mxu1 %vm435_vm1, %v284_v17  ;;  %v10219_v16 = vld [vmem:[%s17427_s26 + $0x730] sm:$0xff]  ;;  %v10283_v14 = vld [vmem:[%s17427_s26 + $0x8e8] sm:$0xff] }
  0xf9   :  { %10101 = vmatmul.msk.f32.gmra.mxu0 %vm435_vm1, %v10096_v18  ;;  %662 = vmatpush.msrb.mxu1 %v10159_v19  ;;  %v10182_v18 = vld [vmem:[%s17427_s26 + $0x608] sm:$0xff]  ;;  %v10201_v19 = vld [vmem:[%s17427_s26 + $0x6a0] sm:$0xff] }
  0xfa   :  { %638 = vmatpush.msrb.mxu0 %v10147_v20  ;;  %v10218_v20 = vld [vmem:[%s17427_s26 + $0x728] sm:$0xff]  ;;  %802 = vmatpush.msrb.mxu3 %v10182_v18  ;;  %v10296_v18 = vld [vmem:[%s17427_s26 + $0x950] sm:$0xff] }
  0xfb   :  { %663 = vmatpush.msrb.mxu1 %v10158_v21  ;;  %v10181_v21 = vld [vmem:[%s17427_s26 + $0x600] sm:$0xff] }
  0xfc   :  { %639 = vmatpush.msrb.mxu0 %v10146_v22  ;;  %v10200_v22 = vld [vmem:[%s17427_s26 + $0x698] sm:$0xff]  ;;  %803 = vmatpush.msrb.mxu3 %v10181_v21  ;;  %v10295_v21 = vld [vmem:[%s17427_s26 + $0x948] sm:$0xff] }
  0xfd   :  { %664 = vmatpush.msrb.mxu1 %v10157_v23  ;;  %804 = vmatmul.f32.vlgmr.msrb.gmra.mxu3 %v12257_v54 }
  0xfe   :  { %640 = vmatpush.msrb.mxu0 %v10145_v24 }
  0xff   :  { %665 = vmatpush.msrb.mxu1 %v10156_v25  ;;  %v10217_v25 = vld [vmem:[%s17427_s26 + $0x720] sm:$0xff] }
 0x100   :  { %641 = vmatpush.msrb.mxu0 %v10144_v26  ;;  %666 = vmatmul.f32.vlgmr.msrb.gmra.mxu1 %v12245_v50 }
 0x101   :  { %10102 = vmatmul.msk.f32.gmra.mxu0 %vm435_vm1, %v10097_v27  ;;  %828 = vmatpush.msra.mxu1 %v10228_v43  ;;  %v10199_v27 = vld [vmem:[%s17427_s26 + $0x690] sm:$0xff]  ;;  %v10241_v43 = vld [vmem:[%s17427_s26 + $0x7e0] sm:$0xff] }
 0x102   :  { %642 = vmatpush.msrb.mxu0 %v10143_v28  ;;  %v10216_v28 = vld [vmem:[%s17427_s26 + $0x718] sm:$0xff] }
 0x103   :  { %829 = vmatpush.msra.mxu1 %v10227_v47  ;;  %v10239_v47 = vld [vmem:[%s17427_s26 + $0x7d0] sm:$0xff] }
 0x104   :  { %643 = vmatpush.msrb.mxu0 %v10142_v29 }
 0x105   :  { %830 = vmatpush.msra.mxu1 %v10226_v52  ;;  %v607_v12 = vpop.f32.mrf.mxu2  ;;  %v10174_v52 = vld [vmem:[%s17429_s2 + $0x50] sm:$0xff] }
 0x106   :  { %644 = vmatpush.msrb.mxu0 %v10141_v30  ;;  %v627_v13 = vpop.f32.mrf.mxu3  ;;  %v10172_v30 = vld [vmem:[%s17429_s2 + $0x40] sm:$0xff] }
 0x107   :  { %831 = vmatpush.msra.mxu1 %v10225_v58  ;;  %v628_v17 = vadd.f32 %v627_v13, %v607_v12  ;;  %v10234_v58 = vld [vmem:[%s17427_s26 + $0x7a8] sm:$0xff] }
 0x108   :  { %645 = vmatpush.msrb.mxu0 %v10140_v31  ;;  %v10198_v31 = vld [vmem:[%s17427_s26 + $0x688] sm:$0xff] }
 0x109   :  { %646 = vmatmul.f32.vlgmr.msrb.gmra.mxu0 %v12231_v45  ;;  %832 = vmatpush.msra.mxu1 %v10224_v61  ;;  %v10232_v61 = vld [vmem:[%s17427_s26 + $0x798] sm:$0xff]  ;;  %v10267_v13 = vld [vmem:[%s17427_s26 + $0x868] sm:$0xff] }
 0x10a   :  { %808 = vmatpush.msra.mxu0 %v10212_v39  ;;  %v10214_v39 = vld [vmem:[%s17427_s26 + $0x708] sm:$0xff] }
 0x10b   :  { %833 = vmatpush.msra.mxu1 %v10223_v0  ;;  %v10229_v0 = vld [vmem:[%s17427_s26 + $0x780] sm:$0xff] }
 0x10c   :  { %809 = vmatpush.msra.mxu0 %v10211_v42  ;;  %v10242_v42 = vld [vmem:[%s17427_s26 + $0x7e8] sm:$0xff] }
 0x10d   :  { %834 = vmatpush.msra.mxu1 %v10222_v3  ;;  %v10300_v3 = vld [vmem:[%s17427_s26 + $0x970] sm:$0xff] }
 0x10e   :  { %810 = vmatpush.msra.mxu0 %v10210_v46  ;;  %v10240_v46 = vld [vmem:[%s17427_s26 + $0x7d8] sm:$0xff] }
 0x10f   :  { %835 = vmatpush.msra.mxu1 %v10221_v8  ;;  %v10299_v8 = vld [vmem:[%s17427_s26 + $0x968] sm:$0xff] }
 0x110   :  { %811 = vmatpush.msra.mxu0 %v10209_v51  ;;  %v10237_v51 = vld [vmem:[%s17427_s26 + $0x7c0] sm:$0xff] }
 0x111   :  { %836 = vmatpush.msra.mxu1 %v10220_v11  ;;  %v10298_v11 = vld [vmem:[%s17427_s26 + $0x960] sm:$0xff] }
 0x112   :  { %812 = vmatpush.msra.mxu0 %v10208_v55  ;;  %v10235_v55 = vld [vmem:[%s17427_s26 + $0x7b0] sm:$0xff] }
 0x113   :  { %837 = vmatpush.msra.mxu1 %v10219_v16  ;;  %v10266_v16 = vld [vmem:[%s17427_s26 + $0x860] sm:$0xff] }
 0x114   :  { %813 = vmatpush.msra.mxu0 %v10207_v60  ;;  %v10175_v60 = vld [vmem:[%s17429_s2 + $0x58] sm:$0xff] }
 0x115   :  { %838 = vmatpush.msra.mxu1 %v10218_v20  ;;  %v10281_v20 = vld [vmem:[%s17427_s26 + $0x8d8] sm:$0xff] }
 0x116   :  { %814 = vmatpush.msra.mxu0 %v10206_v63  ;;  %v10230_v63 = vld [vmem:[%s17427_s26 + $0x788] sm:$0xff] }
 0x117   :  { %839 = vmatpush.msra.mxu1 %v10217_v25 }
 0x118   :  { %815 = vmatpush.msra.mxu0 %v10205_v2  ;;  %v10301_v2 = vld [vmem:[%s17427_s26 + $0x978] sm:$0xff] }
 0x119   :  { %840 = vmatpush.msra.mxu1 %v10216_v28  ;;  %v10293_v28 = vld [vmem:[%s17427_s26 + $0x938] sm:$0xff] }
 0x11a   :  { %816 = vmatpush.msra.mxu0 %v10204_v5  ;;  %v10285_v5 = vld [vmem:[%s17427_s26 + $0x8f8] sm:$0xff] }
 0x11b   :  { %841 = vmatpush.msra.mxu1 %v10215_v34  ;;  %v10261_v34 = vld [vmem:[%s17427_s26 + $0x838] sm:$0xff] }
 0x11c   :  { %817 = vmatpush.msra.mxu0 %v10203_v10  ;;  %v10284_v10 = vld [vmem:[%s17427_s26 + $0x8f0] sm:$0xff] }
 0x11d   :  { %842 = vmatpush.msra.mxu1 %v10214_v39  ;;  %v10291_v39 = vld [vmem:[%s17427_s26 + $0x928] sm:$0xff] }
 0x11e   :  { %818 = vmatpush.msra.mxu0 %v10202_v15  ;;  %v10297_v15 = vld [vmem:[%s17427_s26 + $0x958] sm:$0xff] }
 0x11f   :  { %843 = vmatpush.msra.mxu1 %v10213_v41  ;;  %v10260_v41 = vld [vmem:[%s17427_s26 + $0x830] sm:$0xff] }
 0x120   :  { %819 = vmatpush.msra.mxu0 %v10201_v19  ;;  %844 = vmatmul.f32.vlgmr.msra.gmra.mxu1 %v12231_v45  ;;  %v10265_v19 = vld [vmem:[%s17427_s26 + $0x858] sm:$0xff] }
 0x121   :  { %1006 = vmatpush.msrb.mxu1 %v10285_v5  ;;  %v10245_v5 = vld [vmem:[%s17429_s2 + $0x60] sm:$0xff] }
 0x122   :  { %820 = vmatpush.msra.mxu0 %v10200_v22  ;;  %v10264_v22 = vld [vmem:[%s17427_s26 + $0x850] sm:$0xff] }
 0x123   :  { %1007 = vmatpush.msrb.mxu1 %v10284_v10  ;;  %v10271_v10 = vld [vmem:[%s17427_s26 + $0x888] sm:$0xff] }
 0x124   :  { %821 = vmatpush.msra.mxu0 %v10199_v27  ;;  %v10279_v27 = vld [vmem:[%s17427_s26 + $0x8c8] sm:$0xff] }
 0x125   :  { %1008 = vmatpush.msrb.mxu1 %v10283_v14  ;;  %v10270_v14 = vld [vmem:[%s17427_s26 + $0x880] sm:$0xff] }
 0x126   :  { %822 = vmatpush.msra.mxu0 %v10198_v31  ;;  %v10292_v31 = vld [vmem:[%s17427_s26 + $0x930] sm:$0xff] }
 0x128   :  { %823 = vmatpush.msra.mxu0 %v10197_v38 }
 0x129   :  { %824 = vmatmul.f32.vlgmr.msra.gmra.mxu0 %v12262_v56 }
 0x12a   :  { %986 = vmatpush.msrb.mxu0 %v10269_v4 }
 0x12c   :  { %987 = vmatpush.msrb.mxu0 %v10268_v9  ;;  %v10317_v9 = vld [vmem:[%s17427_s26 + $0x9f8] sm:$0xff] }
 0x12e   :  { %988 = vmatpush.msrb.mxu0 %v10267_v13  ;;  %v10254_v13 = vld [vmem:[%s17427_s26 + $0x800] sm:$0xff] }
 0x130   :  { %989 = vmatpush.msrb.mxu0 %v10266_v16  ;;  %v10314_v16 = vld [vmem:[%s17427_s26 + $0x9e0] sm:$0xff] }
 0x132   :  { %990 = vmatpush.msrb.mxu0 %v10265_v19  ;;  %v10312_v19 = vld [vmem:[%s17427_s26 + $0x9d0] sm:$0xff] }
 0x134   :  { %991 = vmatpush.msrb.mxu0 %v10264_v22  ;;  %v10247_v22 = vld [vmem:[%s17429_s2 + $0x70] sm:$0xff] }
 0x15d   :  { %v12540_v32 = vpop.f32.mrf.mxu1 }
 0x165   :  { %v12547_v35 = vpop.f32.mrf.mxu1 }
 0x166   :  { %v12542_v33 = vpop.f32.mrf.mxu0 }
 0x16d   :  { %v12581_v48 = vpop.f32.mrf.mxu1 }
 0x16e   :  { %v12561_v40 = vpop.f32.mrf.mxu0 }
 0x175   :  { %v12638_v7 = vpop.f32.mrf.mxu1 }
 0x176   :  { %v12598_v57 = vpop.f32.mrf.mxu0 }
 0x17d   :  { %v667_v24 = vpop.f32.mrf.mxu1 }
 0x17e   :  { %v12636_v6 = vpop.f32.mrf.mxu0 }
 0x186   :  { %v647_v23 = vpop.f32.mrf.mxu0 }
 0x187   :  { %v648_v26 = vadd.f32 %v647_v23, %v628_v17  ;;  %v10282_v17 = vld [vmem:[%s17427_s26 + $0x8e0] sm:$0xff]  ;;  %v10280_v23 = vld [vmem:[%s17427_s26 + $0x8d0] sm:$0xff] }
 0x188   :  { %1009 = vmatpush.msrb.mxu1 %v10282_v17  ;;  %v10246_v17 = vld [vmem:[%s17429_s2 + $0x68] sm:$0xff] }
 0x189   :  { %v668_v29 = vadd.f32 %v667_v24, %v648_v26  ;;  %v10294_v24 = vld [vmem:[%s17427_s26 + $0x940] sm:$0xff]  ;;  %v10263_v26 = vld [vmem:[%s17427_s26 + $0x848] sm:$0xff] }
 0x18a   :  { %1010 = vmatpush.msrb.mxu1 %v10281_v20  ;;  %992 = vmatpush.msrb.mxu0 %v10263_v26  ;;  %v10311_v20 = vld [vmem:[%s17427_s26 + $0x9c8] sm:$0xff] }
 0x18b   :  { %10176 = vmatpush.msk.msrb.mxu2 %vm448_vm0, %v668_v29  ;;  %v10262_v29 = vld [vmem:[%s17427_s26 + $0x840] sm:$0xff]  ;;  %v10307_v26 = vld [vmem:[%s17427_s26 + $0x9a8] sm:$0xff] }
 0x18c   :  { %10177 = vmatmul.msk.f32.vlgmr.msrb.gmra.mxu2 %vm435_vm1, %v10172_v30  ;;  %1011 = vmatpush.msrb.mxu1 %v10280_v23  ;;  %v10278_v30 = vld [vmem:[%s17427_s26 + $0x8c0] sm:$0xff]  ;;  %v10309_v23 = vld [vmem:[%s17427_s26 + $0x9b8] sm:$0xff] }
 0x18d   :  { %848 = vmatpush.msra.mxu2 %v10244_v36  ;;  %993 = vmatpush.msrb.mxu0 %v10262_v29  ;;  %v10277_v36 = vld [vmem:[%s17427_s26 + $0x8b8] sm:$0xff] }
 0x18e   :  { %1012 = vmatpush.msrb.mxu1 %v10279_v27  ;;  %v10306_v27 = vld [vmem:[%s17427_s26 + $0x9a0] sm:$0xff]  ;;  %v10305_v29 = vld [vmem:[%s17427_s26 + $0x998] sm:$0xff] }
 0x18f   :  { %849 = vmatpush.msra.mxu2 %v10243_v37  ;;  %v805_v37 = vpop.f32.mrf.mxu3  ;;  %994 = vmatpush.msrb.mxu0 %v10261_v34  ;;  %v10302_v34 = vld [vmem:[%s17427_s26 + $0x980] sm:$0xff] }
 0x190   :  { %1013 = vmatpush.msrb.mxu1 %v10278_v30  ;;  %v10304_v30 = vld [vmem:[%s17427_s26 + $0x990] sm:$0xff] }
 0x191   :  { %850 = vmatpush.msra.mxu2 %v10242_v42  ;;  %v10276_v42 = vld [vmem:[%s17427_s26 + $0x8b0] sm:$0xff]  ;;  %995 = vmatpush.msrb.mxu0 %v10260_v41  ;;  %v10356_v41 = vld [vmem:[%s17427_s26 + $0xae8] sm:$0xff] }
 0x192   :  { %1014 = vmatpush.msrb.mxu1 %v10277_v36  ;;  %v10358_v36 = vld [vmem:[%s17427_s26 + $0xaf8] sm:$0xff] }
 0x193   :  { %851 = vmatpush.msra.mxu2 %v10241_v43  ;;  %v10290_v43 = vld [vmem:[%s17427_s26 + $0x920] sm:$0xff] }
 0x194   :  { %10178 = vmatmul.msk.f32.gmra.mxu2 %vm435_vm1, %v10173_v44  ;;  %1015 = vmatpush.msrb.mxu1 %v10276_v42 }
 0x195   :  { %852 = vmatpush.msra.mxu2 %v10240_v46 }
 0x197   :  { %853 = vmatpush.msra.mxu2 %v10239_v47  ;;  %v10259_v47 = vld [vmem:[%s17427_s26 + $0x828] sm:$0xff] }
 0x198   :  { %996 = vmatpush.msrb.mxu0 %v10259_v47  ;;  %v10372_v47 = vld [vmem:[%s17427_s26 + $0xb68] sm:$0xff] }
 0x199   :  { %854 = vmatpush.msra.mxu2 %v10238_v49  ;;  %v10275_v49 = vld [vmem:[%s17427_s26 + $0x8a8] sm:$0xff] }
 0x19a   :  { %1016 = vmatpush.msrb.mxu1 %v10275_v49  ;;  %v10341_v49 = vld [vmem:[%s17427_s26 + $0xa70] sm:$0xff] }
 0x19b   :  { %855 = vmatpush.msra.mxu2 %v10237_v51  ;;  %v10289_v51 = vld [vmem:[%s17427_s26 + $0x918] sm:$0xff] }
 0x19c   :  { %10179 = vmatmul.msk.f32.gmra.mxu2 %vm435_vm1, %v10174_v52 }
 0x19d   :  { %856 = vmatpush.msra.mxu2 %v10236_v53  ;;  %v845_v52 = vpop.f32.mrf.mxu1  ;;  %v10258_v53 = vld [vmem:[%s17427_s26 + $0x820] sm:$0xff] }
 0x19e   :  { %997 = vmatpush.msrb.mxu0 %v10258_v53  ;;  %v10340_v53 = vld [vmem:[%s17427_s26 + $0xa68] sm:$0xff] }
 0x19f   :  { %857 = vmatpush.msra.mxu2 %v10235_v55  ;;  %v10274_v55 = vld [vmem:[%s17427_s26 + $0x8a0] sm:$0xff] }
 0x1a0   :  { %1017 = vmatpush.msrb.mxu1 %v10274_v55  ;;  %v10353_v55 = vld [vmem:[%s17427_s26 + $0xad0] sm:$0xff] }
 0x1a1   :  { %858 = vmatpush.msra.mxu2 %v10234_v58  ;;  %v10288_v58 = vld [vmem:[%s17427_s26 + $0x910] sm:$0xff] }
 0x1a3   :  { %859 = vmatpush.msra.mxu2 %v10233_v59 }
 0x1a4   :  { %10180 = vmatmul.msk.f32.gmra.mxu2 %vm435_vm1, %v10175_v60  ;;  %v10257_v60 = vld [vmem:[%s17427_s26 + $0x818] sm:$0xff] }
 0x1a5   :  { %860 = vmatpush.msra.mxu2 %v10232_v61  ;;  %v10273_v61 = vld [vmem:[%s17427_s26 + $0x898] sm:$0xff]  ;;  %998 = vmatpush.msrb.mxu0 %v10257_v60  ;;  %v10352_v60 = vld [vmem:[%s17427_s26 + $0xac8] sm:$0xff] }
 0x1a6   :  { %v825_v38 = vpop.f32.mrf.mxu0  ;;  %1018 = vmatpush.msrb.mxu1 %v10273_v61  ;;  %v10369_v61 = vld [vmem:[%s17427_s26 + $0xb50] sm:$0xff] }
 0x1a7   :  { %861 = vmatpush.msra.mxu2 %v10231_v62  ;;  %v826_v46 = vadd.f32 %v825_v38, %v805_v37  ;;  %v10287_v62 = vld [vmem:[%s17427_s26 + $0x908] sm:$0xff]  ;;  %v10357_v37 = vld [vmem:[%s17427_s26 + $0xaf0] sm:$0xff]  ;;  %v10374_v38 = vld [vmem:[%s17427_s26 + $0xb78] sm:$0xff] }
 0x1a9   :  { %862 = vmatpush.msra.mxu2 %v10230_v63  ;;  %v846_v59 = vadd.f32 %v845_v52, %v826_v46  ;;  %v10256_v63 = vld [vmem:[%s17427_s26 + $0x810] sm:$0xff]  ;;  %v10355_v46 = vld [vmem:[%s17427_s26 + $0xae0] sm:$0xff] }
 0x1aa   :  { %999 = vmatpush.msrb.mxu0 %v10256_v63  ;;  %v10371_v52 = vld [vmem:[%s17427_s26 + $0xb60] sm:$0xff] }
 0x1ab   :  { %863 = vmatpush.msra.mxu2 %v10229_v0  ;;  %v10272_v0 = vld [vmem:[%s17427_s26 + $0x890] sm:$0xff]  ;;  %v10351_v63 = vld [vmem:[%s17427_s26 + $0xac0] sm:$0xff] }
 0x1ac   :  { %864 = vmatmul.f32.vlgmr.msra.gmra.mxu2 %v12245_v50  ;;  %1019 = vmatpush.msrb.mxu1 %v10272_v0  ;;  %v10368_v0 = vld [vmem:[%s17427_s26 + $0xb48] sm:$0xff] }
 0x1ad   :  { %1026 = vmatpush.msrb.mxu2 %v10301_v2  ;;  %v10286_v2 = vld [vmem:[%s17427_s26 + $0x900] sm:$0xff] }
 0x1ae   :  { %1020 = vmatpush.msrb.mxu1 %v10271_v10  ;;  %v10366_v10 = vld [vmem:[%s17427_s26 + $0xb38] sm:$0xff] }
 0x1af   :  { %1027 = vmatpush.msrb.mxu2 %v10300_v3 }
 0x1b0   :  { %1021 = vmatpush.msrb.mxu1 %v10270_v14  ;;  %v10365_v14 = vld [vmem:[%s17427_s26 + $0xb30] sm:$0xff] }
 0x1b1   :  { %1028 = vmatpush.msrb.mxu2 %v10299_v8  ;;  %v10255_v8 = vld [vmem:[%s17427_s26 + $0x808] sm:$0xff]  ;;  %1022 = vmatmul.f32.vlgmr.msrb.gmra.mxu1 %v12262_v56 }
 0x1b2   :  { %1000 = vmatpush.msrb.mxu0 %v10255_v8  ;;  %v10336_v8 = vld [vmem:[%s17427_s26 + $0xa48] sm:$0xff] }
 0x1b3   :  { %1029 = vmatpush.msrb.mxu2 %v10298_v11  ;;  %v10316_v11 = vld [vmem:[%s17427_s26 + $0x9f0] sm:$0xff] }
 0x1b4   :  { %1001 = vmatpush.msrb.mxu0 %v10254_v13  ;;  %v10348_v13 = vld [vmem:[%s17427_s26 + $0xaa8] sm:$0xff] }
 0x1b5   :  { %1030 = vmatpush.msrb.mxu2 %v10297_v15  ;;  %v10315_v15 = vld [vmem:[%s17427_s26 + $0x9e8] sm:$0xff]  ;;  %1002 = vmatmul.f32.vlgmr.msrb.gmra.mxu0 %v12257_v54 }
 0x1b7   :  { %1031 = vmatpush.msrb.mxu2 %v10296_v18  ;;  %v10313_v18 = vld [vmem:[%s17427_s26 + $0x9d8] sm:$0xff] }
 0x1b9   :  { %1032 = vmatpush.msrb.mxu2 %v10295_v21  ;;  %v10310_v21 = vld [vmem:[%s17427_s26 + $0x9c0] sm:$0xff] }
 0x1bb   :  { %1033 = vmatpush.msrb.mxu2 %v10294_v24  ;;  %v10308_v24 = vld [vmem:[%s17427_s26 + $0x9b0] sm:$0xff] }
 0x1bd   :  { %1034 = vmatpush.msrb.mxu2 %v10293_v28  ;;  %v10248_v28 = vld [vmem:[%s17429_s2 + $0x78] sm:$0xff] }
 0x1bf   :  { %1035 = vmatpush.msrb.mxu2 %v10292_v31  ;;  %v10303_v31 = vld [vmem:[%s17427_s26 + $0x988] sm:$0xff] }
 0x1c1   :  { %1036 = vmatpush.msrb.mxu2 %v10291_v39  ;;  %v10373_v39 = vld [vmem:[%s17427_s26 + $0xb70] sm:$0xff] }
 0x1c3   :  { %1037 = vmatpush.msrb.mxu2 %v10290_v43  ;;  %v10342_v43 = vld [vmem:[%s17427_s26 + $0xa78] sm:$0xff] }
 0x1c4   :  { %1184 = vmatpush.msra.mxu1 %v10342_v43 }
 0x1c5   :  { %1038 = vmatpush.msrb.mxu2 %v10289_v51  ;;  %v10354_v51 = vld [vmem:[%s17427_s26 + $0xad8] sm:$0xff] }
 0x1c6   :  { %1185 = vmatpush.msra.mxu1 %v10341_v49  ;;  %v10327_v49 = vld [vmem:[%s17427_s26 + $0xa00] sm:$0xff] }
 0x1c7   :  { %1039 = vmatpush.msrb.mxu2 %v10288_v58  ;;  %v10370_v58 = vld [vmem:[%s17427_s26 + $0xb58] sm:$0xff] }
 0x1c8   :  { %1186 = vmatpush.msra.mxu1 %v10340_v53  ;;  %v10318_v53 = vld [vmem:[%s17429_s2 + $0x80] sm:$0xff] }
 0x1c9   :  { %1040 = vmatpush.msrb.mxu2 %v10287_v62  ;;  %v10338_v62 = vld [vmem:[%s17427_s26 + $0xa58] sm:$0xff] }
 0x1cb   :  { %1041 = vmatpush.msrb.mxu2 %v10286_v2 }
 0x1cc   :  { %1042 = vmatmul.f32.vlgmr.msrb.gmra.mxu2 %v12231_v45 }
 0x1cd   :  { %1204 = vmatpush.msra.mxu2 %v10358_v36  ;;  %v10360_v36 = vld [vmem:[%s17427_s26 + $0xb08] sm:$0xff] }
 0x1cf   :  { %1205 = vmatpush.msra.mxu2 %v10357_v37 }
 0x1d1   :  { %1206 = vmatpush.msra.mxu2 %v10356_v41  ;;  %v10359_v41 = vld [vmem:[%s17427_s26 + $0xb00] sm:$0xff] }
 0x1d3   :  { %1207 = vmatpush.msra.mxu2 %v10355_v46  ;;  %v10328_v46 = vld [vmem:[%s17427_s26 + $0xa08] sm:$0xff] }
 0x1d5   :  { %1208 = vmatpush.msra.mxu2 %v10354_v51 }
 0x1d7   :  { %1209 = vmatpush.msra.mxu2 %v10353_v55  ;;  %v10390_v55 = vld [vmem:[%s17427_s26 + $0xbf8] sm:$0xff] }
 0x1d9   :  { %1210 = vmatpush.msra.mxu2 %v10352_v60  ;;  %v10387_v60 = vld [vmem:[%s17427_s26 + $0xbe0] sm:$0xff] }
 0x1db   :  { %1211 = vmatpush.msra.mxu2 %v10351_v63  ;;  %v10385_v63 = vld [vmem:[%s17427_s26 + $0xbd0] sm:$0xff] }
 0x20f   :  { %v12769_v1 = vpop.f32.mrf.mxu2 }
 0x217   :  { %v12795_v12 = vpop.f32.mrf.mxu2 }
 0x21f   :  { %v12833_v25 = vpop.f32.mrf.mxu2 }
 0x227   :  { %v12871_v44 = vpop.f32.mrf.mxu2 }
 0x22f   :  { %v865_v3 = vpop.f32.mrf.mxu2 }
 0x230   :  { %v866_v4 = vadd.f32 %v865_v3, %v846_v59  ;;  %v10339_v59 = vld [vmem:[%s17427_s26 + $0xa60] sm:$0xff]  ;;  %v10337_v3 = vld [vmem:[%s17427_s26 + $0xa50] sm:$0xff] }
 0x231   :  { %1187 = vmatpush.msra.mxu1 %v10339_v59  ;;  %v10388_v59 = vld [vmem:[%s17427_s26 + $0xbe8] sm:$0xff] }
 0x232   :  { %10249 = vmatpush.msk.msra.mxu3 %vm448_vm0, %v866_v4  ;;  %v10350_v4 = vld [vmem:[%s17427_s26 + $0xab8] sm:$0xff] }
 0x233   :  { %10250 = vmatmul.msk.f32.vlgmr.msra.gmra.mxu3 %vm435_vm1, %v10245_v5  ;;  %1188 = vmatpush.msra.mxu1 %v10338_v62  ;;  %v10367_v5 = vld [vmem:[%s17427_s26 + $0xb40] sm:$0xff]  ;;  %v10386_v62 = vld [vmem:[%s17427_s26 + $0xbd8] sm:$0xff] }
 0x234   :  { %1046 = vmatpush.msrb.mxu3 %v10317_v9  ;;  %1212 = vmatpush.msra.mxu2 %v10350_v4  ;;  %v10349_v9 = vld [vmem:[%s17427_s26 + $0xab0] sm:$0xff] }
 0x235   :  { %1189 = vmatpush.msra.mxu1 %v10337_v3  ;;  %v10383_v3 = vld [vmem:[%s17427_s26 + $0xbc0] sm:$0xff]  ;;  %v10320_v4 = vld [vmem:[%s17429_s2 + $0x90] sm:$0xff] }
 0x236   :  { %1047 = vmatpush.msrb.mxu3 %v10316_v11  ;;  %1213 = vmatpush.msra.mxu2 %v10349_v9  ;;  %v10335_v11 = vld [vmem:[%s17427_s26 + $0xa40] sm:$0xff]  ;;  %v10380_v9 = vld [vmem:[%s17427_s26 + $0xba8] sm:$0xff] }
 0x237   :  { %1190 = vmatpush.msra.mxu1 %v10336_v8  ;;  %v10381_v8 = vld [vmem:[%s17427_s26 + $0xbb0] sm:$0xff] }
 0x238   :  { %1048 = vmatpush.msrb.mxu3 %v10315_v15  ;;  %1214 = vmatpush.msra.mxu2 %v10348_v13  ;;  %v10334_v15 = vld [vmem:[%s17427_s26 + $0xa38] sm:$0xff] }
 0x239   :  { %1191 = vmatpush.msra.mxu1 %v10335_v11  ;;  %v10321_v11 = vld [vmem:[%s17429_s2 + $0x98] sm:$0xff] }
 0x23a   :  { %1049 = vmatpush.msrb.mxu3 %v10314_v16  ;;  %v10347_v16 = vld [vmem:[%s17427_s26 + $0xaa0] sm:$0xff]  ;;  %v10378_v13 = vld [vmem:[%s17427_s26 + $0xb98] sm:$0xff] }
 0x23b   :  { %10251 = vmatmul.msk.f32.gmra.mxu3 %vm435_vm1, %v10246_v17  ;;  %v10364_v17 = vld [vmem:[%s17427_s26 + $0xb28] sm:$0xff]  ;;  %1192 = vmatpush.msra.mxu1 %v10334_v15 }
 0x23c   :  { %1050 = vmatpush.msrb.mxu3 %v10313_v18  ;;  %1215 = vmatpush.msra.mxu2 %v10347_v16  ;;  %v10376_v15 = vld [vmem:[%s17427_s26 + $0xb88] sm:$0xff]  ;;  %v10375_v16 = vld [vmem:[%s17427_s26 + $0xb80] sm:$0xff] }
 0x23e   :  { %1051 = vmatpush.msrb.mxu3 %v10312_v19  ;;  %v10333_v19 = vld [vmem:[%s17427_s26 + $0xa30] sm:$0xff] }
 0x23f   :  { %1193 = vmatpush.msra.mxu1 %v10333_v19  ;;  %v10431_v19 = vld [vmem:[%s17427_s26 + $0xcf8] sm:$0xff] }
 0x240   :  { %1052 = vmatpush.msrb.mxu3 %v10311_v20  ;;  %v10346_v20 = vld [vmem:[%s17427_s26 + $0xa98] sm:$0xff] }
 0x241   :  { %1216 = vmatpush.msra.mxu2 %v10346_v20  ;;  %v10414_v20 = vld [vmem:[%s17427_s26 + $0xc70] sm:$0xff] }
 0x242   :  { %1053 = vmatpush.msrb.mxu3 %v10310_v21  ;;  %v10363_v21 = vld [vmem:[%s17427_s26 + $0xb20] sm:$0xff] }
 0x243   :  { %10252 = vmatmul.msk.f32.gmra.mxu3 %vm435_vm1, %v10247_v22  ;;  %v10332_v22 = vld [vmem:[%s17427_s26 + $0xa28] sm:$0xff] }
 0x244   :  { %1054 = vmatpush.msrb.mxu3 %v10309_v23  ;;  %v10345_v23 = vld [vmem:[%s17427_s26 + $0xa90] sm:$0xff]  ;;  %1194 = vmatpush.msra.mxu1 %v10332_v22  ;;  %v10413_v22 = vld [vmem:[%s17427_s26 + $0xc68] sm:$0xff] }
 0x245   :  { %1217 = vmatpush.msra.mxu2 %v10345_v23  ;;  %v10429_v23 = vld [vmem:[%s17427_s26 + $0xce8] sm:$0xff] }
 0x246   :  { %1055 = vmatpush.msrb.mxu3 %v10308_v24  ;;  %v10362_v24 = vld [vmem:[%s17427_s26 + $0xb18] sm:$0xff] }
 0x248   :  { %1056 = vmatpush.msrb.mxu3 %v10307_v26  ;;  %v10331_v26 = vld [vmem:[%s17427_s26 + $0xa20] sm:$0xff] }
 0x249   :  { %1195 = vmatpush.msra.mxu1 %v10331_v26  ;;  %v10412_v26 = vld [vmem:[%s17427_s26 + $0xc60] sm:$0xff] }
 0x24a   :  { %1057 = vmatpush.msrb.mxu3 %v10306_v27  ;;  %v10344_v27 = vld [vmem:[%s17427_s26 + $0xa88] sm:$0xff] }
 0x24b   :  { %10253 = vmatmul.msk.f32.gmra.mxu3 %vm435_vm1, %v10248_v28  ;;  %v1003_v28 = vpop.f32.mrf.mxu0  ;;  %1218 = vmatpush.msra.mxu2 %v10344_v27  ;;  %v10428_v27 = vld [vmem:[%s17427_s26 + $0xce0] sm:$0xff] }
 0x24c   :  { %1058 = vmatpush.msrb.mxu3 %v10305_v29  ;;  %v1023_v29 = vpop.f32.mrf.mxu1 }
 0x24e   :  { %1059 = vmatpush.msrb.mxu3 %v10304_v30  ;;  %v10361_v30 = vld [vmem:[%s17427_s26 + $0xb10] sm:$0xff] }
 0x24f   :  { %v1043_v43 = vpop.f32.mrf.mxu2 }
 0x250   :  { %1060 = vmatpush.msrb.mxu3 %v10303_v31  ;;  %v10330_v31 = vld [vmem:[%s17427_s26 + $0xa18] sm:$0xff] }
 0x251   :  { %1196 = vmatpush.msra.mxu1 %v10330_v31  ;;  %v10410_v31 = vld [vmem:[%s17427_s26 + $0xc50] sm:$0xff] }
 0x252   :  { %1061 = vmatpush.msrb.mxu3 %v10302_v34  ;;  %v10343_v34 = vld [vmem:[%s17427_s26 + $0xa80] sm:$0xff] }
 0x253   :  { %1062 = vmatmul.f32.vlgmr.msrb.gmra.mxu3 %v12245_v50  ;;  %1219 = vmatpush.msra.mxu2 %v10343_v34  ;;  %v10426_v34 = vld [vmem:[%s17427_s26 + $0xcd0] sm:$0xff] }
 0x254   :  { %1224 = vmatpush.msra.mxu3 %v10374_v38  ;;  %v1024_v38 = vadd.f32 %v1023_v29, %v1003_v28  ;;  %1220 = vmatmul.f32.vlgmr.msra.gmra.mxu2 %v12262_v56  ;;  %v10411_v28 = vld [vmem:[%s17427_s26 + $0xc58] sm:$0xff] }
 0x255   :  { %v10427_v29 = vld [vmem:[%s17427_s26 + $0xcd8] sm:$0xff] }
 0x256   :  { %1225 = vmatpush.msra.mxu3 %v10373_v39  ;;  %v10329_v39 = vld [vmem:[%s17427_s26 + $0xa10] sm:$0xff] }
 0x257   :  { %1197 = vmatpush.msra.mxu1 %v10329_v39  ;;  %v10425_v39 = vld [vmem:[%s17427_s26 + $0xcc8] sm:$0xff] }
 0x258   :  { %1226 = vmatpush.msra.mxu3 %v10372_v47  ;;  %v1044_v47 = vadd.f32 %v1043_v43, %v1024_v38  ;;  %v10409_v38 = vld [vmem:[%s17427_s26 + $0xc48] sm:$0xff]  ;;  %v10408_v43 = vld [vmem:[%s17427_s26 + $0xc40] sm:$0xff] }
 0x259   :  { %1198 = vmatpush.msra.mxu1 %v10328_v46  ;;  %v10424_v46 = vld [vmem:[%s17427_s26 + $0xcc0] sm:$0xff] }
 0x25a   :  { %1227 = vmatpush.msra.mxu3 %v10371_v52 }
 0x25b   :  { %1199 = vmatpush.msra.mxu1 %v10327_v49 }
 0x25c   :  { %1228 = vmatpush.msra.mxu3 %v10370_v58  ;;  %1200 = vmatmul.f32.vlgmr.msra.gmra.mxu1 %v12257_v54  ;;  %v10389_v58 = vld [vmem:[%s17427_s26 + $0xbf0] sm:$0xff] }
 0x25e   :  { %1229 = vmatpush.msra.mxu3 %v10369_v61  ;;  %v10319_v61 = vld [vmem:[%s17429_s2 + $0x88] sm:$0xff] }
 0x260   :  { %1230 = vmatpush.msra.mxu3 %v10368_v0  ;;  %v10384_v0 = vld [vmem:[%s17427_s26 + $0xbc8] sm:$0xff] }
 0x262   :  { %1231 = vmatpush.msra.mxu3 %v10367_v5  ;;  %v10382_v5 = vld [vmem:[%s17427_s26 + $0xbb8] sm:$0xff] }
 0x264   :  { %1232 = vmatpush.msra.mxu3 %v10366_v10  ;;  %v10379_v10 = vld [vmem:[%s17427_s26 + $0xba0] sm:$0xff] }
 0x266   :  { %1233 = vmatpush.msra.mxu3 %v10365_v14  ;;  %v10377_v14 = vld [vmem:[%s17427_s26 + $0xb90] sm:$0xff] }
 0x268   :  { %1234 = vmatpush.msra.mxu3 %v10364_v17  ;;  %v10415_v17 = vld [vmem:[%s17427_s26 + $0xc78] sm:$0xff] }
 0x269   :  { %1382 = vmatpush.msrb.mxu2 %v10415_v17 }
 0x26a   :  { %1235 = vmatpush.msra.mxu3 %v10363_v21  ;;  %v10430_v21 = vld [vmem:[%s17427_s26 + $0xcf0] sm:$0xff] }
 0x26b   :  { %1383 = vmatpush.msrb.mxu2 %v10414_v20  ;;  %v10400_v20 = vld [vmem:[%s17427_s26 + $0xc00] sm:$0xff] }
 0x26c   :  { %1236 = vmatpush.msra.mxu3 %v10362_v24 }
 0x26d   :  { %1384 = vmatpush.msrb.mxu2 %v10413_v22  ;;  %v10436_v22 = vld [vmem:[%s17427_s26 + $0xd20] sm:$0xff] }
 0x26e   :  { %1237 = vmatpush.msra.mxu3 %v10361_v30  ;;  %v10447_v30 = vld [vmem:[%s17427_s26 + $0xd78] sm:$0xff] }
 0x26f   :  { %1385 = vmatpush.msrb.mxu2 %v10412_v26 }
 0x270   :  { %1238 = vmatpush.msra.mxu3 %v10360_v36  ;;  %v10446_v36 = vld [vmem:[%s17427_s26 + $0xd70] sm:$0xff] }
 0x271   :  { %1386 = vmatpush.msrb.mxu2 %v10411_v28 }
 0x272   :  { %1239 = vmatpush.msra.mxu3 %v10359_v41  ;;  %v10445_v41 = vld [vmem:[%s17427_s26 + $0xd68] sm:$0xff] }
 0x273   :  { %1240 = vmatmul.f32.vlgmr.msra.gmra.mxu3 %v12231_v45  ;;  %1387 = vmatpush.msrb.mxu2 %v10410_v31  ;;  %v10433_v31 = vld [vmem:[%s17427_s26 + $0xd08] sm:$0xff] }
 0x274   :  { %1402 = vmatpush.msrb.mxu3 %v10431_v19  ;;  %v10437_v19 = vld [vmem:[%s17427_s26 + $0xd28] sm:$0xff] }
 0x275   :  { %1388 = vmatpush.msrb.mxu2 %v10409_v38 }
 0x276   :  { %1403 = vmatpush.msrb.mxu3 %v10430_v21  ;;  %v10416_v21 = vld [vmem:[%s17427_s26 + $0xc80] sm:$0xff] }
 0x277   :  { %1389 = vmatpush.msrb.mxu2 %v10408_v43  ;;  %v10462_v43 = vld [vmem:[%s17427_s26 + $0xdf0] sm:$0xff] }
 0x278   :  { %1404 = vmatpush.msrb.mxu3 %v10429_v23 }
 0x27a   :  { %1405 = vmatpush.msrb.mxu3 %v10428_v27  ;;  %v10435_v27 = vld [vmem:[%s17427_s26 + $0xd18] sm:$0xff] }
 0x27c   :  { %1406 = vmatpush.msrb.mxu3 %v10427_v29  ;;  %v10434_v29 = vld [vmem:[%s17427_s26 + $0xd10] sm:$0xff] }
 0x27e   :  { %1407 = vmatpush.msrb.mxu3 %v10426_v34  ;;  %v10432_v34 = vld [vmem:[%s17427_s26 + $0xd00] sm:$0xff] }
 0x280   :  { %1408 = vmatpush.msrb.mxu3 %v10425_v39  ;;  %v10391_v39 = vld [vmem:[%s17429_s2 + $0xa0] sm:$0xff] }
 0x282   :  { %1409 = vmatpush.msrb.mxu3 %v10424_v46  ;;  %v10461_v46 = vld [vmem:[%s17427_s26 + $0xde8] sm:$0xff] }
 0x2b6   :  { %v13005_v42 = vpop.f32.mrf.mxu3 }
 0x2be   :  { %v13052_v2 = vpop.f32.mrf.mxu3 }
 0x2c6   :  { %v13090_v18 = vpop.f32.mrf.mxu3 }
 0x2ce   :  { %v13128_v37 = vpop.f32.mrf.mxu3 }
 0x2d6   :  { %v1063_v51 = vpop.f32.mrf.mxu3 }
 0x2d7   :  { %v1064_v52 = vadd.f32 %v1063_v51, %v1044_v47  ;;  %v10444_v47 = vld [vmem:[%s17427_s26 + $0xd60] sm:$0xff]  ;;  %v10407_v51 = vld [vmem:[%s17427_s26 + $0xc38] sm:$0xff]  ;;  %v1221_v17 = vpop.f32.mrf.mxu2 }
 0x2d8   :  { %1390 = vmatpush.msrb.mxu2 %v10407_v51  ;;  %v10392_v51 = vld [vmem:[%s17429_s2 + $0xa8] sm:$0xff] }
 0x2d9   :  { %10322 = vmatpush.msk.msra.mxu0 %vm448_vm0, %v1064_v52  ;;  %v10423_v52 = vld [vmem:[%s17427_s26 + $0xcb8] sm:$0xff] }
 0x2da   :  { %10323 = vmatmul.msk.f32.vlgmr.msra.gmra.mxu0 %vm435_vm1, %v10318_v53  ;;  %v10443_v53 = vld [vmem:[%s17427_s26 + $0xd58] sm:$0xff]  ;;  %1410 = vmatpush.msrb.mxu3 %v10423_v52 }
 0x2db   :  { %1244 = vmatpush.msrb.mxu0 %v10390_v55  ;;  %v10406_v55 = vld [vmem:[%s17427_s26 + $0xc30] sm:$0xff]  ;;  %v10459_v52 = vld [vmem:[%s17427_s26 + $0xdd8] sm:$0xff] }
 0x2dc   :  { %1391 = vmatpush.msrb.mxu2 %v10406_v55  ;;  %v10457_v55 = vld [vmem:[%s17427_s26 + $0xdc8] sm:$0xff] }
 0x2dd   :  { %1245 = vmatpush.msrb.mxu0 %v10389_v58  ;;  %v10422_v58 = vld [vmem:[%s17427_s26 + $0xcb0] sm:$0xff] }
 0x2de   :  { %1411 = vmatpush.msrb.mxu3 %v10422_v58  ;;  %v10456_v58 = vld [vmem:[%s17427_s26 + $0xdc0] sm:$0xff] }
 0x2df   :  { %1246 = vmatpush.msrb.mxu0 %v10388_v59  ;;  %v10442_v59 = vld [vmem:[%s17427_s26 + $0xd50] sm:$0xff] }
 0x2e1   :  { %1247 = vmatpush.msrb.mxu0 %v10387_v60  ;;  %v10405_v60 = vld [vmem:[%s17427_s26 + $0xc28] sm:$0xff] }
 0x2e2   :  { %10324 = vmatmul.msk.f32.gmra.mxu0 %vm435_vm1, %v10319_v61  ;;  %v10421_v61 = vld [vmem:[%s17427_s26 + $0xca8] sm:$0xff]  ;;  %1392 = vmatpush.msrb.mxu2 %v10405_v60  ;;  %v10455_v60 = vld [vmem:[%s17427_s26 + $0xdb8] sm:$0xff] }
 0x2e3   :  { %1248 = vmatpush.msrb.mxu0 %v10386_v62  ;;  %v10441_v62 = vld [vmem:[%s17427_s26 + $0xd48] sm:$0xff]  ;;  %1412 = vmatpush.msrb.mxu3 %v10421_v61  ;;  %v10454_v61 = vld [vmem:[%s17427_s26 + $0xdb0] sm:$0xff] }
 0x2e5   :  { %1249 = vmatpush.msrb.mxu0 %v10385_v63  ;;  %v10404_v63 = vld [vmem:[%s17427_s26 + $0xc20] sm:$0xff] }
 0x2e6   :  { %1393 = vmatpush.msrb.mxu2 %v10404_v63  ;;  %v10452_v63 = vld [vmem:[%s17427_s26 + $0xda0] sm:$0xff] }
 0x2e7   :  { %1250 = vmatpush.msrb.mxu0 %v10384_v0  ;;  %v10420_v0 = vld [vmem:[%s17427_s26 + $0xca0] sm:$0xff] }
 0x2e8   :  { %1413 = vmatpush.msrb.mxu3 %v10420_v0  ;;  %v10394_v0 = vld [vmem:[%s17429_s2 + $0xb8] sm:$0xff] }
 0x2e9   :  { %1251 = vmatpush.msrb.mxu0 %v10383_v3  ;;  %v10440_v3 = vld [vmem:[%s17427_s26 + $0xd40] sm:$0xff] }
 0x2ea   :  { %10325 = vmatmul.msk.f32.gmra.mxu0 %vm435_vm1, %v10320_v4 }
 0x2eb   :  { %1252 = vmatpush.msrb.mxu0 %v10382_v5  ;;  %v10403_v5 = vld [vmem:[%s17427_s26 + $0xc18] sm:$0xff] }
 0x2ec   :  { %1394 = vmatpush.msrb.mxu2 %v10403_v5  ;;  %v10450_v5 = vld [vmem:[%s17427_s26 + $0xd90] sm:$0xff] }
 0x2ed   :  { %1253 = vmatpush.msrb.mxu0 %v10381_v8  ;;  %v10419_v8 = vld [vmem:[%s17427_s26 + $0xc98] sm:$0xff] }
 0x2ee   :  { %1414 = vmatpush.msrb.mxu3 %v10419_v8  ;;  %v10449_v8 = vld [vmem:[%s17427_s26 + $0xd88] sm:$0xff] }
 0x2ef   :  { %1254 = vmatpush.msrb.mxu0 %v10380_v9  ;;  %v10439_v9 = vld [vmem:[%s17427_s26 + $0xd38] sm:$0xff] }
 0x2f1   :  { %1255 = vmatpush.msrb.mxu0 %v10379_v10  ;;  %v10402_v10 = vld [vmem:[%s17427_s26 + $0xc10] sm:$0xff] }
 0x2f2   :  { %10326 = vmatmul.msk.f32.gmra.mxu0 %vm435_vm1, %v10321_v11  ;;  %v10418_v11 = vld [vmem:[%s17427_s26 + $0xc90] sm:$0xff]  ;;  %1395 = vmatpush.msrb.mxu2 %v10402_v10 }
 0x2f3   :  { %1256 = vmatpush.msrb.mxu0 %v10378_v13  ;;  %v10438_v13 = vld [vmem:[%s17427_s26 + $0xd30] sm:$0xff]  ;;  %1415 = vmatpush.msrb.mxu3 %v10418_v11  ;;  %v10488_v11 = vld [vmem:[%s17427_s26 + $0xe78] sm:$0xff] }
 0x2f5   :  { %1257 = vmatpush.msrb.mxu0 %v10377_v14  ;;  %v10401_v14 = vld [vmem:[%s17427_s26 + $0xc08] sm:$0xff] }
 0x2f6   :  { %1396 = vmatpush.msrb.mxu2 %v10401_v14  ;;  %v1241_v28 = vpop.f32.mrf.mxu3  ;;  %v10486_v14 = vld [vmem:[%s17427_s26 + $0xe68] sm:$0xff] }
 0x2f7   :  { %1258 = vmatpush.msrb.mxu0 %v10376_v15  ;;  %v10417_v15 = vld [vmem:[%s17427_s26 + $0xc88] sm:$0xff] }
 0x2f8   :  { %1416 = vmatpush.msrb.mxu3 %v10417_v15  ;;  %1397 = vmatpush.msrb.mxu2 %v10400_v20  ;;  %v10485_v15 = vld [vmem:[%s17427_s26 + $0xe60] sm:$0xff]  ;;  %v10520_v20 = vld [vmem:[%s17427_s26 + $0xf78] sm:$0xff] }
 0x2f9   :  { %1259 = vmatpush.msrb.mxu0 %v10375_v16  ;;  %v1201_v16 = vpop.f32.mrf.mxu1  ;;  %1398 = vmatmul.f32.vlgmr.msrb.gmra.mxu2 %v12257_v54 }
 0x2fa   :  { %1260 = vmatmul.f32.vlgmr.msrb.gmra.mxu0 %v12245_v50  ;;  %v1222_v26 = vadd.f32 %v1221_v17, %v1201_v16  ;;  %1417 = vmatpush.msrb.mxu3 %v10416_v21  ;;  %v10504_v16 = vld [vmem:[%s17427_s26 + $0xef8] sm:$0xff] }
 0x2fb   :  { %1422 = vmatpush.msra.mxu0 %v10447_v30  ;;  %1418 = vmatmul.f32.vlgmr.msrb.gmra.mxu3 %v12262_v56  ;;  %v10484_v17 = vld [vmem:[%s17427_s26 + $0xe58] sm:$0xff] }
 0x2fc   :  { %v1242_v30 = vadd.f32 %v1241_v28, %v1222_v26  ;;  %1580 = vmatpush.msra.mxu3 %v10488_v11  ;;  %v10502_v26 = vld [vmem:[%s17427_s26 + $0xee8] sm:$0xff] }
 0x2fd   :  { %1423 = vmatpush.msra.mxu0 %v10446_v36  ;;  %v10482_v28 = vld [vmem:[%s17427_s26 + $0xe48] sm:$0xff] }
 0x2fe   :  { %v10494_v11 = vld [vmem:[%s17427_s26 + $0xea8] sm:$0xff] }
 0x2ff   :  { %1424 = vmatpush.msra.mxu0 %v10445_v41  ;;  %v10463_v41 = vld [vmem:[%s17427_s26 + $0xdf8] sm:$0xff] }
 0x301   :  { %1425 = vmatpush.msra.mxu0 %v10444_v47  ;;  %v10460_v47 = vld [vmem:[%s17427_s26 + $0xde0] sm:$0xff] }
 0x303   :  { %1426 = vmatpush.msra.mxu0 %v10443_v53  ;;  %v10458_v53 = vld [vmem:[%s17427_s26 + $0xdd0] sm:$0xff] }
 0x305   :  { %1427 = vmatpush.msra.mxu0 %v10442_v59  ;;  %v10393_v59 = vld [vmem:[%s17429_s2 + $0xb0] sm:$0xff] }
 0x307   :  { %1428 = vmatpush.msra.mxu0 %v10441_v62  ;;  %v10453_v62 = vld [vmem:[%s17427_s26 + $0xda8] sm:$0xff] }
 0x309   :  { %1429 = vmatpush.msra.mxu0 %v10440_v3  ;;  %v10451_v3 = vld [vmem:[%s17427_s26 + $0xd98] sm:$0xff] }
 0x30b   :  { %1430 = vmatpush.msra.mxu0 %v10439_v9  ;;  %v10448_v9 = vld [vmem:[%s17427_s26 + $0xd80] sm:$0xff] }
 0x30d   :  { %1431 = vmatpush.msra.mxu0 %v10438_v13  ;;  %v10487_v13 = vld [vmem:[%s17427_s26 + $0xe70] sm:$0xff] }
 0x30e   :  { %1581 = vmatpush.msra.mxu3 %v10487_v13  ;;  %v10511_v13 = vld [vmem:[%s17427_s26 + $0xf30] sm:$0xff] }
 0x30f   :  { %1432 = vmatpush.msra.mxu0 %v10437_v19  ;;  %v10503_v19 = vld [vmem:[%s17427_s26 + $0xef0] sm:$0xff] }
 0x310   :  { %1582 = vmatpush.msra.mxu3 %v10486_v14 }
 0x311   :  { %1433 = vmatpush.msra.mxu0 %v10436_v22  ;;  %v10483_v22 = vld [vmem:[%s17427_s26 + $0xe50] sm:$0xff] }
 0x312   :  { %1583 = vmatpush.msra.mxu3 %v10485_v15  ;;  %v10474_v15 = vld [vmem:[%s17427_s26 + $0xe08] sm:$0xff] }
 0x313   :  { %1434 = vmatpush.msra.mxu0 %v10435_v27  ;;  %v10519_v27 = vld [vmem:[%s17427_s26 + $0xf70] sm:$0xff] }
 0x314   :  { %1584 = vmatpush.msra.mxu3 %v10484_v17  ;;  %v10510_v17 = vld [vmem:[%s17427_s26 + $0xf28] sm:$0xff] }
 0x315   :  { %1435 = vmatpush.msra.mxu0 %v10434_v29  ;;  %v10501_v29 = vld [vmem:[%s17427_s26 + $0xee0] sm:$0xff] }
 0x316   :  { %1585 = vmatpush.msra.mxu3 %v10483_v22  ;;  %v10492_v22 = vld [vmem:[%s17427_s26 + $0xe98] sm:$0xff] }
 0x317   :  { %1436 = vmatpush.msra.mxu0 %v10433_v31  ;;  %v10481_v31 = vld [vmem:[%s17427_s26 + $0xe40] sm:$0xff] }
 0x318   :  { %1586 = vmatpush.msra.mxu3 %v10482_v28  ;;  %v10508_v28 = vld [vmem:[%s17427_s26 + $0xf18] sm:$0xff] }
 0x319   :  { %1437 = vmatpush.msra.mxu0 %v10432_v34  ;;  %v10500_v34 = vld [vmem:[%s17427_s26 + $0xed8] sm:$0xff] }
 0x31a   :  { %1438 = vmatmul.f32.vlgmr.msra.gmra.mxu0 %v12231_v45  ;;  %1587 = vmatpush.msra.mxu3 %v10481_v31  ;;  %v10464_v31 = vld [vmem:[%s17429_s2 + $0xc0] sm:$0xff] }
 0x31b   :  { %1600 = vmatpush.msrb.mxu0 %v10504_v16  ;;  %v10493_v16 = vld [vmem:[%s17427_s26 + $0xea0] sm:$0xff] }
 0x31d   :  { %1601 = vmatpush.msrb.mxu0 %v10503_v19 }
 0x31f   :  { %1602 = vmatpush.msrb.mxu0 %v10502_v26  ;;  %v10509_v26 = vld [vmem:[%s17427_s26 + $0xf20] sm:$0xff] }
 0x321   :  { %1603 = vmatpush.msrb.mxu0 %v10501_v29 }
 0x323   :  { %1604 = vmatpush.msrb.mxu0 %v10500_v34  ;;  %v10490_v34 = vld [vmem:[%s17427_s26 + $0xe88] sm:$0xff] }
 0x357   :  { %v13229_v24 = vpop.f32.mrf.mxu0 }
 0x35f   :  { %v13273_v49 = vpop.f32.mrf.mxu0 }
 0x367   :  { %v13311_v4 = vpop.f32.mrf.mxu0 }
 0x36f   :  { %v13349_v23 = vpop.f32.mrf.mxu0 }
 0x377   :  { %v1261_v36 = vpop.f32.mrf.mxu0 }
 0x378   :  { %v1262_v38 = vadd.f32 %v1261_v36, %v1242_v30  ;;  %v10518_v30 = vld [vmem:[%s17427_s26 + $0xf68] sm:$0xff]  ;;  %v10517_v36 = vld [vmem:[%s17427_s26 + $0xf60] sm:$0xff] }
 0x37a   :  { %10395 = vmatpush.msk.msrb.mxu1 %vm448_vm0, %v1262_v38  ;;  %v10480_v38 = vld [vmem:[%s17427_s26 + $0xe38] sm:$0xff] }
 0x37b   :  { %10396 = vmatmul.msk.f32.vlgmr.msrb.gmra.mxu1 %vm435_vm1, %v10391_v39  ;;  %v10499_v39 = vld [vmem:[%s17427_s26 + $0xed0] sm:$0xff]  ;;  %1588 = vmatpush.msra.mxu3 %v10480_v38  ;;  %v10536_v38 = vld [vmem:[%s17427_s26 + $0xff8] sm:$0xff] }
 0x37c   :  { %1442 = vmatpush.msra.mxu1 %v10463_v41  ;;  %v10516_v41 = vld [vmem:[%s17427_s26 + $0xf58] sm:$0xff]  ;;  %1605 = vmatpush.msrb.mxu0 %v10499_v39  ;;  %v10535_v39 = vld [vmem:[%s17427_s26 + $0xff0] sm:$0xff] }
 0x37e   :  { %1443 = vmatpush.msra.mxu1 %v10462_v43 }
 0x380   :  { %1444 = vmatpush.msra.mxu1 %v10461_v46  ;;  %v10479_v46 = vld [vmem:[%s17427_s26 + $0xe30] sm:$0xff] }
 0x381   :  { %1589 = vmatpush.msra.mxu3 %v10479_v46  ;;  %v10506_v46 = vld [vmem:[%s17427_s26 + $0xf08] sm:$0xff] }
 0x382   :  { %1445 = vmatpush.msra.mxu1 %v10460_v47  ;;  %v10498_v47 = vld [vmem:[%s17427_s26 + $0xec8] sm:$0xff] }
 0x383   :  { %10397 = vmatmul.msk.f32.gmra.mxu1 %vm435_vm1, %v10392_v51  ;;  %v10515_v51 = vld [vmem:[%s17427_s26 + $0xf50] sm:$0xff]  ;;  %1606 = vmatpush.msrb.mxu0 %v10498_v47  ;;  %v10505_v47 = vld [vmem:[%s17427_s26 + $0xf00] sm:$0xff] }
 0x384   :  { %1446 = vmatpush.msra.mxu1 %v10459_v52  ;;  %v10478_v52 = vld [vmem:[%s17427_s26 + $0xe28] sm:$0xff] }
 0x385   :  { %1590 = vmatpush.msra.mxu3 %v10478_v52  ;;  %v10533_v52 = vld [vmem:[%s17427_s26 + $0xfe0] sm:$0xff] }
 0x386   :  { %1447 = vmatpush.msra.mxu1 %v10458_v53  ;;  %v10497_v53 = vld [vmem:[%s17427_s26 + $0xec0] sm:$0xff] }
 0x387   :  { %1607 = vmatpush.msrb.mxu0 %v10497_v53  ;;  %v10465_v53 = vld [vmem:[%s17429_s2 + $0xc8] sm:$0xff] }
 0x388   :  { %1448 = vmatpush.msra.mxu1 %v10457_v55  ;;  %v10514_v55 = vld [vmem:[%s17427_s26 + $0xf48] sm:$0xff] }
 0x38a   :  { %1449 = vmatpush.msra.mxu1 %v10456_v58  ;;  %v10477_v58 = vld [vmem:[%s17427_s26 + $0xe20] sm:$0xff] }
 0x38b   :  { %10398 = vmatmul.msk.f32.gmra.mxu1 %vm435_vm1, %v10393_v59  ;;  %v10496_v59 = vld [vmem:[%s17427_s26 + $0xeb8] sm:$0xff]  ;;  %1591 = vmatpush.msra.mxu3 %v10477_v58  ;;  %v10531_v58 = vld [vmem:[%s17427_s26 + $0xfd0] sm:$0xff] }
 0x38c   :  { %1450 = vmatpush.msra.mxu1 %v10455_v60  ;;  %v1399_v60 = vpop.f32.mrf.mxu2  ;;  %1608 = vmatpush.msrb.mxu0 %v10496_v59  ;;  %v10530_v59 = vld [vmem:[%s17427_s26 + $0xfc8] sm:$0xff] }
 0x38e   :  { %1451 = vmatpush.msra.mxu1 %v10454_v61  ;;  %v1419_v61 = vpop.f32.mrf.mxu3 }
 0x390   :  { %1452 = vmatpush.msra.mxu1 %v10453_v62  ;;  %v10513_v62 = vld [vmem:[%s17427_s26 + $0xf40] sm:$0xff] }
 0x392   :  { %1453 = vmatpush.msra.mxu1 %v10452_v63  ;;  %v10476_v63 = vld [vmem:[%s17427_s26 + $0xe18] sm:$0xff] }
 0x393   :  { %10399 = vmatmul.msk.f32.gmra.mxu1 %vm435_vm1, %v10394_v0  ;;  %v10495_v0 = vld [vmem:[%s17427_s26 + $0xeb0] sm:$0xff]  ;;  %1592 = vmatpush.msra.mxu3 %v10476_v63 }
 0x394   :  { %1454 = vmatpush.msra.mxu1 %v10451_v3  ;;  %v10512_v3 = vld [vmem:[%s17427_s26 + $0xf38] sm:$0xff]  ;;  %1609 = vmatpush.msrb.mxu0 %v10495_v0  ;;  %v10527_v63 = vld [vmem:[%s17427_s26 + $0xfb0] sm:$0xff]  ;;  %v10526_v0 = vld [vmem:[%s17427_s26 + $0xfa8] sm:$0xff] }
 0x396   :  { %1455 = vmatpush.msra.mxu1 %v10450_v5  ;;  %1610 = vmatpush.msrb.mxu0 %v10494_v11  ;;  %v10523_v11 = vld [vmem:[%s17427_s26 + $0xf90] sm:$0xff] }
 0x397   :  { %v1439_v14 = vpop.f32.mrf.mxu0 }
 0x398   :  { %1456 = vmatpush.msra.mxu1 %v10449_v8  ;;  %v1420_v8 = vadd.f32 %v1419_v61, %v1399_v60  ;;  %1611 = vmatpush.msrb.mxu0 %v10493_v16  ;;  %v10529_v60 = vld [vmem:[%s17427_s26 + $0xfc0] sm:$0xff]  ;;  %v10466_v61 = vld [vmem:[%s17429_s2 + $0xd0] sm:$0xff]  ;;  %v10593_v16 = vld [vmem:[%s17427_s26 + $0x1178] sm:$0xff] }
 0x39a   :  { %1457 = vmatpush.msra.mxu1 %v10448_v9  ;;  %v10475_v9 = vld [vmem:[%s17427_s26 + $0xe10] sm:$0xff]  ;;  %v1440_v19 = vadd.f32 %v1439_v14, %v1420_v8  ;;  %1612 = vmatpush.msrb.mxu0 %v10492_v22  ;;  %v10467_v8 = vld [vmem:[%s17429_s2 + $0xd8] sm:$0xff]  ;;  %v10521_v14 = vld [vmem:[%s17427_s26 + $0xf80] sm:$0xff] }
 0x39b   :  { %1458 = vmatmul.f32.vlgmr.msra.gmra.mxu1 %v12245_v50  ;;  %1593 = vmatpush.msra.mxu3 %v10475_v9  ;;  %v10524_v9 = vld [vmem:[%s17427_s26 + $0xf98] sm:$0xff]  ;;  %v10591_v22 = vld [vmem:[%s17427_s26 + $0x1168] sm:$0xff] }
 0x39c   :  { %1620 = vmatpush.msrb.mxu1 %v10520_v20  ;;  %v10473_v20 = vld [vmem:[%s17427_s26 + $0xe00] sm:$0xff] }
 0x39d   :  { %1594 = vmatpush.msra.mxu3 %v10474_v15 }
 0x39e   :  { %1621 = vmatpush.msrb.mxu1 %v10519_v27  ;;  %v10491_v27 = vld [vmem:[%s17427_s26 + $0xe90] sm:$0xff] }
 0x39f   :  { %1595 = vmatpush.msra.mxu3 %v10473_v20  ;;  %1613 = vmatpush.msrb.mxu0 %v10491_v27  ;;  %v10577_v20 = vld [vmem:[%s17427_s26 + $0x10f8] sm:$0xff]  ;;  %v10576_v27 = vld [vmem:[%s17427_s26 + $0x10f0] sm:$0xff] }
 0x3a0   :  { %1622 = vmatpush.msrb.mxu1 %v10518_v30  ;;  %1596 = vmatmul.f32.vlgmr.msra.gmra.mxu3 %v12257_v54 }
 0x3a1   :  { %1614 = vmatpush.msrb.mxu0 %v10490_v34  ;;  %v10589_v34 = vld [vmem:[%s17427_s26 + $0x1158] sm:$0xff] }
 0x3a2   :  { %1623 = vmatpush.msrb.mxu1 %v10517_v36  ;;  %v10507_v36 = vld [vmem:[%s17427_s26 + $0xf10] sm:$0xff] }
 0x3a4   :  { %1624 = vmatpush.msrb.mxu1 %v10516_v41  ;;  %v10489_v41 = vld [vmem:[%s17427_s26 + $0xe80] sm:$0xff] }
 0x3a5   :  { %1615 = vmatpush.msrb.mxu0 %v10489_v41  ;;  %v10557_v41 = vld [vmem:[%s17427_s26 + $0x1058] sm:$0xff] }
 0x3a6   :  { %1625 = vmatpush.msrb.mxu1 %v10515_v51  ;;  %v10534_v51 = vld [vmem:[%s17427_s26 + $0xfe8] sm:$0xff]  ;;  %1616 = vmatmul.f32.vlgmr.msrb.gmra.mxu0 %v12262_v56 }
 0x3a8   :  { %1626 = vmatpush.msrb.mxu1 %v10514_v55  ;;  %v10532_v55 = vld [vmem:[%s17427_s26 + $0xfd8] sm:$0xff] }
 0x3aa   :  { %1627 = vmatpush.msrb.mxu1 %v10513_v62  ;;  %v10528_v62 = vld [vmem:[%s17427_s26 + $0xfb8] sm:$0xff] }
 0x3ac   :  { %1628 = vmatpush.msrb.mxu1 %v10512_v3  ;;  %v10525_v3 = vld [vmem:[%s17427_s26 + $0xfa0] sm:$0xff] }
 0x3ae   :  { %1629 = vmatpush.msrb.mxu1 %v10511_v13  ;;  %v10522_v13 = vld [vmem:[%s17427_s26 + $0xf88] sm:$0xff] }
 0x3b0   :  { %1630 = vmatpush.msrb.mxu1 %v10510_v17  ;;  %v10592_v17 = vld [vmem:[%s17427_s26 + $0x1170] sm:$0xff] }
 0x3b2   :  { %1631 = vmatpush.msrb.mxu1 %v10509_v26  ;;  %v10560_v26 = vld [vmem:[%s17427_s26 + $0x1070] sm:$0xff] }
 0x3b4   :  { %1632 = vmatpush.msrb.mxu1 %v10508_v28  ;;  %v10590_v28 = vld [vmem:[%s17427_s26 + $0x1160] sm:$0xff] }
 0x3b6   :  { %1633 = vmatpush.msrb.mxu1 %v10507_v36  ;;  %v10558_v36 = vld [vmem:[%s17427_s26 + $0x1060] sm:$0xff] }
 0x3b8   :  { %1634 = vmatpush.msrb.mxu1 %v10506_v46  ;;  %v10573_v46 = vld [vmem:[%s17427_s26 + $0x10d8] sm:$0xff] }
 0x3ba   :  { %1635 = vmatpush.msrb.mxu1 %v10505_v47  ;;  %v10587_v47 = vld [vmem:[%s17427_s26 + $0x1148] sm:$0xff] }
 0x3bb   :  { %1636 = vmatmul.f32.vlgmr.msrb.gmra.mxu1 %v12231_v45 }
 0x3bc   :  { %1798 = vmatpush.msra.mxu1 %v10577_v20  ;;  %v10551_v20 = vld [vmem:[%s17427_s26 + $0x1028] sm:$0xff] }
 0x3be   :  { %1799 = vmatpush.msra.mxu1 %v10576_v27 }
 0x3f8   :  { %v13432_v10 = vpop.f32.mrf.mxu1 }
 0x400   :  { %v13458_v21 = vpop.f32.mrf.mxu1 }
 0x408   :  { %v13496_v43 = vpop.f32.mrf.mxu1 }
 0x410   :  { %v13534_v5 = vpop.f32.mrf.mxu1 }
 0x418   :  { %v1459_v29 = vpop.f32.mrf.mxu1 }
 0x419   :  { %v1460_v30 = vadd.f32 %v1459_v29, %v1440_v19  ;;  %v10561_v19 = vld [vmem:[%s17427_s26 + $0x1078] sm:$0xff] }
 0x41a   :  { %1778 = vmatpush.msra.mxu0 %v10561_v19 }
 0x41b   :  { %10468 = vmatpush.msk.msra.mxu2 %vm448_vm0, %v1460_v30  ;;  %v10559_v30 = vld [vmem:[%s17427_s26 + $0x1068] sm:$0xff] }
 0x41c   :  { %10469 = vmatmul.msk.f32.vlgmr.msra.gmra.mxu2 %vm435_vm1, %v10464_v31  ;;  %1779 = vmatpush.msra.mxu0 %v10560_v26  ;;  %v10575_v31 = vld [vmem:[%s17427_s26 + $0x10e8] sm:$0xff]  ;;  %v10581_v26 = vld [vmem:[%s17427_s26 + $0x1118] sm:$0xff] }
 0x41d   :  { %1640 = vmatpush.msrb.mxu2 %v10536_v38  ;;  %1800 = vmatpush.msra.mxu1 %v10575_v31  ;;  %v10574_v38 = vld [vmem:[%s17427_s26 + $0x10e0] sm:$0xff]  ;;  %v10580_v31 = vld [vmem:[%s17427_s26 + $0x1110] sm:$0xff] }
 0x41e   :  { %1780 = vmatpush.msra.mxu0 %v10559_v30  ;;  %v10566_v30 = vld [vmem:[%s17427_s26 + $0x10a0] sm:$0xff] }
 0x41f   :  { %1641 = vmatpush.msrb.mxu2 %v10535_v39  ;;  %v10588_v39 = vld [vmem:[%s17427_s26 + $0x1150] sm:$0xff]  ;;  %1801 = vmatpush.msra.mxu1 %v10574_v38  ;;  %v10565_v38 = vld [vmem:[%s17427_s26 + $0x1098] sm:$0xff] }
 0x420   :  { %1781 = vmatpush.msra.mxu0 %v10558_v36  ;;  %v10549_v36 = vld [vmem:[%s17427_s26 + $0x1018] sm:$0xff] }
 0x421   :  { %1642 = vmatpush.msrb.mxu2 %v10534_v51  ;;  %1802 = vmatpush.msra.mxu1 %v10573_v46  ;;  %v10556_v51 = vld [vmem:[%s17427_s26 + $0x1050] sm:$0xff] }
 0x422   :  { %1782 = vmatpush.msra.mxu0 %v10557_v41  ;;  %v10548_v41 = vld [vmem:[%s17427_s26 + $0x1010] sm:$0xff] }
 0x423   :  { %1643 = vmatpush.msrb.mxu2 %v10533_v52  ;;  %v10572_v52 = vld [vmem:[%s17427_s26 + $0x10d0] sm:$0xff] }
 0x424   :  { %10470 = vmatmul.msk.f32.gmra.mxu2 %vm435_vm1, %v10465_v53  ;;  %v10586_v53 = vld [vmem:[%s17427_s26 + $0x1140] sm:$0xff]  ;;  %1783 = vmatpush.msra.mxu0 %v10556_v51  ;;  %v10564_v46 = vld [vmem:[%s17427_s26 + $0x1090] sm:$0xff] }
 0x425   :  { %1644 = vmatpush.msrb.mxu2 %v10532_v55  ;;  %1803 = vmatpush.msra.mxu1 %v10572_v52 }
 0x427   :  { %1645 = vmatpush.msrb.mxu2 %v10531_v58  ;;  %v10555_v58 = vld [vmem:[%s17427_s26 + $0x1048] sm:$0xff] }
 0x428   :  { %1784 = vmatpush.msra.mxu0 %v10555_v58  ;;  %v10547_v58 = vld [vmem:[%s17427_s26 + $0x1008] sm:$0xff] }
 0x429   :  { %1646 = vmatpush.msrb.mxu2 %v10530_v59  ;;  %v10571_v59 = vld [vmem:[%s17427_s26 + $0x10c8] sm:$0xff] }
 0x42a   :  { %1804 = vmatpush.msra.mxu1 %v10571_v59  ;;  %v10609_v59 = vld [vmem:[%s17427_s26 + $0x11f8] sm:$0xff] }
 0x42b   :  { %1647 = vmatpush.msrb.mxu2 %v10529_v60  ;;  %v10585_v60 = vld [vmem:[%s17427_s26 + $0x1138] sm:$0xff] }
 0x42c   :  { %10471 = vmatmul.msk.f32.gmra.mxu2 %vm435_vm1, %v10466_v61  ;;  %v10554_v61 = vld [vmem:[%s17427_s26 + $0x1040] sm:$0xff] }
 0x42d   :  { %1648 = vmatpush.msrb.mxu2 %v10528_v62  ;;  %v10570_v62 = vld [vmem:[%s17427_s26 + $0x10c0] sm:$0xff]  ;;  %1785 = vmatpush.msra.mxu0 %v10554_v61  ;;  %v10608_v61 = vld [vmem:[%s17427_s26 + $0x11f0] sm:$0xff] }
 0x42e   :  { %1805 = vmatpush.msra.mxu1 %v10570_v62  ;;  %v10546_v62 = vld [vmem:[%s17427_s26 + $0x1000] sm:$0xff] }
 0x42f   :  { %1649 = vmatpush.msrb.mxu2 %v10527_v63  ;;  %v10584_v63 = vld [vmem:[%s17427_s26 + $0x1130] sm:$0xff] }
 0x431   :  { %1650 = vmatpush.msrb.mxu2 %v10526_v0  ;;  %v10553_v0 = vld [vmem:[%s17427_s26 + $0x1038] sm:$0xff] }
 0x432   :  { %1786 = vmatpush.msra.mxu0 %v10553_v0  ;;  %v11791_v0 = vmov 0  }
 0x433   :  { %1651 = vmatpush.msrb.mxu2 %v10525_v3  ;;  %v10569_v3 = vld [vmem:[%s17427_s26 + $0x10b8] sm:$0xff]  ;;  %11661 = vset.pattern.permute.xlu0 %v11791_v0 }
 0x434   :  { %10472 = vmatmul.msk.f32.gmra.mxu2 %vm435_vm1, %v10467_v8  ;;  %v1597_v8 = vpop.f32.mrf.mxu3  ;;  %1806 = vmatpush.msra.mxu1 %v10569_v3  ;;  %v10606_v3 = vld [vmem:[%s17427_s26 + $0x11e0] sm:$0xff] }
 0x435   :  { %1652 = vmatpush.msrb.mxu2 %v10524_v9  ;;  %v1617_v9 = vpop.f32.mrf.mxu0  ;;  %11662 = vset.pattern.permute.xlu1 %v11791_v0 }
 0x436   :  { %v1618_v19 = vadd.f32 %v1617_v9, %v1597_v8  ;;  %v10538_v8 = vld [vmem:[%s17429_s2 + $0xe8] sm:$0xff]  ;;  %v10605_v9 = vld [vmem:[%s17427_s26 + $0x11d8] sm:$0xff]  ;;  %11663 = vset.pattern.permute.xlu2 %v11791_v0 }
 0x437   :  { %1653 = vmatpush.msrb.mxu2 %v10523_v11  ;;  %v10583_v11 = vld [vmem:[%s17427_s26 + $0x1128] sm:$0xff] }
 0x438   :  { %v1637_v27 = vpop.f32.mrf.mxu1 }
 0x439   :  { %1654 = vmatpush.msrb.mxu2 %v10522_v13  ;;  %v10552_v13 = vld [vmem:[%s17427_s26 + $0x1030] sm:$0xff] }
 0x43a   :  { %1787 = vmatpush.msra.mxu0 %v10552_v13  ;;  %v10539_v13 = vld [vmem:[%s17429_s2 + $0xf0] sm:$0xff] }
 0x43b   :  { %1655 = vmatpush.msrb.mxu2 %v10521_v14  ;;  %v10568_v14 = vld [vmem:[%s17427_s26 + $0x10b0] sm:$0xff] }
 0x43c   :  { %1656 = vmatmul.f32.vlgmr.msrb.gmra.mxu2 %v12245_v50  ;;  %1807 = vmatpush.msra.mxu1 %v10568_v14  ;;  %v10601_v14 = vld [vmem:[%s17427_s26 + $0x11b8] sm:$0xff] }
 0x43d   :  { %1818 = vmatpush.msra.mxu2 %v10593_v16  ;;  %v10582_v16 = vld [vmem:[%s17427_s26 + $0x1120] sm:$0xff]  ;;  %1788 = vmatpush.msra.mxu0 %v10551_v20 }
 0x43e   :  { %v10598_v20 = vld [vmem:[%s17427_s26 + $0x11a0] sm:$0xff] }
 0x43f   :  { %1819 = vmatpush.msra.mxu2 %v10592_v17 }
 0x441   :  { %1820 = vmatpush.msra.mxu2 %v10591_v22  ;;  %v10567_v22 = vld [vmem:[%s17427_s26 + $0x10a8] sm:$0xff] }
 0x442   :  { %1808 = vmatpush.msra.mxu1 %v10567_v22  ;;  %v10540_v22 = vld [vmem:[%s17429_s2 + $0xf8] sm:$0xff] }
 0x443   :  { %1821 = vmatpush.msra.mxu2 %v10590_v28  ;;  %v10550_v28 = vld [vmem:[%s17427_s26 + $0x1020] sm:$0xff] }
 0x444   :  { %1789 = vmatpush.msra.mxu0 %v10550_v28  ;;  %1809 = vmatpush.msra.mxu1 %v10566_v30  ;;  %v10595_v28 = vld [vmem:[%s17427_s26 + $0x1188] sm:$0xff]  ;;  %v10594_v30 = vld [vmem:[%s17427_s26 + $0x1180] sm:$0xff] }
 0x445   :  { %1822 = vmatpush.msra.mxu2 %v10589_v34  ;;  %v1638_v34 = vadd.f32 %v1637_v27, %v1618_v19  ;;  %v10599_v19 = vld [vmem:[%s17427_s26 + $0x11a8] sm:$0xff]  ;;  %v10596_v27 = vld [vmem:[%s17427_s26 + $0x1190] sm:$0xff] }
 0x446   :  { %1790 = vmatpush.msra.mxu0 %v10549_v36  ;;  %1810 = vmatpush.msra.mxu1 %v10565_v38  ;;  %v1913_v36 = vld [vmem:[%s17430_s24 + $0x10] sm:$0xff] }
 0x447   :  { %1823 = vmatpush.msra.mxu2 %v10588_v39  ;;  %v10579_v39 = vld [vmem:[%s17427_s26 + $0x1108] sm:$0xff]  ;;  %v3080_v38 = vld [vmem:[%s17406_s6 + $0x10] sm:$0xff]  ;;  %1927 = vperm.xlu1 %11662, %v1913_v36   ;;  %v10630_v36 = vld [vmem:[%s17404_s4 + $0xd8] sm:$0xff] }
 0x448   :  { %1791 = vmatpush.msra.mxu0 %v10548_v41  ;;  %1811 = vmatpush.msra.mxu1 %v10564_v46  ;;  %v3081_v46 = vld [vmem:[%s17406_s6 + $0x18] sm:$0xff] }
 0x449   :  { %1824 = vmatpush.msra.mxu2 %v10587_v47  ;;  %v10578_v47 = vld [vmem:[%s17427_s26 + $0x1100] sm:$0xff] }
 0x44a   :  { %1792 = vmatpush.msra.mxu0 %v10547_v58  ;;  %v4694_v58 = vld [vmem:[%s17409_s9 + $0x8] sm:$0xff] }
 0x44b   :  { %1825 = vmatpush.msra.mxu2 %v10586_v53  ;;  %v10537_v53 = vld [vmem:[%s17429_s2 + $0xe0] sm:$0xff] }
 0x44c   :  { %1793 = vmatpush.msra.mxu0 %v10546_v62 }
 0x44d   :  { %1826 = vmatpush.msra.mxu2 %v10585_v60  ;;  %v10563_v60 = vld [vmem:[%s17427_s26 + $0x1088] sm:$0xff]  ;;  %1794 = vmatmul.f32.vlgmr.msra.gmra.mxu0 %v12257_v54  ;;  %v10604_v54 = vld [vmem:[%s17427_s26 + $0x11d0] sm:$0xff] }
 0x44e   :  { %1812 = vmatpush.msra.mxu1 %v10563_v60 }
 0x44f   :  { %1827 = vmatpush.msra.mxu2 %v10584_v63  ;;  %v10562_v63 = vld [vmem:[%s17427_s26 + $0x1080] sm:$0xff] }
 0x450   :  { %1813 = vmatpush.msra.mxu1 %v10562_v63  ;;  %v7467_v63 = vld [vmem:[%s17415_s15] sm:$0xff] }
 0x451   :  { %1828 = vmatpush.msra.mxu2 %v10583_v11  ;;  %1814 = vmatmul.f32.vlgmr.msra.gmra.mxu1 %v12262_v56  ;;  %v10603_v56 = vld [vmem:[%s17427_s26 + $0x11c8] sm:$0xff]  ;;  %v10602_v11 = vld [vmem:[%s17427_s26 + $0x11c0] sm:$0xff] }
 0x453   :  { %1829 = vmatpush.msra.mxu2 %v10582_v16  ;;  %v10600_v16 = vld [vmem:[%s17427_s26 + $0x11b0] sm:$0xff] }
 0x455   :  { %1830 = vmatpush.msra.mxu2 %v10581_v26  ;;  %v10597_v26 = vld [vmem:[%s17427_s26 + $0x1198] sm:$0xff] }
 0x457   :  { %1831 = vmatpush.msra.mxu2 %v10580_v31  ;;  %v1911_v31 = vld [vmem:[%s17430_s24] sm:$0xff] }
 0x458   :  { %1917 = vperm.xlu0 %11661, %v1911_v31   ;;  %v10631_v31 = vld [vmem:[%s17404_s4 + $0xe0] sm:$0xff] }
 0x459   :  { %1832 = vmatpush.msra.mxu2 %v10579_v39  ;;  %v3083_v39 = vld [vmem:[%s17406_s6 + $0x28] sm:$0xff] }
 0x45b   :  { %1833 = vmatpush.msra.mxu2 %v10578_v47  ;;  %v4693_v47 = vld [vmem:[%s17409_s9] sm:$0xff] }
 0x45c   :  { %1834 = vmatmul.f32.vlgmr.msra.gmra.mxu2 %v12231_v45  ;;  %v10607_v45 = vld [vmem:[%s17427_s26 + $0x11e8] sm:$0xff] }
 0x49f   :  { %v13653_v15 = vpop.f32.mrf.mxu2 }
 0x4a7   :  { %v13679_v29 = vpop.f32.mrf.mxu2 }
 0x4af   :  { %v13717_v55 = vpop.f32.mrf.mxu2 }
 0x4b7   :  { %v13755_v17 = vpop.f32.mrf.mxu2 }
 0x4bf   :  { %v1657_v51 = vpop.f32.mrf.mxu2 }
 0x4c0   :  { %v1658_v52 = vadd.f32 %v1657_v51, %v1638_v34  ;;  %v1912_v34 = vld [vmem:[%s17430_s24 + $0x8] sm:$0xff]  ;;  %v3084_v51 = vld [vmem:[%s17406_s6 + $0x30] sm:$0xff] }
 0x4c1   :  { %1922 = vperm.xlu0 %11661, %v1912_v34   ;;  %v1954_v34 = vld [vmem:[%s17404_s4 + $0x58] sm:$0xff] }
 0x4c2   :  { %10541 = vmatpush.msk.msrb.mxu3 %vm448_vm0, %v1658_v52  ;;  %v4696_v52 = vld [vmem:[%s17409_s9 + $0x18] sm:$0xff] }
 0x4c3   :  { %10542 = vmatmul.msk.f32.vlgmr.msrb.gmra.mxu3 %vm435_vm1, %v10537_v53 }
 0x4c4   :  { %1838 = vmatpush.msra.mxu3 %v10609_v59  ;;  %v7469_v59 = vld [vmem:[%s17415_s15 + $0x10] sm:$0xff] }
 0x4c6   :  { %1839 = vmatpush.msra.mxu3 %v10608_v61 }
 0x4c8   :  { %1840 = vmatpush.msra.mxu3 %v10607_v45 }
 0x4c9   :  { %3098 = vperm.xlu0 %11661, %v3080_v38   ;;  %v1953_v38 = vld [vmem:[%s17404_s4 + $0x50] sm:$0xff] }
 0x4ca   :  { %1841 = vmatpush.msra.mxu3 %v10606_v3  ;;  %v1795_v61 = vpop.f32.mrf.mxu0 }
 0x4cb   :  { %10543 = vmatmul.msk.f32.gmra.mxu3 %vm435_vm1, %v10538_v8 }
 0x4cc   :  { %1842 = vmatpush.msra.mxu3 %v10605_v9  ;;  %v7470_v9 = vld [vmem:[%s17415_s15 + $0x18] sm:$0xff] }
 0x4ce   :  { %1843 = vmatpush.msra.mxu3 %v10604_v54  ;;  %v1815_v62 = vpop.f32.mrf.mxu1 }
 0x4cf   :  { %v1816_v0 = vadd.f32 %v1815_v62, %v1795_v61  ;;  %v10625_v61 = vld [vmem:[%s17404_s4 + $0xb0] sm:$0xff]  ;;  %v1948_v62 = vld [vmem:[%s17404_s4 + $0x28] sm:$0xff] }
 0x4d0   :  { %1844 = vmatpush.msra.mxu3 %v10603_v56 }
 0x4d1   :  { %3113 = vperm.xlu0 %11661, %v3083_v39   ;;  %v1952_v39 = vld [vmem:[%s17404_s4 + $0x48] sm:$0xff] }
 0x4d2   :  { %1845 = vmatpush.msra.mxu3 %v10602_v11  ;;  %v10610_v11 = vld [vmem:[%s17429_s2 + $0x100] sm:$0xff] }
 0x4d3   :  { %10544 = vmatmul.msk.f32.gmra.mxu3 %vm435_vm1, %v10539_v13  ;;  %v10611_v13 = vld [vmem:[%s17429_s2 + $0x108] sm:$0xff] }
 0x4d4   :  { %1846 = vmatpush.msra.mxu3 %v10601_v14  ;;  %v10612_v14 = vld [vmem:[%s17429_s2 + $0x110] sm:$0xff] }
 0x4d6   :  { %1847 = vmatpush.msra.mxu3 %v10600_v16  ;;  %v10613_v16 = vld [vmem:[%s17429_s2 + $0x118] sm:$0xff] }
 0x4d8   :  { %1848 = vmatpush.msra.mxu3 %v10599_v19  ;;  %v1958_v19 = vld [vmem:[%s17404_s4 + $0x78] sm:$0xff] }
 0x4d9   :  { %4699 = vperm.xlu0 %11661, %v4693_v47   ;;  %1959 = vmatpush.msrb.mxu1 %v1958_v19  ;;  %v1951_v47 = vld [vmem:[%s17404_s4 + $0x40] sm:$0xff]  ;;  %v10674_v19 = vld [vmem:[%s17404_s4 + $0x178] sm:$0xff] }
 0x4da   :  { %1849 = vmatpush.msra.mxu3 %v10598_v20  ;;  %v10634_v20 = vld [vmem:[%s17404_s4 + $0xf8] sm:$0xff] }
 0x4db   :  { %10545 = vmatmul.msk.f32.gmra.mxu3 %vm435_vm1, %v10540_v22  ;;  %2013 = vmatpush.msrb.mxu2 %v10634_v20  ;;  %v1957_v22 = vld [vmem:[%s17404_s4 + $0x70] sm:$0xff] }
 0x4dc   :  { %1850 = vmatpush.msra.mxu3 %v10597_v26  ;;  %v10633_v26 = vld [vmem:[%s17404_s4 + $0xf0] sm:$0xff]  ;;  %1960 = vmatpush.msrb.mxu1 %v1957_v22  ;;  %v10672_v22 = vld [vmem:[%s17404_s4 + $0x168] sm:$0xff] }
 0x4dd   :  { %2014 = vmatpush.msrb.mxu2 %v10633_v26  ;;  %v10673_v20 = vld [vmem:[%s17404_s4 + $0x170] sm:$0xff]  ;;  %v10671_v26 = vld [vmem:[%s17404_s4 + $0x160] sm:$0xff] }
 0x4de   :  { %1851 = vmatpush.msra.mxu3 %v10596_v27  ;;  %v1956_v27 = vld [vmem:[%s17404_s4 + $0x68] sm:$0xff] }
 0x4df   :  { %v1835_v3 = vpop.f32.mrf.mxu2  ;;  %1961 = vmatpush.msrb.mxu1 %v1956_v27  ;;  %v10670_v27 = vld [vmem:[%s17404_s4 + $0x158] sm:$0xff] }
 0x4e0   :  { %1852 = vmatpush.msra.mxu3 %v10595_v28  ;;  %v1836_v8 = vadd.f32 %v1835_v3, %v1816_v0  ;;  %v10632_v28 = vld [vmem:[%s17404_s4 + $0xe8] sm:$0xff]  ;;  %v1947_v0 = vld [vmem:[%s17404_s4 + $0x20] sm:$0xff] }
 0x4e1   :  { %4714 = vperm.xlu0 %11661, %v4696_v52   ;;  %2015 = vmatpush.msrb.mxu2 %v10632_v28  ;;  %v1950_v52 = vld [vmem:[%s17404_s4 + $0x38] sm:$0xff]  ;;  %v10623_v3 = vld [vmem:[%s17404_s4 + $0xa0] sm:$0xff]  ;;  %v10669_v28 = vld [vmem:[%s17404_s4 + $0x150] sm:$0xff] }
 0x4e2   :  { %1853 = vmatpush.msra.mxu3 %v10594_v30  ;;  %v1955_v30 = vld [vmem:[%s17404_s4 + $0x60] sm:$0xff] }
 0x4e3   :  { %1854 = vmatmul.f32.vlgmr.msra.gmra.mxu3 %v12245_v50  ;;  %v1914_v50 = vld [vmem:[%s17430_s24 + $0x18] sm:$0xff]  ;;  %1962 = vmatpush.msrb.mxu1 %v1955_v30  ;;  %v514_v30 = vadd.f32 %v12540_v32, %v12542_v33  ;;  %v10665_v33 = vld [vmem:[%s17404_s4 + $0x130] sm:$0xff] }
 0x4e4   :  { %1932 = vperm.xlu1 %11662, %v1914_v50   ;;  %2016 = vmatpush.msrb.mxu2 %v10631_v31  ;;  %v10629_v50 = vld [vmem:[%s17404_s4 + $0xd0] sm:$0xff]  ;;  %v10668_v31 = vld [vmem:[%s17404_s4 + $0x148] sm:$0xff] }
 0x4e5   :  { %1963 = vmatpush.msrb.mxu1 %v1954_v34  ;;  %v719_v34 = vadd.f32 %v12769_v1, %v514_v30  ;;  %v517_v1 = vadd.f32 %v12547_v35, %v12561_v40  ;;  %v10662_v40 = vld [vmem:[%s17404_s4 + $0x118] sm:$0xff] }
 0x4e6   :  { %2017 = vmatpush.msrb.mxu2 %v10630_v36  ;;  %v10667_v36 = vld [vmem:[%s17404_s4 + $0x140] sm:$0xff] }
 0x4e7   :  { %1964 = vmatpush.msrb.mxu1 %v1953_v38  ;;  %v917_v38 = vadd.f32 %v13005_v42, %v719_v34  ;;  %v10664_v42 = vld [vmem:[%s17404_s4 + $0x128] sm:$0xff] }
 0x4e8   :  { %2018 = vmatpush.msrb.mxu2 %v10629_v50  ;;  %v10666_v50 = vld [vmem:[%s17404_s4 + $0x138] sm:$0xff] }
 0x4e9   :  { %7483 = vperm.xlu0 %11661, %v7469_v59   ;;  %1965 = vmatpush.msrb.mxu1 %v1952_v39  ;;  %v1949_v59 = vld [vmem:[%s17404_s4 + $0x30] sm:$0xff]  ;;  %v1115_v32 = vadd.f32 %v13229_v24, %v917_v38  ;;  %v10663_v24 = vld [vmem:[%s17404_s4 + $0x120] sm:$0xff]  ;;  %v10738_v38 = vld [vmem:[%s17404_s4 + $0x278] sm:$0xff] }
 0x4eb   :  { %1966 = vmatpush.msrb.mxu1 %v1951_v47  ;;  %v1313_v39 = vadd.f32 %v13432_v10, %v1115_v32  ;;  %v10661_v10 = vld [vmem:[%s17404_s4 + $0x110] sm:$0xff]  ;;  %v10736_v32 = vld [vmem:[%s17404_s4 + $0x268] sm:$0xff] }
 0x4ec   :  { %3103 = vperm.xlu1 %11662, %v3081_v46   ;;  %v10628_v46 = vld [vmem:[%s17404_s4 + $0xc8] sm:$0xff] }
 0x4ed   :  { %2019 = vmatpush.msrb.mxu2 %v10628_v46  ;;  %1967 = vmatpush.msrb.mxu1 %v1950_v52  ;;  %v720_v46 = vadd.f32 %v12795_v12, %v517_v1  ;;  %v1511_v47 = vadd.f32 %v13653_v15, %v1313_v39  ;;  %v1918_v12 = vpop.permute.xlu0 %1917  ;;  %v1989_v1 = vld [vmem:[%s17405_s5 + $0x8] sm:$0xff]  ;;  %v10706_v39 = vld [vmem:[%s17404_s4 + $0x1f8] sm:$0xff] }
 0x4ef   :  { %1968 = vmatpush.msrb.mxu1 %v1949_v59 }
 0x4f1   :  { %1969 = vmatpush.msrb.mxu1 %v1948_v62  ;;  %v10659_v62 = vld [vmem:[%s17404_s4 + $0x100] sm:$0xff] }
 0x4f3   :  { %1970 = vmatpush.msrb.mxu1 %v1947_v0 }
 0x4f4   :  { %3118 = vperm.xlu1 %11662, %v3084_v51   ;;  %v10627_v51 = vld [vmem:[%s17404_s4 + $0xc0] sm:$0xff] }
 0x4f5   :  { %2020 = vmatpush.msrb.mxu2 %v10627_v51  ;;  %v918_v51 = vadd.f32 %v13052_v2, %v720_v46  ;;  %v10660_v2 = vld [vmem:[%s17404_s4 + $0x108] sm:$0xff] }
 0x4f7   :  { %v1116_v15 = vadd.f32 %v13273_v49, %v918_v51  ;;  %v10704_v51 = vld [vmem:[%s17404_s4 + $0x1e8] sm:$0xff] }
 0x4f9   :  { %v1314_v59 = vadd.f32 %v13458_v21, %v1116_v15  ;;  %v10702_v15 = vld [vmem:[%s17404_s4 + $0x1d8] sm:$0xff] }
 0x4fb   :  { %v1512_v49 = vadd.f32 %v13679_v29, %v1314_v59  ;;  %v10730_v59 = vld [vmem:[%s17404_s4 + $0x238] sm:$0xff] }
 0x4fc   :  { %4704 = vperm.xlu1 %11662, %v4694_v58   ;;  %v10626_v58 = vld [vmem:[%s17404_s4 + $0xb8] sm:$0xff] }
 0x4fd   :  { %2021 = vmatpush.msrb.mxu2 %v10626_v58 }
 0x4ff   :  { %2022 = vmatpush.msrb.mxu2 %v10625_v61 }
 0x504   :  { %7473 = vperm.xlu1 %11662, %v7467_v63   ;;  %v10624_v63 = vld [vmem:[%s17404_s4 + $0xa8] sm:$0xff] }
 0x505   :  { %2023 = vmatpush.msrb.mxu2 %v10624_v63 }
 0x507   :  { %2024 = vmatpush.msrb.mxu2 %v10623_v3 }
 0x50c   :  { %7488 = vperm.xlu1 %11662, %v7470_v9   ;;  %v10622_v9 = vld [vmem:[%s17404_s4 + $0x98] sm:$0xff] }
 0x50d   :  { %2025 = vmatpush.msrb.mxu2 %v10622_v9 }
 0x533   :  { %v1923_v9 = vpop.permute.xlu0 %1922 }
 0x546   :  { %v13892_v41 = vpop.f32.mrf.mxu3 }
 0x547   :  { %v1709_v35 = vadd.f32 %v13892_v41, %v1511_v47  ;;  %v520_v41 = vadd.f32 %v12581_v48, %v12598_v57  ;;  %v10705_v47 = vld [vmem:[%s17404_s4 + $0x1f0] sm:$0xff] }
 0x549   :  { %v721_v63 = vadd.f32 %v12833_v25, %v520_v41  ;;  %v523_v25 = vadd.f32 %v12638_v7, %v12636_v6  ;;  %v10701_v41 = vld [vmem:[%s17404_s4 + $0x1d0] sm:$0xff] }
 0x54b   :  { %v919_v3 = vadd.f32 %v13090_v18, %v721_v63  ;;  %v10699_v63 = vld [vmem:[%s17404_s4 + $0x1c0] sm:$0xff] }
 0x54d   :  { %v1117_v57 = vadd.f32 %v13311_v4, %v919_v3  ;;  %v1928_v4 = vpop.permute.xlu1 %1927  ;;  %v10637_v3 = vld [vmem:[%s17405_s5 + $0x50] sm:$0xff] }
 0x54e   :  { %v13906_v53 = vpop.f32.mrf.mxu3 }
 0x54f   :  { %v1315_v29 = vadd.f32 %v13496_v43, %v1117_v57  ;;  %v10727_v57 = vld [vmem:[%s17404_s4 + $0x220] sm:$0xff] }
 0x551   :  { %v1513_v18 = vadd.f32 %v13717_v55, %v1315_v29  ;;  %v10696_v29 = vld [vmem:[%s17404_s4 + $0x1a8] sm:$0xff] }
 0x556   :  { %v13914_v60 = vpop.f32.mrf.mxu3 }
 0x55e   :  { %v13919_v45 = vpop.f32.mrf.mxu3 }
 0x566   :  { %v1855_v54 = vpop.f32.mrf.mxu3 }
 0x567   :  { %v1856_v56 = vadd.f32 %v1855_v54, %v1836_v8  ;;  %v1946_v8 = vld [vmem:[%s17404_s4 + $0x18] sm:$0xff]  ;;  %v1945_v54 = vld [vmem:[%s17404_s4 + $0x10] sm:$0xff] }
 0x568   :  { %1971 = vmatpush.msrb.mxu1 %v1946_v8  ;;  %v1710_v8 = vadd.f32 %v13906_v53, %v1512_v49  ;;  %v10728_v49 = vld [vmem:[%s17404_s4 + $0x228] sm:$0xff] }
 0x569   :  { %10614 = vmatpush.msk.msrb.mxu0 %vm448_vm0, %v1856_v56  ;;  %v10621_v56 = vld [vmem:[%s17404_s4 + $0x90] sm:$0xff] }
 0x56a   :  { %10615 = vmatmul.msk.f32.vlgmr.msrb.gmra.mxu0 %vm435_vm1, %v10610_v11  ;;  %1972 = vmatpush.msrb.mxu1 %v1945_v54  ;;  %v1944_v11 = vld [vmem:[%s17404_s4 + $0x8] sm:$0xff] }
 0x56b   :  { %2026 = vmatpush.msrb.mxu2 %v10621_v56  ;;  %v722_v56 = vadd.f32 %v12871_v44, %v523_v25  ;;  %v10726_v25 = vld [vmem:[%s17404_s4 + $0x218] sm:$0xff] }
 0x56c   :  { %1973 = vmatpush.msrb.mxu1 %v1944_v11 }
 0x56d   :  { %v920_v11 = vadd.f32 %v13128_v37, %v722_v56  ;;  %v10695_v56 = vld [vmem:[%s17404_s4 + $0x1a0] sm:$0xff] }
 0x56f   :  { %v1118_v6 = vadd.f32 %v13349_v23, %v920_v11  ;;  %v10724_v11 = vld [vmem:[%s17404_s4 + $0x208] sm:$0xff] }
 0x571   :  { %v1316_v43 = vadd.f32 %v13534_v5, %v1118_v6  ;;  %v10723_v6 = vld [vmem:[%s17404_s4 + $0x200] sm:$0xff] }
 0x572   :  { %10616 = vmatmul.msk.f32.gmra.mxu0 %vm435_vm1, %v10611_v13  ;;  %v10620_v13 = vld [vmem:[%s17404_s4 + $0x88] sm:$0xff] }
 0x573   :  { %2027 = vmatpush.msrb.mxu2 %v10620_v13  ;;  %v1711_v13 = vadd.f32 %v13914_v60, %v1513_v18  ;;  %v1514_v55 = vadd.f32 %v13755_v17, %v1316_v43  ;;  %v10638_v18 = vld [vmem:[%s17405_s5 + $0x58] sm:$0xff] }
 0x574   :  { %v10770_v43 = vld [vmem:[%s17404_s4 + $0x2f8] sm:$0xff] }
 0x575   :  { %v1712_v37 = vadd.f32 %v13919_v45, %v1514_v55  ;;  %v10769_v55 = vld [vmem:[%s17404_s4 + $0x2f0] sm:$0xff] }
 0x57a   :  { %10617 = vmatmul.msk.f32.gmra.mxu0 %vm435_vm1, %v10612_v14  ;;  %v1943_v14 = vld [vmem:[%s17404_s4] sm:$0xff] }
 0x57b   :  { %1974 = vmatpush.msrb.mxu1 %v1943_v14 }
 0x57d   :  { %2199 = vmatpush.msra.mxu1 %v10674_v19 }
 0x57f   :  { %2200 = vmatpush.msra.mxu1 %v10673_v20  ;;  %v1933_v20 = vpop.permute.xlu1 %1932 }
 0x581   :  { %2201 = vmatpush.msra.mxu1 %v10672_v22 }
 0x582   :  { %10618 = vmatmul.msk.f32.gmra.mxu0 %vm435_vm1, %v10613_v16  ;;  %v10619_v16 = vld [vmem:[%s17404_s4 + $0x80] sm:$0xff] }
 0x583   :  { %2028 = vmatpush.msrb.mxu2 %v10619_v16  ;;  %2202 = vmatpush.msra.mxu1 %v10671_v26 }
 0x585   :  { %2203 = vmatpush.msra.mxu1 %v10670_v27 }
 0x587   :  { %2204 = vmatpush.msra.mxu1 %v10669_v28 }
 0x589   :  { %2205 = vmatpush.msra.mxu1 %v10668_v31  ;;  %v1988_v31 = vld [vmem:[%s17405_s5] sm:$0xff] }
 0x58b   :  { %2206 = vmatpush.msra.mxu1 %v10667_v36 }
 0x58d   :  { %2207 = vmatpush.msra.mxu1 %v10666_v50  ;;  %v10737_v50 = vld [vmem:[%s17404_s4 + $0x270] sm:$0xff] }
 0x58f   :  { %2208 = vmatpush.msra.mxu1 %v10665_v33  ;;  %v10635_v33 = vld [vmem:[%s17405_s5 + $0x40] sm:$0xff] }
 0x591   :  { %2209 = vmatpush.msra.mxu1 %v10664_v42  ;;  %v10735_v42 = vld [vmem:[%s17404_s4 + $0x260] sm:$0xff] }
 0x593   :  { %2210 = vmatpush.msra.mxu1 %v10663_v24  ;;  %v10734_v24 = vld [vmem:[%s17404_s4 + $0x258] sm:$0xff] }
 0x595   :  { %2211 = vmatpush.msra.mxu1 %v10662_v40  ;;  %v10703_v40 = vld [vmem:[%s17404_s4 + $0x1e0] sm:$0xff] }
 0x597   :  { %2212 = vmatpush.msra.mxu1 %v10661_v10  ;;  %v10732_v10 = vld [vmem:[%s17404_s4 + $0x248] sm:$0xff] }
 0x599   :  { %2213 = vmatpush.msra.mxu1 %v10660_v2 }
 0x59b   :  { %2214 = vmatpush.msra.mxu1 %v10659_v62  ;;  %v10729_v62 = vld [vmem:[%s17404_s4 + $0x230] sm:$0xff] }
 0x5e7   :  { %v1895_v52 = vpop.f32.mrf.mxu0 }
 0x5e8   :  { %v1907_v58 = vadd.f32 %v1895_v52, %v1709_v35  ;;  %v10733_v35 = vld [vmem:[%s17404_s4 + $0x250] sm:$0xff] }
 0x5e9   :  { %v1990_v52 = vld [vmem:[%s17405_s5 + $0x10] sm:$0xff] }
 0x5ea   :  { %v1935_v61 = vadd.f32 %v1918_v12, %v1907_v58  ;;  %v10636_v12 = vld [vmem:[%s17405_s5 + $0x48] sm:$0xff]  ;;  %v10731_v58 = vld [vmem:[%s17404_s4 + $0x240] sm:$0xff] }
 0x5ec   :  { %v14103_v0 = vmax.f32 %v1935_v61, 0.0  ;;  %v10700_v61 = vld [vmem:[%s17404_s4 + $0x1c8] sm:$0xff] }
 0x5ee   :  { %1975 = vmatmul.f32.vlgmr.msrb.gmra.mxu1 %v14103_v0  ;;  %2029 = vmatmul.f32.vlgmr.msrb.gmra.mxu2 %v14103_v0 }
 0x5ef   :  { %v1898_v48 = vpop.f32.mrf.mxu0 }
 0x5f0   :  { %v1908_v21 = vadd.f32 %v1898_v48, %v1710_v8  ;;  %v1991_v8 = vld [vmem:[%s17405_s5 + $0x18] sm:$0xff] }
 0x5f1   :  { %v10698_v48 = vld [vmem:[%s17404_s4 + $0x1b8] sm:$0xff] }
 0x5f2   :  { %v1936_v54 = vadd.f32 %v1923_v9, %v1908_v21  ;;  %v10697_v9 = vld [vmem:[%s17404_s4 + $0x1b0] sm:$0xff] }
 0x5f4   :  { %v14115_v53 = vmax.f32 %v1936_v54, 0.0  ;;  %v10725_v54 = vld [vmem:[%s17404_s4 + $0x210] sm:$0xff] }
 0x5f6   :  { %1978 = vmatmul.f32.gmra.mxu1 %v14115_v53  ;;  %2032 = vmatmul.f32.gmra.mxu2 %v14115_v53 }
 0x5f7   :  { %v1901_v14 = vpop.f32.mrf.mxu0 }
 0x5f8   :  { %v1909_v7 = vadd.f32 %v1901_v14, %v1711_v13  ;;  %v1992_v13 = vld [vmem:[%s17405_s5 + $0x20] sm:$0xff]  ;;  %v10694_v14 = vld [vmem:[%s17404_s4 + $0x198] sm:$0xff] }
 0x5fa   :  { %v1937_v44 = vadd.f32 %v1928_v4, %v1909_v7  ;;  %v10675_v4 = vld [vmem:[%s17405_s5 + $0x80] sm:$0xff]  ;;  %v10693_v7 = vld [vmem:[%s17404_s4 + $0x190] sm:$0xff] }
 0x5fc   :  { %v14124_v16 = vmax.f32 %v1937_v44, 0.0  ;;  %v10692_v44 = vld [vmem:[%s17404_s4 + $0x188] sm:$0xff] }
 0x5fe   :  { %1981 = vmatmul.f32.gmra.mxu1 %v14124_v16  ;;  %2035 = vmatmul.f32.gmra.mxu2 %v14124_v16 }
 0x5ff   :  { %v1904_v60 = vpop.f32.mrf.mxu0 }
 0x600   :  { %v1910_v19 = vadd.f32 %v1904_v60, %v1712_v37  ;;  %v10691_v37 = vld [vmem:[%s17404_s4 + $0x180] sm:$0xff] }
 0x601   :  { %v10639_v60 = vld [vmem:[%s17405_s5 + $0x60] sm:$0xff] }
 0x602   :  { %v1938_v22 = vadd.f32 %v1933_v20, %v1910_v19  ;;  %v10768_v19 = vld [vmem:[%s17404_s4 + $0x2e8] sm:$0xff] }
 0x603   :  { %v1993_v20 = vld [vmem:[%s17405_s5 + $0x28] sm:$0xff] }
 0x604   :  { %v14129_v26 = vmax.f32 %v1938_v22, 0.0  ;;  %v10676_v22 = vld [vmem:[%s17405_s5 + $0x88] sm:$0xff] }
 0x606   :  { %1984 = vmatmul.f32.gmra.mxu1 %v14129_v26  ;;  %2038 = vmatmul.f32.gmra.mxu2 %v14129_v26 }
 0x60e   :  { %2215 = vmatmul.f32.vlgmr.msra.gmra.mxu1 %v14103_v0 }
 0x616   :  { %2218 = vmatmul.f32.gmra.mxu1 %v14115_v53 }
 0x61e   :  { %2221 = vmatmul.f32.gmra.mxu1 %v14124_v16 }
 0x626   :  { %2224 = vmatmul.f32.gmra.mxu1 %v14129_v26 }
 0x66b   :  { %v1976_v23 = vpop.f32.mrf.mxu1 }
 0x671   :  { %v2030_v5 = vpop.f32.mrf.mxu2 }
 0x673   :  { %v1979_v17 = vpop.f32.mrf.mxu1 }
 0x679   :  { %v2033_v45 = vpop.f32.mrf.mxu2 }
 0x67b   :  { %v1982_v27 = vpop.f32.mrf.mxu1 }
 0x681   :  { %v2036_v28 = vpop.f32.mrf.mxu2 }
 0x683   :  { %v1985_v30 = vpop.f32.mrf.mxu1 }
 0x684   :  { %2153 = vmatpush.msra.mxu0 %v1985_v30  ;;  %v10677_v30 = vld [vmem:[%s17405_s5 + $0x90] sm:$0xff] }
 0x686   :  { %2154 = vmatpush.msra.mxu0 %v1982_v27  ;;  %v10764_v27 = vld [vmem:[%s17404_s4 + $0x2c8] sm:$0xff] }
 0x688   :  { %2155 = vmatpush.msra.mxu0 %v1979_v17  ;;  %v10765_v17 = vld [vmem:[%s17404_s4 + $0x2d0] sm:$0xff] }
 0x689   :  { %v2039_v34 = vpop.f32.mrf.mxu2 }
 0x68a   :  { %2088 = vmatpush.msrb.mxu3 %v2039_v34  ;;  %2156 = vmatpush.msra.mxu0 %v1976_v23  ;;  %v10767_v23 = vld [vmem:[%s17404_s4 + $0x2e0] sm:$0xff]  ;;  %v10762_v34 = vld [vmem:[%s17404_s4 + $0x2b8] sm:$0xff] }
 0x68b   :  { %10651 = vmatmul.msk.f32.vlgmr.msra.gmra.mxu0 %vm2051_vm2, %v1988_v31  ;;  %v14141_v36 = vpop.f32.mrf.mxu1  ;;  %v10763_v31 = vld [vmem:[%s17404_s4 + $0x2c0] sm:$0xff] }
 0x68c   :  { %2089 = vmatpush.msrb.mxu3 %v2036_v28  ;;  %2455 = vmatpush.msrb.mxu0 %v10738_v38  ;;  %v1994_v28 = vld [vmem:[%s17405_s5 + $0x30] sm:$0xff] }
 0x68d   :  { %v10641_v38 = vld [vmem:[%s17405_s5 + $0x70] sm:$0xff] }
 0x68e   :  { %2090 = vmatpush.msrb.mxu3 %v2033_v45  ;;  %2456 = vmatpush.msrb.mxu0 %v10737_v50  ;;  %v10640_v45 = vld [vmem:[%s17405_s5 + $0x68] sm:$0xff] }
 0x68f   :  { %v10760_v50 = vld [vmem:[%s17404_s4 + $0x2a8] sm:$0xff] }
 0x690   :  { %2091 = vmatpush.msrb.mxu3 %v2030_v5  ;;  %2457 = vmatpush.msrb.mxu0 %v10736_v32  ;;  %v10766_v5 = vld [vmem:[%s17404_s4 + $0x2d8] sm:$0xff] }
 0x691   :  { %10643 = vmatmul.msk.f32.vlgmr.msrb.gmra.mxu3 %vm2051_vm2, %v10635_v33  ;;  %v1995_v32 = vld [vmem:[%s17405_s5 + $0x38] sm:$0xff] }
 0x692   :  { %2327 = vmatpush.msra.mxu3 %v10706_v39  ;;  %2458 = vmatpush.msrb.mxu0 %v10735_v42  ;;  %v10678_v33 = vld [vmem:[%s17405_s5 + $0x98] sm:$0xff]  ;;  %v10757_v42 = vld [vmem:[%s17404_s4 + $0x290] sm:$0xff] }
 0x693   :  { %10652 = vmatmul.msk.f32.gmra.mxu0 %vm2051_vm2, %v1989_v1  ;;  %v2219_v46 = vpop.f32.mrf.mxu1  ;;  %v10759_v1 = vld [vmem:[%s17404_s4 + $0x2a0] sm:$0xff]  ;;  %v10758_v39 = vld [vmem:[%s17404_s4 + $0x298] sm:$0xff] }
 0x694   :  { %2328 = vmatpush.msra.mxu3 %v10705_v47  ;;  %2459 = vmatpush.msrb.mxu0 %v10734_v24  ;;  %v10756_v47 = vld [vmem:[%s17404_s4 + $0x288] sm:$0xff]  ;;  %v10679_v24 = vld [vmem:[%s17405_s5 + $0xa0] sm:$0xff] }
 0x696   :  { %2329 = vmatpush.msra.mxu3 %v10704_v51  ;;  %2460 = vmatpush.msrb.mxu0 %v10733_v35  ;;  %v10755_v51 = vld [vmem:[%s17404_s4 + $0x280] sm:$0xff]  ;;  %v10680_v35 = vld [vmem:[%s17405_s5 + $0xa8] sm:$0xff] }
 0x698   :  { %2330 = vmatpush.msra.mxu3 %v10703_v40  ;;  %2461 = vmatpush.msrb.mxu0 %v10732_v10  ;;  %v10681_v40 = vld [vmem:[%s17405_s5 + $0xb0] sm:$0xff]  ;;  %v10682_v10 = vld [vmem:[%s17405_s5 + $0xb8] sm:$0xff] }
 0x699   :  { %10644 = vmatmul.msk.f32.gmra.mxu3 %vm2051_vm2, %v10636_v12 }
 0x69a   :  { %2331 = vmatpush.msra.mxu3 %v10702_v15  ;;  %2462 = vmatpush.msrb.mxu0 %v10731_v58 }
 0x69b   :  { %10653 = vmatmul.msk.f32.gmra.mxu0 %vm2051_vm2, %v1990_v52  ;;  %v2222_v2 = vpop.f32.mrf.mxu1 }
 0x69c   :  { %2332 = vmatpush.msra.mxu3 %v10701_v41  ;;  %2463 = vmatpush.msrb.mxu0 %v10730_v59 }
 0x69e   :  { %2333 = vmatpush.msra.mxu3 %v10700_v61  ;;  %2464 = vmatpush.msrb.mxu0 %v10729_v62 }
 0x6a0   :  { %2334 = vmatpush.msra.mxu3 %v10699_v63  ;;  %2465 = vmatpush.msrb.mxu0 %v10728_v49 }
 0x6a1   :  { %10645 = vmatmul.msk.f32.gmra.mxu3 %vm2051_vm2, %v10637_v3 }
 0x6a2   :  { %2335 = vmatpush.msra.mxu3 %v10698_v48  ;;  %2466 = vmatpush.msrb.mxu0 %v10727_v57 }
 0x6a3   :  { %10654 = vmatmul.msk.f32.gmra.mxu0 %vm2051_vm2, %v1991_v8  ;;  %v2225_v21 = vpop.f32.mrf.mxu1 }
 0x6a4   :  { %2273 = vmatpush.msra.mxu2 %v2225_v21  ;;  %2336 = vmatpush.msra.mxu3 %v10697_v9 }
 0x6a5   :  { %2467 = vmatpush.msrb.mxu0 %v10726_v25 }
 0x6a6   :  { %2274 = vmatpush.msra.mxu2 %v2222_v2  ;;  %2337 = vmatpush.msra.mxu3 %v10696_v29 }
 0x6a7   :  { %2468 = vmatpush.msrb.mxu0 %v10725_v54 }
 0x6a8   :  { %2275 = vmatpush.msra.mxu2 %v2219_v46  ;;  %2338 = vmatpush.msra.mxu3 %v10695_v56  ;;  %v10642_v46 = vld [vmem:[%s17405_s5 + $0x78] sm:$0xff] }
 0x6a9   :  { %10646 = vmatmul.msk.f32.gmra.mxu3 %vm2051_vm2, %v10638_v18  ;;  %2469 = vmatpush.msrb.mxu0 %v10724_v11 }
 0x6aa   :  { %2276 = vmatpush.msra.mxu2 %v14141_v36  ;;  %2339 = vmatpush.msra.mxu3 %v10694_v14  ;;  %v10761_v36 = vld [vmem:[%s17404_s4 + $0x2b0] sm:$0xff] }
 0x6ab   :  { %10655 = vmatmul.msk.f32.gmra.mxu0 %vm2051_vm2, %v1992_v13  ;;  %10683 = vmatmul.msk.f32.vlgmr.msra.gmra.mxu2 %vm2051_vm2, %v10675_v4 }
 0x6ac   :  { %2470 = vmatpush.msrb.mxu0 %v10723_v6  ;;  %2340 = vmatpush.msra.mxu3 %v10693_v7 }
 0x6ad   :  { %2583 = vmatpush.msrb.mxu2 %v10770_v43 }
 0x6ae   :  { %2341 = vmatpush.msra.mxu3 %v10692_v44 }
 0x6af   :  { %2584 = vmatpush.msrb.mxu2 %v10769_v55  ;;  %v10739_v55 = vld [vmem:[%s17405_s5 + $0x100] sm:$0xff] }
 0x6b0   :  { %2342 = vmatpush.msra.mxu3 %v10691_v37 }
 0x6b1   :  { %10647 = vmatmul.msk.f32.gmra.mxu3 %vm2051_vm2, %v10639_v60  ;;  %2585 = vmatpush.msrb.mxu2 %v10768_v19  ;;  %v10834_v60 = vld [vmem:[%s17404_s4 + $0x3f8] sm:$0xff]  ;;  %v10833_v19 = vld [vmem:[%s17404_s4 + $0x3f0] sm:$0xff] }
 0x6b3   :  { %10656 = vmatmul.msk.f32.gmra.mxu0 %vm2051_vm2, %v1993_v20  ;;  %10684 = vmatmul.msk.f32.gmra.mxu2 %vm2051_vm2, %v10676_v22  ;;  %v10832_v22 = vld [vmem:[%s17404_s4 + $0x3e8] sm:$0xff] }
 0x6b4   :  { %2586 = vmatpush.msrb.mxu2 %v10767_v23  ;;  %v10740_v23 = vld [vmem:[%s17405_s5 + $0x108] sm:$0xff] }
 0x6b6   :  { %2587 = vmatpush.msrb.mxu2 %v10766_v5 }
 0x6b8   :  { %2588 = vmatpush.msrb.mxu2 %v10765_v17  ;;  %v10831_v17 = vld [vmem:[%s17404_s4 + $0x3e0] sm:$0xff] }
 0x6b9   :  { %10648 = vmatmul.msk.f32.gmra.mxu3 %vm2051_vm2, %v10640_v45  ;;  %v10830_v45 = vld [vmem:[%s17404_s4 + $0x3d8] sm:$0xff] }
 0x6ba   :  { %2589 = vmatpush.msrb.mxu2 %v10764_v27  ;;  %v10829_v27 = vld [vmem:[%s17404_s4 + $0x3d0] sm:$0xff] }
 0x6bb   :  { %10657 = vmatmul.msk.f32.gmra.mxu0 %vm2051_vm2, %v1994_v28  ;;  %10685 = vmatmul.msk.f32.gmra.mxu2 %vm2051_vm2, %v10677_v30  ;;  %v10707_v28 = vld [vmem:[%s17405_s5 + $0xc0] sm:$0xff]  ;;  %v10802_v30 = vld [vmem:[%s17404_s4 + $0x378] sm:$0xff] }
 0x6bc   :  { %2590 = vmatpush.msrb.mxu2 %v10763_v31  ;;  %v10828_v31 = vld [vmem:[%s17404_s4 + $0x3c8] sm:$0xff] }
 0x6be   :  { %2591 = vmatpush.msrb.mxu2 %v10762_v34  ;;  %v10741_v34 = vld [vmem:[%s17405_s5 + $0x110] sm:$0xff] }
 0x6c0   :  { %2592 = vmatpush.msrb.mxu2 %v10761_v36 }
 0x6c1   :  { %10649 = vmatmul.msk.f32.gmra.mxu3 %vm2051_vm2, %v10641_v38  ;;  %v10801_v38 = vld [vmem:[%s17404_s4 + $0x370] sm:$0xff] }
 0x6c2   :  { %2593 = vmatpush.msrb.mxu2 %v10760_v50  ;;  %v10827_v50 = vld [vmem:[%s17404_s4 + $0x3c0] sm:$0xff] }
 0x6c3   :  { %10658 = vmatmul.msk.f32.gmra.mxu0 %vm2051_vm2, %v1995_v32  ;;  %10686 = vmatmul.msk.f32.gmra.mxu2 %vm2051_vm2, %v10678_v33  ;;  %v10800_v32 = vld [vmem:[%s17404_s4 + $0x368] sm:$0xff]  ;;  %v10826_v33 = vld [vmem:[%s17404_s4 + $0x3b8] sm:$0xff] }
 0x6c4   :  { %2594 = vmatpush.msrb.mxu2 %v10759_v1  ;;  %v10799_v1 = vld [vmem:[%s17404_s4 + $0x360] sm:$0xff] }
 0x6c6   :  { %2595 = vmatpush.msrb.mxu2 %v10758_v39  ;;  %v10708_v39 = vld [vmem:[%s17405_s5 + $0xc8] sm:$0xff] }
 0x6c8   :  { %2596 = vmatpush.msrb.mxu2 %v10757_v42  ;;  %v10825_v42 = vld [vmem:[%s17404_s4 + $0x3b0] sm:$0xff] }
 0x6c9   :  { %10650 = vmatmul.msk.f32.gmra.mxu3 %vm2051_vm2, %v10642_v46  ;;  %v10798_v46 = vld [vmem:[%s17404_s4 + $0x358] sm:$0xff] }
 0x6ca   :  { %2597 = vmatpush.msrb.mxu2 %v10756_v47  ;;  %v10824_v47 = vld [vmem:[%s17404_s4 + $0x3a8] sm:$0xff] }
 0x6cb   :  { %10687 = vmatmul.msk.f32.gmra.mxu2 %vm2051_vm2, %v10679_v24  ;;  %2471 = vmatmul.f32.vlgmr.msrb.gmra.mxu0 %v14103_v0  ;;  %v10742_v24 = vld [vmem:[%s17405_s5 + $0x118] sm:$0xff] }
 0x6cc   :  { %2598 = vmatpush.msrb.mxu2 %v10755_v51 }
 0x6d1   :  { %2343 = vmatmul.f32.vlgmr.msra.gmra.mxu3 %v14103_v0 }
 0x6d3   :  { %10688 = vmatmul.msk.f32.gmra.mxu2 %vm2051_vm2, %v10680_v35  ;;  %2474 = vmatmul.f32.gmra.mxu0 %v14115_v53  ;;  %v10797_v35 = vld [vmem:[%s17404_s4 + $0x350] sm:$0xff] }
 0x6d9   :  { %2346 = vmatmul.f32.gmra.mxu3 %v14115_v53 }
 0x6db   :  { %10689 = vmatmul.msk.f32.gmra.mxu2 %vm2051_vm2, %v10681_v40  ;;  %2477 = vmatmul.f32.gmra.mxu0 %v14124_v16  ;;  %v10823_v40 = vld [vmem:[%s17404_s4 + $0x3a0] sm:$0xff] }
 0x6e1   :  { %2349 = vmatmul.f32.gmra.mxu3 %v14124_v16 }
 0x6e3   :  { %10690 = vmatmul.msk.f32.gmra.mxu2 %vm2051_vm2, %v10682_v10  ;;  %2480 = vmatmul.f32.gmra.mxu0 %v14129_v26  ;;  %v10796_v10 = vld [vmem:[%s17404_s4 + $0x348] sm:$0xff] }
 0x6e9   :  { %2352 = vmatmul.f32.gmra.mxu3 %v14129_v26 }
 0x6eb   :  { %2599 = vmatmul.f32.vlgmr.msrb.gmra.mxu2 %v14103_v0 }
 0x6f3   :  { %2602 = vmatmul.f32.gmra.mxu2 %v14115_v53 }
 0x6fb   :  { %2605 = vmatmul.f32.gmra.mxu2 %v14124_v16 }
 0x703   :  { %2608 = vmatmul.f32.gmra.mxu2 %v14129_v26 }
 0x708   :  { %v14392_v12 = vpop.f32.mrf.mxu0 }
 0x710   :  { %v14394_v52 = vpop.f32.mrf.mxu0 }
 0x714   :  { %v14396_v15 = vpop.f32.mrf.mxu3 }
 0x718   :  { %v14398_v58 = vpop.f32.mrf.mxu0 }
 0x71c   :  { %v14400_v2 = vpop.f32.mrf.mxu3 }
 0x720   :  { %v14402_v41 = vpop.f32.mrf.mxu0 }
 0x724   :  { %v14404_v59 = vpop.f32.mrf.mxu3 }
 0x728   :  { %v14406_v61 = vpop.f32.mrf.mxu0 }
 0x72c   :  { %v14408_v62 = vpop.f32.mrf.mxu3 }
 0x72e   :  { %v14410_v63 = vpop.f32.mrf.mxu2 }
 0x730   :  { %v14412_v49 = vpop.f32.mrf.mxu0 }
 0x734   :  { %v14414_v3 = vpop.f32.mrf.mxu3 }
 0x736   :  { %v14416_v8 = vpop.f32.mrf.mxu2 }
 0x738   :  { %v14418_v48 = vpop.f32.mrf.mxu0 }
 0x73c   :  { %v14420_v57 = vpop.f32.mrf.mxu3 }
 0x73e   :  { %v14422_v21 = vpop.f32.mrf.mxu2 }
 0x740   :  { %v14424_v9 = vpop.f32.mrf.mxu0 }
 0x744   :  { %v14426_v25 = vpop.f32.mrf.mxu3 }
 0x746   :  { %v14428_v29 = vpop.f32.mrf.mxu2 }
 0x748   :  { %v2472_v54 = vpop.f32.mrf.mxu0 }
 0x74c   :  { %v14430_v56 = vpop.f32.mrf.mxu3 }
 0x74e   :  { %v14432_v18 = vpop.f32.mrf.mxu2 }
 0x750   :  { %v2475_v11 = vpop.f32.mrf.mxu0 }
 0x754   :  { %v2344_v13 = vpop.f32.mrf.mxu3 }
 0x756   :  { %v14434_v4 = vpop.f32.mrf.mxu2 }
 0x758   :  { %v2478_v14 = vpop.f32.mrf.mxu0 }
 0x75c   :  { %v2347_v6 = vpop.f32.mrf.mxu3 }
 0x75e   :  { %v14436_v7 = vpop.f32.mrf.mxu2 }
 0x760   :  { %v2481_v43 = vpop.f32.mrf.mxu0 }
 0x761   :  { %2529 = vmatpush.msrb.mxu3 %v2481_v43  ;;  %v10820_v43 = vld [vmem:[%s17404_s4 + $0x388] sm:$0xff] }
 0x763   :  { %2530 = vmatpush.msrb.mxu3 %v2478_v14  ;;  %v10821_v14 = vld [vmem:[%s17404_s4 + $0x390] sm:$0xff] }
 0x764   :  { %v2350_v44 = vpop.f32.mrf.mxu3 }
 0x765   :  { %2531 = vmatpush.msrb.mxu3 %v2475_v11  ;;  %v10795_v11 = vld [vmem:[%s17404_s4 + $0x340] sm:$0xff] }
 0x766   :  { %v14441_v37 = vpop.f32.mrf.mxu2 }
 0x767   :  { %2532 = vmatpush.msrb.mxu3 %v2472_v54  ;;  %v10822_v54 = vld [vmem:[%s17404_s4 + $0x398] sm:$0xff] }
 0x768   :  { %10747 = vmatmul.msk.f32.vlgmr.msrb.gmra.mxu3 %vm2051_vm2, %v10739_v55 }
 0x769   :  { %2839 = vmatpush.msra.mxu3 %v10834_v60  ;;  %v10793_v60 = vld [vmem:[%s17404_s4 + $0x330] sm:$0xff] }
 0x76b   :  { %2840 = vmatpush.msra.mxu3 %v10833_v19  ;;  %v10819_v19 = vld [vmem:[%s17404_s4 + $0x380] sm:$0xff] }
 0x76c   :  { %v2353_v20 = vpop.f32.mrf.mxu3 }
 0x76d   :  { %2401 = vmatpush.msrb.mxu1 %v2353_v20  ;;  %2841 = vmatpush.msra.mxu3 %v10832_v22  ;;  %v10792_v20 = vld [vmem:[%s17404_s4 + $0x328] sm:$0xff]  ;;  %v10710_v22 = vld [vmem:[%s17405_s5 + $0xd8] sm:$0xff] }
 0x76e   :  { %v14456_v5 = vpop.f32.mrf.mxu2 }
 0x76f   :  { %2402 = vmatpush.msrb.mxu1 %v2350_v44  ;;  %2842 = vmatpush.msra.mxu3 %v10831_v17  ;;  %v10743_v44 = vld [vmem:[%s17405_s5 + $0x120] sm:$0xff] }
 0x770   :  { %10748 = vmatmul.msk.f32.gmra.mxu3 %vm2051_vm2, %v10740_v23  ;;  %v10791_v23 = vld [vmem:[%s17404_s4 + $0x320] sm:$0xff] }
 0x771   :  { %2403 = vmatpush.msrb.mxu1 %v2347_v6  ;;  %2843 = vmatpush.msra.mxu3 %v10830_v45  ;;  %v10794_v6 = vld [vmem:[%s17404_s4 + $0x338] sm:$0xff]  ;;  %v10771_v17 = vld [vmem:[%s17405_s5 + $0x140] sm:$0xff] }
 0x772   :  { %v10790_v45 = vld [vmem:[%s17404_s4 + $0x318] sm:$0xff] }
 0x773   :  { %2404 = vmatpush.msrb.mxu1 %v2344_v13  ;;  %2844 = vmatpush.msra.mxu3 %v10829_v27  ;;  %v10709_v13 = vld [vmem:[%s17405_s5 + $0xd0] sm:$0xff]  ;;  %v10744_v27 = vld [vmem:[%s17405_s5 + $0x128] sm:$0xff] }
 0x774   :  { %10715 = vmatmul.msk.f32.vlgmr.msrb.gmra.mxu1 %vm2051_vm2, %v10707_v28  ;;  %v10789_v28 = vld [vmem:[%s17404_s4 + $0x310] sm:$0xff] }
 0x775   :  { %2711 = vmatpush.msra.mxu1 %v10802_v30  ;;  %2845 = vmatpush.msra.mxu3 %v10828_v31  ;;  %v10866_v30 = vld [vmem:[%s17404_s4 + $0x478] sm:$0xff]  ;;  %v10865_v31 = vld [vmem:[%s17404_s4 + $0x470] sm:$0xff] }
 0x776   :  { %v2603_v36 = vpop.f32.mrf.mxu2 }
 0x777   :  { %2712 = vmatpush.msra.mxu1 %v10801_v38  ;;  %2846 = vmatpush.msra.mxu3 %v10827_v50  ;;  %v10787_v38 = vld [vmem:[%s17404_s4 + $0x300] sm:$0xff]  ;;  %v10772_v50 = vld [vmem:[%s17405_s5 + $0x148] sm:$0xff] }
 0x778   :  { %10749 = vmatmul.msk.f32.gmra.mxu3 %vm2051_vm2, %v10741_v34  ;;  %v10711_v34 = vld [vmem:[%s17405_s5 + $0xe0] sm:$0xff] }
 0x779   :  { %2713 = vmatpush.msra.mxu1 %v10800_v32  ;;  %2847 = vmatpush.msra.mxu3 %v10826_v33  ;;  %v10863_v32 = vld [vmem:[%s17404_s4 + $0x460] sm:$0xff]  ;;  %v10745_v33 = vld [vmem:[%s17405_s5 + $0x130] sm:$0xff] }
 0x77b   :  { %2714 = vmatpush.msra.mxu1 %v10799_v1  ;;  %2848 = vmatpush.msra.mxu3 %v10825_v42  ;;  %v10862_v1 = vld [vmem:[%s17404_s4 + $0x458] sm:$0xff]  ;;  %v10860_v42 = vld [vmem:[%s17404_s4 + $0x448] sm:$0xff] }
 0x77c   :  { %10716 = vmatmul.msk.f32.gmra.mxu1 %vm2051_vm2, %v10708_v39  ;;  %v10861_v39 = vld [vmem:[%s17404_s4 + $0x450] sm:$0xff] }
 0x77d   :  { %2715 = vmatpush.msra.mxu1 %v10798_v46  ;;  %2849 = vmatpush.msra.mxu3 %v10824_v47  ;;  %v10712_v46 = vld [vmem:[%s17405_s5 + $0xe8] sm:$0xff]  ;;  %v10773_v47 = vld [vmem:[%s17405_s5 + $0x150] sm:$0xff] }
 0x77e   :  { %v2606_v51 = vpop.f32.mrf.mxu2 }
 0x77f   :  { %2716 = vmatpush.msra.mxu1 %v10797_v35  ;;  %2850 = vmatpush.msra.mxu3 %v10823_v40  ;;  %v10858_v35 = vld [vmem:[%s17404_s4 + $0x438] sm:$0xff]  ;;  %v10857_v40 = vld [vmem:[%s17404_s4 + $0x430] sm:$0xff] }
 0x780   :  { %10750 = vmatmul.msk.f32.gmra.mxu3 %vm2051_vm2, %v10742_v24  ;;  %v10859_v24 = vld [vmem:[%s17404_s4 + $0x440] sm:$0xff] }
 0x781   :  { %2717 = vmatpush.msra.mxu1 %v10796_v10  ;;  %2851 = vmatpush.msra.mxu3 %v10822_v54  ;;  %v10856_v10 = vld [vmem:[%s17404_s4 + $0x428] sm:$0xff]  ;;  %v10713_v54 = vld [vmem:[%s17405_s5 + $0xf0] sm:$0xff] }
 0x783   :  { %2718 = vmatpush.msra.mxu1 %v10795_v11  ;;  %2852 = vmatpush.msra.mxu3 %v10821_v14  ;;  %v10774_v11 = vld [vmem:[%s17405_s5 + $0x158] sm:$0xff] }
 0x784   :  { %10717 = vmatmul.msk.f32.gmra.mxu1 %vm2051_vm2, %v10709_v13  ;;  %v10855_v13 = vld [vmem:[%s17404_s4 + $0x420] sm:$0xff]  ;;  %v10854_v14 = vld [vmem:[%s17404_s4 + $0x418] sm:$0xff] }
 0x785   :  { %2719 = vmatpush.msra.mxu1 %v10794_v6  ;;  %2853 = vmatpush.msra.mxu3 %v10820_v43  ;;  %v10853_v6 = vld [vmem:[%s17404_s4 + $0x410] sm:$0xff]  ;;  %v10852_v43 = vld [vmem:[%s17404_s4 + $0x408] sm:$0xff] }
 0x786   :  { %v2609_v55 = vpop.f32.mrf.mxu2 }
 0x787   :  { %2657 = vmatpush.msra.mxu0 %v2609_v55  ;;  %2720 = vmatpush.msra.mxu1 %v10793_v60  ;;  %v10775_v55 = vld [vmem:[%s17405_s5 + $0x160] sm:$0xff] }
 0x788   :  { %10751 = vmatmul.msk.f32.gmra.mxu3 %vm2051_vm2, %v10743_v44  ;;  %v10714_v44 = vld [vmem:[%s17405_s5 + $0xf8] sm:$0xff]  ;;  %v10851_v60 = vld [vmem:[%s17404_s4 + $0x400] sm:$0xff] }
 0x789   :  { %2658 = vmatpush.msra.mxu0 %v2606_v51  ;;  %2854 = vmatpush.msra.mxu3 %v10819_v19  ;;  %v10746_v51 = vld [vmem:[%s17405_s5 + $0x138] sm:$0xff]  ;;  %v10776_v19 = vld [vmem:[%s17405_s5 + $0x168] sm:$0xff] }
 0x78a   :  { %2721 = vmatpush.msra.mxu1 %v10792_v20  ;;  %v10777_v20 = vld [vmem:[%s17405_s5 + $0x170] sm:$0xff] }
 0x78b   :  { %2659 = vmatpush.msra.mxu0 %v2603_v36  ;;  %v10864_v36 = vld [vmem:[%s17404_s4 + $0x468] sm:$0xff] }
 0x78c   :  { %10718 = vmatmul.msk.f32.gmra.mxu1 %vm2051_vm2, %v10710_v22  ;;  %v10778_v22 = vld [vmem:[%s17405_s5 + $0x178] sm:$0xff] }
 0x78d   :  { %2660 = vmatpush.msra.mxu0 %v14456_v5  ;;  %2722 = vmatpush.msra.mxu1 %v10791_v23  ;;  %v10788_v5 = vld [vmem:[%s17404_s4 + $0x308] sm:$0xff] }
 0x78e   :  { %10779 = vmatmul.msk.f32.vlgmr.msra.gmra.mxu0 %vm2051_vm2, %v10771_v17 }
 0x78f   :  { %2723 = vmatpush.msra.mxu1 %v10790_v45  ;;  %2967 = vmatpush.msrb.mxu0 %v10866_v30 }
 0x790   :  { %10752 = vmatmul.msk.f32.gmra.mxu3 %vm2051_vm2, %v10744_v27 }
 0x791   :  { %2724 = vmatpush.msra.mxu1 %v10789_v28  ;;  %2968 = vmatpush.msrb.mxu0 %v10865_v31 }
 0x793   :  { %2725 = vmatpush.msra.mxu1 %v10788_v5  ;;  %2969 = vmatpush.msrb.mxu0 %v10864_v36 }
 0x794   :  { %10719 = vmatmul.msk.f32.gmra.mxu1 %vm2051_vm2, %v10711_v34 }
 0x795   :  { %2726 = vmatpush.msra.mxu1 %v10787_v38  ;;  %2970 = vmatpush.msrb.mxu0 %v10863_v32 }
 0x796   :  { %10780 = vmatmul.msk.f32.gmra.mxu0 %vm2051_vm2, %v10772_v50 }
 0x797   :  { %2971 = vmatpush.msrb.mxu0 %v10862_v1 }
 0x798   :  { %10753 = vmatmul.msk.f32.gmra.mxu3 %vm2051_vm2, %v10745_v33 }
 0x799   :  { %2972 = vmatpush.msrb.mxu0 %v10861_v39 }
 0x79b   :  { %2973 = vmatpush.msrb.mxu0 %v10860_v42 }
 0x79c   :  { %10720 = vmatmul.msk.f32.gmra.mxu1 %vm2051_vm2, %v10712_v46 }
 0x79d   :  { %2974 = vmatpush.msrb.mxu0 %v10859_v24 }
 0x79e   :  { %10781 = vmatmul.msk.f32.gmra.mxu0 %vm2051_vm2, %v10773_v47 }
 0x79f   :  { %2975 = vmatpush.msrb.mxu0 %v10858_v35 }
 0x7a0   :  { %10754 = vmatmul.msk.f32.gmra.mxu3 %vm2051_vm2, %v10746_v51 }
 0x7a1   :  { %2976 = vmatpush.msrb.mxu0 %v10857_v40 }
 0x7a3   :  { %2977 = vmatpush.msrb.mxu0 %v10856_v10 }
 0x7a4   :  { %10721 = vmatmul.msk.f32.gmra.mxu1 %vm2051_vm2, %v10713_v54 }
 0x7a5   :  { %2978 = vmatpush.msrb.mxu0 %v10855_v13 }
 0x7a6   :  { %10782 = vmatmul.msk.f32.gmra.mxu0 %vm2051_vm2, %v10774_v11 }
 0x7a7   :  { %2979 = vmatpush.msrb.mxu0 %v10854_v14  ;;  %v3078_v14 = vld [vmem:[%s17406_s6] sm:$0xff] }
 0x7a8   :  { %2855 = vmatmul.f32.vlgmr.msra.gmra.mxu3 %v14103_v0  ;;  %3088 = vperm.xlu2 %11663, %v3078_v14   ;;  %v4695_v14 = vld [vmem:[%s17409_s9 + $0x10] sm:$0xff] }
 0x7a9   :  { %2980 = vmatpush.msrb.mxu0 %v10853_v6  ;;  %v10835_v6 = vld [vmem:[%s17405_s5 + $0x1c0] sm:$0xff] }
 0x7ab   :  { %2981 = vmatpush.msrb.mxu0 %v10852_v43 }
 0x7ac   :  { %10722 = vmatmul.msk.f32.gmra.mxu1 %vm2051_vm2, %v10714_v44 }
 0x7ad   :  { %2982 = vmatpush.msrb.mxu0 %v10851_v60  ;;  %v10803_v60 = vld [vmem:[%s17405_s5 + $0x180] sm:$0xff] }
 0x7ae   :  { %10783 = vmatmul.msk.f32.gmra.mxu0 %vm2051_vm2, %v10775_v55  ;;  %v3079_v55 = vld [vmem:[%s17406_s6 + $0x8] sm:$0xff] }
 0x7b0   :  { %2858 = vmatmul.f32.gmra.mxu3 %v14115_v53  ;;  %3093 = vperm.xlu2 %11663, %v3079_v55   ;;  %v10839_v55 = vld [vmem:[%s17405_s5 + $0x1e0] sm:$0xff] }
 0x7b4   :  { %2727 = vmatmul.f32.vlgmr.msra.gmra.mxu1 %v14103_v0 }
 0x7b6   :  { %10784 = vmatmul.msk.f32.gmra.mxu0 %vm2051_vm2, %v10776_v19  ;;  %v10836_v19 = vld [vmem:[%s17405_s5 + $0x1c8] sm:$0xff] }
 0x7b8   :  { %2861 = vmatmul.f32.gmra.mxu3 %v14124_v16 }
 0x7bc   :  { %2730 = vmatmul.f32.gmra.mxu1 %v14115_v53 }
 0x7be   :  { %10785 = vmatmul.msk.f32.gmra.mxu0 %vm2051_vm2, %v10777_v20 }
 0x7c0   :  { %2864 = vmatmul.f32.gmra.mxu3 %v14129_v26 }
 0x7c4   :  { %2733 = vmatmul.f32.gmra.mxu1 %v14124_v16 }
 0x7c6   :  { %10786 = vmatmul.msk.f32.gmra.mxu0 %vm2051_vm2, %v10778_v22  ;;  %v3082_v22 = vld [vmem:[%s17406_s6 + $0x20] sm:$0xff] }
 0x7c7   :  { %3108 = vperm.xlu2 %11663, %v3082_v22   ;;  %v9919_v22 = vld [vmem:[#allocation2] sm:$0x1] }
 0x7cc   :  { %2736 = vmatmul.f32.gmra.mxu1 %v14129_v26 }
 0x7ce   :  { %2983 = vmatmul.f32.vlgmr.msrb.gmra.mxu0 %v14103_v0 }
 0x7d6   :  { %2986 = vmatmul.f32.gmra.mxu0 %v14115_v53 }
 0x7de   :  { %2989 = vmatmul.f32.gmra.mxu0 %v14124_v16 }
 0x7e6   :  { %2992 = vmatmul.f32.gmra.mxu0 %v14129_v26 }
 0x7eb   :  { %v14695_v23 = vpop.f32.mrf.mxu3 }
 0x7f1   :  { %v14697_v17 = vpop.f32.mrf.mxu1 }
 0x7f3   :  { %v14699_v45 = vpop.f32.mrf.mxu3 }
 0x7f9   :  { %v14701_v27 = vpop.f32.mrf.mxu1 }
 0x7fb   :  { %v14703_v28 = vpop.f32.mrf.mxu3 }
 0x801   :  { %v14705_v30 = vpop.f32.mrf.mxu1 }
 0x803   :  { %v14707_v5 = vpop.f32.mrf.mxu3 }
 0x809   :  { %v14709_v0 = vpop.f32.mrf.mxu1 }
 0x80b   :  { %v14711_v53 = vpop.f32.mrf.mxu3  ;;  %v14713_v16 = vpop.f32.mrf.mxu0 }
 0x811   :  { %v14715_v26 = vpop.f32.mrf.mxu1 }
 0x813   :  { %v14717_v31 = vpop.f32.mrf.mxu3  ;;  %v14719_v34 = vpop.f32.mrf.mxu0 }
 0x819   :  { %v14721_v36 = vpop.f32.mrf.mxu1 }
 0x81b   :  { %v14723_v38 = vpop.f32.mrf.mxu3  ;;  %v14725_v50 = vpop.f32.mrf.mxu0 }
 0x821   :  { %v14727_v32 = vpop.f32.mrf.mxu1 }
 0x823   :  { %v14729_v33 = vpop.f32.mrf.mxu3  ;;  %v14731_v1 = vpop.f32.mrf.mxu0 }
 0x829   :  { %v14733_v39 = vpop.f32.mrf.mxu1 }
 0x82b   :  { %v14735_v42 = vpop.f32.mrf.mxu0  ;;  %v2856_v46 = vpop.f32.mrf.mxu3 }
 0x831   :  { %v2728_v47 = vpop.f32.mrf.mxu1 }
 0x833   :  { %v14737_v24 = vpop.f32.mrf.mxu0  ;;  %v2859_v51 = vpop.f32.mrf.mxu3 }
 0x839   :  { %v2731_v35 = vpop.f32.mrf.mxu1 }
 0x83b   :  { %v14739_v40 = vpop.f32.mrf.mxu0  ;;  %v2862_v10 = vpop.f32.mrf.mxu3 }
 0x841   :  { %v2734_v54 = vpop.f32.mrf.mxu1 }
 0x843   :  { %v14741_v11 = vpop.f32.mrf.mxu0  ;;  %v2865_v13 = vpop.f32.mrf.mxu3 }
 0x844   :  { %2913 = vmatpush.msrb.mxu1 %v2865_v13 }
 0x846   :  { %2914 = vmatpush.msrb.mxu1 %v2862_v10  ;;  %v10805_v10 = vld [vmem:[%s17405_s5 + $0x190] sm:$0xff] }
 0x848   :  { %2915 = vmatpush.msrb.mxu1 %v2859_v51 }
 0x849   :  { %v2737_v43 = vpop.f32.mrf.mxu1 }
 0x84a   :  { %2785 = vmatpush.msra.mxu2 %v2737_v43  ;;  %2916 = vmatpush.msrb.mxu1 %v2856_v46  ;;  %v10804_v46 = vld [vmem:[%s17405_s5 + $0x188] sm:$0xff]  ;;  %v10867_v43 = vld [vmem:[%s17405_s5 + $0x200] sm:$0xff] }
 0x84b   :  { %v2984_v44 = vpop.f32.mrf.mxu0  ;;  %10843 = vmatmul.msk.f32.vlgmr.msrb.gmra.mxu1 %vm2051_vm2, %v10835_v6  ;;  %v10806_v6 = vld [vmem:[%s17405_s5 + $0x198] sm:$0xff] }
 0x84c   :  { %2786 = vmatpush.msra.mxu2 %v2734_v54  ;;  %v10838_v54 = vld [vmem:[%s17405_s5 + $0x1d8] sm:$0xff] }
 0x84e   :  { %2787 = vmatpush.msra.mxu2 %v2731_v35  ;;  %v3085_v35 = vld [vmem:[%s17406_s6 + $0x38] sm:$0xff] }
 0x84f   :  { %3123 = vperm.xlu2 %11663, %v3085_v35   ;;  %v10809_v35 = vld [vmem:[%s17405_s5 + $0x1b0] sm:$0xff] }
 0x850   :  { %2788 = vmatpush.msra.mxu2 %v2728_v47  ;;  %v10837_v47 = vld [vmem:[%s17405_s5 + $0x1d0] sm:$0xff] }
 0x851   :  { %10811 = vmatmul.msk.f32.vlgmr.msra.gmra.mxu2 %vm2051_vm2, %v10803_v60  ;;  %v7468_v60 = vld [vmem:[%s17415_s15 + $0x8] sm:$0xff] }
 0x853   :  { %v2987_v20 = vpop.f32.mrf.mxu0  ;;  %10844 = vmatmul.msk.f32.gmra.mxu1 %vm2051_vm2, %v10836_v19  ;;  %v10807_v19 = vld [vmem:[%s17405_s5 + $0x1a0] sm:$0xff] }
 0x857   :  { %4709 = vperm.xlu2 %11663, %v4695_v14   ;;  %v10871_v14 = vld [vmem:[%s17405_s5 + $0x220] sm:$0xff] }
 0x859   :  { %10812 = vmatmul.msk.f32.gmra.mxu2 %vm2051_vm2, %v10804_v46  ;;  %v10808_v46 = vld [vmem:[%s17405_s5 + $0x1a8] sm:$0xff] }
 0x85b   :  { %v2990_v51 = vpop.f32.mrf.mxu0  ;;  %10845 = vmatmul.msk.f32.gmra.mxu1 %vm2051_vm2, %v10837_v47  ;;  %v10869_v47 = vld [vmem:[%s17405_s5 + $0x210] sm:$0xff] }
 0x85f   :  { %7478 = vperm.xlu2 %11663, %v7468_v60   ;;  %v3145_v60 = vld [vmem:[%s17407_s7 + $0x18] sm:$0xff] }
 0x860   :  { %3182 = vmatpush.msrb.mxu2 %v3145_v60 }
 0x861   :  { %10813 = vmatmul.msk.f32.gmra.mxu2 %vm2051_vm2, %v10805_v10  ;;  %v10870_v10 = vld [vmem:[%s17405_s5 + $0x218] sm:$0xff] }
 0x863   :  { %v2993_v13 = vpop.f32.mrf.mxu0  ;;  %10846 = vmatmul.msk.f32.gmra.mxu1 %vm2051_vm2, %v10838_v54  ;;  %v10842_v54 = vld [vmem:[%s17405_s5 + $0x1f8] sm:$0xff] }
 0x864   :  { %3041 = vmatpush.msrb.mxu3 %v2993_v13  ;;  %v10810_v13 = vld [vmem:[%s17405_s5 + $0x1b8] sm:$0xff] }
 0x866   :  { %3042 = vmatpush.msrb.mxu3 %v2990_v51  ;;  %v10841_v51 = vld [vmem:[%s17405_s5 + $0x1f0] sm:$0xff] }
 0x867   :  { %9922 = vperm.xlu2 %11663, %v9919_v22   ;;  %v3143_v22 = vld [vmem:[%s17407_s7 + $0x8] sm:$0xff] }
 0x868   :  { %3043 = vmatpush.msrb.mxu3 %v2987_v20  ;;  %v10868_v20 = vld [vmem:[%s17405_s5 + $0x208] sm:$0xff] }
 0x869   :  { %10814 = vmatmul.msk.f32.gmra.mxu2 %vm2051_vm2, %v10806_v6  ;;  %v10872_v6 = vld [vmem:[%s17405_s5 + $0x228] sm:$0xff] }
 0x86a   :  { %3044 = vmatpush.msrb.mxu3 %v2984_v44  ;;  %v10840_v44 = vld [vmem:[%s17405_s5 + $0x1e8] sm:$0xff] }
 0x86b   :  { %10875 = vmatmul.msk.f32.vlgmr.msrb.gmra.mxu3 %vm2051_vm2, %v10867_v43  ;;  %10847 = vmatmul.msk.f32.gmra.mxu1 %vm2051_vm2, %v10839_v55  ;;  %v10873_v43 = vld [vmem:[%s17405_s5 + $0x230] sm:$0xff]  ;;  %v10874_v55 = vld [vmem:[%s17405_s5 + $0x238] sm:$0xff] }
 0x871   :  { %10815 = vmatmul.msk.f32.gmra.mxu2 %vm2051_vm2, %v10807_v19  ;;  %v10894_v19 = vld [vmem:[%s17407_s7 + $0x38] sm:$0xff] }
 0x872   :  { %3232 = vmatpush.msra.mxu0 %v10894_v19 }
 0x873   :  { %10876 = vmatmul.msk.f32.gmra.mxu3 %vm2051_vm2, %v10868_v20  ;;  %10848 = vmatmul.msk.f32.gmra.mxu1 %vm2051_vm2, %v10840_v44  ;;  %v3144_v20 = vld [vmem:[%s17407_s7 + $0x10] sm:$0xff] }
 0x874   :  { %v10893_v44 = vld [vmem:[%s17407_s7 + $0x30] sm:$0xff]  ;;  %3183 = vmatpush.msrb.mxu2 %v3144_v20 }
 0x875   :  { %3233 = vmatpush.msra.mxu0 %v10893_v44 }
 0x876   :  { %3184 = vmatpush.msrb.mxu2 %v3143_v22 }
 0x879   :  { %10816 = vmatmul.msk.f32.gmra.mxu2 %vm2051_vm2, %v10808_v46  ;;  %v10892_v46 = vld [vmem:[%s17407_s7 + $0x28] sm:$0xff] }
 0x87a   :  { %3234 = vmatpush.msra.mxu0 %v10892_v46 }
 0x87b   :  { %10877 = vmatmul.msk.f32.gmra.mxu3 %vm2051_vm2, %v10869_v47  ;;  %10849 = vmatmul.msk.f32.gmra.mxu1 %vm2051_vm2, %v10841_v51  ;;  %v3142_v47 = vld [vmem:[%s17407_s7] sm:$0xff] }
 0x87c   :  { %v10891_v51 = vld [vmem:[%s17407_s7 + $0x20] sm:$0xff]  ;;  %3185 = vmatpush.msrb.mxu2 %v3142_v47 }
 0x87d   :  { %3235 = vmatpush.msra.mxu0 %v10891_v51 }
 0x881   :  { %10817 = vmatmul.msk.f32.gmra.mxu2 %vm2051_vm2, %v10809_v35 }
 0x883   :  { %10878 = vmatmul.msk.f32.gmra.mxu3 %vm2051_vm2, %v10870_v10  ;;  %10850 = vmatmul.msk.f32.gmra.mxu1 %vm2051_vm2, %v10842_v54  ;;  %v2159_v54 = vadd.f32 %v14392_v12, %v14396_v15  ;;  %v2165_v12 = vadd.f32 %v14398_v58, %v14404_v59  ;;  %v2168_v58 = vadd.f32 %v14402_v41, %v14408_v62 }
 0x889   :  { %10818 = vmatmul.msk.f32.gmra.mxu2 %vm2051_vm2, %v10810_v13  ;;  %v2302_v13 = vadd.f32 %v14410_v63, %v2159_v54 }
 0x88b   :  { %10879 = vmatmul.msk.f32.gmra.mxu3 %vm2051_vm2, %v10871_v14  ;;  %v2430_v14 = vadd.f32 %v14697_v17, %v2302_v13  ;;  %v3089_v17 = vpop.permute.xlu2 %3088 }
 0x893   :  { %10880 = vmatmul.msk.f32.gmra.mxu3 %vm2051_vm2, %v10872_v6  ;;  %v3094_v13 = vpop.permute.xlu2 %3093 }
 0x89b   :  { %10881 = vmatmul.msk.f32.gmra.mxu3 %vm2051_vm2, %v10873_v43  ;;  %v2162_v43 = vadd.f32 %v14394_v52, %v14400_v2  ;;  %v2304_v52 = vadd.f32 %v14422_v21, %v2165_v12  ;;  %v2174_v12 = vadd.f32 %v14412_v49, %v14420_v57 }
 0x89d   :  { %v2303_v19 = vadd.f32 %v14416_v8, %v2162_v43  ;;  %v2171_v43 = vadd.f32 %v14406_v61, %v14414_v3 }
 0x89f   :  { %v2431_v44 = vadd.f32 %v14701_v27, %v2303_v19 }
 0x8a1   :  { %v2559_v15 = vadd.f32 %v14699_v45, %v2431_v44 }
 0x8a3   :  { %10882 = vmatmul.msk.f32.gmra.mxu3 %vm2051_vm2, %v10874_v55  ;;  %v2558_v55 = vadd.f32 %v14695_v23, %v2430_v14  ;;  %v2687_v2 = vadd.f32 %v14719_v34, %v2559_v15 }
 0x8a5   :  { %v2686_v20 = vadd.f32 %v14713_v16, %v2558_v55  ;;  %v2432_v16 = vadd.f32 %v14705_v30, %v2304_v52  ;;  %v2305_v30 = vadd.f32 %v14428_v29, %v2168_v58  ;;  %v3109_v58 = vpop.permute.xlu2 %3108 }
 0x8a7   :  { %v2560_v59 = vadd.f32 %v14703_v28, %v2432_v16  ;;  %v2433_v14 = vadd.f32 %v14709_v0, %v2305_v30  ;;  %v2306_v0 = vadd.f32 %v14432_v18, %v2171_v43 }
 0x8a9   :  { %v2561_v55 = vadd.f32 %v14707_v5, %v2433_v14 }
 0x8c8   :  { %v2918_v10 = vpop.f32.mrf.mxu1 }
 0x8d0   :  { %v2921_v60 = vpop.f32.mrf.mxu1 }
 0x8d4   :  { %v2790_v35 = vpop.f32.mrf.mxu2 }
 0x8d5   :  { %v2814_v22 = vadd.f32 %v2790_v35, %v2686_v20  ;;  %v3099_v20 = vpop.permute.xlu0 %3098 }
 0x8d7   :  { %v2942_v63 = vadd.f32 %v2918_v10, %v2814_v22  ;;  %v2688_v10 = vadd.f32 %v14725_v50, %v2560_v59  ;;  %v2689_v50 = vadd.f32 %v14731_v1, %v2561_v55  ;;  %v2434_v22 = vadd.f32 %v14715_v26, %v2306_v0 }
 0x8d8   :  { %v2924_v8 = vpop.f32.mrf.mxu1  ;;  %v2307_v26 = vadd.f32 %v14434_v4, %v2174_v12  ;;  %v10930_v4 = vld [vmem:[%s17407_s7 + $0x78] sm:$0xff] }
 0x8d9   :  { %v2562_v15 = vadd.f32 %v14711_v53, %v2434_v22  ;;  %3462 = vmatpush.msrb.mxu0 %v10930_v4 }
 0x8da   :  { %v2435_v52 = vadd.f32 %v14721_v36, %v2307_v26  ;;  %v10929_v36 = vld [vmem:[%s17407_s7 + $0x70] sm:$0xff] }
 0x8db   :  { %v2690_v1 = vadd.f32 %v14735_v42, %v2562_v15  ;;  %3463 = vmatpush.msrb.mxu0 %v10929_v36 }
 0x8dc   :  { %v2793_v6 = vpop.f32.mrf.mxu2 }
 0x8dd   :  { %v2815_v51 = vadd.f32 %v2793_v6, %v2687_v2 }
 0x8df   :  { %v2943_v45 = vadd.f32 %v2921_v60, %v2815_v51 }
 0x8e0   :  { %v2927_v28 = vpop.f32.mrf.mxu1 }
 0x8e4   :  { %v2796_v46 = vpop.f32.mrf.mxu2 }
 0x8e5   :  { %v2816_v41 = vadd.f32 %v2796_v46, %v2688_v10 }
 0x8e7   :  { %v2944_v60 = vadd.f32 %v2924_v8, %v2816_v41  ;;  %v2563_v8 = vadd.f32 %v14717_v31, %v2435_v52 }
 0x8e8   :  { %v2930_v46 = vpop.f32.mrf.mxu1 }
 0x8ec   :  { %v2799_v21 = vpop.f32.mrf.mxu2 }
 0x8ed   :  { %v2817_v61 = vadd.f32 %v2799_v21, %v2689_v50 }
 0x8ee   :  { %v3046_v47 = vpop.f32.mrf.mxu3 }
 0x8ef   :  { %v3070_v23 = vadd.f32 %v3046_v47, %v2942_v63  ;;  %v2945_v63 = vadd.f32 %v2927_v28, %v2817_v61  ;;  %v3104_v47 = vpop.permute.xlu1 %3103 }
 0x8f0   :  { %v2933_v42 = vpop.f32.mrf.mxu1 }
 0x8f1   :  { %v3126_v27 = vadd.f32 %v3089_v17, %v3070_v23  ;;  %v2177_v23 = vadd.f32 %v14418_v48, %v14426_v25  ;;  %v2691_v25 = vadd.f32 %v14737_v24, %v2563_v8  ;;  %v2180_v24 = vadd.f32 %v14424_v9, %v14430_v56 }
 0x8f3   :  { %v14897_v35 = vmax.f32 %v3126_v27, 0.0  ;;  %v2308_v48 = vadd.f32 %v14436_v7, %v2177_v23  ;;  %v10928_v27 = vld [vmem:[%s17407_s7 + $0x68] sm:$0xff] }
 0x8f4   :  { %v2802_v44 = vpop.f32.mrf.mxu2  ;;  %3464 = vmatpush.msrb.mxu0 %v10928_v27  ;;  %v3211_v27 = vld [vmem:[#allocation3] sm:$0xff] }
 0x8f5   :  { %10883 = vmatmul.msk.f32.vlgmr.msrb.gmra.mxu2 %vm2051_vm2, %v14897_v35  ;;  %10895 = vmatmul.msk.f32.vlgmr.msra.gmra.mxu0 %vm2051_vm2, %v14897_v35  ;;  %v2818_v2 = vadd.f32 %v2802_v44, %v2690_v1  ;;  %v2436_v59 = vadd.f32 %v14727_v32, %v2308_v48 }
 0x8f6   :  { %v3049_v34 = vpop.f32.mrf.mxu3 }
 0x8f7   :  { %v3071_v54 = vadd.f32 %v3049_v34, %v2943_v45  ;;  %v2946_v16 = vadd.f32 %v2930_v46, %v2818_v2  ;;  %v10927_v34 = vld [vmem:[%s17407_s7 + $0x60] sm:$0xff]  ;;  %v2564_v10 = vadd.f32 %v14723_v38, %v2436_v59  ;;  %v3119_v50 = vpop.permute.xlu1 %3118  ;;  %v3263_v59 = vld [vmem:[#allocation3 + $0x28] sm:$0xff] }
 0x8f8   :  { %3465 = vmatpush.msrb.mxu0 %v10927_v34  ;;  %v2936_v28 = vpop.f32.mrf.mxu1  ;;  %v3264_v34 = vld [vmem:[#allocation3 + $0x30] sm:$0xff] }
 0x8f9   :  { %v3127_v62 = vadd.f32 %v3094_v13, %v3071_v54  ;;  %v2309_v13 = vadd.f32 %v14441_v37, %v2180_v24  ;;  %v2692_v14 = vadd.f32 %v14739_v40, %v2564_v10  ;;  %v3213_v24 = vld [vmem:[#allocation3 + $0x10] sm:$0xff]  ;;  %v3265_v10 = vld [vmem:[#allocation3 + $0x38] sm:$0xff] }
 0x8fb   :  { %v14909_v6 = vmax.f32 %v3127_v62, 0.0  ;;  %v3114_v62 = vpop.permute.xlu0 %3113  ;;  %v2437_v43 = vadd.f32 %v14733_v39, %v2309_v13 }
 0x8fc   :  { %v2805_v57 = vpop.f32.mrf.mxu2 }
 0x8fd   :  { %10884 = vmatmul.msk.f32.gmra.mxu2 %vm2051_vm2, %v14909_v6  ;;  %10896 = vmatmul.msk.f32.gmra.mxu0 %vm2051_vm2, %v14909_v6  ;;  %v2819_v45 = vadd.f32 %v2805_v57, %v2691_v25  ;;  %v2565_v55 = vadd.f32 %v14729_v33, %v2437_v43  ;;  %v10913_v25 = vld [vmem:[%s17407_s7 + $0x50] sm:$0xff]  ;;  %v10960_v43 = vld [vmem:[%s17407_s7 + $0xa8] sm:$0xff] }
 0x8fe   :  { %v3052_v29 = vpop.f32.mrf.mxu3 }
 0x8ff   :  { %v3072_v19 = vadd.f32 %v3052_v29, %v2944_v60  ;;  %v2947_v54 = vadd.f32 %v2933_v42, %v2819_v45  ;;  %v2693_v29 = vadd.f32 %v14741_v11, %v2565_v55  ;;  %v3262_v42 = vld [vmem:[#allocation3 + $0x20] sm:$0xff] }
 0x901   :  { %v3128_v3 = vadd.f32 %v3099_v20, %v3072_v19  ;;  %v2939_v20 = vpop.f32.mrf.mxu1 }
 0x903   :  { %v14921_v5 = vmax.f32 %v3128_v3, 0.0  ;;  %v3124_v3 = vpop.permute.xlu2 %3123 }
 0x904   :  { %v2808_v7 = vpop.f32.mrf.mxu2 }
 0x905   :  { %10885 = vmatmul.msk.f32.gmra.mxu2 %vm2051_vm2, %v14921_v5  ;;  %10897 = vmatmul.msk.f32.gmra.mxu0 %vm2051_vm2, %v14921_v5  ;;  %v2820_v9 = vadd.f32 %v2808_v7, %v2692_v14 }
 0x906   :  { %v3055_v18 = vpop.f32.mrf.mxu3 }
 0x907   :  { %v3073_v17 = vadd.f32 %v3055_v18, %v2945_v63  ;;  %v2948_v60 = vadd.f32 %v2936_v28, %v2820_v9  ;;  %v10961_v28 = vld [vmem:[%s17407_s7 + $0xb0] sm:$0xff]  ;;  %v10959_v9 = vld [vmem:[%s17407_s7 + $0xa0] sm:$0xff] }
 0x909   :  { %v3129_v49 = vadd.f32 %v3104_v47, %v3073_v17 }
 0x90b   :  { %v14933_v53 = vmax.f32 %v3129_v49, 0.0 }
 0x90c   :  { %v2811_v37 = vpop.f32.mrf.mxu2 }
 0x90d   :  { %10886 = vmatmul.msk.f32.gmra.mxu2 %vm2051_vm2, %v14933_v53  ;;  %10898 = vmatmul.msk.f32.gmra.mxu0 %vm2051_vm2, %v14933_v53  ;;  %v2821_v39 = vadd.f32 %v2811_v37, %v2693_v29 }
 0x90e   :  { %v3058_v51 = vpop.f32.mrf.mxu3 }
 0x90f   :  { %v3074_v31 = vadd.f32 %v3058_v51, %v2946_v16  ;;  %v2949_v22 = vadd.f32 %v2939_v20, %v2821_v39  ;;  %v10914_v51 = vld [vmem:[%s17407_s7 + $0x58] sm:$0xff]  ;;  %v3492_v20 = vld [vmem:[#allocation3 + $0x60] sm:$0xff] }
 0x911   :  { %v3130_v21 = vadd.f32 %v3109_v58, %v3074_v31  ;;  %v10912_v31 = vld [vmem:[%s17407_s7 + $0x48] sm:$0xff]  ;;  %v10911_v58 = vld [vmem:[%s17407_s7 + $0x40] sm:$0xff] }
 0x913   :  { %v14957_v30 = vmax.f32 %v3130_v21, 0.0  ;;  %v3212_v21 = vld [vmem:[#allocation3 + $0x8] sm:$0xff] }
 0x915   :  { %10887 = vmatmul.msk.f32.gmra.mxu2 %vm2051_vm2, %v14957_v30  ;;  %10899 = vmatmul.msk.f32.gmra.mxu0 %vm2051_vm2, %v14957_v30 }
 0x916   :  { %v3061_v32 = vpop.f32.mrf.mxu3 }
 0x917   :  { %v3075_v41 = vadd.f32 %v3061_v32, %v2947_v54  ;;  %v3214_v32 = vld [vmem:[#allocation3 + $0x18] sm:$0xff] }
 0x919   :  { %v3131_v56 = vadd.f32 %v3114_v62, %v3075_v41  ;;  %v10962_v62 = vld [vmem:[%s17407_s7 + $0xb8] sm:$0xff] }
 0x91b   :  { %v14969_v38 = vmax.f32 %v3131_v56, 0.0 }
 0x91d   :  { %10888 = vmatmul.msk.f32.gmra.mxu2 %vm2051_vm2, %v14969_v38  ;;  %10900 = vmatmul.msk.f32.gmra.mxu0 %vm2051_vm2, %v14969_v38 }
 0x91e   :  { %v3064_v40 = vpop.f32.mrf.mxu3 }
 0x91f   :  { %v3076_v0 = vadd.f32 %v3064_v40, %v2948_v60 }
 0x921   :  { %v3132_v19 = vadd.f32 %v3119_v50, %v3076_v0 }
 0x923   :  { %v14977_v44 = vmax.f32 %v3132_v19, 0.0 }
 0x925   :  { %10889 = vmatmul.msk.f32.gmra.mxu2 %vm2051_vm2, %v14977_v44  ;;  %10901 = vmatmul.msk.f32.gmra.mxu0 %vm2051_vm2, %v14977_v44 }
 0x926   :  { %v3067_v33 = vpop.f32.mrf.mxu3 }
 0x927   :  { %v3077_v61 = vadd.f32 %v3067_v33, %v2949_v22  ;;  %v3493_v33 = vld [vmem:[#allocation3 + $0x68] sm:$0xff] }
 0x929   :  { %v3133_v46 = vadd.f32 %v3124_v3, %v3077_v61  ;;  %v3494_v3 = vld [vmem:[#allocation3 + $0x70] sm:$0xff] }
 0x92b   :  { %v14983_v12 = vmax.f32 %v3133_v46, 0.0 }
 0x92d   :  { %10890 = vmatmul.msk.f32.gmra.mxu2 %vm2051_vm2, %v14983_v12  ;;  %10902 = vmatmul.msk.f32.gmra.mxu0 %vm2051_vm2, %v14983_v12 }
 0x935   :  { %10931 = vmatmul.msk.f32.vlgmr.msrb.gmra.mxu0 %vm2051_vm2, %v14897_v35 }
 0x93d   :  { %10932 = vmatmul.msk.f32.gmra.mxu0 %vm2051_vm2, %v14909_v6 }
 0x945   :  { %10933 = vmatmul.msk.f32.gmra.mxu0 %vm2051_vm2, %v14921_v5 }
 0x94d   :  { %10934 = vmatmul.msk.f32.gmra.mxu0 %vm2051_vm2, %v14933_v53 }
 0x955   :  { %10935 = vmatmul.msk.f32.gmra.mxu0 %vm2051_vm2, %v14957_v30 }
 0x95d   :  { %10936 = vmatmul.msk.f32.gmra.mxu0 %vm2051_vm2, %v14969_v38 }
 0x965   :  { %10937 = vmatmul.msk.f32.gmra.mxu0 %vm2051_vm2, %v14977_v44 }
 0x96d   :  { %10938 = vmatmul.msk.f32.gmra.mxu0 %vm2051_vm2, %v14983_v12 }
 0x972   :  { %v3237_v11 = vpop.f32.mrf.mxu0 }
 0x978   :  { %v3187_v15 = vpop.f32.mrf.mxu2 }
 0x97a   :  { %v3240_v63 = vpop.f32.mrf.mxu0 }
 0x980   :  { %v3190_v18 = vpop.f32.mrf.mxu2 }
 0x982   :  { %v3243_v26 = vpop.f32.mrf.mxu0 }
 0x988   :  { %v3193_v1 = vpop.f32.mrf.mxu2 }
 0x98a   :  { %v3246_v17 = vpop.f32.mrf.mxu0 }
 0x990   :  { %v3196_v47 = vpop.f32.mrf.mxu2 }
 0x992   :  { %v3249_v52 = vpop.f32.mrf.mxu0 }
 0x998   :  { %v3199_v2 = vpop.f32.mrf.mxu2 }
 0x99a   :  { %v3252_v49 = vpop.f32.mrf.mxu0 }
 0x9a0   :  { %v3202_v57 = vpop.f32.mrf.mxu2 }
 0x9a2   :  { %v3255_v23 = vpop.f32.mrf.mxu0 }
 0x9a8   :  { %v3205_v8 = vpop.f32.mrf.mxu2 }
 0x9aa   :  { %v3258_v16 = vpop.f32.mrf.mxu0 }
 0x9ab   :  { %3287 = vmatpush.msra.mxu1 %v3258_v16 }
 0x9ad   :  { %3288 = vmatpush.msra.mxu1 %v3255_v23 }
 0x9af   :  { %3289 = vmatpush.msra.mxu1 %v3252_v49 }
 0x9b0   :  { %v3208_v4 = vpop.f32.mrf.mxu2 }
 0x9b1   :  { %3290 = vmatpush.msra.mxu1 %v3249_v52  ;;  %3328 = vmatpush.msra.mxu3 %v3208_v4 }
 0x9b2   :  { %v3467_v36 = vpop.f32.mrf.mxu0 }
 0x9b3   :  { %3291 = vmatpush.msra.mxu1 %v3246_v17  ;;  %3329 = vmatpush.msra.mxu3 %v3205_v8  ;;  %v10943_v17 = vld [vmem:[%s17407_s7 + $0x80] sm:$0xff] }
 0x9b5   :  { %3292 = vmatpush.msra.mxu1 %v3243_v26  ;;  %3330 = vmatpush.msra.mxu3 %v3202_v57  ;;  %v10945_v26 = vld [vmem:[%s17407_s7 + $0x90] sm:$0xff]  ;;  %v3399_v57 = vld [vmem:[#allocation3 + $0x58] sm:$0xff] }
 0x9b7   :  { %3293 = vmatpush.msra.mxu1 %v3240_v63  ;;  %3331 = vmatpush.msra.mxu3 %v3199_v2  ;;  %v10946_v63 = vld [vmem:[%s17407_s7 + $0x98] sm:$0xff] }
 0x9b8   :  { %v3398_v2 = vld [vmem:[#allocation3 + $0x50] sm:$0xff] }
 0x9b9   :  { %3294 = vmatpush.msra.mxu1 %v3237_v11  ;;  %3332 = vmatpush.msra.mxu3 %v3196_v47  ;;  %v3495_v11 = vld [vmem:[#allocation3 + $0x78] sm:$0xff]  ;;  %v3397_v47 = vld [vmem:[#allocation3 + $0x48] sm:$0xff] }
 0x9ba   :  { %10903 = vmatmul.msk.f32.vlgmr.msra.gmra.mxu1 %vm3266_vm3, %v3262_v42  ;;  %v3470_v48 = vpop.f32.mrf.mxu0  ;;  %v10994_v42 = vld [vmem:[%s17407_s7 + $0xf8] sm:$0xff] }
 0x9bb   :  { %3333 = vmatpush.msra.mxu3 %v3193_v1  ;;  %3366 = vmatpush.msrb.mxu1 %v10914_v51  ;;  %v10944_v1 = vld [vmem:[%s17407_s7 + $0x88] sm:$0xff]  ;;  %v10993_v51 = vld [vmem:[%s17407_s7 + $0xf0] sm:$0xff] }
 0x9bd   :  { %3334 = vmatpush.msra.mxu3 %v3190_v18  ;;  %3367 = vmatpush.msrb.mxu1 %v10913_v25  ;;  %v10991_v25 = vld [vmem:[%s17407_s7 + $0xe0] sm:$0xff] }
 0x9bf   :  { %3335 = vmatpush.msra.mxu3 %v3187_v15  ;;  %3368 = vmatpush.msrb.mxu1 %v10912_v31  ;;  %v3396_v15 = vld [vmem:[#allocation3 + $0x40] sm:$0xff]  ;;  %v3685_v31 = vld [vmem:[#allocation3 + $0xa8] sm:$0xff] }
 0x9c0   :  { %10907 = vmatmul.msk.f32.vlgmr.msra.gmra.mxu3 %vm3266_vm3, %v3211_v27  ;;  %v3686_v27 = vld [vmem:[#allocation3 + $0xb0] sm:$0xff] }
 0x9c1   :  { %3369 = vmatpush.msrb.mxu1 %v10911_v58  ;;  %v3687_v58 = vld [vmem:[#allocation3 + $0xb8] sm:$0xff] }
 0x9c2   :  { %10904 = vmatmul.msk.f32.gmra.mxu1 %vm3266_vm3, %v3263_v59  ;;  %v3473_v45 = vpop.f32.mrf.mxu0 }
 0x9c3   :  { %3654 = vmatpush.msra.mxu1 %v10962_v62 }
 0x9c5   :  { %3655 = vmatpush.msra.mxu1 %v10961_v28 }
 0x9c7   :  { %3656 = vmatpush.msra.mxu1 %v10960_v43 }
 0x9c8   :  { %10908 = vmatmul.msk.f32.gmra.mxu3 %vm3266_vm3, %v3212_v21 }
 0x9c9   :  { %3657 = vmatpush.msra.mxu1 %v10959_v9 }
 0x9ca   :  { %10905 = vmatmul.msk.f32.gmra.mxu1 %vm3266_vm3, %v3264_v34  ;;  %v3476_v7 = vpop.f32.mrf.mxu0 }
 0x9d0   :  { %10909 = vmatmul.msk.f32.gmra.mxu3 %vm3266_vm3, %v3213_v24 }
 0x9d2   :  { %10906 = vmatmul.msk.f32.gmra.mxu1 %vm3266_vm3, %v3265_v10  ;;  %v3479_v54 = vpop.f32.mrf.mxu0 }
 0x9d8   :  { %10910 = vmatmul.msk.f32.gmra.mxu3 %vm3266_vm3, %v3214_v32 }
 0x9da   :  { %10915 = vmatmul.msk.f32.vlgmr.msrb.gmra.mxu1 %vm2051_vm2, %v14897_v35  ;;  %v3482_v13 = vpop.f32.mrf.mxu0 }
 0x9e2   :  { %10916 = vmatmul.msk.f32.gmra.mxu1 %vm2051_vm2, %v14909_v6  ;;  %v3485_v14 = vpop.f32.mrf.mxu0 }
 0x9ea   :  { %10917 = vmatmul.msk.f32.gmra.mxu1 %vm2051_vm2, %v14921_v5  ;;  %v3488_v41 = vpop.f32.mrf.mxu0 }
 0x9eb   :  { %3516 = vmatpush.msrb.mxu3 %v3488_v41 }
 0x9ed   :  { %3517 = vmatpush.msrb.mxu3 %v3485_v14 }
 0x9ef   :  { %3518 = vmatpush.msrb.mxu3 %v3482_v13 }
 0x9f1   :  { %3519 = vmatpush.msrb.mxu3 %v3479_v54 }
 0x9f2   :  { %10918 = vmatmul.msk.f32.gmra.mxu1 %vm2051_vm2, %v14933_v53 }
 0x9f3   :  { %3520 = vmatpush.msrb.mxu3 %v3476_v7 }
 0x9f5   :  { %3521 = vmatpush.msrb.mxu3 %v3473_v45 }
 0x9f7   :  { %3522 = vmatpush.msrb.mxu3 %v3470_v48  ;;  %v10992_v48 = vld [vmem:[%s17407_s7 + $0xe8] sm:$0xff] }
 0x9f9   :  { %3523 = vmatpush.msrb.mxu3 %v3467_v36  ;;  %v3684_v36 = vld [vmem:[#allocation3 + $0xa0] sm:$0xff] }
 0x9fa   :  { %10919 = vmatmul.msk.f32.gmra.mxu1 %vm2051_vm2, %v14957_v30  ;;  %10939 = vmatmul.msk.f32.vlgmr.msrb.gmra.mxu3 %vm3266_vm3, %v3492_v20  ;;  %v10976_v20 = vld [vmem:[%s17407_s7 + $0xc8] sm:$0xff] }
 0xa02   :  { %10920 = vmatmul.msk.f32.gmra.mxu1 %vm2051_vm2, %v14969_v38  ;;  %10940 = vmatmul.msk.f32.gmra.mxu3 %vm3266_vm3, %v3493_v33  ;;  %v3589_v33 = vld [vmem:[#allocation3 + $0x88] sm:$0xff] }
 0xa0a   :  { %10921 = vmatmul.msk.f32.gmra.mxu1 %vm2051_vm2, %v14977_v44  ;;  %10941 = vmatmul.msk.f32.gmra.mxu3 %vm3266_vm3, %v3494_v3  ;;  %v3590_v3 = vld [vmem:[#allocation3 + $0x90] sm:$0xff] }
 0xa12   :  { %10922 = vmatmul.msk.f32.gmra.mxu1 %vm2051_vm2, %v14983_v12  ;;  %10942 = vmatmul.msk.f32.gmra.mxu3 %vm3266_vm3, %v3495_v11  ;;  %v3591_v11 = vld [vmem:[#allocation3 + $0x98] sm:$0xff] }
 0xa1a   :  { %10963 = vmatmul.msk.f32.vlgmr.msra.gmra.mxu1 %vm2051_vm2, %v14897_v35 }
 0xa22   :  { %10964 = vmatmul.msk.f32.gmra.mxu1 %vm2051_vm2, %v14909_v6 }
 0xa2a   :  { %10965 = vmatmul.msk.f32.gmra.mxu1 %vm2051_vm2, %v14921_v5 }
 0xa32   :  { %10966 = vmatmul.msk.f32.gmra.mxu1 %vm2051_vm2, %v14933_v53 }
 0xa37   :  { %v15061_v56 = vpop.f32.mrf.mxu1 }
 0xa3a   :  { %10967 = vmatmul.msk.f32.gmra.mxu1 %vm2051_vm2, %v14957_v30 }
 0xa3f   :  { %v15065_v55 = vpop.f32.mrf.mxu1 }
 0xa42   :  { %10968 = vmatmul.msk.f32.gmra.mxu1 %vm2051_vm2, %v14969_v38 }
 0xa47   :  { %v15069_v60 = vpop.f32.mrf.mxu1 }
 0xa4a   :  { %10969 = vmatmul.msk.f32.gmra.mxu1 %vm2051_vm2, %v14977_v44 }
 0xa4f   :  { %v15073_v37 = vpop.f32.mrf.mxu1 }
 0xa52   :  { %10970 = vmatmul.msk.f32.gmra.mxu1 %vm2051_vm2, %v14983_v12 }
 0xa57   :  { %v3371_v40 = vpop.f32.mrf.mxu1 }
 0xa5f   :  { %v3374_v29 = vpop.f32.mrf.mxu1 }
 0xa67   :  { %v3377_v0 = vpop.f32.mrf.mxu1 }
 0xa6f   :  { %v3380_v50 = vpop.f32.mrf.mxu1 }
 0xa77   :  { %v3383_v39 = vpop.f32.mrf.mxu1 }
 0xa7f   :  { %v3386_v19 = vpop.f32.mrf.mxu1 }
 0xa87   :  { %v3389_v22 = vpop.f32.mrf.mxu1 }
 0xa8f   :  { %v3392_v61 = vpop.f32.mrf.mxu1 }
 0xa90   :  { %3420 = vmatpush.msra.mxu2 %v3392_v61 }
 0xa92   :  { %3421 = vmatpush.msra.mxu2 %v3389_v22  ;;  %v10975_v22 = vld [vmem:[%s17407_s7 + $0xc0] sm:$0xff] }
 0xa94   :  { %3422 = vmatpush.msra.mxu2 %v3386_v19 }
 0xa96   :  { %3423 = vmatpush.msra.mxu2 %v3383_v39  ;;  %v10977_v39 = vld [vmem:[%s17407_s7 + $0xd0] sm:$0xff] }
 0xa97   :  { %v3659_v46 = vpop.f32.mrf.mxu1 }
 0xa98   :  { %3424 = vmatpush.msra.mxu2 %v3380_v50  ;;  %v10978_v50 = vld [vmem:[%s17407_s7 + $0xd8] sm:$0xff] }
 0xa9a   :  { %3425 = vmatpush.msra.mxu2 %v3377_v0  ;;  %v3588_v0 = vld [vmem:[#allocation3 + $0x80] sm:$0xff] }
 0xa9c   :  { %3426 = vmatpush.msra.mxu2 %v3374_v29 }
 0xa9e   :  { %3427 = vmatpush.msra.mxu2 %v3371_v40 }
 0xa9f   :  { %10923 = vmatmul.msk.f32.vlgmr.msra.gmra.mxu2 %vm3266_vm3, %v3396_v15  ;;  %v3662_v18 = vpop.f32.mrf.mxu1 }
 0xaa0   :  { %3558 = vmatpush.msrb.mxu2 %v10946_v63 }
 0xaa2   :  { %3559 = vmatpush.msrb.mxu2 %v10945_v26  ;;  %v15183_v26 = vpop.f32.mrf.mxu3 }
 0xaa4   :  { %3560 = vmatpush.msrb.mxu2 %v10944_v1  ;;  %v3876_v1 = vld [vmem:[#allocation3 + $0xe0] sm:$0xff] }
 0xaa6   :  { %3561 = vmatpush.msrb.mxu2 %v10943_v17  ;;  %v11026_v17 = vld [vmem:[%s17407_s7 + $0x138] sm:$0xff] }
 0xaa7   :  { %10924 = vmatmul.msk.f32.gmra.mxu2 %vm3266_vm3, %v3397_v47  ;;  %v3665_v52 = vpop.f32.mrf.mxu1  ;;  %v11025_v47 = vld [vmem:[%s17407_s7 + $0x130] sm:$0xff] }
 0xaaf   :  { %10925 = vmatmul.msk.f32.gmra.mxu2 %vm3266_vm3, %v3398_v2  ;;  %v3668_v49 = vpop.f32.mrf.mxu1  ;;  %v11023_v2 = vld [vmem:[%s17407_s7 + $0x120] sm:$0xff] }
 0xab7   :  { %10926 = vmatmul.msk.f32.gmra.mxu2 %vm3266_vm3, %v3399_v57  ;;  %v3671_v23 = vpop.f32.mrf.mxu1  ;;  %v15202_v57 = vpop.f32.mrf.mxu3 }
 0xabf   :  { %10947 = vmatmul.msk.f32.vlgmr.msrb.gmra.mxu2 %vm2051_vm2, %v14897_v35  ;;  %v3674_v8 = vpop.f32.mrf.mxu1 }
 0xac7   :  { %10948 = vmatmul.msk.f32.gmra.mxu2 %vm2051_vm2, %v14909_v6  ;;  %v3677_v16 = vpop.f32.mrf.mxu1 }
 0xacf   :  { %10949 = vmatmul.msk.f32.gmra.mxu2 %vm2051_vm2, %v14921_v5  ;;  %v3680_v4 = vpop.f32.mrf.mxu1 }
 0xad0   :  { %3708 = vmatpush.msra.mxu0 %v3680_v4 }
 0xad2   :  { %3709 = vmatpush.msra.mxu0 %v3677_v16  ;;  %v3879_v16 = vld [vmem:[#allocation3 + $0xf8] sm:$0xff] }
 0xad4   :  { %3710 = vmatpush.msra.mxu0 %v3674_v8  ;;  %v15208_v8 = vpop.f32.mrf.mxu3 }
 0xad6   :  { %3711 = vmatpush.msra.mxu0 %v3671_v23  ;;  %v3878_v23 = vld [vmem:[#allocation3 + $0xf0] sm:$0xff] }
 0xad7   :  { %10950 = vmatmul.msk.f32.gmra.mxu2 %vm2051_vm2, %v14933_v53 }
 0xad8   :  { %3712 = vmatpush.msra.mxu0 %v3668_v49  ;;  %v3877_v49 = vld [vmem:[#allocation3 + $0xe8] sm:$0xff] }
 0xada   :  { %3713 = vmatpush.msra.mxu0 %v3665_v52  ;;  %v11024_v52 = vld [vmem:[%s17407_s7 + $0x128] sm:$0xff] }
 0xadc   :  { %3714 = vmatpush.msra.mxu0 %v3662_v18  ;;  %v15213_v4 = vpop.f32.mrf.mxu3 }
 0xade   :  { %3715 = vmatpush.msra.mxu0 %v3659_v46 }
 0xadf   :  { %10951 = vmatmul.msk.f32.gmra.mxu2 %vm2051_vm2, %v14957_v30  ;;  %10971 = vmatmul.msk.f32.vlgmr.msra.gmra.mxu0 %vm3266_vm3, %v3684_v36 }
 0xae0   :  { %3846 = vmatpush.msrb.mxu0 %v10994_v42 }
 0xae2   :  { %3847 = vmatpush.msrb.mxu0 %v10993_v51 }
 0xae4   :  { %3848 = vmatpush.msrb.mxu0 %v10992_v48  ;;  %v15219_v36 = vpop.f32.mrf.mxu3 }
 0xae6   :  { %3849 = vmatpush.msrb.mxu0 %v10991_v25 }
 0xae7   :  { %10952 = vmatmul.msk.f32.gmra.mxu2 %vm2051_vm2, %v14969_v38  ;;  %10972 = vmatmul.msk.f32.gmra.mxu0 %vm3266_vm3, %v3685_v31 }
 0xaec   :  { %v15223_v42 = vpop.f32.mrf.mxu3 }
 0xaef   :  { %10953 = vmatmul.msk.f32.gmra.mxu2 %vm2051_vm2, %v14977_v44  ;;  %10973 = vmatmul.msk.f32.gmra.mxu0 %vm3266_vm3, %v3686_v27 }
 0xaf4   :  { %v15227_v51 = vpop.f32.mrf.mxu3 }
 0xaf7   :  { %10954 = vmatmul.msk.f32.gmra.mxu2 %vm2051_vm2, %v14983_v12  ;;  %10974 = vmatmul.msk.f32.gmra.mxu0 %vm3266_vm3, %v3687_v58 }
 0xafc   :  { %v15233_v48 = vpop.f32.mrf.mxu3 }
 0xaff   :  { %10995 = vmatmul.msk.f32.vlgmr.msrb.gmra.mxu0 %vm2051_vm2, %v14897_v35 }
 0xb07   :  { %10996 = vmatmul.msk.f32.gmra.mxu0 %vm2051_vm2, %v14909_v6 }
 0xb0f   :  { %10997 = vmatmul.msk.f32.gmra.mxu0 %vm2051_vm2, %v14921_v5 }
 0xb17   :  { %10998 = vmatmul.msk.f32.gmra.mxu0 %vm2051_vm2, %v14933_v53 }
 0xb1f   :  { %10999 = vmatmul.msk.f32.gmra.mxu0 %vm2051_vm2, %v14957_v30 }
 0xb22   :  { %v15139_v59 = vpop.f32.mrf.mxu2 }
 0xb27   :  { %11000 = vmatmul.msk.f32.gmra.mxu0 %vm2051_vm2, %v14969_v38 }
 0xb2a   :  { %v15143_v45 = vpop.f32.mrf.mxu2 }
 0xb2f   :  { %11001 = vmatmul.msk.f32.gmra.mxu0 %vm2051_vm2, %v14977_v44 }
 0xb32   :  { %v15147_v21 = vpop.f32.mrf.mxu2 }
 0xb37   :  { %11002 = vmatmul.msk.f32.gmra.mxu0 %vm2051_vm2, %v14983_v12 }
 0xb3a   :  { %v15151_v34 = vpop.f32.mrf.mxu2 }
 0xb42   :  { %v3563_v7 = vpop.f32.mrf.mxu2 }
 0xb4a   :  { %v3566_v24 = vpop.f32.mrf.mxu2 }
 0xb52   :  { %v3569_v10 = vpop.f32.mrf.mxu2 }
 0xb5a   :  { %v3572_v54 = vpop.f32.mrf.mxu2 }
 0xb5c   :  { %v15153_v32 = vpop.f32.mrf.mxu0 }
 0xb62   :  { %v3575_v13 = vpop.f32.mrf.mxu2 }
 0xb64   :  { %v15155_v14 = vpop.f32.mrf.mxu0 }
 0xb6a   :  { %v3578_v41 = vpop.f32.mrf.mxu2 }
 0xb6c   :  { %v15157_v62 = vpop.f32.mrf.mxu0 }
 0xb72   :  { %v3581_v28 = vpop.f32.mrf.mxu2 }
 0xb74   :  { %v15159_v43 = vpop.f32.mrf.mxu0 }
 0xb7a   :  { %v3584_v9 = vpop.f32.mrf.mxu2 }
 0xb7b   :  { %3612 = vmatpush.msra.mxu3 %v3584_v9 }
 0xb7c   :  { %v3851_v40 = vpop.f32.mrf.mxu0 }
 0xb7d   :  { %3613 = vmatpush.msra.mxu3 %v3581_v28 }
 0xb7f   :  { %3614 = vmatpush.msra.mxu3 %v3578_v41 }
 0xb81   :  { %3615 = vmatpush.msra.mxu3 %v3575_v13 }
 0xb83   :  { %3616 = vmatpush.msra.mxu3 %v3572_v54 }
 0xb84   :  { %v3854_v29 = vpop.f32.mrf.mxu0 }
 0xb85   :  { %3617 = vmatpush.msra.mxu3 %v3569_v10 }
 0xb87   :  { %3618 = vmatpush.msra.mxu3 %v3566_v24 }
 0xb89   :  { %3619 = vmatpush.msra.mxu3 %v3563_v7 }
 0xb8a   :  { %10955 = vmatmul.msk.f32.vlgmr.msra.gmra.mxu3 %vm3266_vm3, %v3588_v0 }
 0xb8b   :  { %3750 = vmatpush.msrb.mxu3 %v10978_v50 }
 0xb8c   :  { %v3857_v19 = vpop.f32.mrf.mxu0 }
 0xb8d   :  { %3751 = vmatpush.msrb.mxu3 %v10977_v39 }
 0xb8f   :  { %3752 = vmatpush.msrb.mxu3 %v10976_v20 }
 0xb91   :  { %3753 = vmatpush.msrb.mxu3 %v10975_v22  ;;  %v3780_v22 = vld [vmem:[#allocation3 + $0xc0] sm:$0xff] }
 0xb92   :  { %10956 = vmatmul.msk.f32.gmra.mxu3 %vm3266_vm3, %v3589_v33  ;;  %v11010_v33 = vld [vmem:[%s17407_s7 + $0x118] sm:$0xff] }
 0xb94   :  { %v3860_v61 = vpop.f32.mrf.mxu0 }
 0xb9a   :  { %10957 = vmatmul.msk.f32.gmra.mxu3 %vm3266_vm3, %v3590_v3  ;;  %v11008_v3 = vld [vmem:[%s17407_s7 + $0x108] sm:$0xff] }
 0xb9c   :  { %v3863_v46 = vpop.f32.mrf.mxu0 }
 0xba2   :  { %10958 = vmatmul.msk.f32.gmra.mxu3 %vm3266_vm3, %v3591_v11  ;;  %v11007_v11 = vld [vmem:[%s17407_s7 + $0x100] sm:$0xff] }
 0xba4   :  { %v3866_v15 = vpop.f32.mrf.mxu0 }
 0xbaa   :  { %10979 = vmatmul.msk.f32.vlgmr.msrb.gmra.mxu3 %vm2051_vm2, %v14897_v35 }
 0xbac   :  { %v3869_v63 = vpop.f32.mrf.mxu0 }
 0xbb2   :  { %10980 = vmatmul.msk.f32.gmra.mxu3 %vm2051_vm2, %v14909_v6 }
 0xbb4   :  { %v3872_v18 = vpop.f32.mrf.mxu0 }
 0xbb5   :  { %3900 = vmatpush.msrb.mxu1 %v3872_v18  ;;  %v3782_v18 = vld [vmem:[#allocation3 + $0xd0] sm:$0xff] }
 0xbb7   :  { %3901 = vmatpush.msrb.mxu1 %v3869_v63 }
 0xbb9   :  { %3902 = vmatpush.msrb.mxu1 %v3866_v15  ;;  %v3781_v15 = vld [vmem:[#allocation3 + $0xc8] sm:$0xff] }
 0xbba   :  { %10981 = vmatmul.msk.f32.gmra.mxu3 %vm2051_vm2, %v14921_v5 }
 0xbbb   :  { %3903 = vmatpush.msrb.mxu1 %v3863_v46 }
 0xbbd   :  { %3904 = vmatpush.msrb.mxu1 %v3860_v61  ;;  %v11009_v61 = vld [vmem:[%s17407_s7 + $0x110] sm:$0xff] }
 0xbbf   :  { %3905 = vmatpush.msrb.mxu1 %v3857_v19 }
 0xbc1   :  { %3906 = vmatpush.msrb.mxu1 %v3854_v29 }
 0xbc2   :  { %10982 = vmatmul.msk.f32.gmra.mxu3 %vm2051_vm2, %v14933_v53 }
 0xbc3   :  { %3907 = vmatpush.msrb.mxu1 %v3851_v40 }
 0xbc4   :  { %11003 = vmatmul.msk.f32.vlgmr.msrb.gmra.mxu1 %vm3266_vm3, %v3876_v1 }
 0xbc5   :  { %4038 = vmatpush.msra.mxu1 %v11026_v17  ;;  %v3783_v17 = vld [vmem:[#allocation3 + $0xd8] sm:$0xff] }
 0xbc7   :  { %4039 = vmatpush.msra.mxu1 %v11025_v47 }
 0xbc9   :  { %4040 = vmatpush.msra.mxu1 %v11024_v52 }
 0xbca   :  { %10983 = vmatmul.msk.f32.gmra.mxu3 %vm2051_vm2, %v14957_v30 }
 0xbcb   :  { %4041 = vmatpush.msra.mxu1 %v11023_v2  ;;  %v4068_v2 = vld [vmem:[#allocation3 + $0x120] sm:$0xff] }
 0xbcc   :  { %11004 = vmatmul.msk.f32.gmra.mxu1 %vm3266_vm3, %v3877_v49  ;;  %v11058_v49 = vld [vmem:[%s17407_s7 + $0x178] sm:$0xff] }
 0xbd2   :  { %10984 = vmatmul.msk.f32.gmra.mxu3 %vm2051_vm2, %v14969_v38 }
 0xbd4   :  { %11005 = vmatmul.msk.f32.gmra.mxu1 %vm3266_vm3, %v3878_v23  ;;  %v11057_v23 = vld [vmem:[%s17407_s7 + $0x170] sm:$0xff] }
 0xbda   :  { %10985 = vmatmul.msk.f32.gmra.mxu3 %vm2051_vm2, %v14977_v44 }
 0xbdc   :  { %11006 = vmatmul.msk.f32.gmra.mxu1 %vm3266_vm3, %v3879_v16  ;;  %v11056_v16 = vld [vmem:[%s17407_s7 + $0x168] sm:$0xff] }
 0xbe2   :  { %10986 = vmatmul.msk.f32.gmra.mxu3 %vm2051_vm2, %v14983_v12 }
 0xbe4   :  { %11027 = vmatmul.msk.f32.vlgmr.msra.gmra.mxu1 %vm2051_vm2, %v14897_v35 }
 0xbec   :  { %11028 = vmatmul.msk.f32.gmra.mxu1 %vm2051_vm2, %v14909_v6 }
 0xbf4   :  { %11029 = vmatmul.msk.f32.gmra.mxu1 %vm2051_vm2, %v14921_v5 }
 0xbfc   :  { %11030 = vmatmul.msk.f32.gmra.mxu1 %vm2051_vm2, %v14933_v53 }
 0xc04   :  { %11031 = vmatmul.msk.f32.gmra.mxu1 %vm2051_vm2, %v14957_v30 }
 0xc0c   :  { %11032 = vmatmul.msk.f32.gmra.mxu1 %vm2051_vm2, %v14969_v38 }
 0xc0d   :  { %v15237_v25 = vpop.f32.mrf.mxu3 }
 0xc14   :  { %11033 = vmatmul.msk.f32.gmra.mxu1 %vm2051_vm2, %v14977_v44 }
 0xc15   :  { %v15241_v31 = vpop.f32.mrf.mxu3 }
 0xc1c   :  { %11034 = vmatmul.msk.f32.gmra.mxu1 %vm2051_vm2, %v14983_v12 }
 0xc1d   :  { %v15245_v27 = vpop.f32.mrf.mxu3 }
 0xc25   :  { %v15247_v58 = vpop.f32.mrf.mxu3 }
 0xc2d   :  { %v3755_v7 = vpop.f32.mrf.mxu3 }
 0xc35   :  { %v3758_v24 = vpop.f32.mrf.mxu3 }
 0xc3d   :  { %v3761_v10 = vpop.f32.mrf.mxu3 }
 0xc41   :  { %v15249_v54 = vpop.f32.mrf.mxu1 }
 0xc45   :  { %v3764_v13 = vpop.f32.mrf.mxu3 }
 0xc49   :  { %v15251_v41 = vpop.f32.mrf.mxu1 }
 0xc4d   :  { %v3767_v28 = vpop.f32.mrf.mxu3 }
 0xc51   :  { %v15253_v9 = vpop.f32.mrf.mxu1 }
 0xc55   :  { %v3770_v40 = vpop.f32.mrf.mxu3 }
 0xc59   :  { %v15255_v29 = vpop.f32.mrf.mxu1 }
 0xc5a   :  { %17431 = vst [vmem:[#allocation13_spill] sm:$0xff] %v15255_v29 }
 0xc5d   :  { %v3773_v0 = vpop.f32.mrf.mxu3 }
 0xc61   :  { %v4043_v50 = vpop.f32.mrf.mxu1 }
 0xc65   :  { %v3776_v39 = vpop.f32.mrf.mxu3 }
 0xc66   :  { %3804 = vmatpush.msra.mxu2 %v3776_v39 }
 0xc68   :  { %3805 = vmatpush.msra.mxu2 %v3773_v0 }
 0xc69   :  { %v4046_v19 = vpop.f32.mrf.mxu1 }
 0xc6a   :  { %3806 = vmatpush.msra.mxu2 %v3770_v40 }
 0xc6c   :  { %3807 = vmatpush.msra.mxu2 %v3767_v28 }
 0xc6e   :  { %3808 = vmatpush.msra.mxu2 %v3764_v13  ;;  %v4071_v13 = vld [vmem:[#allocation3 + $0x138] sm:$0xff] }
 0xc70   :  { %3809 = vmatpush.msra.mxu2 %v3761_v10  ;;  %v4070_v10 = vld [vmem:[#allocation3 + $0x130] sm:$0xff] }
 0xc71   :  { %v4049_v20 = vpop.f32.mrf.mxu1 }
 0xc72   :  { %3810 = vmatpush.msra.mxu2 %v3758_v24  ;;  %v4069_v24 = vld [vmem:[#allocation3 + $0x128] sm:$0xff] }
 0xc74   :  { %3811 = vmatpush.msra.mxu2 %v3755_v7  ;;  %v11055_v7 = vld [vmem:[%s17407_s7 + $0x160] sm:$0xff] }
 0xc75   :  { %10987 = vmatmul.msk.f32.vlgmr.msra.gmra.mxu2 %vm3266_vm3, %v3780_v22 }
 0xc76   :  { %3942 = vmatpush.msrb.mxu2 %v11010_v33 }
 0xc78   :  { %3943 = vmatpush.msrb.mxu2 %v11009_v61 }
 0xc79   :  { %v4052_v46 = vpop.f32.mrf.mxu1 }
 0xc7a   :  { %3944 = vmatpush.msrb.mxu2 %v11008_v3 }
 0xc7c   :  { %3945 = vmatpush.msrb.mxu2 %v11007_v11 }
 0xc7d   :  { %10988 = vmatmul.msk.f32.gmra.mxu2 %vm3266_vm3, %v3781_v15 }
 0xc81   :  { %v4055_v63 = vpop.f32.mrf.mxu1 }
 0xc85   :  { %10989 = vmatmul.msk.f32.gmra.mxu2 %vm3266_vm3, %v3782_v18 }
 0xc89   :  { %v4058_v1 = vpop.f32.mrf.mxu1 }
 0xc8d   :  { %10990 = vmatmul.msk.f32.gmra.mxu2 %vm3266_vm3, %v3783_v17 }
 0xc91   :  { %v4061_v47 = vpop.f32.mrf.mxu1 }
 0xc95   :  { %11011 = vmatmul.msk.f32.vlgmr.msrb.gmra.mxu2 %vm2051_vm2, %v14897_v35 }
 0xc99   :  { %v4064_v52 = vpop.f32.mrf.mxu1 }
 0xc9a   :  { %4092 = vmatpush.msra.mxu0 %v4064_v52  ;;  %v3972_v52 = vld [vmem:[#allocation3 + $0x100] sm:$0xff] }
 0xc9c   :  { %4093 = vmatpush.msra.mxu0 %v4061_v47 }
 0xc9d   :  { %11012 = vmatmul.msk.f32.gmra.mxu2 %vm2051_vm2, %v14909_v6 }
 0xc9e   :  { %4094 = vmatpush.msra.mxu0 %v4058_v1 }
 0xca0   :  { %4095 = vmatpush.msra.mxu0 %v4055_v63 }
 0xca2   :  { %4096 = vmatpush.msra.mxu0 %v4052_v46 }
 0xca4   :  { %4097 = vmatpush.msra.mxu0 %v4049_v20 }
 0xca5   :  { %11013 = vmatmul.msk.f32.gmra.mxu2 %vm2051_vm2, %v14921_v5 }
 0xca6   :  { %4098 = vmatpush.msra.mxu0 %v4046_v19 }
 0xca8   :  { %4099 = vmatpush.msra.mxu0 %v4043_v50 }
 0xca9   :  { %11035 = vmatmul.msk.f32.vlgmr.msra.gmra.mxu0 %vm3266_vm3, %v4068_v2 }
 0xcaa   :  { %4230 = vmatpush.msrb.mxu0 %v11058_v49  ;;  %v11042_v49 = vld [vmem:[%s17407_s7 + $0x158] sm:$0xff] }
 0xcac   :  { %4231 = vmatpush.msrb.mxu0 %v11057_v23  ;;  %v11041_v23 = vld [vmem:[%s17407_s7 + $0x150] sm:$0xff] }
 0xcad   :  { %11014 = vmatmul.msk.f32.gmra.mxu2 %vm2051_vm2, %v14933_v53 }
 0xcae   :  { %4232 = vmatpush.msrb.mxu0 %v11056_v16  ;;  %v11040_v16 = vld [vmem:[%s17407_s7 + $0x148] sm:$0xff] }
 0xcb0   :  { %4233 = vmatpush.msrb.mxu0 %v11055_v7  ;;  %v11039_v7 = vld [vmem:[%s17407_s7 + $0x140] sm:$0xff] }
 0xcb1   :  { %11036 = vmatmul.msk.f32.gmra.mxu0 %vm3266_vm3, %v4069_v24  ;;  %v3973_v24 = vld [vmem:[#allocation3 + $0x108] sm:$0xff] }
 0xcb5   :  { %11015 = vmatmul.msk.f32.gmra.mxu2 %vm2051_vm2, %v14957_v30 }
 0xcb9   :  { %11037 = vmatmul.msk.f32.gmra.mxu0 %vm3266_vm3, %v4070_v10 }
 0xcbd   :  { %11016 = vmatmul.msk.f32.gmra.mxu2 %vm2051_vm2, %v14969_v38 }
 0xcc1   :  { %11038 = vmatmul.msk.f32.gmra.mxu0 %vm3266_vm3, %v4071_v13  ;;  %v3974_v13 = vld [vmem:[#allocation3 + $0x110] sm:$0xff] }
 0xcc5   :  { %11017 = vmatmul.msk.f32.gmra.mxu2 %vm2051_vm2, %v14977_v44 }
 0xcc9   :  { %11059 = vmatmul.msk.f32.vlgmr.msrb.gmra.mxu0 %vm2051_vm2, %v14897_v35 }
 0xccd   :  { %11018 = vmatmul.msk.f32.gmra.mxu2 %vm2051_vm2, %v14983_v12 }
 0xcd1   :  { %11060 = vmatmul.msk.f32.gmra.mxu0 %vm2051_vm2, %v14909_v6 }
 0xcd9   :  { %11061 = vmatmul.msk.f32.gmra.mxu0 %vm2051_vm2, %v14921_v5 }
 0xce1   :  { %11062 = vmatmul.msk.f32.gmra.mxu0 %vm2051_vm2, %v14933_v53 }
 0xce9   :  { %11063 = vmatmul.msk.f32.gmra.mxu0 %vm2051_vm2, %v14957_v30 }
 0xcf1   :  { %11064 = vmatmul.msk.f32.gmra.mxu0 %vm2051_vm2, %v14969_v38 }
 0xcf8   :  { %v15317_v28 = vpop.f32.mrf.mxu2 }
 0xcf9   :  { %11065 = vmatmul.msk.f32.gmra.mxu0 %vm2051_vm2, %v14977_v44 }
 0xd00   :  { %v15321_v40 = vpop.f32.mrf.mxu2 }
 0xd01   :  { %11066 = vmatmul.msk.f32.gmra.mxu0 %vm2051_vm2, %v14983_v12 }
 0xd08   :  { %v15325_v0 = vpop.f32.mrf.mxu2 }
 0xd10   :  { %v15327_v50 = vpop.f32.mrf.mxu2 }
 0xd18   :  { %v3947_v39 = vpop.f32.mrf.mxu2 }
 0xd20   :  { %v3950_v19 = vpop.f32.mrf.mxu2 }
 0xd26   :  { %v15329_v20 = vpop.f32.mrf.mxu0 }
 0xd28   :  { %v3953_v22 = vpop.f32.mrf.mxu2 }
 0xd2e   :  { %v15331_v33 = vpop.f32.mrf.mxu0 }
 0xd30   :  { %v3956_v61 = vpop.f32.mrf.mxu2 }
 0xd36   :  { %v15333_v3 = vpop.f32.mrf.mxu0 }
 0xd37   :  { %17432 = vst [vmem:[#allocation14_spill] sm:$0xff] %v15333_v3 }
 0xd38   :  { %v3959_v46 = vpop.f32.mrf.mxu2 }
 0xd3e   :  { %v15335_v11 = vpop.f32.mrf.mxu0 }
 0xd3f   :  { %17433 = vst [vmem:[#allocation15_spill] sm:$0xff] %v15335_v11  ;;  %v4164_v11 = vld [vmem:[#allocation3 + $0x140] sm:$0xff] }
 0xd40   :  { %v3962_v15 = vpop.f32.mrf.mxu2 }
 0xd46   :  { %v4235_v63 = vpop.f32.mrf.mxu0 }
 0xd48   :  { %v3965_v18 = vpop.f32.mrf.mxu2 }
 0xd4e   :  { %v4238_v1 = vpop.f32.mrf.mxu0 }
 0xd50   :  { %v3968_v17 = vpop.f32.mrf.mxu2 }
 0xd51   :  { %3996 = vmatpush.msra.mxu3 %v3968_v17  ;;  %v11087_v17 = vld [vmem:[%s17407_s7 + $0x1a0] sm:$0xff] }
 0xd53   :  { %3997 = vmatpush.msra.mxu3 %v3965_v18  ;;  %v11089_v18 = vld [vmem:[%s17407_s7 + $0x1b0] sm:$0xff] }
 0xd55   :  { %3998 = vmatpush.msra.mxu3 %v3962_v15  ;;  %v11090_v15 = vld [vmem:[%s17407_s7 + $0x1b8] sm:$0xff] }
 0xd56   :  { %v4241_v47 = vpop.f32.mrf.mxu0 }
 0xd57   :  { %3999 = vmatpush.msra.mxu3 %v3959_v46  ;;  %v4260_v46 = vld [vmem:[#allocation3 + $0x160] sm:$0xff] }
 0xd59   :  { %4000 = vmatpush.msra.mxu3 %v3956_v61 }
 0xd5b   :  { %4001 = vmatpush.msra.mxu3 %v3953_v22 }
 0xd5d   :  { %4002 = vmatpush.msra.mxu3 %v3950_v19  ;;  %v3975_v19 = vld [vmem:[#allocation3 + $0x118] sm:$0xff] }
 0xd5e   :  { %v4244_v2 = vpop.f32.mrf.mxu0 }
 0xd5f   :  { %4003 = vmatpush.msra.mxu3 %v3947_v39 }
 0xd60   :  { %11019 = vmatmul.msk.f32.vlgmr.msra.gmra.mxu3 %vm3266_vm3, %v3972_v52  ;;  %v4263_v52 = vld [vmem:[#allocation3 + $0x178] sm:$0xff] }
 0xd61   :  { %4134 = vmatpush.msrb.mxu3 %v11042_v49 }
 0xd63   :  { %4135 = vmatpush.msrb.mxu3 %v11041_v23 }
 0xd65   :  { %4136 = vmatpush.msrb.mxu3 %v11040_v16 }
 0xd66   :  { %v4247_v10 = vpop.f32.mrf.mxu0 }
 0xd67   :  { %4137 = vmatpush.msrb.mxu3 %v11039_v7 }
 0xd68   :  { %11020 = vmatmul.msk.f32.gmra.mxu3 %vm3266_vm3, %v3973_v24 }
 0xd6e   :  { %v4250_v39 = vpop.f32.mrf.mxu0 }
 0xd70   :  { %11021 = vmatmul.msk.f32.gmra.mxu3 %vm3266_vm3, %v3974_v13 }
 0xd76   :  { %v4253_v22 = vpop.f32.mrf.mxu0 }
 0xd78   :  { %11022 = vmatmul.msk.f32.gmra.mxu3 %vm3266_vm3, %v3975_v19 }
 0xd7e   :  { %v4256_v61 = vpop.f32.mrf.mxu0 }
 0xd7f   :  { %4284 = vmatpush.msrb.mxu1 %v4256_v61 }
 0xd80   :  { %11043 = vmatmul.msk.f32.vlgmr.msrb.gmra.mxu3 %vm2051_vm2, %v14897_v35 }
 0xd81   :  { %4285 = vmatpush.msrb.mxu1 %v4253_v22 }
 0xd83   :  { %4286 = vmatpush.msrb.mxu1 %v4250_v39 }
 0xd85   :  { %4287 = vmatpush.msrb.mxu1 %v4247_v10 }
 0xd87   :  { %4288 = vmatpush.msrb.mxu1 %v4244_v2 }
 0xd88   :  { %11044 = vmatmul.msk.f32.gmra.mxu3 %vm2051_vm2, %v14909_v6 }
 0xd89   :  { %4289 = vmatpush.msrb.mxu1 %v4241_v47  ;;  %v4262_v47 = vld [vmem:[#allocation3 + $0x170] sm:$0xff] }
 0xd8b   :  { %4290 = vmatpush.msrb.mxu1 %v4238_v1  ;;  %v11088_v1 = vld [vmem:[%s17407_s7 + $0x1a8] sm:$0xff] }
 0xd8d   :  { %4291 = vmatpush.msrb.mxu1 %v4235_v63  ;;  %v4261_v63 = vld [vmem:[#allocation3 + $0x168] sm:$0xff] }
 0xd8e   :  { %11067 = vmatmul.msk.f32.vlgmr.msrb.gmra.mxu1 %vm3266_vm3, %v4260_v46 }
 0xd8f   :  { %4422 = vmatpush.msra.mxu1 %v11090_v15 }
 0xd90   :  { %11045 = vmatmul.msk.f32.gmra.mxu3 %vm2051_vm2, %v14921_v5 }
 0xd91   :  { %4423 = vmatpush.msra.mxu1 %v11089_v18 }
 0xd93   :  { %4424 = vmatpush.msra.mxu1 %v11088_v1 }
 0xd95   :  { %4425 = vmatpush.msra.mxu1 %v11087_v17 }
 0xd96   :  { %11068 = vmatmul.msk.f32.gmra.mxu1 %vm3266_vm3, %v4261_v63 }
 0xd98   :  { %11046 = vmatmul.msk.f32.gmra.mxu3 %vm2051_vm2, %v14933_v53 }
 0xd9e   :  { %11069 = vmatmul.msk.f32.gmra.mxu1 %vm3266_vm3, %v4262_v47 }
 0xda0   :  { %11047 = vmatmul.msk.f32.gmra.mxu3 %vm2051_vm2, %v14957_v30 }
 0xda6   :  { %11070 = vmatmul.msk.f32.gmra.mxu1 %vm3266_vm3, %v4263_v52 }
 0xda8   :  { %11048 = vmatmul.msk.f32.gmra.mxu3 %vm2051_vm2, %v14969_v38 }
 0xdae   :  { %11091 = vmatmul.msk.f32.vlgmr.msra.gmra.mxu1 %vm2051_vm2, %v14897_v35 }
 0xdb0   :  { %11049 = vmatmul.msk.f32.gmra.mxu3 %vm2051_vm2, %v14977_v44 }
 0xdb6   :  { %11092 = vmatmul.msk.f32.gmra.mxu1 %vm2051_vm2, %v14909_v6 }
 0xdb8   :  { %11050 = vmatmul.msk.f32.gmra.mxu3 %vm2051_vm2, %v14983_v12 }
 0xdbe   :  { %11093 = vmatmul.msk.f32.gmra.mxu1 %vm2051_vm2, %v14921_v5 }
 0xdc6   :  { %11094 = vmatmul.msk.f32.gmra.mxu1 %vm2051_vm2, %v14933_v53 }
 0xdce   :  { %11095 = vmatmul.msk.f32.gmra.mxu1 %vm2051_vm2, %v14957_v30 }
 0xdd6   :  { %11096 = vmatmul.msk.f32.gmra.mxu1 %vm2051_vm2, %v14969_v38 }
 0xdde   :  { %11097 = vmatmul.msk.f32.gmra.mxu1 %vm2051_vm2, %v14977_v44 }
 0xde3   :  { %v15399_v2 = vpop.f32.mrf.mxu3 }
 0xde6   :  { %11098 = vmatmul.msk.f32.gmra.mxu1 %vm2051_vm2, %v14983_v12 }
 0xdeb   :  { %v15403_v49 = vpop.f32.mrf.mxu3 }
 0xdf3   :  { %v15405_v23 = vpop.f32.mrf.mxu3 }
 0xdfb   :  { %v15407_v16 = vpop.f32.mrf.mxu3 }
 0xdfc   :  { %17434 = vst [vmem:[#allocation16_spill] sm:$0xff] %v15407_v16 }
 0xe03   :  { %v4139_v7 = vpop.f32.mrf.mxu3 }
 0xe0b   :  { %v4142_v24 = vpop.f32.mrf.mxu3  ;;  %v15409_v10 = vpop.f32.mrf.mxu1 }
 0xe13   :  { %v4145_v13 = vpop.f32.mrf.mxu3  ;;  %v15411_v39 = vpop.f32.mrf.mxu1 }
 0xe1b   :  { %v4148_v19 = vpop.f32.mrf.mxu3  ;;  %v15413_v22 = vpop.f32.mrf.mxu1 }
 0xe1c   :  { %17435 = vst [vmem:[#allocation17_spill] sm:$0xff] %v15413_v22  ;;  %v11074_v22 = vld [vmem:[%s17407_s7 + $0x198] sm:$0xff] }
 0xe23   :  { %v4151_v61 = vpop.f32.mrf.mxu3  ;;  %v15415_v46 = vpop.f32.mrf.mxu1 }
 0xe24   :  { %17436 = vst [vmem:[#allocation18_spill] sm:$0xff] %v15415_v46 }
 0xe2b   :  { %v4154_v15 = vpop.f32.mrf.mxu3  ;;  %v4427_v18 = vpop.f32.mrf.mxu1 }
 0xe33   :  { %v4157_v1 = vpop.f32.mrf.mxu3  ;;  %v4430_v17 = vpop.f32.mrf.mxu1 }
 0xe3b   :  { %v4160_v63 = vpop.f32.mrf.mxu3  ;;  %v4433_v47 = vpop.f32.mrf.mxu1 }
 0xe3c   :  { %4188 = vmatpush.msra.mxu2 %v4160_v63  ;;  %v11073_v63 = vld [vmem:[%s17407_s7 + $0x190] sm:$0xff] }
 0xe3e   :  { %4189 = vmatpush.msra.mxu2 %v4157_v1  ;;  %v4452_v1 = vld [vmem:[#allocation3 + $0x1a0] sm:$0xff] }
 0xe40   :  { %4190 = vmatpush.msra.mxu2 %v4154_v15 }
 0xe42   :  { %4191 = vmatpush.msra.mxu2 %v4151_v61 }
 0xe43   :  { %v4436_v52 = vpop.f32.mrf.mxu1 }
 0xe44   :  { %4192 = vmatpush.msra.mxu2 %v4148_v19  ;;  %v11072_v19 = vld [vmem:[%s17407_s7 + $0x188] sm:$0xff] }
 0xe46   :  { %4193 = vmatpush.msra.mxu2 %v4145_v13  ;;  %v4165_v13 = vld [vmem:[#allocation3 + $0x148] sm:$0xff] }
 0xe48   :  { %4194 = vmatpush.msra.mxu2 %v4142_v24  ;;  %v11071_v24 = vld [vmem:[%s17407_s7 + $0x180] sm:$0xff] }
 0xe4a   :  { %4195 = vmatpush.msra.mxu2 %v4139_v7  ;;  %v4166_v7 = vld [vmem:[#allocation3 + $0x150] sm:$0xff] }
 0xe4b   :  { %11051 = vmatmul.msk.f32.vlgmr.msra.gmra.mxu2 %vm3266_vm3, %v4164_v11  ;;  %v4439_v46 = vpop.f32.mrf.mxu1 }
 0xe4c   :  { %4326 = vmatpush.msrb.mxu2 %v11074_v22  ;;  %v4167_v22 = vld [vmem:[#allocation3 + $0x158] sm:$0xff] }
 0xe4e   :  { %4327 = vmatpush.msrb.mxu2 %v11073_v63  ;;  %v11122_v63 = vld [vmem:[%s17407_s7 + $0x1f8] sm:$0xff] }
 0xe50   :  { %4328 = vmatpush.msrb.mxu2 %v11072_v19  ;;  %v4455_v19 = vld [vmem:[#allocation3 + $0x1b8] sm:$0xff] }
 0xe52   :  { %4329 = vmatpush.msrb.mxu2 %v11071_v24 }
 0xe53   :  { %11052 = vmatmul.msk.f32.gmra.mxu2 %vm3266_vm3, %v4165_v13  ;;  %v4442_v11 = vpop.f32.mrf.mxu1 }
 0xe5b   :  { %11053 = vmatmul.msk.f32.gmra.mxu2 %vm3266_vm3, %v4166_v7  ;;  %v4445_v61 = vpop.f32.mrf.mxu1 }
 0xe63   :  { %11054 = vmatmul.msk.f32.gmra.mxu2 %vm3266_vm3, %v4167_v22  ;;  %v4448_v15 = vpop.f32.mrf.mxu1 }
 0xe64   :  { %4476 = vmatpush.msra.mxu0 %v4448_v15 }
 0xe66   :  { %4477 = vmatpush.msra.mxu0 %v4445_v61 }
 0xe68   :  { %4478 = vmatpush.msra.mxu0 %v4442_v11 }
 0xe6a   :  { %4479 = vmatpush.msra.mxu0 %v4439_v46  ;;  %v11121_v46 = vld [vmem:[%s17407_s7 + $0x1f0] sm:$0xff] }
 0xe6b   :  { %11075 = vmatmul.msk.f32.vlgmr.msrb.gmra.mxu2 %vm2051_vm2, %v14897_v35 }
 0xe6c   :  { %4480 = vmatpush.msra.mxu0 %v4436_v52  ;;  %v4454_v52 = vld [vmem:[#allocation3 + $0x1b0] sm:$0xff] }
 0xe6e   :  { %4481 = vmatpush.msra.mxu0 %v4433_v47  ;;  %v11119_v47 = vld [vmem:[%s17407_s7 + $0x1e0] sm:$0xff] }
 0xe70   :  { %4482 = vmatpush.msra.mxu0 %v4430_v17  ;;  %v11120_v17 = vld [vmem:[%s17407_s7 + $0x1e8] sm:$0xff] }
 0xe72   :  { %4483 = vmatpush.msra.mxu0 %v4427_v18  ;;  %v4453_v18 = vld [vmem:[#allocation3 + $0x1a8] sm:$0xff] }
 0xe73   :  { %11076 = vmatmul.msk.f32.gmra.mxu2 %vm2051_vm2, %v14909_v6  ;;  %11099 = vmatmul.msk.f32.vlgmr.msra.gmra.mxu0 %vm3266_vm3, %v4452_v1 }
 0xe74   :  { %4614 = vmatpush.msrb.mxu0 %v11122_v63 }
 0xe76   :  { %4615 = vmatpush.msrb.mxu0 %v11121_v46 }
 0xe78   :  { %4616 = vmatpush.msrb.mxu0 %v11120_v17 }
 0xe7a   :  { %4617 = vmatpush.msrb.mxu0 %v11119_v47 }
 0xe7b   :  { %11077 = vmatmul.msk.f32.gmra.mxu2 %vm2051_vm2, %v14921_v5  ;;  %11100 = vmatmul.msk.f32.gmra.mxu0 %vm3266_vm3, %v4453_v18 }
 0xe83   :  { %11078 = vmatmul.msk.f32.gmra.mxu2 %vm2051_vm2, %v14933_v53  ;;  %11101 = vmatmul.msk.f32.gmra.mxu0 %vm3266_vm3, %v4454_v52 }
 0xe8b   :  { %11079 = vmatmul.msk.f32.gmra.mxu2 %vm2051_vm2, %v14957_v30  ;;  %11102 = vmatmul.msk.f32.gmra.mxu0 %vm3266_vm3, %v4455_v19 }
 0xe93   :  { %11080 = vmatmul.msk.f32.gmra.mxu2 %vm2051_vm2, %v14969_v38  ;;  %11123 = vmatmul.msk.f32.vlgmr.msrb.gmra.mxu0 %vm2051_vm2, %v14897_v35 }
 0xe9b   :  { %11081 = vmatmul.msk.f32.gmra.mxu2 %vm2051_vm2, %v14977_v44  ;;  %11124 = vmatmul.msk.f32.gmra.mxu0 %vm2051_vm2, %v14909_v6 }
 0xea3   :  { %11082 = vmatmul.msk.f32.gmra.mxu2 %vm2051_vm2, %v14983_v12  ;;  %11125 = vmatmul.msk.f32.gmra.mxu0 %vm2051_vm2, %v14921_v5 }
 0xeab   :  { %11126 = vmatmul.msk.f32.gmra.mxu0 %vm2051_vm2, %v14933_v53 }
 0xeb3   :  { %11127 = vmatmul.msk.f32.gmra.mxu0 %vm2051_vm2, %v14957_v30 }
 0xebb   :  { %11128 = vmatmul.msk.f32.gmra.mxu0 %vm2051_vm2, %v14969_v38 }
 0xec3   :  { %11129 = vmatmul.msk.f32.gmra.mxu0 %vm2051_vm2, %v14977_v44 }
 0xecb   :  { %11130 = vmatmul.msk.f32.gmra.mxu0 %vm2051_vm2, %v14983_v12 }
 0xece   :  { %v15481_v24 = vpop.f32.mrf.mxu2 }
 0xed6   :  { %v15483_v13 = vpop.f32.mrf.mxu2 }
 0xede   :  { %v15485_v11 = vpop.f32.mrf.mxu2 }
 0xedf   :  { %17437 = vst [vmem:[#allocation19_spill] sm:$0xff] %v15485_v11 }
 0xee6   :  { %v15487_v7 = vpop.f32.mrf.mxu2 }
 0xee7   :  { %17438 = vst [vmem:[#allocation20_spill] sm:$0xff] %v15487_v7 }
 0xeee   :  { %v4331_v61 = vpop.f32.mrf.mxu2 }
 0xef0   :  { %v15489_v22 = vpop.f32.mrf.mxu0 }
 0xef6   :  { %v4334_v15 = vpop.f32.mrf.mxu2 }
 0xef8   :  { %v15491_v1 = vpop.f32.mrf.mxu0 }
 0xef9   :  { %17439 = vst [vmem:[#allocation21_spill] sm:$0xff] %v15491_v1 }
 0xefe   :  { %v4337_v63 = vpop.f32.mrf.mxu2 }
 0xf00   :  { %v15493_v46 = vpop.f32.mrf.mxu0 }
 0xf01   :  { %17440 = vst [vmem:[#allocation22_spill] sm:$0xff] %v15493_v46  ;;  %v4356_v46 = vld [vmem:[#allocation3 + $0x180] sm:$0xff] }
 0xf06   :  { %v4340_v17 = vpop.f32.mrf.mxu2 }
 0xf08   :  { %v15495_v47 = vpop.f32.mrf.mxu0 }
 0xf09   :  { %17441 = vst [vmem:[#allocation23_spill] sm:$0xff] %v15495_v47  ;;  %v11106_v47 = vld [vmem:[%s17407_s7 + $0x1d8] sm:$0xff] }
 0xf0e   :  { %v4343_v18 = vpop.f32.mrf.mxu2 }
 0xf10   :  { %v4619_v52 = vpop.f32.mrf.mxu0 }
 0xf16   :  { %v4346_v19 = vpop.f32.mrf.mxu2 }
 0xf18   :  { %v4622_v16 = vpop.f32.mrf.mxu0 }
 0xf1e   :  { %v4349_v29 = vpop.f32.mrf.mxu2 }
 0xf20   :  { %v4625_v11 = vpop.f32.mrf.mxu0 }
 0xf26   :  { %v4352_v3 = vpop.f32.mrf.mxu2 }
 0xf27   :  { %4380 = vmatpush.msra.mxu3 %v4352_v3  ;;  %v11105_v3 = vld [vmem:[%s17407_s7 + $0x1d0] sm:$0xff] }
 0xf28   :  { %v4628_v7 = vpop.f32.mrf.mxu0 }
 0xf29   :  { %4381 = vmatpush.msra.mxu3 %v4349_v29 }
 0xf2b   :  { %4382 = vmatpush.msra.mxu3 %v4346_v19 }
 0xf2d   :  { %4383 = vmatpush.msra.mxu3 %v4343_v18  ;;  %v4359_v18 = vld [vmem:[#allocation3 + $0x198] sm:$0xff] }
 0xf2f   :  { %4384 = vmatpush.msra.mxu3 %v4340_v17  ;;  %v11104_v17 = vld [vmem:[%s17407_s7 + $0x1c8] sm:$0xff] }
 0xf30   :  { %v4631_v1 = vpop.f32.mrf.mxu0 }
 0xf31   :  { %4385 = vmatpush.msra.mxu3 %v4337_v63  ;;  %v4357_v63 = vld [vmem:[#allocation3 + $0x188] sm:$0xff] }
 0xf33   :  { %4386 = vmatpush.msra.mxu3 %v4334_v15  ;;  %v11103_v15 = vld [vmem:[%s17407_s7 + $0x1c0] sm:$0xff] }
 0xf35   :  { %4387 = vmatpush.msra.mxu3 %v4331_v61 }
 0xf36   :  { %11083 = vmatmul.msk.f32.vlgmr.msra.gmra.mxu3 %vm3266_vm3, %v4356_v46  ;;  %v4358_v46 = vld [vmem:[#allocation3 + $0x190] sm:$0xff] }
 0xf37   :  { %4518 = vmatpush.msrb.mxu3 %v11106_v47 }
 0xf38   :  { %v4634_v29 = vpop.f32.mrf.mxu0 }
 0xf39   :  { %4519 = vmatpush.msrb.mxu3 %v11105_v3  ;;  %v4646_v3 = vld [vmem:[#allocation3 + $0x1f0] sm:$0xff] }
 0xf3b   :  { %4520 = vmatpush.msrb.mxu3 %v11104_v17  ;;  %v4647_v17 = vld [vmem:[#allocation3 + $0x1f8] sm:$0xff] }
 0xf3d   :  { %4521 = vmatpush.msrb.mxu3 %v11103_v15  ;;  %v4549_v15 = vld [vmem:[#allocation3 + $0x1c8] sm:$0xff] }
 0xf3e   :  { %11084 = vmatmul.msk.f32.gmra.mxu3 %vm3266_vm3, %v4357_v63  ;;  %v4550_v63 = vld [vmem:[#allocation3 + $0x1d0] sm:$0xff] }
 0xf40   :  { %v4637_v61 = vpop.f32.mrf.mxu0 }
 0xf46   :  { %11085 = vmatmul.msk.f32.gmra.mxu3 %vm3266_vm3, %v4358_v46  ;;  %v3338_v46 = vadd.f32 %v15183_v26, %v15061_v56  ;;  %v3344_v26 = vadd.f32 %v15208_v8, %v15069_v60 }
 0xf48   :  { %v4640_v47 = vpop.f32.mrf.mxu0 }
 0xf49   :  { %4668 = vmatpush.msrb.mxu1 %v4640_v47  ;;  %v3441_v47 = vadd.f32 %v15139_v59, %v3338_v46 }
 0xf4b   :  { %4669 = vmatpush.msrb.mxu1 %v4637_v61  ;;  %v4551_v61 = vld [vmem:[#allocation3 + $0x1d8] sm:$0xff] }
 0xf4d   :  { %4670 = vmatpush.msrb.mxu1 %v4634_v29  ;;  %v4548_v29 = vld [vmem:[#allocation3 + $0x1c0] sm:$0xff] }
 0xf4e   :  { %11086 = vmatmul.msk.f32.gmra.mxu3 %vm3266_vm3, %v4359_v18  ;;  %v3537_v18 = vadd.f32 %v15219_v36, %v3441_v47 }
 0xf4f   :  { %4671 = vmatpush.msrb.mxu1 %v4631_v1 }
 0xf51   :  { %4672 = vmatpush.msrb.mxu1 %v4628_v7 }
 0xf53   :  { %4673 = vmatpush.msrb.mxu1 %v4625_v11 }
 0xf55   :  { %4674 = vmatpush.msrb.mxu1 %v4622_v16 }
 0xf56   :  { %11107 = vmatmul.msk.f32.vlgmr.msrb.gmra.mxu3 %vm2051_vm2, %v14897_v35 }
 0xf57   :  { %4675 = vmatpush.msrb.mxu1 %v4619_v52  ;;  %v4644_v52 = vld [vmem:[#allocation3 + $0x1e0] sm:$0xff] }
 0xf58   :  { %11131 = vmatmul.msk.f32.vlgmr.msrb.gmra.mxu1 %vm3266_vm3, %v4644_v52 }
 0xf5e   :  { %11108 = vmatmul.msk.f32.gmra.mxu3 %vm2051_vm2, %v14909_v6 }
 0xf66   :  { %11109 = vmatmul.msk.f32.gmra.mxu3 %vm2051_vm2, %v14921_v5 }
 0xf6e   :  { %11110 = vmatmul.msk.f32.gmra.mxu3 %vm2051_vm2, %v14933_v53 }
 0xf76   :  { %11111 = vmatmul.msk.f32.gmra.mxu3 %vm2051_vm2, %v14957_v30 }
 0xf7e   :  { %11112 = vmatmul.msk.f32.gmra.mxu3 %vm2051_vm2, %v14969_v38 }
 0xf86   :  { %11113 = vmatmul.msk.f32.gmra.mxu3 %vm2051_vm2, %v14977_v44  ;;  %v4645_v44 = vld [vmem:[#allocation3 + $0x1e8] sm:$0xff] }
 0xf87   :  { %11132 = vmatmul.msk.f32.gmra.mxu1 %vm3266_vm3, %v4645_v44 }
 0xf8e   :  { %11114 = vmatmul.msk.f32.gmra.mxu3 %vm2051_vm2, %v14983_v12 }
 0xf8f   :  { %11133 = vmatmul.msk.f32.gmra.mxu1 %vm3266_vm3, %v4646_v3 }
 0xf97   :  { %11134 = vmatmul.msk.f32.gmra.mxu1 %vm3266_vm3, %v4647_v17 }
 0xfb9   :  { %v15529_v35 = vpop.f32.mrf.mxu3 }
 0xfc1   :  { %v15531_v6 = vpop.f32.mrf.mxu3 }
 0xfc9   :  { %v15533_v5 = vpop.f32.mrf.mxu3 }
 0xfd1   :  { %v15535_v16 = vpop.f32.mrf.mxu3 }
 0xfd9   :  { %v4523_v53 = vpop.f32.mrf.mxu3 }
 0xfe1   :  { %v4526_v11 = vpop.f32.mrf.mxu3 }
 0xfe9   :  { %v4529_v30 = vpop.f32.mrf.mxu3 }
 0xff1   :  { %v4532_v7 = vpop.f32.mrf.mxu3 }
 0xff9   :  { %v4535_v1 = vpop.f32.mrf.mxu3 }
0x1001   :  { %v4538_v38 = vpop.f32.mrf.mxu3 }
0x1009   :  { %v4541_v19 = vpop.f32.mrf.mxu3 }
0x1011   :  { %v4544_v12 = vpop.f32.mrf.mxu3 }
0x1012   :  { %4572 = vmatpush.msra.mxu2 %v4544_v12  ;;  %v4700_v12 = vpop.permute.xlu0 %4699 }
0x1014   :  { %4573 = vmatpush.msra.mxu2 %v4541_v19 }
0x1016   :  { %4574 = vmatpush.msra.mxu2 %v4538_v38  ;;  %v4950_v38 = vld [vmem:[#allocation5 + $0x4] sm:$0x3] }
0x1017   :  { %11169 = vmatpush.msk.msra.mxu0 %vm4735_vm4, %v4950_v38 }
0x1018   :  { %4575 = vmatpush.msra.mxu2 %v4535_v1  ;;  %v4777_v1 = vld [vmem:[#allocation5 + $0x2] sm:$0x3] }
0x1019   :  { %11140 = vmatpush.msk.msra.mxu3 %vm4735_vm4, %v4777_v1  ;;  %v17449_v1 = vld [vmem:[#allocation20_spill] sm:$0xff] }
0x101a   :  { %4576 = vmatpush.msra.mxu2 %v4532_v7  ;;  %v4721_v7 = vld [vmem:[#allocation5] sm:$0x3] }
0x101c   :  { %4577 = vmatpush.msra.mxu2 %v4529_v30 }
0x101e   :  { %4578 = vmatpush.msra.mxu2 %v4526_v11  ;;  %v3633_v11 = vadd.f32 %v15237_v25, %v3537_v18  ;;  %v17448_v18 = vld [vmem:[#allocation15_spill] sm:$0xff] }
0x1020   :  { %4579 = vmatpush.msra.mxu2 %v4523_v53  ;;  %v3341_v53 = vadd.f32 %v15202_v57, %v15065_v55  ;;  %v3729_v56 = vadd.f32 %v15153_v32, %v3633_v11  ;;  %v3443_v57 = vadd.f32 %v15147_v21, %v3344_v26 }
0x1021   :  { %11115 = vmatmul.msk.f32.vlgmr.msra.gmra.mxu2 %vm3266_vm3, %v4548_v29 }
0x1022   :  { %v3442_v30 = vadd.f32 %v15143_v45, %v3341_v53  ;;  %11135 = vmatpush.msk.msrb.mxu2 %vm4735_vm4, %v4721_v7  ;;  %v3825_v55 = vadd.f32 %v15317_v28, %v3729_v56  ;;  %v3539_v32 = vadd.f32 %v15227_v51, %v3443_v57  ;;  %v4705_v7 = vpop.permute.xlu1 %4704 }
0x1024   :  { %v3538_v59 = vadd.f32 %v15223_v42, %v3442_v30  ;;  %v3921_v36 = vadd.f32 %v15249_v54, %v3825_v55  ;;  %v3347_v42 = vadd.f32 %v15213_v4, %v15073_v37  ;;  %v3635_v28 = vadd.f32 %v15245_v27, %v3539_v32  ;;  %v4677_v4 = vpop.f32.mrf.mxu1  ;;  %v17450_v55 = vld [vmem:[#allocation22_spill] sm:$0xff]  ;;  %v4710_v32 = vpop.permute.xlu2 %4709 }
0x1026   :  { %v3634_v45 = vadd.f32 %v15241_v31, %v3538_v59  ;;  %v4017_v52 = vadd.f32 %v15399_v2, %v3921_v36  ;;  %v3444_v8 = vadd.f32 %v15151_v34, %v3347_v42  ;;  %v17452_v42 = vld [vmem:[#allocation23_spill] sm:$0xff] }
0x1028   :  { %v3730_v25 = vadd.f32 %v15155_v14, %v3634_v45  ;;  %v4113_v60 = vadd.f32 %v15329_v20, %v4017_v52  ;;  %v3731_v14 = vadd.f32 %v15157_v62, %v3635_v28  ;;  %v3540_v51 = vadd.f32 %v15233_v48, %v3444_v8 }
0x1029   :  { %11116 = vmatmul.msk.f32.gmra.mxu2 %vm3266_vm3, %v4549_v15 }
0x102a   :  { %v3826_v19 = vadd.f32 %v15321_v40, %v3730_v25  ;;  %v4209_v31 = vadd.f32 %v15481_v24, %v4113_v60  ;;  %v3827_v40 = vadd.f32 %v15325_v0, %v3731_v14  ;;  %v3636_v27 = vadd.f32 %v15247_v58, %v3540_v51  ;;  %v5066_v24 = vld [vmem:[#allocation5 + $0x6] sm:$0x3] }
0x102b   :  { %11190 = vmatpush.msk.msrb.mxu0 %vm4735_vm4, %v5066_v24  ;;  %v11145_v24 = vld [vmem:[%s17411_s11 + $0x40] sm:$0xff] }
0x102c   :  { %v3922_v21 = vadd.f32 %v15251_v41, %v3826_v19  ;;  %v4305_v37 = vadd.f32 %v15409_v10, %v4209_v31  ;;  %v3923_v41 = vadd.f32 %v15253_v9, %v3827_v40  ;;  %v3732_v62 = vadd.f32 %v15159_v43, %v3636_v27  ;;  %v4680_v43 = vpop.f32.mrf.mxu1 }
0x102e   :  { %v4018_v54 = vadd.f32 %v15403_v49, %v3922_v21  ;;  %v4401_v34 = vadd.f32 %v15529_v35, %v4305_v37  ;;  %v4019_v49 = vadd.f32 %v15405_v23, %v3923_v41  ;;  %v3828_v10 = vadd.f32 %v15327_v50, %v3732_v62  ;;  %v17443_v23 = vld [vmem:[#allocation13_spill] sm:$0xff]  ;;  %v17445_v50 = vld [vmem:[#allocation16_spill] sm:$0xff] }
0x1030   :  { %v4114_v20 = vadd.f32 %v15331_v33, %v4018_v54  ;;  %v4497_v48 = vadd.f32 %v15489_v22, %v4401_v34  ;;  %v17442_v33 = vld [vmem:[#allocation14_spill] sm:$0xff]  ;;  %v3924_v3 = vadd.f32 %v17443_v23, %v3828_v10  ;;  %v17444_v22 = vld [vmem:[#allocation19_spill] sm:$0xff]  ;;  %v4768_v10 = vld [vmem:[%s17411_s11] sm:$0xff] }
0x1031   :  { %11117 = vmatmul.msk.f32.gmra.mxu2 %vm3266_vm3, %v4550_v63  ;;  %v4115_v35 = vadd.f32 %v17442_v33, %v4019_v49  ;;  %v11146_v33 = vld [vmem:[%s17411_s11 + $0x48] sm:$0xff]  ;;  %v11177_v23 = vld [vmem:[%s17411_s11 + $0x98] sm:$0xff] }
0x1032   :  { %v4210_v2 = vadd.f32 %v15483_v13, %v4114_v20  ;;  %v4020_v15 = vadd.f32 %v17445_v50, %v3924_v3  ;;  %v11178_v50 = vld [vmem:[%s17411_s11 + $0xa0] sm:$0xff] }
0x1033   :  { %v4211_v29 = vadd.f32 %v17444_v22, %v4115_v35  ;;  %v4769_v35 = vld [vmem:[%s17411_s11 + $0x8] sm:$0xff]  ;;  %v11148_v22 = vld [vmem:[%s17411_s11 + $0x58] sm:$0xff] }
0x1034   :  { %v4306_v58 = vadd.f32 %v15411_v39, %v4210_v2  ;;  %v17446_v39 = vld [vmem:[#allocation21_spill] sm:$0xff]  ;;  %v4116_v53 = vadd.f32 %v17448_v18, %v4020_v15  ;;  %v4683_v59 = vpop.f32.mrf.mxu1  ;;  %v5298_v15 = vld [vmem:[#allocation5 + $0xa] sm:$0x3]  ;;  %v11180_v18 = vld [vmem:[%s17411_s11 + $0xb0] sm:$0xff] }
0x1036   :  { %v4402_v9 = vadd.f32 %v15531_v6, %v4306_v58  ;;  %v4212_v38 = vadd.f32 %v17449_v1, %v4116_v53  ;;  %v11175_v58 = vld [vmem:[%s17411_s11 + $0x88] sm:$0xff]  ;;  %v11151_v53 = vld [vmem:[%s17411_s11 + $0x70] sm:$0xff]  ;;  %v4775_v1 = vld [vmem:[%s17411_s11 + $0x38] sm:$0xff] }
0x1038   :  { %v4498_v6 = vadd.f32 %v17446_v39, %v4402_v9  ;;  %v11176_v9 = vld [vmem:[%s17411_s11 + $0x90] sm:$0xff]  ;;  %v5182_v39 = vld [vmem:[#allocation5 + $0x8] sm:$0x3] }
0x1039   :  { %11118 = vmatmul.msk.f32.gmra.mxu2 %vm3266_vm3, %v4551_v61  ;;  %v17447_v61 = vld [vmem:[#allocation17_spill] sm:$0xff] }
0x103a   :  { %v4307_v46 = vadd.f32 %v17447_v61, %v4211_v29  ;;  %v4771_v29 = vld [vmem:[%s17411_s11 + $0x18] sm:$0xff]  ;;  %v11179_v61 = vld [vmem:[%s17411_s11 + $0xa8] sm:$0xff] }
0x103c   :  { %v4403_v11 = vadd.f32 %v15533_v5, %v4307_v46  ;;  %v17451_v5 = vld [vmem:[#allocation18_spill] sm:$0xff]  ;;  %v4686_v8 = vpop.f32.mrf.mxu1 }
0x103d   :  { %v4308_v57 = vadd.f32 %v17451_v5, %v4212_v38  ;;  %v11150_v46 = vld [vmem:[%s17411_s11 + $0x68] sm:$0xff]  ;;  %v11199_v5 = vld [vmem:[%s17411_s11 + $0xe0] sm:$0xff] }
0x103e   :  { %v4499_v26 = vadd.f32 %v17450_v55, %v4403_v11  ;;  %v4774_v11 = vld [vmem:[%s17411_s11 + $0x30] sm:$0xff]  ;;  %v5414_v38 = vld [vmem:[#allocation5 + $0xc] sm:$0x3] }
0x103f   :  { %v4404_v25 = vadd.f32 %v15535_v16, %v4308_v57  ;;  %v4715_v16 = vpop.permute.xlu0 %4714  ;;  %v11196_v55 = vld [vmem:[%s17411_s11 + $0xc8] sm:$0xff] }
0x1040   :  { %v11200_v57 = vld [vmem:[%s17411_s11 + $0xe8] sm:$0xff] }
0x1041   :  { %v4500_v28 = vadd.f32 %v17452_v42, %v4404_v25  ;;  %v11202_v25 = vld [vmem:[%s17411_s11 + $0xf8] sm:$0xff] }
0x10a4   :  { %v4581_v0 = vpop.f32.mrf.mxu2 }
0x10a5   :  { %v4593_v44 = vadd.f32 %v4581_v0, %v4497_v48  ;;  %v11174_v48 = vld [vmem:[%s17411_s11 + $0x80] sm:$0xff] }
0x10a7   :  { %v4689_v13 = vadd.f32 %v4677_v4, %v4593_v44 }
0x10a9   :  { %v15595_v17 = vadd.f32 %v4700_v12, %v4689_v13  ;;  %v11147_v12 = vld [vmem:[%s17411_s11 + $0x50] sm:$0xff] }
0x10ab   :  { %11136 = vmatmul.msk.f32.vlgmr.msrb.gmra.mxu2 %vm4722_vm5, %v15595_v17  ;;  %11141 = vmatmul.msk.f32.vlgmr.msra.gmra.mxu3 %vm4722_vm5, %v15595_v17 }
0x10ac   :  { %11170 = vmatmul.msk.f32.vlgmr.msra.gmra.mxu0 %vm4722_vm5, %v15595_v17  ;;  %v4584_v63 = vpop.f32.mrf.mxu2 }
0x10ad   :  { %v4594_v47 = vadd.f32 %v4584_v63, %v4498_v6  ;;  %v11149_v6 = vld [vmem:[%s17411_s11 + $0x60] sm:$0xff] }
0x10ae   :  { %v4772_v63 = vld [vmem:[%s17411_s11 + $0x20] sm:$0xff] }
0x10af   :  { %v4690_v30 = vadd.f32 %v4680_v43, %v4594_v47  ;;  %v4770_v43 = vld [vmem:[%s17411_s11 + $0x10] sm:$0xff]  ;;  %v4773_v47 = vld [vmem:[%s17411_s11 + $0x28] sm:$0xff] }
0x10b1   :  { %v15609_v56 = vadd.f32 %v4705_v7, %v4690_v30  ;;  %v11181_v30 = vld [vmem:[%s17411_s11 + $0xb8] sm:$0xff] }
0x10b2   :  { %v11152_v7 = vld [vmem:[%s17411_s11 + $0x78] sm:$0xff] }
0x10b3   :  { %11137 = vmatmul.msk.f32.gmra.mxu2 %vm4722_vm5, %v15609_v56  ;;  %11142 = vmatmul.msk.f32.gmra.mxu3 %vm4722_vm5, %v15609_v56 }
0x10b4   :  { %11171 = vmatmul.msk.f32.gmra.mxu0 %vm4722_vm5, %v15609_v56  ;;  %v4587_v45 = vpop.f32.mrf.mxu2 }
0x10b5   :  { %v4595_v36 = vadd.f32 %v4587_v45, %v4499_v26  ;;  %v11197_v26 = vld [vmem:[%s17411_s11 + $0xd0] sm:$0xff]  ;;  %v11198_v45 = vld [vmem:[%s17411_s11 + $0xd8] sm:$0xff] }
0x10b7   :  { %v4691_v52 = vadd.f32 %v4683_v59, %v4595_v36  ;;  %v11195_v59 = vld [vmem:[%s17411_s11 + $0xc0] sm:$0xff]  ;;  %v11201_v36 = vld [vmem:[%s17411_s11 + $0xf0] sm:$0xff] }
0x10b9   :  { %v15620_v19 = vadd.f32 %v4710_v32, %v4691_v52 }
0x10bb   :  { %11138 = vmatmul.msk.f32.gmra.mxu2 %vm4722_vm5, %v15620_v19  ;;  %11143 = vmatmul.msk.f32.gmra.mxu3 %vm4722_vm5, %v15620_v19 }
0x10bc   :  { %11172 = vmatmul.msk.f32.gmra.mxu0 %vm4722_vm5, %v15620_v19  ;;  %v4590_v60 = vpop.f32.mrf.mxu2 }
0x10bd   :  { %v4596_v21 = vadd.f32 %v4590_v60, %v4500_v28 }
0x10bf   :  { %v4692_v31 = vadd.f32 %v4686_v8, %v4596_v21 }
0x10c1   :  { %v15629_v14 = vadd.f32 %v4715_v16, %v4692_v31 }
0x10c3   :  { %11139 = vmatmul.msk.f32.gmra.mxu2 %vm4722_vm5, %v15629_v14  ;;  %11144 = vmatmul.msk.f32.gmra.mxu3 %vm4722_vm5, %v15629_v14 }
0x10c4   :  { %11173 = vmatmul.msk.f32.gmra.mxu0 %vm4722_vm5, %v15629_v14 }
0x10cc   :  { %11191 = vmatmul.msk.f32.vlgmr.msrb.gmra.mxu0 %vm4722_vm5, %v15595_v17 }
0x10d4   :  { %11192 = vmatmul.msk.f32.gmra.mxu0 %vm4722_vm5, %v15609_v56 }
0x10dc   :  { %11193 = vmatmul.msk.f32.gmra.mxu0 %vm4722_vm5, %v15620_v19 }
0x10e4   :  { %11194 = vmatmul.msk.f32.gmra.mxu0 %vm4722_vm5, %v15629_v14 }
0x1129   :  { %v4971_v54 = vpop.f32.mrf.mxu0 }
0x112e   :  { %v4756_v51 = vpop.f32.mrf.mxu2  ;;  %v4798_v40 = vpop.f32.mrf.mxu3 }
0x1131   :  { %v4974_v37 = vpop.f32.mrf.mxu0 }
0x1136   :  { %v4759_v4 = vpop.f32.mrf.mxu2  ;;  %v4801_v27 = vpop.f32.mrf.mxu3 }
0x1139   :  { %v4977_v20 = vpop.f32.mrf.mxu0 }
0x113e   :  { %v4762_v34 = vpop.f32.mrf.mxu2  ;;  %v4804_v41 = vpop.f32.mrf.mxu3 }
0x1141   :  { %v4980_v2 = vpop.f32.mrf.mxu0 }
0x1142   :  { %5028 = vmatpush.msrb.mxu3 %v4980_v2 }
0x1144   :  { %5029 = vmatpush.msrb.mxu3 %v4977_v20 }
0x1146   :  { %5030 = vmatpush.msrb.mxu3 %v4974_v37  ;;  %v4765_v62 = vpop.f32.mrf.mxu2  ;;  %v4807_v49 = vpop.f32.mrf.mxu3 }
0x1147   :  { %4855 = vmatpush.msra.mxu1 %v4807_v49  ;;  %4920 = vmatpush.msra.mxu2 %v4765_v62 }
0x1148   :  { %5031 = vmatpush.msrb.mxu3 %v4971_v54 }
0x1149   :  { %11182 = vmatmul.msk.f32.vlgmr.msrb.gmra.mxu3 %vm2051_vm2, %v11174_v48  ;;  %v5087_v0 = vpop.f32.mrf.mxu0  ;;  %4856 = vmatpush.msra.mxu1 %v4804_v41 }
0x114a   :  { %4921 = vmatpush.msra.mxu2 %v4762_v34  ;;  %11232 = vmatpush.msk.msra.mxu3 %vm4735_vm4, %v5298_v15  ;;  %v11219_v15 = vld [vmem:[%s17411_s11 + $0x118] sm:$0xff] }
0x114b   :  { %4857 = vmatpush.msra.mxu1 %v4801_v27 }
0x114c   :  { %4922 = vmatpush.msra.mxu2 %v4759_v4  ;;  %11253 = vmatpush.msk.msrb.mxu3 %vm4735_vm4, %v5414_v38 }
0x114d   :  { %4858 = vmatpush.msra.mxu1 %v4798_v40 }
0x114e   :  { %4923 = vmatpush.msra.mxu2 %v4756_v51  ;;  %11153 = vmatmul.msk.f32.vlgmr.msra.gmra.mxu1 %vm2051_vm2, %v11145_v24  ;;  %v11237_v24 = vld [vmem:[%s17411_s11 + $0x140] sm:$0xff] }
0x114f   :  { %11161 = vmatmul.msk.f32.vlgmr.msra.gmra.mxu2 %vm2051_vm2, %v4768_v10 }
0x1150   :  { %11211 = vmatpush.msk.msrb.mxu2 %vm4735_vm4, %v5182_v39 }
0x1151   :  { %11183 = vmatmul.msk.f32.gmra.mxu3 %vm2051_vm2, %v11175_v58  ;;  %v5090_v44 = vpop.f32.mrf.mxu0 }
0x1156   :  { %11154 = vmatmul.msk.f32.gmra.mxu1 %vm2051_vm2, %v11146_v33  ;;  %v11216_v33 = vld [vmem:[%s17411_s11 + $0x100] sm:$0xff] }
0x1157   :  { %11162 = vmatmul.msk.f32.gmra.mxu2 %vm2051_vm2, %v4769_v35  ;;  %v11238_v35 = vld [vmem:[%s17411_s11 + $0x148] sm:$0xff] }
0x1159   :  { %11184 = vmatmul.msk.f32.gmra.mxu3 %vm2051_vm2, %v11176_v9  ;;  %v5093_v13 = vpop.f32.mrf.mxu0 }
0x115e   :  { %11155 = vmatmul.msk.f32.gmra.mxu1 %vm2051_vm2, %v11147_v12  ;;  %v11217_v12 = vld [vmem:[%s17411_s11 + $0x108] sm:$0xff] }
0x115f   :  { %11163 = vmatmul.msk.f32.gmra.mxu2 %vm2051_vm2, %v4770_v43  ;;  %v11239_v43 = vld [vmem:[%s17411_s11 + $0x150] sm:$0xff] }
0x1161   :  { %11185 = vmatmul.msk.f32.gmra.mxu3 %vm2051_vm2, %v11177_v23  ;;  %v5096_v3 = vpop.f32.mrf.mxu0 }
0x1162   :  { %5144 = vmatpush.msrb.mxu1 %v5096_v3 }
0x1164   :  { %5145 = vmatpush.msrb.mxu1 %v5093_v13 }
0x1166   :  { %5146 = vmatpush.msrb.mxu1 %v5090_v44 }
0x1167   :  { %11156 = vmatmul.msk.f32.gmra.mxu1 %vm2051_vm2, %v11148_v22  ;;  %11164 = vmatmul.msk.f32.gmra.mxu2 %vm2051_vm2, %v4771_v29  ;;  %v11218_v22 = vld [vmem:[%s17411_s11 + $0x110] sm:$0xff]  ;;  %v11240_v29 = vld [vmem:[%s17411_s11 + $0x158] sm:$0xff] }
0x1168   :  { %5147 = vmatpush.msrb.mxu1 %v5087_v0 }
0x1169   :  { %11186 = vmatmul.msk.f32.gmra.mxu3 %vm2051_vm2, %v11178_v50 }
0x116f   :  { %11157 = vmatmul.msk.f32.gmra.mxu1 %vm2051_vm2, %v11149_v6  ;;  %11165 = vmatmul.msk.f32.gmra.mxu2 %vm2051_vm2, %v4772_v63  ;;  %v11241_v6 = vld [vmem:[%s17411_s11 + $0x160] sm:$0xff] }
0x1170   :  { %v11258_v63 = vld [vmem:[%s17411_s11 + $0x180] sm:$0xff] }
0x1171   :  { %11187 = vmatmul.msk.f32.gmra.mxu3 %vm2051_vm2, %v11179_v61  ;;  %v5646_v61 = vld [vmem:[#allocation5 + $0x10] sm:$0x3] }
0x1177   :  { %11158 = vmatmul.msk.f32.gmra.mxu1 %vm2051_vm2, %v11150_v46  ;;  %11166 = vmatmul.msk.f32.gmra.mxu2 %vm2051_vm2, %v4773_v47  ;;  %v5530_v46 = vld [vmem:[#allocation5 + $0xe] sm:$0x3]  ;;  %v11220_v47 = vld [vmem:[%s17411_s11 + $0x120] sm:$0xff] }
0x1179   :  { %11188 = vmatmul.msk.f32.gmra.mxu3 %vm2051_vm2, %v11180_v18  ;;  %v11242_v18 = vld [vmem:[%s17411_s11 + $0x168] sm:$0xff] }
0x117f   :  { %11159 = vmatmul.msk.f32.gmra.mxu1 %vm2051_vm2, %v11151_v53  ;;  %11167 = vmatmul.msk.f32.gmra.mxu2 %vm2051_vm2, %v4774_v11  ;;  %v11259_v53 = vld [vmem:[%s17411_s11 + $0x188] sm:$0xff] }
0x1181   :  { %11189 = vmatmul.msk.f32.gmra.mxu3 %vm2051_vm2, %v11181_v30  ;;  %v11221_v30 = vld [vmem:[%s17411_s11 + $0x128] sm:$0xff] }
0x1187   :  { %11160 = vmatmul.msk.f32.gmra.mxu1 %vm2051_vm2, %v11152_v7  ;;  %11168 = vmatmul.msk.f32.gmra.mxu2 %vm2051_vm2, %v4775_v1  ;;  %v11243_v7 = vld [vmem:[%s17411_s11 + $0x170] sm:$0xff] }
0x1188   :  { %v11260_v1 = vld [vmem:[%s17411_s11 + $0x190] sm:$0xff] }
0x1189   :  { %11233 = vmatmul.msk.f32.vlgmr.msra.gmra.mxu3 %vm4722_vm5, %v15595_v17 }
0x118f   :  { %11203 = vmatmul.msk.f32.vlgmr.msrb.gmra.mxu1 %vm2051_vm2, %v11195_v59  ;;  %11212 = vmatmul.msk.f32.vlgmr.msrb.gmra.mxu2 %vm4722_vm5, %v15595_v17  ;;  %v11222_v59 = vld [vmem:[%s17411_s11 + $0x130] sm:$0xff] }
0x1191   :  { %11234 = vmatmul.msk.f32.gmra.mxu3 %vm4722_vm5, %v15609_v56 }
0x1197   :  { %11204 = vmatmul.msk.f32.gmra.mxu1 %vm2051_vm2, %v11196_v55  ;;  %11213 = vmatmul.msk.f32.gmra.mxu2 %vm4722_vm5, %v15609_v56  ;;  %v11244_v55 = vld [vmem:[%s17411_s11 + $0x178] sm:$0xff] }
0x1199   :  { %11235 = vmatmul.msk.f32.gmra.mxu3 %vm4722_vm5, %v15620_v19 }
0x119f   :  { %11205 = vmatmul.msk.f32.gmra.mxu1 %vm2051_vm2, %v11197_v26  ;;  %11214 = vmatmul.msk.f32.gmra.mxu2 %vm4722_vm5, %v15620_v19  ;;  %v11261_v26 = vld [vmem:[%s17411_s11 + $0x198] sm:$0xff] }
0x11a1   :  { %11236 = vmatmul.msk.f32.gmra.mxu3 %vm4722_vm5, %v15629_v14 }
0x11a7   :  { %11206 = vmatmul.msk.f32.gmra.mxu1 %vm2051_vm2, %v11198_v45  ;;  %11215 = vmatmul.msk.f32.gmra.mxu2 %vm4722_vm5, %v15629_v14 }
0x11a9   :  { %11254 = vmatmul.msk.f32.vlgmr.msrb.gmra.mxu3 %vm4722_vm5, %v15595_v17 }
0x11af   :  { %11207 = vmatmul.msk.f32.gmra.mxu1 %vm2051_vm2, %v11199_v5  ;;  %v11223_v5 = vld [vmem:[%s17411_s11 + $0x138] sm:$0xff] }
0x11b1   :  { %11255 = vmatmul.msk.f32.gmra.mxu3 %vm4722_vm5, %v15609_v56 }
0x11b7   :  { %11208 = vmatmul.msk.f32.gmra.mxu1 %vm2051_vm2, %v11200_v57  ;;  %v11262_v57 = vld [vmem:[%s17411_s11 + $0x1a0] sm:$0xff] }
0x11b9   :  { %11256 = vmatmul.msk.f32.gmra.mxu3 %vm4722_vm5, %v15620_v19 }
0x11bf   :  { %11209 = vmatmul.msk.f32.gmra.mxu1 %vm2051_vm2, %v11201_v36  ;;  %v5762_v36 = vld [vmem:[#allocation5 + $0x12] sm:$0x3] }
0x11c1   :  { %11257 = vmatmul.msk.f32.gmra.mxu3 %vm4722_vm5, %v15629_v14 }
0x11c7   :  { %11210 = vmatmul.msk.f32.gmra.mxu1 %vm2051_vm2, %v11202_v25 }
0x11cb   :  { %v15835_v10 = vpop.f32.mrf.mxu1 }
0x11cc   :  { %v15800_v52 = vpop.f32.mrf.mxu3 }
0x11d2   :  { %v15802_v32 = vpop.f32.mrf.mxu2 }
0x11d3   :  { %v15845_v9 = vpop.f32.mrf.mxu1 }
0x11d4   :  { %v15804_v42 = vpop.f32.mrf.mxu3 }
0x11da   :  { %v15806_v28 = vpop.f32.mrf.mxu2 }
0x11db   :  { %v15856_v3 = vpop.f32.mrf.mxu1 }
0x11dc   :  { %v15808_v60 = vpop.f32.mrf.mxu3 }
0x11e2   :  { %v15810_v8 = vpop.f32.mrf.mxu2 }
0x11e4   :  { %v15812_v21 = vpop.f32.mrf.mxu3  ;;  %v15869_v39 = vpop.f32.mrf.mxu1 }
0x11ea   :  { %v15814_v31 = vpop.f32.mrf.mxu2 }
0x11ec   :  { %v15816_v16 = vpop.f32.mrf.mxu3  ;;  %v15891_v11 = vpop.f32.mrf.mxu1 }
0x11f2   :  { %v15818_v54 = vpop.f32.mrf.mxu2 }
0x11f4   :  { %v15820_v51 = vpop.f32.mrf.mxu3  ;;  %v15906_v38 = vpop.f32.mrf.mxu1 }
0x11f5   :  { %17453 = vst [vmem:[#allocation14_spill] sm:$0xff] %v15820_v51 }
0x11fa   :  { %v15822_v40 = vpop.f32.mrf.mxu2 }
0x11fc   :  { %v15824_v37 = vpop.f32.mrf.mxu3  ;;  %v15922_v45 = vpop.f32.mrf.mxu1 }
0x11fd   :  { %17454 = vst [vmem:[#allocation13_spill] sm:$0xff] %v15824_v37 }
0x11fe   :  { %17458 = vst [vmem:[#allocation17_spill] sm:$0xff] %v15922_v45 }
0x1202   :  { %v15826_v4 = vpop.f32.mrf.mxu2 }
0x1203   :  { %17455 = vst [vmem:[#allocation19_spill] sm:$0xff] %v15826_v4 }
0x1204   :  { %v15828_v27 = vpop.f32.mrf.mxu3  ;;  %v15935_v25 = vpop.f32.mrf.mxu1 }
0x1205   :  { %17456 = vst [vmem:[#allocation16_spill] sm:$0xff] %v15828_v27 }
0x1206   :  { %17459 = vst [vmem:[#allocation15_spill] sm:$0xff] %v15935_v25 }
0x120a   :  { %v15830_v20 = vpop.f32.mrf.mxu2 }
0x120b   :  { %17457 = vst [vmem:[#allocation21_spill] sm:$0xff] %v15830_v20 }
0x120c   :  { %v5319_v34 = vpop.f32.mrf.mxu3 }
0x1212   :  { %v5203_v41 = vpop.f32.mrf.mxu2 }
0x1214   :  { %v5322_v2 = vpop.f32.mrf.mxu3 }
0x121a   :  { %v5206_v62 = vpop.f32.mrf.mxu2 }
0x121c   :  { %v5325_v49 = vpop.f32.mrf.mxu3 }
0x1222   :  { %v5209_v48 = vpop.f32.mrf.mxu2 }
0x1224   :  { %v5328_v0 = vpop.f32.mrf.mxu3 }
0x1225   :  { %5376 = vmatpush.msra.mxu2 %v5328_v0 }
0x1227   :  { %5377 = vmatpush.msra.mxu2 %v5325_v49 }
0x1229   :  { %5378 = vmatpush.msra.mxu2 %v5322_v2  ;;  %v15948_v2 = vpop.f32.mrf.mxu1 }
0x122a   :  { %v5212_v58 = vpop.f32.mrf.mxu2 }
0x122b   :  { %5260 = vmatpush.msra.mxu0 %v5212_v58  ;;  %5379 = vmatpush.msra.mxu2 %v5319_v34  ;;  %v11263_v34 = vld [vmem:[%s17411_s11 + $0x1a8] sm:$0xff] }
0x122c   :  { %11245 = vmatmul.msk.f32.vlgmr.msra.gmra.mxu2 %vm2051_vm2, %v11237_v24  ;;  %v5435_v44 = vpop.f32.mrf.mxu3 }
0x122d   :  { %5261 = vmatpush.msra.mxu0 %v5209_v48  ;;  %11295 = vmatpush.msk.msrb.mxu2 %vm4735_vm4, %v5646_v61 }
0x122f   :  { %5262 = vmatpush.msra.mxu0 %v5206_v62  ;;  %v11265_v62 = vld [vmem:[%s17411_s11 + $0x1b8] sm:$0xff] }
0x1231   :  { %5263 = vmatpush.msra.mxu0 %v5203_v41  ;;  %v11264_v41 = vld [vmem:[%s17411_s11 + $0x1b0] sm:$0xff]  ;;  %v15960_v49 = vpop.f32.mrf.mxu1 }
0x1232   :  { %11224 = vmatmul.msk.f32.vlgmr.msra.gmra.mxu0 %vm2051_vm2, %v11216_v33 }
0x1233   :  { %11274 = vmatpush.msk.msrb.mxu0 %vm4735_vm4, %v5530_v46 }
0x1234   :  { %11246 = vmatmul.msk.f32.gmra.mxu2 %vm2051_vm2, %v11238_v35  ;;  %v5438_v13 = vpop.f32.mrf.mxu3 }
0x1239   :  { %v15969_v48 = vpop.f32.mrf.mxu1 }
0x123a   :  { %11225 = vmatmul.msk.f32.gmra.mxu0 %vm2051_vm2, %v11217_v12 }
0x123c   :  { %11247 = vmatmul.msk.f32.gmra.mxu2 %vm2051_vm2, %v11239_v43  ;;  %v5441_v23 = vpop.f32.mrf.mxu3 }
0x1241   :  { %v15973_v0 = vpop.f32.mrf.mxu1 }
0x1242   :  { %11226 = vmatmul.msk.f32.gmra.mxu0 %vm2051_vm2, %v11218_v22 }
0x1244   :  { %11248 = vmatmul.msk.f32.gmra.mxu2 %vm2051_vm2, %v11240_v29  ;;  %v5444_v50 = vpop.f32.mrf.mxu3 }
0x1245   :  { %5492 = vmatpush.msra.mxu1 %v5444_v50 }
0x1247   :  { %5493 = vmatpush.msra.mxu1 %v5441_v23 }
0x1249   :  { %5494 = vmatpush.msra.mxu1 %v5438_v13  ;;  %v15977_v24 = vpop.f32.mrf.mxu1 }
0x124a   :  { %11227 = vmatmul.msk.f32.gmra.mxu0 %vm2051_vm2, %v11219_v15 }
0x124b   :  { %5495 = vmatpush.msra.mxu1 %v5435_v44 }
0x124c   :  { %11249 = vmatmul.msk.f32.gmra.mxu2 %vm2051_vm2, %v11241_v6  ;;  %11266 = vmatmul.msk.f32.vlgmr.msra.gmra.mxu1 %vm2051_vm2, %v11258_v63 }
0x124d   :  { %11316 = vmatpush.msk.msrb.mxu1 %vm4735_vm4, %v5762_v36 }
0x1251   :  { %v15981_v58 = vpop.f32.mrf.mxu1 }
0x1252   :  { %11228 = vmatmul.msk.f32.gmra.mxu0 %vm2051_vm2, %v11220_v47  ;;  %17460 = vst [vmem:[#allocation20_spill] sm:$0xff] %v15981_v58 }
0x1254   :  { %11250 = vmatmul.msk.f32.gmra.mxu2 %vm2051_vm2, %v11242_v18  ;;  %11267 = vmatmul.msk.f32.gmra.mxu1 %vm2051_vm2, %v11259_v53 }
0x1259   :  { %v15987_v35 = vpop.f32.mrf.mxu1 }
0x125a   :  { %11229 = vmatmul.msk.f32.gmra.mxu0 %vm2051_vm2, %v11221_v30  ;;  %17461 = vst [vmem:[#allocation22_spill] sm:$0xff] %v15987_v35 }
0x125c   :  { %11251 = vmatmul.msk.f32.gmra.mxu2 %vm2051_vm2, %v11243_v7  ;;  %11268 = vmatmul.msk.f32.gmra.mxu1 %vm2051_vm2, %v11260_v1 }
0x1261   :  { %v15997_v22 = vpop.f32.mrf.mxu1 }
0x1262   :  { %11230 = vmatmul.msk.f32.gmra.mxu0 %vm2051_vm2, %v11222_v59  ;;  %17462 = vst [vmem:[#allocation18_spill] sm:$0xff] %v15997_v22 }
0x1264   :  { %11252 = vmatmul.msk.f32.gmra.mxu2 %vm2051_vm2, %v11244_v55  ;;  %11269 = vmatmul.msk.f32.gmra.mxu1 %vm2051_vm2, %v11261_v26 }
0x126a   :  { %11231 = vmatmul.msk.f32.gmra.mxu0 %vm2051_vm2, %v11223_v5 }
0x126c   :  { %11270 = vmatmul.msk.f32.gmra.mxu1 %vm2051_vm2, %v11262_v57  ;;  %11296 = vmatmul.msk.f32.vlgmr.msrb.gmra.mxu2 %vm4722_vm5, %v15595_v17 }
0x1272   :  { %11275 = vmatmul.msk.f32.vlgmr.msrb.gmra.mxu0 %vm4722_vm5, %v15595_v17 }
0x1274   :  { %11271 = vmatmul.msk.f32.gmra.mxu1 %vm2051_vm2, %v11263_v34  ;;  %11297 = vmatmul.msk.f32.gmra.mxu2 %vm4722_vm5, %v15609_v56 }
0x127a   :  { %11276 = vmatmul.msk.f32.gmra.mxu0 %vm4722_vm5, %v15609_v56 }
0x127c   :  { %11272 = vmatmul.msk.f32.gmra.mxu1 %vm2051_vm2, %v11264_v41  ;;  %11298 = vmatmul.msk.f32.gmra.mxu2 %vm4722_vm5, %v15620_v19 }
0x1282   :  { %11277 = vmatmul.msk.f32.gmra.mxu0 %vm4722_vm5, %v15620_v19 }
0x1284   :  { %11273 = vmatmul.msk.f32.gmra.mxu1 %vm2051_vm2, %v11265_v62  ;;  %11299 = vmatmul.msk.f32.gmra.mxu2 %vm4722_vm5, %v15629_v14 }
0x128a   :  { %11278 = vmatmul.msk.f32.gmra.mxu0 %vm4722_vm5, %v15629_v14 }
0x128c   :  { %11317 = vmatmul.msk.f32.vlgmr.msrb.gmra.mxu1 %vm4722_vm5, %v15595_v17 }
0x1294   :  { %11318 = vmatmul.msk.f32.gmra.mxu1 %vm4722_vm5, %v15609_v56 }
0x129c   :  { %11319 = vmatmul.msk.f32.gmra.mxu1 %vm4722_vm5, %v15620_v19 }
0x12a4   :  { %11320 = vmatmul.msk.f32.gmra.mxu1 %vm4722_vm5, %v15629_v14 }
0x12af   :  { %v15983_v44 = vpop.f32.mrf.mxu0  ;;  %v15985_v33 = vpop.f32.mrf.mxu2 }
0x12b7   :  { %v15989_v13 = vpop.f32.mrf.mxu0  ;;  %v15991_v12 = vpop.f32.mrf.mxu2 }
0x12bf   :  { %v15993_v43 = vpop.f32.mrf.mxu0  ;;  %v15995_v23 = vpop.f32.mrf.mxu2 }
0x12c7   :  { %v15999_v29 = vpop.f32.mrf.mxu0  ;;  %v16001_v50 = vpop.f32.mrf.mxu2 }
0x12c9   :  { %v16003_v15 = vpop.f32.mrf.mxu1 }
0x12cf   :  { %v16005_v6 = vpop.f32.mrf.mxu0  ;;  %v16007_v63 = vpop.f32.mrf.mxu2 }
0x12d0   :  { %17463 = vst [vmem:[#allocation23_spill] sm:$0xff] %v16007_v63 }
0x12d1   :  { %v16009_v61 = vpop.f32.mrf.mxu1 }
0x12d7   :  { %v16011_v46 = vpop.f32.mrf.mxu0  ;;  %v16013_v47 = vpop.f32.mrf.mxu2 }
0x12d8   :  { %17464 = vst [vmem:[#allocation24_spill] sm:$0xff] %v16011_v46 }
0x12d9   :  { %17465 = vst [vmem:[#allocation25_spill] sm:$0xff] %v16013_v47  ;;  %v16015_v18 = vpop.f32.mrf.mxu1 }
0x12df   :  { %v16017_v53 = vpop.f32.mrf.mxu0  ;;  %v16019_v30 = vpop.f32.mrf.mxu2 }
0x12e0   :  { %17466 = vst [vmem:[#allocation26_spill] sm:$0xff] %v16017_v53 }
0x12e1   :  { %17467 = vst [vmem:[#allocation27_spill] sm:$0xff] %v16019_v30  ;;  %v16021_v7 = vpop.f32.mrf.mxu1 }
0x12e7   :  { %v16023_v1 = vpop.f32.mrf.mxu0  ;;  %v16025_v59 = vpop.f32.mrf.mxu2 }
0x12e8   :  { %17468 = vst [vmem:[#allocation28_spill] sm:$0xff] %v16023_v1 }
0x12e9   :  { %17469 = vst [vmem:[#allocation29_spill] sm:$0xff] %v16025_v59  ;;  %v16027_v55 = vpop.f32.mrf.mxu1  ;;  %v11279_v59 = vld [vmem:[%s17411_s11 + $0x1c0] sm:$0xff] }
0x12ea   :  { %17470 = vst [vmem:[#allocation30_spill] sm:$0xff] %v16027_v55 }
0x12ef   :  { %v5551_v26 = vpop.f32.mrf.mxu0  ;;  %v5667_v5 = vpop.f32.mrf.mxu2 }
0x12f1   :  { %v16029_v57 = vpop.f32.mrf.mxu1 }
0x12f2   :  { %17471 = vst [vmem:[#allocation31_spill] sm:$0xff] %v16029_v57 }
0x12f7   :  { %v5554_v36 = vpop.f32.mrf.mxu0  ;;  %v5670_v34 = vpop.f32.mrf.mxu2 }
0x12f9   :  { %v16031_v41 = vpop.f32.mrf.mxu1 }
0x12fa   :  { %17472 = vst [vmem:[#allocation32_spill] sm:$0xff] %v16031_v41  ;;  %v11300_v41 = vld [vmem:[%s17411_s11 + $0x200] sm:$0xff] }
0x12ff   :  { %v5557_v62 = vpop.f32.mrf.mxu0  ;;  %v5673_v22 = vpop.f32.mrf.mxu2 }
0x1301   :  { %v16033_v27 = vpop.f32.mrf.mxu1 }
0x1302   :  { %17473 = vst [vmem:[#allocation33_spill] sm:$0xff] %v16033_v27 }
0x1307   :  { %v5560_v30 = vpop.f32.mrf.mxu0  ;;  %v5676_v53 = vpop.f32.mrf.mxu2 }
0x1308   :  { %5608 = vmatpush.msra.mxu3 %v5560_v30  ;;  %5724 = vmatpush.msra.mxu0 %v5676_v53  ;;  %v11301_v30 = vld [vmem:[%s17411_s11 + $0x208] sm:$0xff] }
0x1309   :  { %v5783_v1 = vpop.f32.mrf.mxu1 }
0x130a   :  { %5609 = vmatpush.msra.mxu3 %v5557_v62  ;;  %5725 = vmatpush.msra.mxu0 %v5673_v22  ;;  %v11280_v22 = vld [vmem:[%s17411_s11 + $0x1c8] sm:$0xff]  ;;  %v11321_v62 = vld [vmem:[%s17411_s11 + $0x240] sm:$0xff] }
0x130c   :  { %5610 = vmatpush.msra.mxu3 %v5554_v36  ;;  %5726 = vmatpush.msra.mxu0 %v5670_v34  ;;  %v11282_v34 = vld [vmem:[%s17411_s11 + $0x1d8] sm:$0xff] }
0x130e   :  { %5611 = vmatpush.msra.mxu3 %v5551_v26  ;;  %5727 = vmatpush.msra.mxu0 %v5667_v5  ;;  %v11302_v26 = vld [vmem:[%s17411_s11 + $0x210] sm:$0xff] }
0x130f   :  { %11287 = vmatmul.msk.f32.vlgmr.msra.gmra.mxu3 %vm2051_vm2, %v11279_v59  ;;  %11308 = vmatmul.msk.f32.vlgmr.msra.gmra.mxu0 %vm2051_vm2, %v11300_v41  ;;  %v11281_v59 = vld [vmem:[%s17411_s11 + $0x1d0] sm:$0xff]  ;;  %v11303_v41 = vld [vmem:[%s17411_s11 + $0x218] sm:$0xff] }
0x1311   :  { %v5786_v53 = vpop.f32.mrf.mxu1 }
0x1317   :  { %11288 = vmatmul.msk.f32.gmra.mxu3 %vm2051_vm2, %v11280_v22  ;;  %11309 = vmatmul.msk.f32.gmra.mxu0 %vm2051_vm2, %v11301_v30  ;;  %v5878_v22 = vld [vmem:[#allocation5 + $0x14] sm:$0x3]  ;;  %v5994_v30 = vld [vmem:[#allocation5 + $0x16] sm:$0x3] }
0x1318   :  { %11337 = vmatpush.msk.msrb.mxu3 %vm4735_vm4, %v5878_v22  ;;  %11358 = vmatpush.msk.msrb.mxu0 %vm4735_vm4, %v5994_v30  ;;  %v11286_v22 = vld [vmem:[%s17411_s11 + $0x1f8] sm:$0xff] }
0x1319   :  { %v5789_v36 = vpop.f32.mrf.mxu1  ;;  %v11307_v30 = vld [vmem:[%s17411_s11 + $0x238] sm:$0xff] }
0x131f   :  { %11289 = vmatmul.msk.f32.gmra.mxu3 %vm2051_vm2, %v11281_v59  ;;  %11310 = vmatmul.msk.f32.gmra.mxu0 %vm2051_vm2, %v11302_v26  ;;  %v11284_v59 = vld [vmem:[%s17411_s11 + $0x1e8] sm:$0xff] }
0x1320   :  { %v11305_v26 = vld [vmem:[%s17411_s11 + $0x228] sm:$0xff] }
0x1321   :  { %v5792_v5 = vpop.f32.mrf.mxu1 }
0x1322   :  { %5840 = vmatpush.msra.mxu2 %v5792_v5  ;;  %v11323_v5 = vld [vmem:[%s17411_s11 + $0x250] sm:$0xff] }
0x1324   :  { %5841 = vmatpush.msra.mxu2 %v5789_v36  ;;  %v11304_v36 = vld [vmem:[%s17411_s11 + $0x220] sm:$0xff] }
0x1326   :  { %5842 = vmatpush.msra.mxu2 %v5786_v53  ;;  %v11283_v53 = vld [vmem:[%s17411_s11 + $0x1e0] sm:$0xff] }
0x1327   :  { %11290 = vmatmul.msk.f32.gmra.mxu3 %vm2051_vm2, %v11282_v34  ;;  %11311 = vmatmul.msk.f32.gmra.mxu0 %vm2051_vm2, %v11303_v41  ;;  %v11285_v34 = vld [vmem:[%s17411_s11 + $0x1f0] sm:$0xff] }
0x1328   :  { %5843 = vmatpush.msra.mxu2 %v5783_v1  ;;  %v11322_v1 = vld [vmem:[%s17411_s11 + $0x248] sm:$0xff]  ;;  %v11306_v41 = vld [vmem:[%s17411_s11 + $0x230] sm:$0xff] }
0x1329   :  { %11329 = vmatmul.msk.f32.vlgmr.msra.gmra.mxu2 %vm2051_vm2, %v11321_v62  ;;  %v11324_v62 = vld [vmem:[%s17411_s11 + $0x258] sm:$0xff] }
0x132f   :  { %11291 = vmatmul.msk.f32.gmra.mxu3 %vm2051_vm2, %v11283_v53  ;;  %11312 = vmatmul.msk.f32.gmra.mxu0 %vm2051_vm2, %v11304_v36  ;;  %v11325_v53 = vld [vmem:[%s17411_s11 + $0x260] sm:$0xff]  ;;  %v6110_v36 = vld [vmem:[#allocation5 + $0x18] sm:$0x3] }
0x1330   :  { %11379 = vmatpush.msk.msrb.mxu2 %vm4735_vm4, %v6110_v36 }
0x1331   :  { %11330 = vmatmul.msk.f32.gmra.mxu2 %vm2051_vm2, %v11322_v1  ;;  %v11326_v1 = vld [vmem:[%s17411_s11 + $0x268] sm:$0xff] }
0x1337   :  { %11292 = vmatmul.msk.f32.gmra.mxu3 %vm2051_vm2, %v11284_v59  ;;  %11313 = vmatmul.msk.f32.gmra.mxu0 %vm2051_vm2, %v11305_v26  ;;  %v11327_v59 = vld [vmem:[%s17411_s11 + $0x270] sm:$0xff]  ;;  %v11328_v26 = vld [vmem:[%s17411_s11 + $0x278] sm:$0xff] }
0x1339   :  { %11331 = vmatmul.msk.f32.gmra.mxu2 %vm2051_vm2, %v11323_v5 }
0x133f   :  { %11293 = vmatmul.msk.f32.gmra.mxu3 %vm2051_vm2, %v11285_v34  ;;  %11314 = vmatmul.msk.f32.gmra.mxu0 %vm2051_vm2, %v11306_v41 }
0x1341   :  { %11332 = vmatmul.msk.f32.gmra.mxu2 %vm2051_vm2, %v11324_v62 }
0x1347   :  { %11294 = vmatmul.msk.f32.gmra.mxu3 %vm2051_vm2, %v11286_v22  ;;  %11315 = vmatmul.msk.f32.gmra.mxu0 %vm2051_vm2, %v11307_v30 }
0x1349   :  { %11333 = vmatmul.msk.f32.gmra.mxu2 %vm2051_vm2, %v11325_v53 }
0x134f   :  { %11338 = vmatmul.msk.f32.vlgmr.msrb.gmra.mxu3 %vm4722_vm5, %v15595_v17  ;;  %11359 = vmatmul.msk.f32.vlgmr.msrb.gmra.mxu0 %vm4722_vm5, %v15595_v17 }
0x1351   :  { %11334 = vmatmul.msk.f32.gmra.mxu2 %vm2051_vm2, %v11326_v1 }
0x1357   :  { %11339 = vmatmul.msk.f32.gmra.mxu3 %vm4722_vm5, %v15609_v56  ;;  %11360 = vmatmul.msk.f32.gmra.mxu0 %vm4722_vm5, %v15609_v56 }
0x1359   :  { %11335 = vmatmul.msk.f32.gmra.mxu2 %vm2051_vm2, %v11327_v59 }
0x135f   :  { %11340 = vmatmul.msk.f32.gmra.mxu3 %vm4722_vm5, %v15620_v19  ;;  %11361 = vmatmul.msk.f32.gmra.mxu0 %vm4722_vm5, %v15620_v19 }
0x1361   :  { %11336 = vmatmul.msk.f32.gmra.mxu2 %vm2051_vm2, %v11328_v26 }
0x1367   :  { %11341 = vmatmul.msk.f32.gmra.mxu3 %vm4722_vm5, %v15629_v14  ;;  %11362 = vmatmul.msk.f32.gmra.mxu0 %vm4722_vm5, %v15629_v14 }
0x1369   :  { %11380 = vmatmul.msk.f32.vlgmr.msrb.gmra.mxu2 %vm4722_vm5, %v15595_v17 }
0x1371   :  { %11381 = vmatmul.msk.f32.gmra.mxu2 %vm4722_vm5, %v15609_v56 }
0x1379   :  { %11382 = vmatmul.msk.f32.gmra.mxu2 %vm4722_vm5, %v15620_v19 }
0x1381   :  { %11383 = vmatmul.msk.f32.gmra.mxu2 %vm4722_vm5, %v15629_v14 }
0x138c   :  { %v16158_v5 = vpop.f32.mrf.mxu0 }
0x1392   :  { %v16160_v34 = vpop.f32.mrf.mxu3 }
0x1394   :  { %v16162_v41 = vpop.f32.mrf.mxu0 }
0x139a   :  { %v16164_v62 = vpop.f32.mrf.mxu3 }
0x139c   :  { %v16166_v22 = vpop.f32.mrf.mxu0 }
0x13a2   :  { %v16168_v30 = vpop.f32.mrf.mxu3 }
0x13a4   :  { %v16170_v53 = vpop.f32.mrf.mxu0 }
0x13a5   :  { %17474 = vst [vmem:[#allocation34_spill] sm:$0xff] %v16170_v53 }
0x13aa   :  { %v16172_v36 = vpop.f32.mrf.mxu3 }
0x13ab   :  { %17475 = vst [vmem:[#allocation35_spill] sm:$0xff] %v16172_v36 }
0x13ac   :  { %v16174_v1 = vpop.f32.mrf.mxu0  ;;  %v16176_v59 = vpop.f32.mrf.mxu2 }
0x13ad   :  { %17476 = vst [vmem:[#allocation36_spill] sm:$0xff] %v16174_v1 }
0x13b2   :  { %v16178_v26 = vpop.f32.mrf.mxu3 }
0x13b3   :  { %17477 = vst [vmem:[#allocation37_spill] sm:$0xff] %v16178_v26 }
0x13b4   :  { %v16180_v27 = vpop.f32.mrf.mxu0  ;;  %v16182_v20 = vpop.f32.mrf.mxu2 }
0x13b5   :  { %17478 = vst [vmem:[#allocation38_spill] sm:$0xff] %v16180_v27 }
0x13ba   :  { %v16184_v25 = vpop.f32.mrf.mxu3 }
0x13bb   :  { %17479 = vst [vmem:[#allocation39_spill] sm:$0xff] %v16184_v25 }
0x13bc   :  { %v16186_v57 = vpop.f32.mrf.mxu0  ;;  %v16188_v35 = vpop.f32.mrf.mxu2 }
0x13bd   :  { %17480 = vst [vmem:[#allocation40_spill] sm:$0xff] %v16186_v57 }
0x13c2   :  { %v16190_v47 = vpop.f32.mrf.mxu3 }
0x13c3   :  { %17481 = vst [vmem:[#allocation41_spill] sm:$0xff] %v16190_v47 }
0x13c4   :  { %v16192_v37 = vpop.f32.mrf.mxu0  ;;  %v16194_v46 = vpop.f32.mrf.mxu2 }
0x13c5   :  { %17482 = vst [vmem:[#allocation42_spill] sm:$0xff] %v16192_v37  ;;  %v11363_v37 = vld [vmem:[%s17411_s11 + $0x2c0] sm:$0xff] }
0x13c6   :  { %17483 = vst [vmem:[#allocation43_spill] sm:$0xff] %v16194_v46 }
0x13ca   :  { %v16196_v1 = vpop.f32.mrf.mxu3 }
0x13cb   :  { %17484 = vst [vmem:[#allocation44_spill] sm:$0xff] %v16196_v1 }
0x13cc   :  { %v16198_v4 = vpop.f32.mrf.mxu2  ;;  %v6015_v26 = vpop.f32.mrf.mxu0 }
0x13cd   :  { %17485 = vst [vmem:[#allocation45_spill] sm:$0xff] %v16198_v4 }
0x13d2   :  { %v5899_v27 = vpop.f32.mrf.mxu3 }
0x13d4   :  { %v16200_v45 = vpop.f32.mrf.mxu2  ;;  %v6018_v55 = vpop.f32.mrf.mxu0 }
0x13d5   :  { %17486 = vst [vmem:[#allocation46_spill] sm:$0xff] %v16200_v45 }
0x13da   :  { %v5902_v25 = vpop.f32.mrf.mxu3 }
0x13dc   :  { %v16202_v58 = vpop.f32.mrf.mxu2  ;;  %v6021_v57 = vpop.f32.mrf.mxu0 }
0x13dd   :  { %17487 = vst [vmem:[#allocation47_spill] sm:$0xff] %v16202_v58 }
0x13e2   :  { %v5905_v53 = vpop.f32.mrf.mxu3 }
0x13e4   :  { %v16204_v63 = vpop.f32.mrf.mxu2  ;;  %v6024_v47 = vpop.f32.mrf.mxu0 }
0x13e5   :  { %17488 = vst [vmem:[#allocation48_spill] sm:$0xff] %v16204_v63  ;;  %6072 = vmatpush.msra.mxu3 %v6024_v47  ;;  %v11342_v63 = vld [vmem:[%s17411_s11 + $0x280] sm:$0xff]  ;;  %v11364_v47 = vld [vmem:[%s17411_s11 + $0x2c8] sm:$0xff] }
0x13e7   :  { %6073 = vmatpush.msra.mxu3 %v6021_v57  ;;  %v11366_v57 = vld [vmem:[%s17411_s11 + $0x2d8] sm:$0xff] }
0x13e9   :  { %6074 = vmatpush.msra.mxu3 %v6018_v55 }
0x13ea   :  { %v5908_v1 = vpop.f32.mrf.mxu3 }
0x13eb   :  { %5956 = vmatpush.msra.mxu1 %v5908_v1  ;;  %6075 = vmatpush.msra.mxu3 %v6015_v26  ;;  %v11345_v1 = vld [vmem:[%s17411_s11 + $0x298] sm:$0xff]  ;;  %v11367_v26 = vld [vmem:[%s17411_s11 + $0x2e0] sm:$0xff] }
0x13ec   :  { %11371 = vmatmul.msk.f32.vlgmr.msra.gmra.mxu3 %vm2051_vm2, %v11363_v37  ;;  %v6131_v45 = vpop.f32.mrf.mxu2  ;;  %v11343_v37 = vld [vmem:[%s17411_s11 + $0x288] sm:$0xff] }
0x13ed   :  { %5957 = vmatpush.msra.mxu1 %v5905_v53 }
0x13ef   :  { %5958 = vmatpush.msra.mxu1 %v5902_v25  ;;  %v11365_v25 = vld [vmem:[%s17411_s11 + $0x2d0] sm:$0xff] }
0x13f1   :  { %5959 = vmatpush.msra.mxu1 %v5899_v27 }
0x13f2   :  { %11350 = vmatmul.msk.f32.vlgmr.msra.gmra.mxu1 %vm2051_vm2, %v11342_v63  ;;  %v11344_v63 = vld [vmem:[%s17411_s11 + $0x290] sm:$0xff] }
0x13f4   :  { %11372 = vmatmul.msk.f32.gmra.mxu3 %vm2051_vm2, %v11364_v47  ;;  %v6134_v55 = vpop.f32.mrf.mxu2  ;;  %v11384_v47 = vld [vmem:[%s17411_s11 + $0x300] sm:$0xff] }
0x13fa   :  { %11351 = vmatmul.msk.f32.gmra.mxu1 %vm2051_vm2, %v11343_v37  ;;  %v6342_v37 = vld [vmem:[#allocation5 + $0x1c] sm:$0x3] }
0x13fb   :  { %11421 = vmatpush.msk.msrb.mxu3 %vm4735_vm4, %v6342_v37  ;;  %v11349_v37 = vld [vmem:[%s17411_s11 + $0x2b8] sm:$0xff] }
0x13fc   :  { %11373 = vmatmul.msk.f32.gmra.mxu3 %vm2051_vm2, %v11365_v25  ;;  %v6137_v27 = vpop.f32.mrf.mxu2  ;;  %v6226_v25 = vld [vmem:[#allocation5 + $0x1a] sm:$0x3] }
0x13fd   :  { %11400 = vmatpush.msk.msrb.mxu1 %vm4735_vm4, %v6226_v25  ;;  %v11388_v25 = vld [vmem:[%s17411_s11 + $0x320] sm:$0xff] }
0x1402   :  { %11352 = vmatmul.msk.f32.gmra.mxu1 %vm2051_vm2, %v11344_v63  ;;  %v11347_v63 = vld [vmem:[%s17411_s11 + $0x2a8] sm:$0xff] }
0x1404   :  { %11374 = vmatmul.msk.f32.gmra.mxu3 %vm2051_vm2, %v11366_v57  ;;  %v6140_v53 = vpop.f32.mrf.mxu2  ;;  %v11369_v57 = vld [vmem:[%s17411_s11 + $0x2f0] sm:$0xff] }
0x1405   :  { %6188 = vmatpush.msra.mxu0 %v6140_v53  ;;  %v11386_v53 = vld [vmem:[%s17411_s11 + $0x310] sm:$0xff] }
0x1407   :  { %6189 = vmatpush.msra.mxu0 %v6137_v27  ;;  %v11368_v27 = vld [vmem:[%s17411_s11 + $0x2e8] sm:$0xff] }
0x1409   :  { %6190 = vmatpush.msra.mxu0 %v6134_v55  ;;  %v11346_v55 = vld [vmem:[%s17411_s11 + $0x2a0] sm:$0xff] }
0x140a   :  { %11353 = vmatmul.msk.f32.gmra.mxu1 %vm2051_vm2, %v11345_v1  ;;  %v11348_v1 = vld [vmem:[%s17411_s11 + $0x2b0] sm:$0xff] }
0x140b   :  { %6191 = vmatpush.msra.mxu0 %v6131_v45  ;;  %v11385_v45 = vld [vmem:[%s17411_s11 + $0x308] sm:$0xff] }
0x140c   :  { %11375 = vmatmul.msk.f32.gmra.mxu3 %vm2051_vm2, %v11367_v26  ;;  %11392 = vmatmul.msk.f32.vlgmr.msra.gmra.mxu0 %vm2051_vm2, %v11384_v47  ;;  %v11370_v26 = vld [vmem:[%s17411_s11 + $0x2f8] sm:$0xff] }
0x140d   :  { %v11387_v47 = vld [vmem:[%s17411_s11 + $0x318] sm:$0xff] }
0x1412   :  { %11354 = vmatmul.msk.f32.gmra.mxu1 %vm2051_vm2, %v11346_v55  ;;  %v6458_v55 = vld [vmem:[#allocation5 + $0x1e] sm:$0x3] }
0x1413   :  { %11442 = vmatpush.msk.msrb.mxu0 %vm4735_vm4, %v6458_v55 }
0x1414   :  { %11376 = vmatmul.msk.f32.gmra.mxu3 %vm2051_vm2, %v11368_v27  ;;  %11393 = vmatmul.msk.f32.gmra.mxu0 %vm2051_vm2, %v11385_v45  ;;  %v11389_v27 = vld [vmem:[%s17411_s11 + $0x328] sm:$0xff]  ;;  %v11390_v45 = vld [vmem:[%s17411_s11 + $0x330] sm:$0xff] }
0x141a   :  { %11355 = vmatmul.msk.f32.gmra.mxu1 %vm2051_vm2, %v11347_v63  ;;  %v11391_v63 = vld [vmem:[%s17411_s11 + $0x338] sm:$0xff] }
0x141c   :  { %11377 = vmatmul.msk.f32.gmra.mxu3 %vm2051_vm2, %v11369_v57  ;;  %11394 = vmatmul.msk.f32.gmra.mxu0 %vm2051_vm2, %v11386_v53 }
0x1422   :  { %11356 = vmatmul.msk.f32.gmra.mxu1 %vm2051_vm2, %v11348_v1 }
0x1424   :  { %11378 = vmatmul.msk.f32.gmra.mxu3 %vm2051_vm2, %v11370_v26  ;;  %11395 = vmatmul.msk.f32.gmra.mxu0 %vm2051_vm2, %v11387_v47 }
0x142a   :  { %11357 = vmatmul.msk.f32.gmra.mxu1 %vm2051_vm2, %v11349_v37 }
0x142c   :  { %11396 = vmatmul.msk.f32.gmra.mxu0 %vm2051_vm2, %v11388_v25  ;;  %11422 = vmatmul.msk.f32.vlgmr.msrb.gmra.mxu3 %vm4722_vm5, %v15595_v17 }
0x1432   :  { %11401 = vmatmul.msk.f32.vlgmr.msrb.gmra.mxu1 %vm4722_vm5, %v15595_v17 }
0x1434   :  { %11397 = vmatmul.msk.f32.gmra.mxu0 %vm2051_vm2, %v11389_v27  ;;  %11423 = vmatmul.msk.f32.gmra.mxu3 %vm4722_vm5, %v15609_v56 }
0x143a   :  { %11402 = vmatmul.msk.f32.gmra.mxu1 %vm4722_vm5, %v15609_v56 }
0x143c   :  { %11398 = vmatmul.msk.f32.gmra.mxu0 %vm2051_vm2, %v11390_v45  ;;  %11424 = vmatmul.msk.f32.gmra.mxu3 %vm4722_vm5, %v15620_v19 }
0x1442   :  { %11403 = vmatmul.msk.f32.gmra.mxu1 %vm4722_vm5, %v15620_v19 }
0x1444   :  { %11399 = vmatmul.msk.f32.gmra.mxu0 %vm2051_vm2, %v11391_v63  ;;  %11425 = vmatmul.msk.f32.gmra.mxu3 %vm4722_vm5, %v15629_v14 }
0x144a   :  { %11404 = vmatmul.msk.f32.gmra.mxu1 %vm4722_vm5, %v15629_v14 }
0x144c   :  { %11443 = vmatmul.msk.f32.vlgmr.msrb.gmra.mxu0 %vm4722_vm5, %v15595_v17 }
0x1454   :  { %11444 = vmatmul.msk.f32.gmra.mxu0 %vm4722_vm5, %v15609_v56 }
0x145c   :  { %11445 = vmatmul.msk.f32.gmra.mxu0 %vm4722_vm5, %v15620_v19 }
0x1464   :  { %11446 = vmatmul.msk.f32.gmra.mxu0 %vm4722_vm5, %v15629_v14 }
0x146f   :  { %v16329_v57 = vpop.f32.mrf.mxu1  ;;  %v16331_v53 = vpop.f32.mrf.mxu3 }
0x1477   :  { %v16333_v1 = vpop.f32.mrf.mxu1  ;;  %v16335_v26 = vpop.f32.mrf.mxu3 }
0x147f   :  { %v16337_v47 = vpop.f32.mrf.mxu1  ;;  %v16339_v17 = vpop.f32.mrf.mxu3 }
0x1480   :  { %17489 = vst [vmem:[#allocation49_spill] sm:$0xff] %v16337_v47 }
0x1481   :  { %17490 = vst [vmem:[#allocation50_spill] sm:$0xff] %v16339_v17 }
0x1487   :  { %v16341_v37 = vpop.f32.mrf.mxu1  ;;  %v16343_v56 = vpop.f32.mrf.mxu3 }
0x1488   :  { %17491 = vst [vmem:[#allocation51_spill] sm:$0xff] %v16341_v37 }
0x1489   :  { %17492 = vst [vmem:[#allocation52_spill] sm:$0xff] %v16343_v56  ;;  %v16345_v19 = vpop.f32.mrf.mxu0 }
0x148f   :  { %v16347_v25 = vpop.f32.mrf.mxu1  ;;  %v16349_v14 = vpop.f32.mrf.mxu3 }
0x1490   :  { %17493 = vst [vmem:[#allocation53_spill] sm:$0xff] %v16347_v25 }
0x1491   :  { %17494 = vst [vmem:[#allocation54_spill] sm:$0xff] %v16349_v14  ;;  %v16351_v55 = vpop.f32.mrf.mxu0 }
0x1497   :  { %v16353_v27 = vpop.f32.mrf.mxu1  ;;  %v16355_v45 = vpop.f32.mrf.mxu3 }
0x1498   :  { %17495 = vst [vmem:[#allocation55_spill] sm:$0xff] %v16353_v27 }
0x1499   :  { %17496 = vst [vmem:[#allocation56_spill] sm:$0xff] %v16355_v45  ;;  %v16357_v63 = vpop.f32.mrf.mxu0 }
0x149a   :  { %17497 = vst [vmem:[#allocation57_spill] sm:$0xff] %v16357_v63 }
0x149f   :  { %v16359_v58 = vpop.f32.mrf.mxu1  ;;  %v16361_v4 = vpop.f32.mrf.mxu3 }
0x14a0   :  { %17498 = vst [vmem:[#allocation58_spill] sm:$0xff] %v16359_v58 }
0x14a1   :  { %17499 = vst [vmem:[#allocation59_spill] sm:$0xff] %v16361_v4  ;;  %v16363_v37 = vpop.f32.mrf.mxu0 }
0x14a2   :  { %17500 = vst [vmem:[#allocation60_spill] sm:$0xff] %v16363_v37 }
0x14a7   :  { %v16365_v56 = vpop.f32.mrf.mxu1  ;;  %v16367_v46 = vpop.f32.mrf.mxu3 }
0x14a8   :  { %17501 = vst [vmem:[#allocation61_spill] sm:$0xff] %v16365_v56 }
0x14a9   :  { %17502 = vst [vmem:[#allocation62_spill] sm:$0xff] %v16367_v46  ;;  %v16369_v25 = vpop.f32.mrf.mxu0  ;;  %v11405_v46 = vld [vmem:[%s17411_s11 + $0x340] sm:$0xff] }
0x14af   :  { %v6247_v14 = vpop.f32.mrf.mxu1  ;;  %v6363_v17 = vpop.f32.mrf.mxu3 }
0x14b1   :  { %v16371_v51 = vpop.f32.mrf.mxu0 }
0x14b7   :  { %v6250_v27 = vpop.f32.mrf.mxu1  ;;  %v6366_v45 = vpop.f32.mrf.mxu3 }
0x14b9   :  { %v16373_v47 = vpop.f32.mrf.mxu0 }
0x14ba   :  { %17503 = vst [vmem:[#allocation63_spill] sm:$0xff] %v16373_v47  ;;  %v11426_v47 = vld [vmem:[%s17411_s11 + $0x380] sm:$0xff] }
0x14bf   :  { %v6253_v63 = vpop.f32.mrf.mxu1  ;;  %v6369_v58 = vpop.f32.mrf.mxu3 }
0x14c1   :  { %v16375_v36 = vpop.f32.mrf.mxu0 }
0x14c7   :  { %v6256_v4 = vpop.f32.mrf.mxu1  ;;  %v6372_v37 = vpop.f32.mrf.mxu3 }
0x14c8   :  { %6304 = vmatpush.msra.mxu2 %v6256_v4  ;;  %6420 = vmatpush.msra.mxu1 %v6372_v37  ;;  %v11427_v37 = vld [vmem:[%s17411_s11 + $0x388] sm:$0xff] }
0x14c9   :  { %v6479_v56 = vpop.f32.mrf.mxu0 }
0x14ca   :  { %6305 = vmatpush.msra.mxu2 %v6253_v63  ;;  %6421 = vmatpush.msra.mxu1 %v6369_v58  ;;  %v11406_v58 = vld [vmem:[%s17411_s11 + $0x348] sm:$0xff]  ;;  %v11447_v63 = vld [vmem:[%s17411_s11 + $0x3c0] sm:$0xff] }
0x14cc   :  { %6306 = vmatpush.msra.mxu2 %v6250_v27  ;;  %6422 = vmatpush.msra.mxu1 %v6366_v45  ;;  %v11429_v45 = vld [vmem:[%s17411_s11 + $0x398] sm:$0xff] }
0x14ce   :  { %6307 = vmatpush.msra.mxu2 %v6247_v14  ;;  %6423 = vmatpush.msra.mxu1 %v6363_v17  ;;  %v11408_v14 = vld [vmem:[%s17411_s11 + $0x358] sm:$0xff] }
0x14cf   :  { %11413 = vmatmul.msk.f32.vlgmr.msra.gmra.mxu2 %vm2051_vm2, %v11405_v46  ;;  %11434 = vmatmul.msk.f32.vlgmr.msra.gmra.mxu1 %vm2051_vm2, %v11426_v47  ;;  %v11407_v46 = vld [vmem:[%s17411_s11 + $0x350] sm:$0xff] }
0x14d0   :  { %v11428_v47 = vld [vmem:[%s17411_s11 + $0x390] sm:$0xff] }
0x14d1   :  { %v6482_v4 = vpop.f32.mrf.mxu0 }
0x14d7   :  { %11414 = vmatmul.msk.f32.gmra.mxu2 %vm2051_vm2, %v11406_v58  ;;  %11435 = vmatmul.msk.f32.gmra.mxu1 %vm2051_vm2, %v11427_v37  ;;  %v11409_v58 = vld [vmem:[%s17411_s11 + $0x360] sm:$0xff] }
0x14d8   :  { %v11430_v37 = vld [vmem:[%s17411_s11 + $0x3a0] sm:$0xff] }
0x14d9   :  { %v6485_v27 = vpop.f32.mrf.mxu0 }
0x14df   :  { %11415 = vmatmul.msk.f32.gmra.mxu2 %vm2051_vm2, %v11407_v46  ;;  %11436 = vmatmul.msk.f32.gmra.mxu1 %vm2051_vm2, %v11428_v47  ;;  %v11449_v46 = vld [vmem:[%s17411_s11 + $0x3d0] sm:$0xff] }
0x14e0   :  { %v11411_v47 = vld [vmem:[%s17411_s11 + $0x370] sm:$0xff] }
0x14e1   :  { %v6488_v17 = vpop.f32.mrf.mxu0 }
0x14e2   :  { %6536 = vmatpush.msra.mxu3 %v6488_v17  ;;  %v11432_v17 = vld [vmem:[%s17411_s11 + $0x3b0] sm:$0xff] }
0x14e4   :  { %6537 = vmatpush.msra.mxu3 %v6485_v27  ;;  %v11431_v27 = vld [vmem:[%s17411_s11 + $0x3a8] sm:$0xff] }
0x14e6   :  { %6538 = vmatpush.msra.mxu3 %v6482_v4  ;;  %v11448_v4 = vld [vmem:[%s17411_s11 + $0x3c8] sm:$0xff] }
0x14e7   :  { %11416 = vmatmul.msk.f32.gmra.mxu2 %vm2051_vm2, %v11408_v14  ;;  %11437 = vmatmul.msk.f32.gmra.mxu1 %vm2051_vm2, %v11429_v45  ;;  %v11450_v14 = vld [vmem:[%s17411_s11 + $0x3d8] sm:$0xff] }
0x14e8   :  { %6539 = vmatpush.msra.mxu3 %v6479_v56  ;;  %v11410_v56 = vld [vmem:[%s17411_s11 + $0x368] sm:$0xff]  ;;  %v11412_v45 = vld [vmem:[%s17411_s11 + $0x378] sm:$0xff] }
0x14e9   :  { %11455 = vmatmul.msk.f32.vlgmr.msra.gmra.mxu3 %vm2051_vm2, %v11447_v63  ;;  %v11433_v63 = vld [vmem:[%s17411_s11 + $0x3b8] sm:$0xff] }
0x14ef   :  { %11417 = vmatmul.msk.f32.gmra.mxu2 %vm2051_vm2, %v11409_v58  ;;  %11438 = vmatmul.msk.f32.gmra.mxu1 %vm2051_vm2, %v11430_v37  ;;  %v11451_v58 = vld [vmem:[%s17411_s11 + $0x3e0] sm:$0xff]  ;;  %v11452_v37 = vld [vmem:[%s17411_s11 + $0x3e8] sm:$0xff] }
0x14f1   :  { %11456 = vmatmul.msk.f32.gmra.mxu3 %vm2051_vm2, %v11448_v4  ;;  %v11453_v4 = vld [vmem:[%s17411_s11 + $0x3f0] sm:$0xff] }
0x14f7   :  { %11418 = vmatmul.msk.f32.gmra.mxu2 %vm2051_vm2, %v11410_v56  ;;  %11439 = vmatmul.msk.f32.gmra.mxu1 %vm2051_vm2, %v11431_v27  ;;  %v11454_v56 = vld [vmem:[%s17411_s11 + $0x3f8] sm:$0xff]  ;;  %v4926_v27 = vadd.f32 %v15802_v32, %v15835_v10  ;;  %v11473_v32 = vld [vmem:[%s17413_s13 + $0x30] sm:$0xff] }
0x14f9   :  { %11457 = vmatmul.msk.f32.gmra.mxu3 %vm2051_vm2, %v11449_v46  ;;  %v6592_v46 = vld [vmem:[%s17413_s13 + $0x18] sm:$0xff] }
0x14fa   :  { %6629 = vmatpush.msrb.mxu2 %v6592_v46 }
0x14ff   :  { %11419 = vmatmul.msk.f32.gmra.mxu2 %vm2051_vm2, %v11411_v47  ;;  %11440 = vmatmul.msk.f32.gmra.mxu1 %vm2051_vm2, %v11432_v17  ;;  %v11474_v47 = vld [vmem:[%s17413_s13 + $0x38] sm:$0xff]  ;;  %v5057_v17 = vadd.f32 %v15800_v52, %v4926_v27  ;;  %v11472_v52 = vld [vmem:[%s17413_s13 + $0x28] sm:$0xff] }
0x1500   :  { %6679 = vmatpush.msra.mxu0 %v11474_v47 }
0x1501   :  { %11458 = vmatmul.msk.f32.gmra.mxu3 %vm2051_vm2, %v11450_v14  ;;  %v6591_v14 = vld [vmem:[%s17413_s13 + $0x10] sm:$0xff]  ;;  %v5173_v10 = vadd.f32 %v15948_v2, %v5057_v17  ;;  %v11471_v2 = vld [vmem:[%s17413_s13 + $0x20] sm:$0xff] }
0x1502   :  { %6630 = vmatpush.msrb.mxu2 %v6591_v14  ;;  %6680 = vmatpush.msra.mxu0 %v11473_v32 }
0x1504   :  { %6681 = vmatpush.msra.mxu0 %v11472_v52 }
0x1506   :  { %6682 = vmatpush.msra.mxu0 %v11471_v2 }
0x1507   :  { %11420 = vmatmul.msk.f32.gmra.mxu2 %vm2051_vm2, %v11412_v45  ;;  %11441 = vmatmul.msk.f32.gmra.mxu1 %vm2051_vm2, %v11433_v63  ;;  %v6590_v45 = vld [vmem:[%s17413_s13 + $0x8] sm:$0xff]  ;;  %v4929_v63 = vadd.f32 %v15806_v28, %v15845_v9 }
0x1508   :  { %6631 = vmatpush.msrb.mxu2 %v6590_v45 }
0x1509   :  { %11459 = vmatmul.msk.f32.gmra.mxu3 %vm2051_vm2, %v11451_v58  ;;  %v5289_v58 = vadd.f32 %v15983_v44, %v5173_v10  ;;  %v4932_v44 = vadd.f32 %v15810_v8, %v15856_v3  ;;  %v4935_v8 = vadd.f32 %v15814_v31, %v15869_v39 }
0x150b   :  { %v5059_v14 = vadd.f32 %v15808_v60, %v4932_v44 }
0x1511   :  { %11460 = vmatmul.msk.f32.gmra.mxu3 %vm2051_vm2, %v11452_v37  ;;  %v6589_v37 = vld [vmem:[%s17413_s13] sm:$0xff] }
0x1512   :  { %6632 = vmatpush.msrb.mxu2 %v6589_v37 }
0x1519   :  { %11461 = vmatmul.msk.f32.gmra.mxu3 %vm2051_vm2, %v11453_v4  ;;  %v5058_v4 = vadd.f32 %v15804_v42, %v4929_v63  ;;  %v17504_v63 = vld [vmem:[#allocation35_spill] sm:$0xff] }
0x151b   :  { %v5174_v27 = vadd.f32 %v15960_v49, %v5058_v4 }
0x151d   :  { %v5290_v46 = vadd.f32 %v15989_v13, %v5174_v27 }
0x151f   :  { %v5406_v32 = vadd.f32 %v15991_v12, %v5290_v46  ;;  %v5060_v12 = vadd.f32 %v15812_v21, %v4935_v8 }
0x1521   :  { %11462 = vmatmul.msk.f32.gmra.mxu3 %vm2051_vm2, %v11454_v56  ;;  %v5405_v56 = vadd.f32 %v15985_v33, %v5289_v58  ;;  %v5175_v33 = vadd.f32 %v15969_v48, %v5059_v14  ;;  %v5522_v49 = vadd.f32 %v16009_v61, %v5406_v32  ;;  %v17505_v58 = vld [vmem:[#allocation49_spill] sm:$0xff]  ;;  %v17511_v14 = vld [vmem:[#allocation30_spill] sm:$0xff] }
0x1523   :  { %v5521_v28 = vadd.f32 %v16003_v15, %v5405_v56  ;;  %v5291_v3 = vadd.f32 %v15993_v43, %v5175_v33  ;;  %v5638_v13 = vadd.f32 %v16164_v62, %v5522_v49  ;;  %v4938_v62 = vadd.f32 %v15818_v54, %v15891_v11  ;;  %v6573_v11 = vld [vmem:[%s17412_s12] sm:$0xff]  ;;  %v17509_v56 = vld [vmem:[#allocation50_spill] sm:$0xff] }
0x1524   :  { %v17513_v49 = vld [vmem:[#allocation57_spill] sm:$0xff] }
0x1525   :  { %v5637_v47 = vadd.f32 %v16160_v34, %v5521_v28  ;;  %v5754_v48 = vadd.f32 %v16162_v41, %v5638_v13  ;;  %v17515_v13 = vld [vmem:[#allocation19_spill] sm:$0xff] }
0x1527   :  { %v5753_v42 = vadd.f32 %v16158_v5, %v5637_v47  ;;  %v5407_v5 = vadd.f32 %v15995_v23, %v5291_v3  ;;  %v5870_v39 = vadd.f32 %v16182_v20, %v5754_v48  ;;  %v17514_v3 = vld [vmem:[#allocation17_spill] sm:$0xff] }
0x1529   :  { %v5869_v15 = vadd.f32 %v16176_v59, %v5753_v42  ;;  %v5176_v59 = vadd.f32 %v15973_v0, %v5060_v12  ;;  %v5523_v31 = vadd.f32 %v16015_v18, %v5407_v5  ;;  %v5986_v41 = vadd.f32 %v16333_v1, %v5870_v39  ;;  %v17512_v42 = vld [vmem:[#allocation43_spill] sm:$0xff]  ;;  %v17517_v5 = vld [vmem:[#allocation37_spill] sm:$0xff] }
0x152b   :  { %v5985_v34 = vadd.f32 %v16329_v57, %v5869_v15  ;;  %v5292_v21 = vadd.f32 %v15999_v29, %v5176_v59  ;;  %v5639_v23 = vadd.f32 %v16168_v30, %v5523_v31  ;;  %v6102_v20 = vadd.f32 %v16335_v26, %v5986_v41  ;;  %v17521_v41 = vld [vmem:[#allocation36_spill] sm:$0xff] }
0x152d   :  { %v6101_v61 = vadd.f32 %v16331_v53, %v5985_v34  ;;  %v5061_v53 = vadd.f32 %v15816_v16, %v4938_v62  ;;  %v5408_v0 = vadd.f32 %v16001_v50, %v5292_v21  ;;  %v5755_v18 = vadd.f32 %v16166_v22, %v5639_v23  ;;  %v17520_v21 = vld [vmem:[#allocation25_spill] sm:$0xff] }
0x152e   :  { %v6218_v16 = vadd.f32 %v16351_v55, %v6102_v20  ;;  %v4941_v50 = vadd.f32 %v15822_v40, %v15906_v38  ;;  %v17507_v55 = vld [vmem:[#allocation23_spill] sm:$0xff]  ;;  %v17508_v38 = vld [vmem:[#allocation34_spill] sm:$0xff]  ;;  %v4944_v34 = vadd.f32 %v17515_v13, %v17514_v3 }
0x152f   :  { %v6217_v43 = vadd.f32 %v16345_v19, %v6101_v61  ;;  %v5177_v52 = vadd.f32 %v15977_v24, %v5061_v53  ;;  %v5524_v29 = vadd.f32 %v16021_v7, %v5408_v0  ;;  %v5871_v30 = vadd.f32 %v16188_v35, %v5755_v18  ;;  %v17506_v35 = vld [vmem:[#allocation14_spill] sm:$0xff]  ;;  %v17518_v61 = vld [vmem:[#allocation51_spill] sm:$0xff]  ;;  %v17522_v53 = vld [vmem:[#allocation52_spill] sm:$0xff] }
0x1530   :  { %v5062_v7 = vadd.f32 %v17506_v35, %v4941_v50  ;;  %v17523_v20 = vld [vmem:[#allocation22_spill] sm:$0xff] }
0x1531   :  { %v5293_v22 = vadd.f32 %v16005_v6, %v5177_v52  ;;  %v5640_v24 = vadd.f32 %v17504_v63, %v5524_v29  ;;  %v5987_v37 = vadd.f32 %v17505_v58, %v5871_v30  ;;  %v6575_v52 = vld [vmem:[%s17412_s12 + $0x10] sm:$0xff]  ;;  %v17525_v29 = vld [vmem:[#allocation45_spill] sm:$0xff] }
0x1532   :  { %v17528_v63 = vld [vmem:[#allocation21_spill] sm:$0xff]  ;;  %v17529_v58 = vld [vmem:[#allocation26_spill] sm:$0xff] }
0x1533   :  { %v5409_v40 = vadd.f32 %v17507_v55, %v5293_v22  ;;  %v5756_v6 = vadd.f32 %v17508_v38, %v5640_v24  ;;  %v6103_v27 = vadd.f32 %v17509_v56, %v5987_v37  ;;  %v17527_v22 = vld [vmem:[#allocation15_spill] sm:$0xff]  ;;  %v17538_v3 = vld [vmem:[#allocation46_spill] sm:$0xff] }
0x1534   :  { %v4947_v24 = vadd.f32 %v17528_v63, %v17527_v22  ;;  %v11507_v22 = vld [vmem:[%s17413_s13 + $0x60] sm:$0xff] }
0x1535   :  { %v5525_v32 = vadd.f32 %v17511_v14, %v5409_v40  ;;  %v5872_v33 = vadd.f32 %v17512_v42, %v5756_v6  ;;  %v6219_v15 = vadd.f32 %v17513_v49, %v6103_v27  ;;  %v17532_v6 = vld [vmem:[#allocation16_spill] sm:$0xff]  ;;  %v17536_v42 = vld [vmem:[#allocation18_spill] sm:$0xff] }
0x1536   :  { %v5064_v56 = vadd.f32 %v17532_v6, %v4947_v24  ;;  %v6576_v49 = vld [vmem:[%s17412_s12 + $0x18] sm:$0xff] }
0x1537   :  { %v5641_v48 = vadd.f32 %v17517_v5, %v5525_v32  ;;  %v17547_v63 = vld [vmem:[#allocation44_spill] sm:$0xff] }
0x154c   :  { %v6425_v17 = vpop.f32.mrf.mxu1 }
0x1552   :  { %v6309_v9 = vpop.f32.mrf.mxu2 }
0x1553   :  { %v6333_v57 = vadd.f32 %v6309_v9, %v6217_v43  ;;  %v17510_v9 = vld [vmem:[#allocation20_spill] sm:$0xff]  ;;  %v17519_v43 = vld [vmem:[#allocation13_spill] sm:$0xff] }
0x1554   :  { %v6428_v10 = vpop.f32.mrf.mxu1  ;;  %v5178_v44 = vadd.f32 %v17510_v9, %v5062_v7  ;;  %v5063_v62 = vadd.f32 %v17519_v43, %v4944_v34  ;;  %v17531_v7 = vld [vmem:[#allocation53_spill] sm:$0xff] }
0x1555   :  { %v6449_v19 = vadd.f32 %v6425_v17, %v6333_v57  ;;  %v6574_v17 = vld [vmem:[%s17412_s12 + $0x8] sm:$0xff]  ;;  %v5757_v57 = vadd.f32 %v17521_v41, %v5641_v48 }
0x1556   :  { %v17540_v48 = vld [vmem:[#allocation41_spill] sm:$0xff] }
0x1557   :  { %v5873_v30 = vadd.f32 %v17525_v29, %v5757_v57  ;;  %v17543_v57 = vld [vmem:[#allocation40_spill] sm:$0xff] }
0x1559   :  { %v5989_v55 = vadd.f32 %v17531_v7, %v5873_v30  ;;  %v17546_v30 = vld [vmem:[#allocation47_spill] sm:$0xff] }
0x155a   :  { %v6312_v60 = vpop.f32.mrf.mxu2 }
0x155b   :  { %v6334_v2 = vadd.f32 %v6312_v60, %v6218_v16  ;;  %v17516_v60 = vld [vmem:[#allocation24_spill] sm:$0xff] }
0x155c   :  { %v6431_v26 = vpop.f32.mrf.mxu1  ;;  %v5294_v12 = vadd.f32 %v17516_v60, %v5178_v44  ;;  %v17526_v16 = vld [vmem:[#allocation60_spill] sm:$0xff]  ;;  %v17534_v44 = vld [vmem:[#allocation38_spill] sm:$0xff] }
0x155d   :  { %v6450_v28 = vadd.f32 %v6428_v10, %v6334_v2  ;;  %v5988_v10 = vadd.f32 %v17518_v61, %v5872_v33  ;;  %v17530_v2 = vld [vmem:[#allocation39_spill] sm:$0xff] }
0x155e   :  { %v5410_v23 = vadd.f32 %v17520_v21, %v5294_v12  ;;  %v17539_v12 = vld [vmem:[#allocation28_spill] sm:$0xff]  ;;  %v11509_v21 = vld [vmem:[%s17413_s13 + $0x70] sm:$0xff] }
0x155f   :  { %v6104_v0 = vadd.f32 %v17522_v53, %v5988_v10  ;;  %v17541_v10 = vld [vmem:[#allocation55_spill] sm:$0xff] }
0x1562   :  { %v6315_v45 = vpop.f32.mrf.mxu2 }
0x1563   :  { %v6335_v59 = vadd.f32 %v6315_v45, %v6219_v15  ;;  %v5179_v45 = vadd.f32 %v17523_v20, %v5063_v62  ;;  %v17537_v15 = vld [vmem:[#allocation32_spill] sm:$0xff] }
0x1564   :  { %v6434_v39 = vpop.f32.mrf.mxu1 }
0x1565   :  { %v6451_v18 = vadd.f32 %v6431_v26, %v6335_v59  ;;  %v5295_v37 = vadd.f32 %v17529_v58, %v5179_v45  ;;  %v11508_v45 = vld [vmem:[%s17413_s13 + $0x68] sm:$0xff] }
0x1566   :  { %v17548_v58 = vld [vmem:[#allocation58_spill] sm:$0xff] }
0x156a   :  { %v6318_v46 = vpop.f32.mrf.mxu2 }
0x156c   :  { %v6541_v54 = vpop.f32.mrf.mxu3  ;;  %v6437_v27 = vpop.f32.mrf.mxu1 }
0x156d   :  { %v6565_v1 = vadd.f32 %v6541_v54, %v6449_v19  ;;  %v17524_v54 = vld [vmem:[#allocation31_spill] sm:$0xff] }
0x156f   :  { %v16552_v4 = vadd.f32 %v6573_v11, %v6565_v1  ;;  %v5526_v11 = vadd.f32 %v17524_v54, %v5410_v23  ;;  %v6220_v1 = vadd.f32 %v17526_v16, %v6104_v0  ;;  %v17542_v23 = vld [vmem:[#allocation29_spill] sm:$0xff]  ;;  %v17544_v0 = vld [vmem:[#allocation56_spill] sm:$0xff] }
0x1570   :  { %v6577_v54 = vld [vmem:[%s17412_s12 + $0x20] sm:$0xff] }
0x1571   :  { %11463 = vmatmul.msk.f32.vlgmr.msrb.gmra.mxu2 %vm2051_vm2, %v16552_v4  ;;  %11475 = vmatmul.msk.f32.vlgmr.msra.gmra.mxu0 %vm2051_vm2, %v16552_v4  ;;  %v5642_v35 = vadd.f32 %v17530_v2, %v5526_v11  ;;  %v6336_v40 = vadd.f32 %v6318_v46, %v6220_v1  ;;  %v5180_v46 = vadd.f32 %v17536_v42, %v5064_v56  ;;  %v17545_v11 = vld [vmem:[#allocation33_spill] sm:$0xff] }
0x1572   :  { %v6321_v26 = vpop.f32.mrf.mxu2 }
0x1573   :  { %v6452_v32 = vadd.f32 %v6434_v39, %v6336_v40  ;;  %v5296_v5 = vadd.f32 %v17539_v12, %v5180_v46 }
0x1574   :  { %v6544_v47 = vpop.f32.mrf.mxu3 }
0x1575   :  { %v6566_v8 = vadd.f32 %v6544_v47, %v6450_v28  ;;  %v17533_v28 = vld [vmem:[#allocation27_spill] sm:$0xff]  ;;  %v5758_v47 = vadd.f32 %v17534_v44, %v5642_v35  ;;  %v5412_v41 = vadd.f32 %v17542_v23, %v5296_v5  ;;  %v17549_v35 = vld [vmem:[#allocation42_spill] sm:$0xff] }
0x1576   :  { %v5411_v9 = vadd.f32 %v17533_v28, %v5295_v37  ;;  %v17551_v28 = vld [vmem:[#allocation48_spill] sm:$0xff]  ;;  %v17552_v44 = vld [vmem:[#allocation63_spill] sm:$0xff] }
0x1577   :  { %v16574_v31 = vadd.f32 %v6574_v17, %v6566_v8  ;;  %v17535_v17 = vld [vmem:[#allocation54_spill] sm:$0xff]  ;;  %v5874_v13 = vadd.f32 %v17538_v3, %v5758_v47  ;;  %v5528_v29 = vadd.f32 %v17545_v11, %v5412_v41 }
0x1578   :  { %v6105_v14 = vadd.f32 %v17535_v17, %v5989_v55  ;;  %v5527_v8 = vadd.f32 %v17537_v15, %v5411_v9  ;;  %v17550_v55 = vld [vmem:[#allocation59_spill] sm:$0xff] }
0x1579   :  { %11464 = vmatmul.msk.f32.gmra.mxu2 %vm2051_vm2, %v16574_v31  ;;  %11476 = vmatmul.msk.f32.gmra.mxu0 %vm2051_vm2, %v16574_v31  ;;  %v5990_v59 = vadd.f32 %v17541_v10, %v5874_v13  ;;  %v5644_v24 = vadd.f32 %v17547_v63, %v5528_v29  ;;  %v11493_v63 = vld [vmem:[%s17413_s13 + $0x50] sm:$0xff] }
0x157a   :  { %v6221_v34 = vadd.f32 %v16369_v25, %v6105_v14  ;;  %v5643_v61 = vadd.f32 %v17540_v48, %v5527_v8  ;;  %v6324_v62 = vpop.f32.mrf.mxu2  ;;  %v11510_v25 = vld [vmem:[%s17413_s13 + $0x78] sm:$0xff] }
0x157b   :  { %6908 = vmatpush.msrb.mxu0 %v11510_v25  ;;  %v5760_v7 = vadd.f32 %v17549_v35, %v5644_v24  ;;  %v11492_v24 = vld [vmem:[%s17413_s13 + $0x48] sm:$0xff] }
0x157c   :  { %v6547_v19 = vpop.f32.mrf.mxu3  ;;  %v6337_v39 = vadd.f32 %v6321_v26, %v6221_v34  ;;  %v5759_v53 = vadd.f32 %v17543_v57, %v5643_v61  ;;  %v6579_v34 = vld [vmem:[%s17412_s12 + $0x30] sm:$0xff] }
0x157d   :  { %v6567_v50 = vadd.f32 %v6547_v19, %v6451_v18  ;;  %v6106_v18 = vadd.f32 %v17544_v0, %v5990_v59  ;;  %v6440_v19 = vpop.f32.mrf.mxu1  ;;  %6909 = vmatpush.msrb.mxu0 %v11509_v21  ;;  %v5876_v9 = vadd.f32 %v17551_v28, %v5760_v7  ;;  %v6659_v35 = vld [vmem:[#allocation7 + $0x8] sm:$0xff]  ;;  %v6711_v7 = vld [vmem:[#allocation7 + $0x30] sm:$0xff] }
0x157e   :  { %v6453_v20 = vadd.f32 %v6437_v27, %v6337_v39  ;;  %v5875_v16 = vadd.f32 %v17546_v30, %v5759_v53  ;;  %v6578_v27 = vld [vmem:[%s17412_s12 + $0x28] sm:$0xff]  ;;  %v6580_v39 = vld [vmem:[%s17412_s12 + $0x38] sm:$0xff] }
0x157f   :  { %v16596_v38 = vadd.f32 %v6575_v52, %v6567_v50  ;;  %v6222_v1 = vadd.f32 %v16371_v51, %v6106_v18  ;;  %6910 = vmatpush.msrb.mxu0 %v11508_v45 }
0x1580   :  { %v5991_v37 = vadd.f32 %v17548_v58, %v5875_v16  ;;  %v6658_v58 = vld [vmem:[#allocation7] sm:$0xff] }
0x1581   :  { %11465 = vmatmul.msk.f32.gmra.mxu2 %vm2051_vm2, %v16596_v38  ;;  %11477 = vmatmul.msk.f32.gmra.mxu0 %vm2051_vm2, %v16596_v38  ;;  %v6338_v26 = vadd.f32 %v6324_v62, %v6222_v1  ;;  %v6709_v1 = vld [vmem:[#allocation7 + $0x20] sm:$0xff] }
0x1582   :  { %6911 = vmatpush.msrb.mxu0 %v11507_v22  ;;  %v6327_v51 = vpop.f32.mrf.mxu2  ;;  %v6107_v40 = vadd.f32 %v17550_v55, %v5991_v37  ;;  %v11491_v37 = vld [vmem:[%s17413_s13 + $0x40] sm:$0xff] }
0x1583   :  { %v6454_v6 = vadd.f32 %v6440_v19, %v6338_v26  ;;  %v6710_v26 = vld [vmem:[#allocation7 + $0x28] sm:$0xff] }
0x1584   :  { %v6550_v33 = vpop.f32.mrf.mxu3  ;;  %v6223_v47 = vadd.f32 %v17552_v44, %v6107_v40  ;;  %v6660_v40 = vld [vmem:[#allocation7 + $0x10] sm:$0xff] }
0x1585   :  { %v6568_v60 = vadd.f32 %v6550_v33, %v6452_v32  ;;  %v6443_v14 = vpop.f32.mrf.mxu1  ;;  %v17553_v32 = vld [vmem:[#allocation61_spill] sm:$0xff] }
0x1586   :  { %v5992_v42 = vadd.f32 %v17553_v32, %v5876_v9  ;;  %v6339_v46 = vadd.f32 %v6327_v51, %v6223_v47  ;;  %v11542_v47 = vld [vmem:[%s17413_s13 + $0xb8] sm:$0xff]  ;;  %v11539_v32 = vld [vmem:[%s17413_s13 + $0xa0] sm:$0xff] }
0x1587   :  { %v16616_v43 = vadd.f32 %v6576_v49, %v6568_v60  ;;  %v17554_v49 = vld [vmem:[#allocation62_spill] sm:$0xff] }
0x1588   :  { %v6108_v15 = vadd.f32 %v17554_v49, %v5992_v42  ;;  %v6455_v8 = vadd.f32 %v6443_v14, %v6339_v46  ;;  %v11540_v14 = vld [vmem:[%s17413_s13 + $0xa8] sm:$0xff] }
0x1589   :  { %11466 = vmatmul.msk.f32.gmra.mxu2 %vm2051_vm2, %v16616_v43  ;;  %11478 = vmatmul.msk.f32.gmra.mxu0 %vm2051_vm2, %v16616_v43 }
0x158a   :  { %v6330_v3 = vpop.f32.mrf.mxu2  ;;  %v6224_v60 = vadd.f32 %v16375_v36, %v6108_v15 }
0x158c   :  { %v6553_v52 = vpop.f32.mrf.mxu3  ;;  %v6340_v5 = vadd.f32 %v6330_v3, %v6224_v60 }
0x158d   :  { %v6569_v50 = vadd.f32 %v6553_v52, %v6453_v20  ;;  %v6446_v61 = vpop.f32.mrf.mxu1 }
0x158e   :  { %v6456_v10 = vadd.f32 %v6446_v61, %v6340_v5  ;;  %v6938_v5 = vld [vmem:[#allocation7 + $0x60] sm:$0xff] }
0x158f   :  { %v16645_v2 = vadd.f32 %v6577_v54, %v6569_v50  ;;  %v11494_v50 = vld [vmem:[%s17413_s13 + $0x58] sm:$0xff] }
0x1591   :  { %11467 = vmatmul.msk.f32.gmra.mxu2 %vm2051_vm2, %v16645_v2  ;;  %11479 = vmatmul.msk.f32.gmra.mxu0 %vm2051_vm2, %v16645_v2 }
0x1594   :  { %v6556_v56 = vpop.f32.mrf.mxu3 }
0x1595   :  { %v6570_v17 = vadd.f32 %v6556_v56, %v6454_v6  ;;  %v6712_v6 = vld [vmem:[#allocation7 + $0x38] sm:$0xff] }
0x1597   :  { %v16659_v33 = vadd.f32 %v6578_v27, %v6570_v17  ;;  %v6661_v27 = vld [vmem:[#allocation7 + $0x18] sm:$0xff]  ;;  %v11541_v17 = vld [vmem:[%s17413_s13 + $0xb0] sm:$0xff] }
0x1599   :  { %11468 = vmatmul.msk.f32.gmra.mxu2 %vm2051_vm2, %v16659_v33  ;;  %11480 = vmatmul.msk.f32.gmra.mxu0 %vm2051_vm2, %v16659_v33 }
0x159c   :  { %v6559_v13 = vpop.f32.mrf.mxu3 }
0x159d   :  { %v6571_v12 = vadd.f32 %v6559_v13, %v6455_v8 }
0x159f   :  { %v16670_v48 = vadd.f32 %v6579_v34, %v6571_v12 }
0x15a1   :  { %11469 = vmatmul.msk.f32.gmra.mxu2 %vm2051_vm2, %v16670_v48  ;;  %11481 = vmatmul.msk.f32.gmra.mxu0 %vm2051_vm2, %v16670_v48 }
0x15a4   :  { %v6562_v59 = vpop.f32.mrf.mxu3 }
0x15a5   :  { %v6572_v62 = vadd.f32 %v6562_v59, %v6456_v10  ;;  %v6939_v10 = vld [vmem:[#allocation7 + $0x68] sm:$0xff] }
0x15a7   :  { %v16679_v25 = vadd.f32 %v6580_v39, %v6572_v62  ;;  %v6940_v39 = vld [vmem:[#allocation7 + $0x70] sm:$0xff] }
0x15a9   :  { %11470 = vmatmul.msk.f32.gmra.mxu2 %vm2051_vm2, %v16679_v25  ;;  %11482 = vmatmul.msk.f32.gmra.mxu0 %vm2051_vm2, %v16679_v25 }
0x15b1   :  { %11511 = vmatmul.msk.f32.vlgmr.msrb.gmra.mxu0 %vm2051_vm2, %v16552_v4 }
0x15b9   :  { %11512 = vmatmul.msk.f32.gmra.mxu0 %vm2051_vm2, %v16574_v31 }
0x15c1   :  { %11513 = vmatmul.msk.f32.gmra.mxu0 %vm2051_vm2, %v16596_v38 }
0x15c9   :  { %11514 = vmatmul.msk.f32.gmra.mxu0 %vm2051_vm2, %v16616_v43 }
0x15d1   :  { %11515 = vmatmul.msk.f32.gmra.mxu0 %vm2051_vm2, %v16645_v2 }
0x15d9   :  { %11516 = vmatmul.msk.f32.gmra.mxu0 %vm2051_vm2, %v16659_v33 }
0x15e1   :  { %11517 = vmatmul.msk.f32.gmra.mxu0 %vm2051_vm2, %v16670_v48 }
0x15e9   :  { %11518 = vmatmul.msk.f32.gmra.mxu0 %vm2051_vm2, %v16679_v25 }
0x15ee   :  { %v6684_v36 = vpop.f32.mrf.mxu0 }
0x15f4   :  { %v6634_v21 = vpop.f32.mrf.mxu2 }
0x15f6   :  { %v6687_v23 = vpop.f32.mrf.mxu0 }
0x15fc   :  { %v6637_v41 = vpop.f32.mrf.mxu2 }
0x15fe   :  { %v6690_v57 = vpop.f32.mrf.mxu0 }
0x1604   :  { %v6640_v53 = vpop.f32.mrf.mxu2 }
0x1606   :  { %v6693_v0 = vpop.f32.mrf.mxu0 }
0x160c   :  { %v6643_v18 = vpop.f32.mrf.mxu2 }
0x160e   :  { %v6696_v20 = vpop.f32.mrf.mxu0 }
0x1614   :  { %v6646_v45 = vpop.f32.mrf.mxu2 }
0x1616   :  { %v6699_v19 = vpop.f32.mrf.mxu0 }
0x161c   :  { %v6649_v52 = vpop.f32.mrf.mxu2 }
0x161e   :  { %v6702_v54 = vpop.f32.mrf.mxu0 }
0x1624   :  { %v6652_v11 = vpop.f32.mrf.mxu2 }
0x1626   :  { %v6705_v29 = vpop.f32.mrf.mxu0 }
0x1627   :  { %6733 = vmatpush.msrb.mxu1 %v6705_v29 }
0x1629   :  { %6734 = vmatpush.msrb.mxu1 %v6702_v54 }
0x162b   :  { %6735 = vmatpush.msrb.mxu1 %v6699_v19 }
0x162c   :  { %v6655_v30 = vpop.f32.mrf.mxu2 }
0x162d   :  { %6736 = vmatpush.msrb.mxu1 %v6696_v20  ;;  %6774 = vmatpush.msrb.mxu3 %v6655_v30 }
0x162e   :  { %v6913_v16 = vpop.f32.mrf.mxu0 }
0x162f   :  { %6737 = vmatpush.msrb.mxu1 %v6693_v0  ;;  %6775 = vmatpush.msrb.mxu3 %v6652_v11  ;;  %v11523_v0 = vld [vmem:[%s17413_s13 + $0x80] sm:$0xff] }
0x1631   :  { %6738 = vmatpush.msrb.mxu1 %v6690_v57  ;;  %6776 = vmatpush.msrb.mxu3 %v6649_v52  ;;  %v11525_v57 = vld [vmem:[%s17413_s13 + $0x90] sm:$0xff]  ;;  %v6845_v52 = vld [vmem:[#allocation7 + $0x58] sm:$0xff] }
0x1633   :  { %6739 = vmatpush.msrb.mxu1 %v6687_v23  ;;  %6777 = vmatpush.msrb.mxu3 %v6646_v45  ;;  %v11526_v23 = vld [vmem:[%s17413_s13 + $0x98] sm:$0xff] }
0x1634   :  { %v6844_v45 = vld [vmem:[#allocation7 + $0x50] sm:$0xff] }
0x1635   :  { %6740 = vmatpush.msrb.mxu1 %v6684_v36  ;;  %6778 = vmatpush.msrb.mxu3 %v6643_v18  ;;  %v6941_v36 = vld [vmem:[#allocation7 + $0x78] sm:$0xff]  ;;  %v6843_v18 = vld [vmem:[#allocation7 + $0x48] sm:$0xff] }
0x1636   :  { %11483 = vmatmul.msk.f32.vlgmr.msrb.gmra.mxu1 %vm3266_vm3, %v6709_v1  ;;  %v6916_v22 = vpop.f32.mrf.mxu0  ;;  %v11574_v1 = vld [vmem:[%s17413_s13 + $0xf8] sm:$0xff] }
0x1637   :  { %6779 = vmatpush.msrb.mxu3 %v6640_v53  ;;  %6812 = vmatpush.msra.mxu1 %v11494_v50  ;;  %v11524_v53 = vld [vmem:[%s17413_s13 + $0x88] sm:$0xff]  ;;  %v11573_v50 = vld [vmem:[%s17413_s13 + $0xf0] sm:$0xff] }
0x1639   :  { %6780 = vmatpush.msrb.mxu3 %v6637_v41  ;;  %6813 = vmatpush.msra.mxu1 %v11493_v63  ;;  %v11571_v63 = vld [vmem:[%s17413_s13 + $0xe0] sm:$0xff] }
0x163b   :  { %6781 = vmatpush.msrb.mxu3 %v6634_v21  ;;  %6814 = vmatpush.msra.mxu1 %v11492_v24  ;;  %v6842_v21 = vld [vmem:[#allocation7 + $0x40] sm:$0xff]  ;;  %v7131_v24 = vld [vmem:[#allocation7 + $0xa8] sm:$0xff] }
0x163c   :  { %11487 = vmatmul.msk.f32.vlgmr.msrb.gmra.mxu3 %vm3266_vm3, %v6658_v58  ;;  %v7132_v58 = vld [vmem:[#allocation7 + $0xb0] sm:$0xff] }
0x163d   :  { %6815 = vmatpush.msra.mxu1 %v11491_v37  ;;  %v7133_v37 = vld [vmem:[#allocation7 + $0xb8] sm:$0xff] }
0x163e   :  { %11484 = vmatmul.msk.f32.gmra.mxu1 %vm3266_vm3, %v6710_v26  ;;  %v6919_v51 = vpop.f32.mrf.mxu0 }
0x163f   :  { %7100 = vmatpush.msrb.mxu1 %v11542_v47 }
0x1641   :  { %7101 = vmatpush.msrb.mxu1 %v11541_v17 }
0x1643   :  { %7102 = vmatpush.msrb.mxu1 %v11540_v14 }
0x1644   :  { %11488 = vmatmul.msk.f32.gmra.mxu3 %vm3266_vm3, %v6659_v35 }
0x1645   :  { %7103 = vmatpush.msrb.mxu1 %v11539_v32 }
0x1646   :  { %11485 = vmatmul.msk.f32.gmra.mxu1 %vm3266_vm3, %v6711_v7  ;;  %v6922_v55 = vpop.f32.mrf.mxu0 }
0x164c   :  { %11489 = vmatmul.msk.f32.gmra.mxu3 %vm3266_vm3, %v6660_v40 }
0x164e   :  { %11486 = vmatmul.msk.f32.gmra.mxu1 %vm3266_vm3, %v6712_v6  ;;  %v6925_v56 = vpop.f32.mrf.mxu0 }
0x1654   :  { %11490 = vmatmul.msk.f32.gmra.mxu3 %vm3266_vm3, %v6661_v27 }
0x1656   :  { %11495 = vmatmul.msk.f32.vlgmr.msra.gmra.mxu1 %vm2051_vm2, %v16552_v4  ;;  %v6928_v28 = vpop.f32.mrf.mxu0 }
0x165e   :  { %11496 = vmatmul.msk.f32.gmra.mxu1 %vm2051_vm2, %v16574_v31  ;;  %v6931_v9 = vpop.f32.mrf.mxu0 }
0x1666   :  { %11497 = vmatmul.msk.f32.gmra.mxu1 %vm2051_vm2, %v16596_v38  ;;  %v6934_v44 = vpop.f32.mrf.mxu0 }
0x1667   :  { %6962 = vmatpush.msra.mxu3 %v6934_v44 }
0x1669   :  { %6963 = vmatpush.msra.mxu3 %v6931_v9 }
0x166b   :  { %6964 = vmatpush.msra.mxu3 %v6928_v28 }
0x166d   :  { %6965 = vmatpush.msra.mxu3 %v6925_v56 }
0x166e   :  { %11498 = vmatmul.msk.f32.gmra.mxu1 %vm2051_vm2, %v16616_v43 }
0x166f   :  { %6966 = vmatpush.msra.mxu3 %v6922_v55 }
0x1671   :  { %6967 = vmatpush.msra.mxu3 %v6919_v51 }
0x1673   :  { %6968 = vmatpush.msra.mxu3 %v6916_v22  ;;  %v11572_v22 = vld [vmem:[%s17413_s13 + $0xe8] sm:$0xff] }
0x1675   :  { %6969 = vmatpush.msra.mxu3 %v6913_v16  ;;  %v7130_v16 = vld [vmem:[#allocation7 + $0xa0] sm:$0xff] }
0x1676   :  { %11499 = vmatmul.msk.f32.gmra.mxu1 %vm2051_vm2, %v16645_v2  ;;  %11519 = vmatmul.msk.f32.vlgmr.msra.gmra.mxu3 %vm3266_vm3, %v6938_v5  ;;  %v11556_v5 = vld [vmem:[%s17413_s13 + $0xc8] sm:$0xff] }
0x167e   :  { %11500 = vmatmul.msk.f32.gmra.mxu1 %vm2051_vm2, %v16659_v33  ;;  %11520 = vmatmul.msk.f32.gmra.mxu3 %vm3266_vm3, %v6939_v10  ;;  %v7035_v10 = vld [vmem:[#allocation7 + $0x88] sm:$0xff] }
0x1686   :  { %11501 = vmatmul.msk.f32.gmra.mxu1 %vm2051_vm2, %v16670_v48  ;;  %11521 = vmatmul.msk.f32.gmra.mxu3 %vm3266_vm3, %v6940_v39  ;;  %v7036_v39 = vld [vmem:[#allocation7 + $0x90] sm:$0xff] }
0x168e   :  { %11502 = vmatmul.msk.f32.gmra.mxu1 %vm2051_vm2, %v16679_v25  ;;  %11522 = vmatmul.msk.f32.gmra.mxu3 %vm3266_vm3, %v6941_v36  ;;  %v7037_v36 = vld [vmem:[#allocation7 + $0x98] sm:$0xff] }
0x1696   :  { %11543 = vmatmul.msk.f32.vlgmr.msrb.gmra.mxu1 %vm2051_vm2, %v16552_v4 }
0x169e   :  { %11544 = vmatmul.msk.f32.gmra.mxu1 %vm2051_vm2, %v16574_v31 }
0x16a6   :  { %11545 = vmatmul.msk.f32.gmra.mxu1 %vm2051_vm2, %v16596_v38 }
0x16ae   :  { %11546 = vmatmul.msk.f32.gmra.mxu1 %vm2051_vm2, %v16616_v43 }
0x16b3   :  { %v16757_v42 = vpop.f32.mrf.mxu1 }
0x16b6   :  { %11547 = vmatmul.msk.f32.gmra.mxu1 %vm2051_vm2, %v16645_v2 }
0x16bb   :  { %v16761_v46 = vpop.f32.mrf.mxu1 }
0x16be   :  { %11548 = vmatmul.msk.f32.gmra.mxu1 %vm2051_vm2, %v16659_v33 }
0x16c3   :  { %v16765_v49 = vpop.f32.mrf.mxu1 }
0x16c6   :  { %11549 = vmatmul.msk.f32.gmra.mxu1 %vm2051_vm2, %v16670_v48 }
0x16cb   :  { %v16769_v15 = vpop.f32.mrf.mxu1 }
0x16ce   :  { %11550 = vmatmul.msk.f32.gmra.mxu1 %vm2051_vm2, %v16679_v25 }
0x16d3   :  { %v6817_v8 = vpop.f32.mrf.mxu1 }
0x16db   :  { %v6820_v3 = vpop.f32.mrf.mxu1 }
0x16e3   :  { %v6823_v13 = vpop.f32.mrf.mxu1 }
0x16eb   :  { %v6826_v34 = vpop.f32.mrf.mxu1 }
0x16f3   :  { %v6829_v60 = vpop.f32.mrf.mxu1 }
0x16fb   :  { %v6832_v12 = vpop.f32.mrf.mxu1 }
0x1703   :  { %v6835_v61 = vpop.f32.mrf.mxu1 }
0x170b   :  { %v6838_v59 = vpop.f32.mrf.mxu1 }
0x170c   :  { %6866 = vmatpush.msra.mxu2 %v6838_v59 }
0x170e   :  { %6867 = vmatpush.msra.mxu2 %v6835_v61  ;;  %v11555_v61 = vld [vmem:[%s17413_s13 + $0xc0] sm:$0xff] }
0x1710   :  { %6868 = vmatpush.msra.mxu2 %v6832_v12 }
0x1712   :  { %6869 = vmatpush.msra.mxu2 %v6829_v60  ;;  %v11557_v60 = vld [vmem:[%s17413_s13 + $0xd0] sm:$0xff] }
0x1713   :  { %v7105_v62 = vpop.f32.mrf.mxu1 }
0x1714   :  { %6870 = vmatpush.msra.mxu2 %v6826_v34  ;;  %v11558_v34 = vld [vmem:[%s17413_s13 + $0xd8] sm:$0xff] }
0x1716   :  { %6871 = vmatpush.msra.mxu2 %v6823_v13  ;;  %v7034_v13 = vld [vmem:[#allocation7 + $0x80] sm:$0xff] }
0x1718   :  { %6872 = vmatpush.msra.mxu2 %v6820_v3 }
0x171a   :  { %6873 = vmatpush.msra.mxu2 %v6817_v8 }
0x171b   :  { %11503 = vmatmul.msk.f32.vlgmr.msra.gmra.mxu2 %vm3266_vm3, %v6842_v21  ;;  %v7108_v41 = vpop.f32.mrf.mxu1 }
0x171c   :  { %7004 = vmatpush.msrb.mxu2 %v11526_v23 }
0x171e   :  { %7005 = vmatpush.msrb.mxu2 %v11525_v57  ;;  %v16879_v57 = vpop.f32.mrf.mxu3 }
0x1720   :  { %7006 = vmatpush.msrb.mxu2 %v11524_v53 }
0x1722   :  { %7007 = vmatpush.msrb.mxu2 %v11523_v0 }
0x1723   :  { %11504 = vmatmul.msk.f32.gmra.mxu2 %vm3266_vm3, %v6843_v18  ;;  %v7111_v20 = vpop.f32.mrf.mxu1 }
0x1726   :  { %v16885_v53 = vpop.f32.mrf.mxu3 }
0x172b   :  { %11505 = vmatmul.msk.f32.gmra.mxu2 %vm3266_vm3, %v6844_v45  ;;  %v7114_v19 = vpop.f32.mrf.mxu1 }
0x172e   :  { %v16889_v0 = vpop.f32.mrf.mxu3 }
0x1733   :  { %11506 = vmatmul.msk.f32.gmra.mxu2 %vm3266_vm3, %v6845_v52  ;;  %v7117_v54 = vpop.f32.mrf.mxu1 }
0x1736   :  { %v16893_v18 = vpop.f32.mrf.mxu3 }
0x173b   :  { %11527 = vmatmul.msk.f32.vlgmr.msrb.gmra.mxu2 %vm2051_vm2, %v16552_v4  ;;  %v7120_v11 = vpop.f32.mrf.mxu1 }
0x1743   :  { %11528 = vmatmul.msk.f32.gmra.mxu2 %vm2051_vm2, %v16574_v31  ;;  %v7123_v29 = vpop.f32.mrf.mxu1 }
0x174b   :  { %11529 = vmatmul.msk.f32.gmra.mxu2 %vm2051_vm2, %v16596_v38  ;;  %v7126_v30 = vpop.f32.mrf.mxu1 }
0x174c   :  { %7154 = vmatpush.msra.mxu0 %v7126_v30 }
0x174e   :  { %7155 = vmatpush.msra.mxu0 %v7123_v29 }
0x1750   :  { %7156 = vmatpush.msra.mxu0 %v7120_v11 }
0x1752   :  { %7157 = vmatpush.msra.mxu0 %v7117_v54 }
0x1753   :  { %11530 = vmatmul.msk.f32.gmra.mxu2 %vm2051_vm2, %v16616_v43 }
0x1754   :  { %7158 = vmatpush.msra.mxu0 %v7114_v19 }
0x1756   :  { %7159 = vmatpush.msra.mxu0 %v7111_v20  ;;  %v16897_v20 = vpop.f32.mrf.mxu3 }
0x1758   :  { %7160 = vmatpush.msra.mxu0 %v7108_v41 }
0x175a   :  { %7161 = vmatpush.msra.mxu0 %v7105_v62 }
0x175b   :  { %11531 = vmatmul.msk.f32.gmra.mxu2 %vm2051_vm2, %v16645_v2  ;;  %11551 = vmatmul.msk.f32.vlgmr.msra.gmra.mxu0 %vm3266_vm3, %v7130_v16 }
0x175c   :  { %7292 = vmatpush.msrb.mxu0 %v11574_v1 }
0x175e   :  { %7293 = vmatpush.msrb.mxu0 %v11573_v50  ;;  %v16899_v45 = vpop.f32.mrf.mxu3 }
0x1760   :  { %7294 = vmatpush.msrb.mxu0 %v11572_v22 }
0x1762   :  { %7295 = vmatpush.msrb.mxu0 %v11571_v63 }
0x1763   :  { %11532 = vmatmul.msk.f32.gmra.mxu2 %vm2051_vm2, %v16659_v33  ;;  %11552 = vmatmul.msk.f32.gmra.mxu0 %vm3266_vm3, %v7131_v24 }
0x1766   :  { %v16901_v19 = vpop.f32.mrf.mxu3 }
0x176b   :  { %11533 = vmatmul.msk.f32.gmra.mxu2 %vm2051_vm2, %v16670_v48  ;;  %11553 = vmatmul.msk.f32.gmra.mxu0 %vm3266_vm3, %v7132_v58  ;;  %v7322_v58 = vld [vmem:[#allocation7 + $0xe0] sm:$0xff] }
0x176e   :  { %v16903_v52 = vpop.f32.mrf.mxu3 }
0x1773   :  { %11534 = vmatmul.msk.f32.gmra.mxu2 %vm2051_vm2, %v16679_v25  ;;  %11554 = vmatmul.msk.f32.gmra.mxu0 %vm3266_vm3, %v7133_v37 }
0x177b   :  { %11575 = vmatmul.msk.f32.vlgmr.msrb.gmra.mxu0 %vm2051_vm2, %v16552_v4 }
0x1783   :  { %11576 = vmatmul.msk.f32.gmra.mxu0 %vm2051_vm2, %v16574_v31 }
0x178b   :  { %11577 = vmatmul.msk.f32.gmra.mxu0 %vm2051_vm2, %v16596_v38 }
0x1793   :  { %11578 = vmatmul.msk.f32.gmra.mxu0 %vm2051_vm2, %v16616_v43 }
0x179b   :  { %11579 = vmatmul.msk.f32.gmra.mxu0 %vm2051_vm2, %v16645_v2 }
0x179e   :  { %v16835_v26 = vpop.f32.mrf.mxu2 }
0x17a3   :  { %11580 = vmatmul.msk.f32.gmra.mxu0 %vm2051_vm2, %v16659_v33 }
0x17a6   :  { %v16839_v51 = vpop.f32.mrf.mxu2 }
0x17ab   :  { %11581 = vmatmul.msk.f32.gmra.mxu0 %vm2051_vm2, %v16670_v48 }
0x17ae   :  { %v16843_v35 = vpop.f32.mrf.mxu2 }
0x17b3   :  { %11582 = vmatmul.msk.f32.gmra.mxu0 %vm2051_vm2, %v16679_v25 }
0x17b6   :  { %v16847_v7 = vpop.f32.mrf.mxu2 }
0x17be   :  { %v7009_v55 = vpop.f32.mrf.mxu2 }
0x17c6   :  { %v7012_v40 = vpop.f32.mrf.mxu2 }
0x17ce   :  { %v7015_v6 = vpop.f32.mrf.mxu2 }
0x17d6   :  { %v7018_v56 = vpop.f32.mrf.mxu2 }
0x17d8   :  { %v16849_v27 = vpop.f32.mrf.mxu0 }
0x17de   :  { %v7021_v28 = vpop.f32.mrf.mxu2 }
0x17e0   :  { %v16851_v9 = vpop.f32.mrf.mxu0 }
0x17e6   :  { %v7024_v44 = vpop.f32.mrf.mxu2 }
0x17e8   :  { %v16853_v47 = vpop.f32.mrf.mxu0 }
0x17ee   :  { %v7027_v17 = vpop.f32.mrf.mxu2 }
0x17f0   :  { %v16855_v14 = vpop.f32.mrf.mxu0 }
0x17f6   :  { %v7030_v32 = vpop.f32.mrf.mxu2 }
0x17f7   :  { %7058 = vmatpush.msrb.mxu3 %v7030_v32  ;;  %v11588_v32 = vld [vmem:[%s17413_s13 + $0x108] sm:$0xff] }
0x17f8   :  { %v7297_v8 = vpop.f32.mrf.mxu0 }
0x17f9   :  { %7059 = vmatpush.msrb.mxu3 %v7027_v17  ;;  %v11589_v17 = vld [vmem:[%s17413_s13 + $0x110] sm:$0xff] }
0x17fb   :  { %7060 = vmatpush.msrb.mxu3 %v7024_v44  ;;  %v11590_v44 = vld [vmem:[%s17413_s13 + $0x118] sm:$0xff] }
0x17fd   :  { %7061 = vmatpush.msrb.mxu3 %v7021_v28  ;;  %v7325_v28 = vld [vmem:[#allocation7 + $0xf8] sm:$0xff] }
0x17ff   :  { %7062 = vmatpush.msrb.mxu3 %v7018_v56  ;;  %v7226_v56 = vld [vmem:[#allocation7 + $0xc0] sm:$0xff] }
0x1800   :  { %v7300_v3 = vpop.f32.mrf.mxu0 }
0x1801   :  { %7063 = vmatpush.msrb.mxu3 %v7015_v6  ;;  %v7324_v6 = vld [vmem:[#allocation7 + $0xf0] sm:$0xff] }
0x1803   :  { %7064 = vmatpush.msrb.mxu3 %v7012_v40 }
0x1805   :  { %7065 = vmatpush.msrb.mxu3 %v7009_v55  ;;  %v7323_v55 = vld [vmem:[#allocation7 + $0xe8] sm:$0xff] }
0x1806   :  { %11535 = vmatmul.msk.f32.vlgmr.msrb.gmra.mxu3 %vm3266_vm3, %v7034_v13  ;;  %v7228_v13 = vld [vmem:[#allocation7 + $0xd0] sm:$0xff] }
0x1807   :  { %7196 = vmatpush.msra.mxu3 %v11558_v34  ;;  %v7229_v34 = vld [vmem:[#allocation7 + $0xd8] sm:$0xff] }
0x1808   :  { %v7303_v12 = vpop.f32.mrf.mxu0 }
0x1809   :  { %7197 = vmatpush.msra.mxu3 %v11557_v60 }
0x180b   :  { %7198 = vmatpush.msra.mxu3 %v11556_v5 }
0x180d   :  { %7199 = vmatpush.msra.mxu3 %v11555_v61 }
0x180e   :  { %11536 = vmatmul.msk.f32.gmra.mxu3 %vm3266_vm3, %v7035_v10 }
0x1810   :  { %v7306_v59 = vpop.f32.mrf.mxu0 }
0x1816   :  { %11537 = vmatmul.msk.f32.gmra.mxu3 %vm3266_vm3, %v7036_v39  ;;  %v7741_v39 = vld [vmem:[#allocation8 + $0x3e0] sm:$0xff] }
0x1818   :  { %v7309_v62 = vpop.f32.mrf.mxu0 }
0x181e   :  { %11538 = vmatmul.msk.f32.gmra.mxu3 %vm3266_vm3, %v7037_v36  ;;  %v7556_v36 = vld [vmem:[#allocation8 + $0x1c8] sm:$0xff] }
0x1820   :  { %v7312_v21 = vpop.f32.mrf.mxu0 }
0x1826   :  { %11559 = vmatmul.msk.f32.vlgmr.msra.gmra.mxu3 %vm2051_vm2, %v16552_v4 }
0x1828   :  { %v7315_v23 = vpop.f32.mrf.mxu0 }
0x182e   :  { %11560 = vmatmul.msk.f32.gmra.mxu3 %vm2051_vm2, %v16574_v31 }
0x1830   :  { %v7318_v41 = vpop.f32.mrf.mxu0 }
0x1831   :  { %7346 = vmatpush.msra.mxu1 %v7318_v41  ;;  %v7552_v41 = vld [vmem:[#allocation8 + $0x1a8] sm:$0xff] }
0x1833   :  { %7347 = vmatpush.msra.mxu1 %v7315_v23  ;;  %v7551_v23 = vld [vmem:[#allocation8 + $0x1a0] sm:$0xff] }
0x1835   :  { %7348 = vmatpush.msra.mxu1 %v7312_v21  ;;  %v7737_v21 = vld [vmem:[#allocation8 + $0x3c0] sm:$0xff] }
0x1836   :  { %11561 = vmatmul.msk.f32.gmra.mxu3 %vm2051_vm2, %v16596_v38 }
0x1837   :  { %7349 = vmatpush.msra.mxu1 %v7309_v62  ;;  %v7555_v62 = vld [vmem:[#allocation8 + $0x1c0] sm:$0xff] }
0x1839   :  { %7350 = vmatpush.msra.mxu1 %v7306_v59 }
0x183b   :  { %7351 = vmatpush.msra.mxu1 %v7303_v12 }
0x183d   :  { %7352 = vmatpush.msra.mxu1 %v7300_v3  ;;  %v7227_v3 = vld [vmem:[#allocation7 + $0xc8] sm:$0xff] }
0x183e   :  { %11562 = vmatmul.msk.f32.gmra.mxu3 %vm2051_vm2, %v16616_v43 }
0x183f   :  { %7353 = vmatpush.msra.mxu1 %v7297_v8  ;;  %v11587_v8 = vld [vmem:[%s17413_s13 + $0x100] sm:$0xff] }
0x1840   :  { %11583 = vmatmul.msk.f32.vlgmr.msra.gmra.mxu1 %vm3266_vm3, %v7322_v58  ;;  %v7543_v58 = vld [vmem:[#allocation8 + $0x160] sm:$0xff] }
0x1846   :  { %11563 = vmatmul.msk.f32.gmra.mxu3 %vm2051_vm2, %v16645_v2 }
0x1848   :  { %11584 = vmatmul.msk.f32.gmra.mxu1 %vm3266_vm3, %v7323_v55  ;;  %v7557_v55 = vld [vmem:[#allocation8 + $0x1d0] sm:$0xff] }
0x184e   :  { %11564 = vmatmul.msk.f32.gmra.mxu3 %vm2051_vm2, %v16659_v33 }
0x1850   :  { %11585 = vmatmul.msk.f32.gmra.mxu1 %vm3266_vm3, %v7324_v6  ;;  %v7539_v6 = vld [vmem:[#allocation8 + $0x140] sm:$0xff] }
0x1856   :  { %11565 = vmatmul.msk.f32.gmra.mxu3 %vm2051_vm2, %v16670_v48 }
0x1858   :  { %11586 = vmatmul.msk.f32.gmra.mxu1 %vm3266_vm3, %v7325_v28  ;;  %v7553_v28 = vld [vmem:[#allocation8 + $0x1b0] sm:$0xff] }
0x185e   :  { %11566 = vmatmul.msk.f32.gmra.mxu3 %vm2051_vm2, %v16679_v25 }
0x1889   :  { %v16905_v54 = vpop.f32.mrf.mxu3 }
0x1891   :  { %v16907_v11 = vpop.f32.mrf.mxu3 }
0x1899   :  { %v16909_v29 = vpop.f32.mrf.mxu3 }
0x18a1   :  { %v16911_v30 = vpop.f32.mrf.mxu3 }
0x18a9   :  { %v7201_v16 = vpop.f32.mrf.mxu3 }
0x18b1   :  { %v7204_v1 = vpop.f32.mrf.mxu3 }
0x18b9   :  { %v7207_v50 = vpop.f32.mrf.mxu3 }
0x18c1   :  { %v7210_v22 = vpop.f32.mrf.mxu3 }
0x18c9   :  { %v7213_v63 = vpop.f32.mrf.mxu3 }
0x18d1   :  { %v7216_v24 = vpop.f32.mrf.mxu3 }
0x18d9   :  { %v7219_v37 = vpop.f32.mrf.mxu3 }
0x18e1   :  { %v7222_v40 = vpop.f32.mrf.mxu3 }
0x18e2   :  { %7250 = vmatpush.msra.mxu2 %v7222_v40  ;;  %v7725_v40 = vld [vmem:[#allocation8 + $0x360] sm:$0xff] }
0x18e4   :  { %7251 = vmatpush.msra.mxu2 %v7219_v37  ;;  %v7544_v37 = vld [vmem:[#allocation8 + $0x168] sm:$0xff] }
0x18e6   :  { %7252 = vmatpush.msra.mxu2 %v7216_v24  ;;  %v7729_v24 = vld [vmem:[#allocation8 + $0x380] sm:$0xff] }
0x18e8   :  { %7253 = vmatpush.msra.mxu2 %v7213_v63  ;;  %v7561_v63 = vld [vmem:[#allocation8 + $0x1f0] sm:$0xff] }
0x18ea   :  { %7254 = vmatpush.msra.mxu2 %v7210_v22  ;;  %v7548_v22 = vld [vmem:[#allocation8 + $0x188] sm:$0xff] }
0x18ec   :  { %7255 = vmatpush.msra.mxu2 %v7207_v50  ;;  %v7418_v50 = vld [vmem:[#allocation7 + $0x100] sm:$0xff] }
0x18ee   :  { %7256 = vmatpush.msra.mxu2 %v7204_v1  ;;  %v7547_v1 = vld [vmem:[#allocation8 + $0x180] sm:$0xff] }
0x18f0   :  { %7257 = vmatpush.msra.mxu2 %v7201_v16  ;;  %v7733_v16 = vld [vmem:[#allocation8 + $0x3a0] sm:$0xff] }
0x18f1   :  { %11567 = vmatmul.msk.f32.vlgmr.msra.gmra.mxu2 %vm3266_vm3, %v7226_v56  ;;  %v7540_v56 = vld [vmem:[#allocation8 + $0x148] sm:$0xff] }
0x18f2   :  { %7388 = vmatpush.msrb.mxu2 %v11590_v44  ;;  %v7721_v44 = vld [vmem:[#allocation8 + $0x340] sm:$0xff] }
0x18f4   :  { %7389 = vmatpush.msrb.mxu2 %v11589_v17  ;;  %v7535_v17 = vld [vmem:[#allocation8 + $0x120] sm:$0xff] }
0x18f6   :  { %7390 = vmatpush.msrb.mxu2 %v11588_v32  ;;  %v7536_v32 = vld [vmem:[#allocation8 + $0x128] sm:$0xff] }
0x18f8   :  { %7391 = vmatpush.msrb.mxu2 %v11587_v8  ;;  %v7549_v8 = vld [vmem:[#allocation8 + $0x190] sm:$0xff] }
0x18f9   :  { %11568 = vmatmul.msk.f32.gmra.mxu2 %vm3266_vm3, %v7227_v3  ;;  %v7717_v3 = vld [vmem:[#allocation8 + $0x320] sm:$0xff] }
0x18fa   :  { %7745 = vmatpush.msra.mxu2 %v7741_v39  ;;  %v7705_v39 = vld [vmem:[#allocation8 + $0x2c0] sm:$0xff] }
0x18fc   :  { %7746 = vmatpush.msra.mxu2 %v7737_v21  ;;  %v7520_v21 = vld [vmem:[#allocation8 + $0xa8] sm:$0xff] }
0x18fe   :  { %7747 = vmatpush.msra.mxu2 %v7733_v16  ;;  %v7529_v16 = vld [vmem:[#allocation8 + $0xf0] sm:$0xff] }
0x1900   :  { %7748 = vmatpush.msra.mxu2 %v7729_v24  ;;  %v7521_v24 = vld [vmem:[#allocation8 + $0xb0] sm:$0xff] }
0x1901   :  { %11569 = vmatmul.msk.f32.gmra.mxu2 %vm3266_vm3, %v7228_v13  ;;  %v7419_v13 = vld [vmem:[#allocation7 + $0x108] sm:$0xff] }
0x1902   :  { %7749 = vmatpush.msra.mxu2 %v7725_v40  ;;  %v7512_v40 = vld [vmem:[#allocation8 + $0x68] sm:$0xff] }
0x1904   :  { %7750 = vmatpush.msra.mxu2 %v7721_v44  ;;  %v7508_v44 = vld [vmem:[#allocation8 + $0x48] sm:$0xff] }
0x1906   :  { %7751 = vmatpush.msra.mxu2 %v7717_v3  ;;  %v7504_v3 = vld [vmem:[#allocation8 + $0x28] sm:$0xff] }
0x1909   :  { %11570 = vmatmul.msk.f32.gmra.mxu2 %vm3266_vm3, %v7229_v34  ;;  %v7531_v34 = vld [vmem:[#allocation8 + $0x100] sm:$0xff] }
0x1911   :  { %11591 = vmatmul.msk.f32.vlgmr.msrb.gmra.mxu2 %vm2051_vm2, %v16552_v4 }
0x1919   :  { %11592 = vmatmul.msk.f32.gmra.mxu2 %vm2051_vm2, %v16574_v31 }
0x1921   :  { %11593 = vmatmul.msk.f32.gmra.mxu2 %vm2051_vm2, %v16596_v38 }
0x1929   :  { %11594 = vmatmul.msk.f32.gmra.mxu2 %vm2051_vm2, %v16616_v43 }
0x1931   :  { %11595 = vmatmul.msk.f32.gmra.mxu2 %vm2051_vm2, %v16645_v2 }
0x1939   :  { %11596 = vmatmul.msk.f32.gmra.mxu2 %vm2051_vm2, %v16659_v33 }
0x1941   :  { %11597 = vmatmul.msk.f32.gmra.mxu2 %vm2051_vm2, %v16670_v48  ;;  %v7559_v48 = vld [vmem:[#allocation8 + $0x1e0] sm:$0xff] }
0x1942   :  { %7563 = vmatpush.msrb.mxu1 %v7559_v48  ;;  %v7537_v48 = vld [vmem:[#allocation8 + $0x130] sm:$0xff] }
0x1944   :  { %7564 = vmatpush.msrb.mxu1 %v7555_v62  ;;  %v7519_v62 = vld [vmem:[#allocation8 + $0xa0] sm:$0xff] }
0x1946   :  { %7565 = vmatpush.msrb.mxu1 %v7551_v23  ;;  %v7420_v23 = vld [vmem:[#allocation7 + $0x110] sm:$0xff] }
0x1948   :  { %7566 = vmatpush.msrb.mxu1 %v7547_v1  ;;  %v7515_v1 = vld [vmem:[#allocation8 + $0x80] sm:$0xff] }
0x1949   :  { %11598 = vmatmul.msk.f32.gmra.mxu2 %vm2051_vm2, %v16679_v25  ;;  %v7560_v25 = vld [vmem:[#allocation8 + $0x1e8] sm:$0xff] }
0x194a   :  { %7592 = vmatpush.msra.mxu0 %v7560_v25  ;;  %7567 = vmatpush.msrb.mxu1 %v7543_v58  ;;  %v7524_v25 = vld [vmem:[#allocation8 + $0xc8] sm:$0xff]  ;;  %v7517_v58 = vld [vmem:[#allocation8 + $0x90] sm:$0xff] }
0x194c   :  { %7593 = vmatpush.msra.mxu0 %v7556_v36  ;;  %7568 = vmatpush.msrb.mxu1 %v7539_v6  ;;  %v7533_v36 = vld [vmem:[#allocation8 + $0x110] sm:$0xff] }
0x194d   :  { %v7513_v6 = vld [vmem:[#allocation8 + $0x70] sm:$0xff] }
0x194e   :  { %7594 = vmatpush.msra.mxu0 %v7552_v41  ;;  %7569 = vmatpush.msrb.mxu1 %v7535_v17  ;;  %v7701_v41 = vld [vmem:[#allocation8 + $0x2a0] sm:$0xff]  ;;  %v7509_v17 = vld [vmem:[#allocation8 + $0x50] sm:$0xff] }
0x1950   :  { %7595 = vmatpush.msra.mxu0 %v7548_v22  ;;  %7570 = vmatpush.msrb.mxu1 %v7531_v34  ;;  %v7697_v22 = vld [vmem:[#allocation8 + $0x280] sm:$0xff] }
0x1951   :  { %v7685_v34 = vld [vmem:[#allocation8 + $0x220] sm:$0xff] }
0x1952   :  { %7596 = vmatpush.msra.mxu0 %v7544_v37  ;;  %v7421_v37 = vld [vmem:[#allocation7 + $0x118] sm:$0xff] }
0x1954   :  { %7597 = vmatpush.msra.mxu0 %v7540_v56  ;;  %v7693_v56 = vld [vmem:[#allocation8 + $0x260] sm:$0xff] }
0x1956   :  { %7598 = vmatpush.msra.mxu0 %v7536_v32  ;;  %v7689_v32 = vld [vmem:[#allocation8 + $0x240] sm:$0xff] }
0x1974   :  { %v16949_v4 = vpop.f32.mrf.mxu2 }
0x197c   :  { %v16951_v31 = vpop.f32.mrf.mxu2 }
0x1984   :  { %v16953_v38 = vpop.f32.mrf.mxu2 }
0x198c   :  { %v16955_v60 = vpop.f32.mrf.mxu2 }
0x1994   :  { %v7393_v43 = vpop.f32.mrf.mxu2 }
0x199c   :  { %v7396_v12 = vpop.f32.mrf.mxu2 }
0x19a4   :  { %v7399_v2 = vpop.f32.mrf.mxu2 }
0x19ac   :  { %v7402_v5 = vpop.f32.mrf.mxu2 }
0x19b4   :  { %v7405_v61 = vpop.f32.mrf.mxu2 }
0x19bc   :  { %v7408_v33 = vpop.f32.mrf.mxu2 }
0x19c4   :  { %v7411_v10 = vpop.f32.mrf.mxu2 }
0x19cc   :  { %v7414_v59 = vpop.f32.mrf.mxu2 }
0x19cd   :  { %7442 = vmatpush.msrb.mxu3 %v7414_v59  ;;  %v7523_v59 = vld [vmem:[#allocation8 + $0xc0] sm:$0xff] }
0x19cf   :  { %7443 = vmatpush.msrb.mxu3 %v7411_v10  ;;  %v7709_v10 = vld [vmem:[#allocation8 + $0x2e0] sm:$0xff] }
0x19d1   :  { %7444 = vmatpush.msrb.mxu3 %v7408_v33  ;;  %v7528_v33 = vld [vmem:[#allocation8 + $0xe8] sm:$0xff] }
0x19d3   :  { %7445 = vmatpush.msrb.mxu3 %v7405_v61  ;;  %v7541_v61 = vld [vmem:[#allocation8 + $0x150] sm:$0xff] }
0x19d5   :  { %7446 = vmatpush.msrb.mxu3 %v7402_v5  ;;  %v7527_v5 = vld [vmem:[#allocation8 + $0xe0] sm:$0xff] }
0x19d6   :  { %7571 = vmatpush.msrb.mxu1 %v7527_v5  ;;  %v7681_v5 = vld [vmem:[#allocation8 + $0x200] sm:$0xff] }
0x19d7   :  { %7447 = vmatpush.msrb.mxu3 %v7399_v2  ;;  %v7713_v2 = vld [vmem:[#allocation8 + $0x300] sm:$0xff] }
0x19d8   :  { %7752 = vmatpush.msra.mxu2 %v7713_v2  ;;  %7572 = vmatpush.msrb.mxu1 %v7523_v59  ;;  %v7501_v2 = vld [vmem:[#allocation8 + $0x10] sm:$0xff]  ;;  %v7558_v59 = vld [vmem:[#allocation8 + $0x1d8] sm:$0xff] }
0x19d9   :  { %7448 = vmatpush.msrb.mxu3 %v7396_v12  ;;  %v7532_v12 = vld [vmem:[#allocation8 + $0x108] sm:$0xff] }
0x19da   :  { %7599 = vmatpush.msra.mxu0 %v7532_v12  ;;  %7753 = vmatpush.msra.mxu2 %v7709_v10  ;;  %v7500_v12 = vld [vmem:[#allocation8 + $0x8] sm:$0xff]  ;;  %v7743_v10 = vld [vmem:[#allocation8 + $0x3f0] sm:$0xff] }
0x19db   :  { %7449 = vmatpush.msrb.mxu3 %v7393_v43  ;;  %v7545_v43 = vld [vmem:[#allocation8 + $0x170] sm:$0xff]  ;;  %7573 = vmatpush.msrb.mxu1 %v7519_v62  ;;  %v7734_v62 = vld [vmem:[#allocation8 + $0x3a8] sm:$0xff] }
0x19dc   :  { %11599 = vmatmul.msk.f32.vlgmr.msrb.gmra.mxu3 %vm3266_vm3, %v7418_v50  ;;  %7600 = vmatpush.msra.mxu0 %v7528_v33  ;;  %v7516_v50 = vld [vmem:[#allocation8 + $0x88] sm:$0xff] }
0x19dd   :  { %7621 = vmatpush.msra.mxu3 %v7561_v63  ;;  %7754 = vmatpush.msra.mxu2 %v7705_v39  ;;  %v7525_v63 = vld [vmem:[#allocation8 + $0xd0] sm:$0xff]  ;;  %v7742_v33 = vld [vmem:[#allocation8 + $0x3e8] sm:$0xff]  ;;  %v7554_v39 = vld [vmem:[#allocation8 + $0x1b8] sm:$0xff] }
0x19de   :  { %7601 = vmatpush.msra.mxu0 %v7524_v25  ;;  %7574 = vmatpush.msrb.mxu1 %v7515_v1  ;;  %v7739_v25 = vld [vmem:[#allocation8 + $0x3d0] sm:$0xff] }
0x19df   :  { %7622 = vmatpush.msra.mxu3 %v7557_v55  ;;  %7755 = vmatpush.msra.mxu2 %v7701_v41  ;;  %v7511_v55 = vld [vmem:[#allocation8 + $0x60] sm:$0xff]  ;;  %v7730_v41 = vld [vmem:[#allocation8 + $0x388] sm:$0xff] }
0x19e0   :  { %7602 = vmatpush.msra.mxu0 %v7520_v21  ;;  %7575 = vmatpush.msrb.mxu1 %v7511_v55  ;;  %v6784_v21 = vadd.f32 %v16879_v57, %v16757_v42  ;;  %v7723_v42 = vld [vmem:[#allocation8 + $0x350] sm:$0xff]  ;;  %v7718_v55 = vld [vmem:[#allocation8 + $0x328] sm:$0xff] }
0x19e1   :  { %7623 = vmatpush.msra.mxu3 %v7553_v28  ;;  %7756 = vmatpush.msra.mxu2 %v7697_v22  ;;  %v7507_v28 = vld [vmem:[#allocation8 + $0x40] sm:$0xff]  ;;  %v7726_v22 = vld [vmem:[#allocation8 + $0x368] sm:$0xff] }
0x19e2   :  { %7603 = vmatpush.msra.mxu0 %v7516_v50  ;;  %7576 = vmatpush.msrb.mxu1 %v7507_v28  ;;  %v6887_v1 = vadd.f32 %v16835_v26, %v6784_v21  ;;  %v7546_v50 = vld [vmem:[#allocation8 + $0x178] sm:$0xff]  ;;  %v7719_v26 = vld [vmem:[#allocation8 + $0x330] sm:$0xff]  ;;  %v7714_v28 = vld [vmem:[#allocation8 + $0x308] sm:$0xff] }
0x19e3   :  { %7624 = vmatpush.msra.mxu3 %v7549_v8  ;;  %7757 = vmatpush.msra.mxu2 %v7693_v56  ;;  %v7503_v8 = vld [vmem:[#allocation8 + $0x20] sm:$0xff]  ;;  %v7534_v56 = vld [vmem:[#allocation8 + $0x118] sm:$0xff]  ;;  %v7691_v21 = vld [vmem:[#allocation8 + $0x250] sm:$0xff] }
0x19e4   :  { %11600 = vmatmul.msk.f32.gmra.mxu3 %vm3266_vm3, %v7419_v13  ;;  %7604 = vmatpush.msra.mxu0 %v7512_v40  ;;  %v7505_v13 = vld [vmem:[#allocation8 + $0x30] sm:$0xff]  ;;  %v6983_v57 = vadd.f32 %v16897_v20, %v6887_v1  ;;  %v6787_v40 = vadd.f32 %v16885_v53, %v16761_v46  ;;  %v7526_v46 = vld [vmem:[#allocation8 + $0xd8] sm:$0xff]  ;;  %v7706_v53 = vld [vmem:[#allocation8 + $0x2c8] sm:$0xff] }
0x19e5   :  { %7625 = vmatpush.msra.mxu3 %v7545_v43  ;;  %7758 = vmatpush.msra.mxu2 %v7689_v32  ;;  %v7499_v43 = vld [vmem:[#allocation8] sm:$0xff]  ;;  %v7530_v32 = vld [vmem:[#allocation8 + $0xf8] sm:$0xff] }
0x19e6   :  { %7605 = vmatpush.msra.mxu0 %v7508_v44  ;;  %7577 = vmatpush.msrb.mxu1 %v7503_v8  ;;  %v7715_v44 = vld [vmem:[#allocation8 + $0x310] sm:$0xff]  ;;  %v6888_v20 = vadd.f32 %v16839_v51, %v6787_v40  ;;  %v7710_v8 = vld [vmem:[#allocation8 + $0x2e8] sm:$0xff]  ;;  %v7522_v51 = vld [vmem:[#allocation8 + $0xb8] sm:$0xff] }
0x19e7   :  { %7626 = vmatpush.msra.mxu3 %v7541_v61  ;;  %7759 = vmatpush.msra.mxu2 %v7685_v34  ;;  %v7562_v61 = vld [vmem:[#allocation8 + $0x1f8] sm:$0xff] }
0x19e8   :  { %7606 = vmatpush.msra.mxu0 %v7504_v3  ;;  %7578 = vmatpush.msrb.mxu1 %v7499_v43  ;;  %v7711_v3 = vld [vmem:[#allocation8 + $0x2f0] sm:$0xff]  ;;  %v6984_v34 = vadd.f32 %v16899_v45, %v6888_v20 }
0x19e9   :  { %7627 = vmatpush.msra.mxu3 %v7537_v48  ;;  %7760 = vmatpush.msra.mxu2 %v7681_v5  ;;  %v7738_v48 = vld [vmem:[#allocation8 + $0x3c8] sm:$0xff]  ;;  %v6790_v5 = vadd.f32 %v16889_v0, %v16765_v49 }
0x19ea   :  { %7607 = vmatpush.msra.mxu0 %v7500_v12  ;;  %7650 = vmatpush.msra.mxu1 %v7562_v61  ;;  %v7702_v12 = vld [vmem:[#allocation8 + $0x2a8] sm:$0xff]  ;;  %v7518_v61 = vld [vmem:[#allocation8 + $0x98] sm:$0xff] }
0x19eb   :  { %7628 = vmatpush.msra.mxu3 %v7533_v36  ;;  %v7735_v36 = vld [vmem:[#allocation8 + $0x3b0] sm:$0xff]  ;;  %v6889_v45 = vadd.f32 %v16843_v35, %v6790_v5  ;;  %v7506_v35 = vld [vmem:[#allocation8 + $0x38] sm:$0xff] }
0x19ec   :  { %11601 = vmatmul.msk.f32.gmra.mxu3 %vm3266_vm3, %v7420_v23  ;;  %7774 = vmatpush.msrb.mxu0 %v7742_v33  ;;  %v7550_v23 = vld [vmem:[#allocation8 + $0x198] sm:$0xff]  ;;  %v7698_v33 = vld [vmem:[#allocation8 + $0x288] sm:$0xff] }
0x19ed   :  { %7629 = vmatpush.msra.mxu3 %v7529_v16  ;;  %7651 = vmatpush.msra.mxu1 %v7558_v59  ;;  %v7731_v16 = vld [vmem:[#allocation8 + $0x390] sm:$0xff] }
0x19ee   :  { %7775 = vmatpush.msrb.mxu0 %v7738_v48 }
0x19ef   :  { %7630 = vmatpush.msra.mxu3 %v7525_v63  ;;  %7652 = vmatpush.msra.mxu1 %v7554_v39  ;;  %v7727_v63 = vld [vmem:[#allocation8 + $0x370] sm:$0xff]  ;;  %v7694_v39 = vld [vmem:[#allocation8 + $0x268] sm:$0xff] }
0x19f0   :  { %7776 = vmatpush.msrb.mxu0 %v7734_v62  ;;  %v7695_v62 = vld [vmem:[#allocation8 + $0x270] sm:$0xff] }
0x19f1   :  { %7631 = vmatpush.msra.mxu3 %v7521_v24  ;;  %7653 = vmatpush.msra.mxu1 %v7550_v23  ;;  %v7542_v24 = vld [vmem:[#allocation8 + $0x158] sm:$0xff]  ;;  %v7474_v23 = vpop.permute.xlu1 %7473 }
0x19f2   :  { %7777 = vmatpush.msrb.mxu0 %v7730_v41  ;;  %v7686_v41 = vld [vmem:[#allocation8 + $0x228] sm:$0xff] }
0x19f3   :  { %7632 = vmatpush.msra.mxu3 %v7517_v58  ;;  %7654 = vmatpush.msra.mxu1 %v7546_v50  ;;  %v7722_v58 = vld [vmem:[#allocation8 + $0x348] sm:$0xff] }
0x19f4   :  { %11602 = vmatmul.msk.f32.gmra.mxu3 %vm3266_vm3, %v7421_v37  ;;  %7778 = vmatpush.msrb.mxu0 %v7726_v22  ;;  %v7538_v37 = vld [vmem:[#allocation8 + $0x138] sm:$0xff]  ;;  %v7687_v22 = vld [vmem:[#allocation8 + $0x230] sm:$0xff] }
0x19f5   :  { %7633 = vmatpush.msra.mxu3 %v7513_v6  ;;  %7655 = vmatpush.msra.mxu1 %v7542_v24  ;;  %v7079_v6 = vadd.f32 %v16905_v54, %v6983_v57  ;;  %v7707_v54 = vld [vmem:[#allocation8 + $0x2d0] sm:$0xff] }
0x19f6   :  { %7779 = vmatpush.msrb.mxu0 %v7722_v58  ;;  %v7502_v58 = vld [vmem:[#allocation8 + $0x18] sm:$0xff]  ;;  %v7683_v57 = vld [vmem:[#allocation8 + $0x210] sm:$0xff] }
0x19f7   :  { %7634 = vmatpush.msra.mxu3 %v7509_v17  ;;  %7656 = vmatpush.msra.mxu1 %v7538_v37  ;;  %v7355_v17 = vpop.f32.mrf.mxu1 }
0x19f8   :  { %7780 = vmatpush.msrb.mxu0 %v7718_v55  ;;  %v7740_v55 = vld [vmem:[#allocation8 + $0x3d8] sm:$0xff] }
0x19f9   :  { %7635 = vmatpush.msra.mxu3 %v7505_v13  ;;  %7657 = vmatpush.msra.mxu1 %v7534_v56  ;;  %v7175_v13 = vadd.f32 %v16849_v27, %v7079_v6  ;;  %v7080_v27 = vadd.f32 %v16907_v11, %v6984_v34  ;;  %v7510_v11 = vld [vmem:[#allocation8 + $0x58] sm:$0xff] }
0x19fa   :  { %7781 = vmatpush.msrb.mxu0 %v7714_v28  ;;  %v7736_v28 = vld [vmem:[#allocation8 + $0x3b8] sm:$0xff] }
0x19fb   :  { %7636 = vmatpush.msra.mxu3 %v7501_v2  ;;  %7658 = vmatpush.msra.mxu1 %v7530_v32  ;;  %v7271_v43 = vadd.f32 %v16949_v4, %v7175_v13  ;;  %v7703_v2 = vld [vmem:[#allocation8 + $0x2b0] sm:$0xff]  ;;  %v7176_v49 = vadd.f32 %v16851_v9, %v7080_v27  ;;  %v6793_v9 = vadd.f32 %v16893_v18, %v16769_v15  ;;  %v7744_v18 = vld [vmem:[#allocation8 + $0x3f8] sm:$0xff] }
0x19fc   :  { %7782 = vmatpush.msrb.mxu0 %v7710_v8  ;;  %v7720_v34 = vld [vmem:[#allocation8 + $0x338] sm:$0xff] }
0x19fd   :  { %7803 = vmatpush.msrb.mxu3 %v7743_v10  ;;  %7659 = vmatpush.msra.mxu1 %v7526_v46  ;;  %v7699_v10 = vld [vmem:[#allocation8 + $0x290] sm:$0xff]  ;;  %v7367_v4 = vadd.f32 %v7355_v17, %v7271_v43  ;;  %v7272_v1 = vadd.f32 %v16951_v31, %v7176_v49  ;;  %v8078_v49 = vld [vmem:[#allocation8 + $0x580] sm:$0xff] }
0x19fe   :  { %7783 = vmatpush.msrb.mxu0 %v7706_v53 }
0x19ff   :  { %7804 = vmatpush.msrb.mxu3 %v7739_v25  ;;  %7660 = vmatpush.msra.mxu1 %v7522_v51  ;;  %v7358_v59 = vpop.f32.mrf.mxu1  ;;  %v7514_v25 = vld [vmem:[#allocation8 + $0x78] sm:$0xff] }
0x1a00   :  { %7784 = vmatpush.msrb.mxu0 %v7702_v12  ;;  %v7368_v31 = vadd.f32 %v7358_v59, %v7272_v1  ;;  %v7716_v51 = vld [vmem:[#allocation8 + $0x318] sm:$0xff]  ;;  %v8042_v1 = vld [vmem:[#allocation8 + $0x460] sm:$0xff] }
0x1a01   :  { %7805 = vmatpush.msrb.mxu3 %v7735_v36  ;;  %7661 = vmatpush.msra.mxu1 %v7518_v61  ;;  %v7690_v36 = vld [vmem:[#allocation8 + $0x248] sm:$0xff]  ;;  %v7708_v61 = vld [vmem:[#allocation8 + $0x2d8] sm:$0xff] }
0x1a02   :  { %7785 = vmatpush.msrb.mxu0 %v7698_v33  ;;  %v7704_v33 = vld [vmem:[#allocation8 + $0x2b8] sm:$0xff] }
0x1a03   :  { %7806 = vmatpush.msrb.mxu3 %v7731_v16  ;;  %7662 = vmatpush.msra.mxu1 %v7514_v25  ;;  %v6985_v16 = vadd.f32 %v16901_v19, %v6889_v45  ;;  %v6890_v19 = vadd.f32 %v16847_v7, %v6793_v9  ;;  %v7696_v45 = vld [vmem:[#allocation8 + $0x278] sm:$0xff]  ;;  %v8090_v25 = vld [vmem:[#allocation8 + $0x5e0] sm:$0xff] }
0x1a04   :  { %7786 = vmatpush.msrb.mxu0 %v7694_v39  ;;  %v7688_v59 = vld [vmem:[#allocation8 + $0x238] sm:$0xff]  ;;  %v8086_v39 = vld [vmem:[#allocation8 + $0x5c0] sm:$0xff] }
0x1a05   :  { %7807 = vmatpush.msrb.mxu3 %v7727_v63  ;;  %7663 = vmatpush.msra.mxu1 %v7510_v11  ;;  %v7081_v63 = vadd.f32 %v16909_v29, %v6985_v16  ;;  %v6986_v40 = vadd.f32 %v16903_v52, %v6890_v19  ;;  %v8070_v11 = vld [vmem:[#allocation8 + $0x540] sm:$0xff] }
0x1a06   :  { %7787 = vmatpush.msrb.mxu0 %v7690_v36  ;;  %v8066_v36 = vld [vmem:[#allocation8 + $0x520] sm:$0xff] }
0x1a07   :  { %7808 = vmatpush.msrb.mxu3 %v7723_v42  ;;  %7664 = vmatpush.msra.mxu1 %v7506_v35  ;;  %v7682_v42 = vld [vmem:[#allocation8 + $0x208] sm:$0xff]  ;;  %v7177_v29 = vadd.f32 %v16853_v47, %v7081_v63  ;;  %v7361_v7 = vpop.f32.mrf.mxu1  ;;  %v7732_v47 = vld [vmem:[#allocation8 + $0x398] sm:$0xff]  ;;  %v8054_v35 = vld [vmem:[#allocation8 + $0x4c0] sm:$0xff] }
0x1a08   :  { %7788 = vmatpush.msrb.mxu0 %v7686_v41  ;;  %v8050_v41 = vld [vmem:[#allocation8 + $0x4a0] sm:$0xff] }
0x1a09   :  { %7809 = vmatpush.msrb.mxu3 %v7719_v26  ;;  %7665 = vmatpush.msra.mxu1 %v7502_v58  ;;  %v7479_v26 = vpop.permute.xlu2 %7478  ;;  %v7273_v6 = vadd.f32 %v16953_v38, %v7177_v29  ;;  %v7728_v38 = vld [vmem:[#allocation8 + $0x378] sm:$0xff]  ;;  %v8046_v16 = vld [vmem:[#allocation8 + $0x480] sm:$0xff] }
0x1a0a   :  { %7789 = vmatpush.msrb.mxu0 %v7682_v42  ;;  %v8030_v9 = vld [vmem:[#allocation8 + $0x400] sm:$0xff] }
0x1a0b   :  { %7810 = vmatpush.msrb.mxu3 %v7715_v44  ;;  %v7082_v44 = vadd.f32 %v16911_v30, %v6986_v40  ;;  %v7369_v20 = vadd.f32 %v7361_v7, %v7273_v6  ;;  %v7484_v30 = vpop.permute.xlu0 %7483 }
0x1a0d   :  { %7811 = vmatpush.msrb.mxu3 %v7711_v3  ;;  %v7178_v32 = vadd.f32 %v16855_v14, %v7082_v44  ;;  %v7724_v3 = vld [vmem:[#allocation8 + $0x358] sm:$0xff] }
0x1a0f   :  { %7812 = vmatpush.msrb.mxu3 %v7707_v54  ;;  %v7274_v13 = vadd.f32 %v16955_v60, %v7178_v32  ;;  %v7364_v53 = vpop.f32.mrf.mxu1  ;;  %v7489_v60 = vpop.permute.xlu1 %7488 }
0x1a11   :  { %7813 = vmatpush.msrb.mxu3 %v7703_v2  ;;  %v7370_v43 = vadd.f32 %v7364_v53, %v7274_v13  ;;  %v7712_v2 = vld [vmem:[#allocation8 + $0x2f8] sm:$0xff] }
0x1a13   :  { %7814 = vmatpush.msrb.mxu3 %v7699_v10  ;;  %v7700_v10 = vld [vmem:[#allocation8 + $0x298] sm:$0xff] }
0x1a15   :  { %7815 = vmatpush.msrb.mxu3 %v7695_v62  ;;  %v8082_v62 = vld [vmem:[#allocation8 + $0x5a0] sm:$0xff] }
0x1a17   :  { %7816 = vmatpush.msrb.mxu3 %v7691_v21  ;;  %v8062_v21 = vld [vmem:[#allocation8 + $0x500] sm:$0xff] }
0x1a19   :  { %7817 = vmatpush.msrb.mxu3 %v7687_v22  ;;  %v8034_v22 = vld [vmem:[#allocation8 + $0x420] sm:$0xff] }
0x1a1b   :  { %7818 = vmatpush.msrb.mxu3 %v7683_v57 }
0x1a5f   :  { %v7451_v48 = vpop.f32.mrf.mxu3 }
0x1a60   :  { %v7463_v0 = vadd.f32 %v7451_v48, %v7367_v4  ;;  %v7692_v4 = vld [vmem:[#allocation8 + $0x258] sm:$0xff] }
0x1a61   :  { %v7684_v48 = vld [vmem:[#allocation8 + $0x218] sm:$0xff] }
0x1a62   :  { %v7491_v50 = vadd.f32 %v7474_v23, %v7463_v0  ;;  %v8074_v0 = vld [vmem:[#allocation8 + $0x560] sm:$0xff] }
0x1a63   :  { %v8058_v23 = vld [vmem:[#allocation8 + $0x4e0] sm:$0xff] }
0x1a64   :  { %v16982_v24 = vmax.f32 %v7491_v50, 0.0  ;;  %v8038_v50 = vld [vmem:[#allocation8 + $0x440] sm:$0xff] }
0x1a66   :  { %7579 = vmatmul.f32.vlgmr.msrb.gmra.mxu1 %v16982_v24  ;;  %7608 = vmatmul.f32.vlgmr.msra.gmra.mxu0 %v16982_v24 }
0x1a67   :  { %7637 = vmatmul.f32.vlgmr.msra.gmra.mxu3 %v16982_v24  ;;  %7761 = vmatmul.f32.vlgmr.msra.gmra.mxu2 %v16982_v24  ;;  %v7454_v15 = vpop.f32.mrf.mxu3 }
0x1a68   :  { %v7464_v37 = vadd.f32 %v7454_v15, %v7368_v31  ;;  %7832 = vmatpush.msrb.mxu1 %v7744_v18 }
0x1a6a   :  { %v7492_v56 = vadd.f32 %v7479_v26, %v7464_v37  ;;  %7833 = vmatpush.msrb.mxu1 %v7740_v55 }
0x1a6c   :  { %v16993_v17 = vmax.f32 %v7492_v56, 0.0  ;;  %7834 = vmatpush.msrb.mxu1 %v7736_v28 }
0x1a6e   :  { %7582 = vmatmul.f32.gmra.mxu1 %v16993_v17  ;;  %7611 = vmatmul.f32.gmra.mxu0 %v16993_v17 }
0x1a6f   :  { %7640 = vmatmul.f32.gmra.mxu3 %v16993_v17  ;;  %7764 = vmatmul.f32.gmra.mxu2 %v16993_v17  ;;  %v7457_v52 = vpop.f32.mrf.mxu3 }
0x1a70   :  { %v7465_v8 = vadd.f32 %v7457_v52, %v7369_v20  ;;  %7835 = vmatpush.msrb.mxu1 %v7732_v47  ;;  %v17044_v47 = vld [vmem:[%s17417_s17 + $0x1] sm:$0x1] }
0x1a72   :  { %v7493_v46 = vadd.f32 %v7484_v30, %v7465_v8  ;;  %7836 = vmatpush.msrb.mxu1 %v7728_v38 }
0x1a74   :  { %v17001_v54 = vmax.f32 %v7493_v46, 0.0  ;;  %7837 = vmatpush.msrb.mxu1 %v7724_v3 }
0x1a76   :  { %7585 = vmatmul.f32.gmra.mxu1 %v17001_v54  ;;  %7614 = vmatmul.f32.gmra.mxu0 %v17001_v54 }
0x1a77   :  { %7643 = vmatmul.f32.gmra.mxu3 %v17001_v54  ;;  %7767 = vmatmul.f32.gmra.mxu2 %v17001_v54  ;;  %v7460_v14 = vpop.f32.mrf.mxu3 }
0x1a78   :  { %v7466_v12 = vadd.f32 %v7460_v14, %v7370_v43  ;;  %7838 = vmatpush.msrb.mxu1 %v7720_v34  ;;  %v17055_v43 = vld [vmem:[%s17417_s17] sm:$0x1] }
0x1a7a   :  { %v7494_v5 = vadd.f32 %v7489_v60, %v7466_v12  ;;  %7839 = vmatpush.msrb.mxu1 %v7716_v51  ;;  %v8091_v51 = vld [vmem:[#allocation8 + $0x5e8] sm:$0xff]  ;;  %v8093_v12 = vld [vmem:[#allocation8 + $0x5f8] sm:$0xff] }
0x1a7b   :  { %v8087_v60 = vld [vmem:[#allocation8 + $0x5c8] sm:$0xff] }
0x1a7c   :  { %v17007_v27 = vmax.f32 %v7494_v5, 0.0  ;;  %7840 = vmatpush.msrb.mxu1 %v7712_v2  ;;  %v8089_v2 = vld [vmem:[#allocation8 + $0x5d8] sm:$0xff]  ;;  %v8083_v5 = vld [vmem:[#allocation8 + $0x5a8] sm:$0xff] }
0x1a7e   :  { %7588 = vmatmul.f32.gmra.mxu1 %v17007_v27  ;;  %7617 = vmatmul.f32.gmra.mxu0 %v17007_v27 }
0x1a7f   :  { %7646 = vmatmul.f32.gmra.mxu3 %v17007_v27  ;;  %7770 = vmatmul.f32.gmra.mxu2 %v17007_v27 }
0x1a80   :  { %7841 = vmatpush.msrb.mxu1 %v7708_v61  ;;  %v8085_v61 = vld [vmem:[#allocation8 + $0x5b8] sm:$0xff] }
0x1a82   :  { %7842 = vmatpush.msrb.mxu1 %v7704_v33 }
0x1a84   :  { %7843 = vmatpush.msrb.mxu1 %v7700_v10  ;;  %v8079_v10 = vld [vmem:[#allocation8 + $0x588] sm:$0xff] }
0x1a86   :  { %7666 = vmatmul.f32.vlgmr.msra.gmra.mxu1 %v16982_v24  ;;  %7790 = vmatmul.f32.vlgmr.msrb.gmra.mxu0 %v16982_v24 }
0x1a87   :  { %7819 = vmatmul.f32.vlgmr.msrb.gmra.mxu3 %v16982_v24  ;;  %7844 = vmatpush.msrb.mxu1 %v7696_v45  ;;  %v8081_v45 = vld [vmem:[#allocation8 + $0x598] sm:$0xff] }
0x1a89   :  { %7845 = vmatpush.msrb.mxu1 %v7692_v4  ;;  %v8075_v4 = vld [vmem:[#allocation8 + $0x568] sm:$0xff] }
0x1a8b   :  { %7846 = vmatpush.msrb.mxu1 %v7688_v59  ;;  %v8077_v59 = vld [vmem:[#allocation8 + $0x578] sm:$0xff] }
0x1a8d   :  { %7847 = vmatpush.msrb.mxu1 %v7684_v48  ;;  %v8071_v48 = vld [vmem:[#allocation8 + $0x548] sm:$0xff] }
0x1a8e   :  { %7669 = vmatmul.f32.gmra.mxu1 %v16993_v17  ;;  %7793 = vmatmul.f32.gmra.mxu0 %v16993_v17 }
0x1a8f   :  { %7822 = vmatmul.f32.gmra.mxu3 %v16993_v17  ;;  %8094 = vmatpush.msra.mxu1 %v8090_v25  ;;  %v8073_v25 = vld [vmem:[#allocation8 + $0x558] sm:$0xff] }
0x1a91   :  { %8095 = vmatpush.msra.mxu1 %v8086_v39  ;;  %v8067_v39 = vld [vmem:[#allocation8 + $0x528] sm:$0xff] }
0x1a93   :  { %8096 = vmatpush.msra.mxu1 %v8082_v62  ;;  %v8069_v62 = vld [vmem:[#allocation8 + $0x538] sm:$0xff] }
0x1a95   :  { %8097 = vmatpush.msra.mxu1 %v8078_v49 }
0x1a96   :  { %7672 = vmatmul.f32.gmra.mxu1 %v17001_v54  ;;  %7796 = vmatmul.f32.gmra.mxu0 %v17001_v54 }
0x1a97   :  { %7825 = vmatmul.f32.gmra.mxu3 %v17001_v54  ;;  %8098 = vmatpush.msra.mxu1 %v8074_v0  ;;  %v8063_v0 = vld [vmem:[#allocation8 + $0x508] sm:$0xff] }
0x1a99   :  { %8099 = vmatpush.msra.mxu1 %v8070_v11  ;;  %v8065_v11 = vld [vmem:[#allocation8 + $0x518] sm:$0xff] }
0x1a9b   :  { %8100 = vmatpush.msra.mxu1 %v8066_v36  ;;  %v8059_v36 = vld [vmem:[#allocation8 + $0x4e8] sm:$0xff] }
0x1a9d   :  { %8101 = vmatpush.msra.mxu1 %v8062_v21  ;;  %v8061_v21 = vld [vmem:[#allocation8 + $0x4f8] sm:$0xff] }
0x1a9e   :  { %7675 = vmatmul.f32.gmra.mxu1 %v17007_v27  ;;  %7799 = vmatmul.f32.gmra.mxu0 %v17007_v27 }
0x1a9f   :  { %7828 = vmatmul.f32.gmra.mxu3 %v17007_v27  ;;  %8102 = vmatpush.msra.mxu1 %v8058_v23  ;;  %v8055_v23 = vld [vmem:[#allocation8 + $0x4c8] sm:$0xff] }
0x1aa1   :  { %8103 = vmatpush.msra.mxu1 %v8054_v35  ;;  %v8057_v35 = vld [vmem:[#allocation8 + $0x4d8] sm:$0xff] }
0x1aa3   :  { %8104 = vmatpush.msra.mxu1 %v8050_v41  ;;  %v8051_v41 = vld [vmem:[#allocation8 + $0x4a8] sm:$0xff] }
0x1aa5   :  { %8105 = vmatpush.msra.mxu1 %v8046_v16 }
0x1aa6   :  { %7848 = vmatmul.f32.vlgmr.msrb.gmra.mxu1 %v16982_v24 }
0x1aa7   :  { %8106 = vmatpush.msra.mxu1 %v8042_v1  ;;  %v8053_v1 = vld [vmem:[#allocation8 + $0x4b8] sm:$0xff] }
0x1aa9   :  { %8107 = vmatpush.msra.mxu1 %v8038_v50  ;;  %v8047_v50 = vld [vmem:[#allocation8 + $0x488] sm:$0xff] }
0x1aab   :  { %8108 = vmatpush.msra.mxu1 %v8034_v22  ;;  %v8049_v22 = vld [vmem:[#allocation8 + $0x498] sm:$0xff] }
0x1aad   :  { %8109 = vmatpush.msra.mxu1 %v8030_v9  ;;  %v8043_v9 = vld [vmem:[#allocation8 + $0x468] sm:$0xff] }
0x1aae   :  { %7851 = vmatmul.f32.gmra.mxu1 %v16993_v17 }
0x1ab6   :  { %7854 = vmatmul.f32.gmra.mxu1 %v17001_v54 }
0x1abe   :  { %7857 = vmatmul.f32.gmra.mxu1 %v17007_v27 }
0x1ac6   :  { %8110 = vmatmul.f32.vlgmr.msra.gmra.mxu1 %v16982_v24 }
0x1ace   :  { %8113 = vmatmul.f32.gmra.mxu1 %v16993_v17 }
0x1ad6   :  { %8116 = vmatmul.f32.gmra.mxu1 %v17001_v54 }
0x1ade   :  { %8119 = vmatmul.f32.gmra.mxu1 %v17007_v27 }
0x1ae3   :  { %v7580_v63 = vpop.f32.mrf.mxu1  ;;  %v7609_v58 = vpop.f32.mrf.mxu0 }
0x1aea   :  { %v17033_v42 = vpop.f32.mrf.mxu3  ;;  %v7762_v19 = vpop.f32.mrf.mxu2 }
0x1aeb   :  { %v7583_v31 = vpop.f32.mrf.mxu1  ;;  %v7612_v57 = vpop.f32.mrf.mxu0 }
0x1af2   :  { %v17035_v15 = vpop.f32.mrf.mxu3  ;;  %v7765_v18 = vpop.f32.mrf.mxu2 }
0x1af3   :  { %v7586_v29 = vpop.f32.mrf.mxu1  ;;  %v7615_v37 = vpop.f32.mrf.mxu0 }
0x1afa   :  { %v17037_v55 = vpop.f32.mrf.mxu3  ;;  %v7768_v26 = vpop.f32.mrf.mxu2 }
0x1afb   :  { %v7589_v7 = vpop.f32.mrf.mxu1  ;;  %v7618_v40 = vpop.f32.mrf.mxu0 }
0x1b02   :  { %v17039_v6 = vpop.f32.mrf.mxu3  ;;  %v7771_v56 = vpop.f32.mrf.mxu2 }
0x1b03   :  { %7878 = vmatpush.msrb.mxu2 %v7771_v56  ;;  %v7667_v28 = vpop.f32.mrf.mxu1  ;;  %v7791_v44 = vpop.f32.mrf.mxu0  ;;  %v8072_v56 = vld [vmem:[#allocation8 + $0x550] sm:$0xff] }
0x1b05   :  { %7879 = vmatpush.msrb.mxu2 %v7768_v26  ;;  %v8033_v26 = vld [vmem:[#allocation8 + $0x418] sm:$0xff] }
0x1b07   :  { %7880 = vmatpush.msrb.mxu2 %v7765_v18  ;;  %v8088_v18 = vld [vmem:[#allocation8 + $0x5d0] sm:$0xff] }
0x1b09   :  { %7881 = vmatpush.msrb.mxu2 %v7762_v19  ;;  %v8092_v19 = vld [vmem:[#allocation8 + $0x5f0] sm:$0xff] }
0x1b0a   :  { %v7820_v20 = vpop.f32.mrf.mxu3  ;;  %11604 = vmatmul.msk.f32.vlgmr.msrb.gmra.mxu2 %vm2051_vm2, %v17044_v47 }
0x1b0b   :  { %v7670_v52 = vpop.f32.mrf.mxu1  ;;  %v7794_v38 = vpop.f32.mrf.mxu0 }
0x1b12   :  { %v7823_v32 = vpop.f32.mrf.mxu3 }
0x1b13   :  { %v7673_v8 = vpop.f32.mrf.mxu1  ;;  %v7797_v30 = vpop.f32.mrf.mxu0 }
0x1b1a   :  { %v7826_v3 = vpop.f32.mrf.mxu3 }
0x1b1b   :  { %v7676_v13 = vpop.f32.mrf.mxu1  ;;  %v7800_v46 = vpop.f32.mrf.mxu0 }
0x1b1c   :  { %7898 = vmatpush.msra.mxu0 %v7800_v46  ;;  %v8052_v46 = vld [vmem:[#allocation8 + $0x4b0] sm:$0xff] }
0x1b1e   :  { %7899 = vmatpush.msra.mxu0 %v7797_v30  ;;  %v8056_v30 = vld [vmem:[#allocation8 + $0x4d0] sm:$0xff] }
0x1b20   :  { %7900 = vmatpush.msra.mxu0 %v7794_v38  ;;  %v8345_v38 = vld [vmem:[#allocation8 + $0x768] sm:$0xff] }
0x1b22   :  { %v7829_v53 = vpop.f32.mrf.mxu3  ;;  %7901 = vmatpush.msra.mxu0 %v7791_v44  ;;  %v8353_v44 = vld [vmem:[#allocation8 + $0x7a8] sm:$0xff] }
0x1b23   :  { %7918 = vmatpush.msra.mxu2 %v7829_v53  ;;  %v17048_v34 = vpop.f32.mrf.mxu1  ;;  %11605 = vmatmul.msk.f32.vlgmr.msra.gmra.mxu0 %vm2051_vm2, %v17044_v47  ;;  %v8333_v53 = vld [vmem:[#allocation8 + $0x708] sm:$0xff] }
0x1b24   :  { %7961 = vmatpush.msrb.mxu0 %v7589_v7  ;;  %v8080_v7 = vld [vmem:[#allocation8 + $0x590] sm:$0xff] }
0x1b25   :  { %7919 = vmatpush.msra.mxu2 %v7826_v3 }
0x1b26   :  { %7962 = vmatpush.msrb.mxu0 %v7586_v29 }
0x1b27   :  { %7920 = vmatpush.msra.mxu2 %v7823_v32  ;;  %v8060_v32 = vld [vmem:[#allocation8 + $0x4f0] sm:$0xff] }
0x1b28   :  { %7963 = vmatpush.msrb.mxu0 %v7583_v31  ;;  %v8041_v31 = vld [vmem:[#allocation8 + $0x458] sm:$0xff] }
0x1b29   :  { %7921 = vmatpush.msra.mxu2 %v7820_v20  ;;  %v8349_v20 = vld [vmem:[#allocation8 + $0x788] sm:$0xff] }
0x1b2a   :  { %7964 = vmatpush.msrb.mxu0 %v7580_v63  ;;  %11606 = vmatmul.msk.f32.vlgmr.msra.gmra.mxu2 %vm2051_vm2, %v17044_v47  ;;  %v8045_v63 = vld [vmem:[#allocation8 + $0x478] sm:$0xff] }
0x1b2b   :  { %7981 = vmatpush.msrb.mxu2 %v7618_v40  ;;  %v7852_v14 = vpop.f32.mrf.mxu1  ;;  %11608 = vmatmul.msk.f32.vlgmr.msrb.gmra.mxu0 %vm2051_vm2, %v17055_v43  ;;  %v8076_v40 = vld [vmem:[#allocation8 + $0x570] sm:$0xff] }
0x1b2c   :  { %8021 = vmatpush.msra.mxu0 %v7676_v13  ;;  %v8337_v13 = vld [vmem:[#allocation8 + $0x728] sm:$0xff] }
0x1b2d   :  { %7982 = vmatpush.msrb.mxu2 %v7615_v37  ;;  %v8037_v37 = vld [vmem:[#allocation8 + $0x438] sm:$0xff] }
0x1b2e   :  { %8022 = vmatpush.msra.mxu0 %v7673_v8  ;;  %v8341_v8 = vld [vmem:[#allocation8 + $0x748] sm:$0xff] }
0x1b2f   :  { %7983 = vmatpush.msrb.mxu2 %v7612_v57  ;;  %v8035_v57 = vld [vmem:[#allocation8 + $0x428] sm:$0xff] }
0x1b30   :  { %8023 = vmatpush.msra.mxu0 %v7670_v52  ;;  %v8064_v52 = vld [vmem:[#allocation8 + $0x510] sm:$0xff] }
0x1b31   :  { %7984 = vmatpush.msrb.mxu2 %v7609_v58  ;;  %v8039_v58 = vld [vmem:[#allocation8 + $0x448] sm:$0xff] }
0x1b32   :  { %8024 = vmatpush.msra.mxu0 %v7667_v28  ;;  %11609 = vmatmul.msk.f32.vlgmr.msrb.gmra.mxu2 %vm2051_vm2, %v17055_v43 }
0x1b33   :  { %8123 = vmatpush.msra.mxu2 %v8091_v51  ;;  %v7855_v33 = vpop.f32.mrf.mxu1  ;;  %11611 = vmatmul.msk.f32.vlgmr.msra.gmra.mxu0 %vm2051_vm2, %v17055_v43  ;;  %v8325_v51 = vld [vmem:[#allocation8 + $0x6c8] sm:$0xff] }
0x1b34   :  { %8181 = vmatpush.msrb.mxu0 %v8093_v12  ;;  %v17085_v12 = vld [vmem:[%s17417_s17 + $0x2] sm:$0x1] }
0x1b35   :  { %8124 = vmatpush.msra.mxu2 %v8087_v60  ;;  %v8040_v60 = vld [vmem:[#allocation8 + $0x450] sm:$0xff] }
0x1b36   :  { %8182 = vmatpush.msrb.mxu0 %v8089_v2  ;;  %v8321_v2 = vld [vmem:[#allocation8 + $0x6a8] sm:$0xff] }
0x1b37   :  { %8125 = vmatpush.msra.mxu2 %v8083_v5  ;;  %v8036_v5 = vld [vmem:[#allocation8 + $0x430] sm:$0xff] }
0x1b38   :  { %8183 = vmatpush.msrb.mxu0 %v8085_v61  ;;  %v8317_v61 = vld [vmem:[#allocation8 + $0x688] sm:$0xff] }
0x1b39   :  { %8126 = vmatpush.msra.mxu2 %v8079_v10  ;;  %v8313_v10 = vld [vmem:[#allocation8 + $0x668] sm:$0xff] }
0x1b3a   :  { %8184 = vmatpush.msrb.mxu0 %v8081_v45  ;;  %v8360_v45 = vld [vmem:[#allocation8 + $0x7e0] sm:$0xff] }
0x1b3b   :  { %8127 = vmatpush.msra.mxu2 %v8075_v4  ;;  %v7858_v49 = vpop.f32.mrf.mxu1  ;;  %v8309_v4 = vld [vmem:[#allocation8 + $0x648] sm:$0xff] }
0x1b3c   :  { %8185 = vmatpush.msrb.mxu0 %v8077_v59  ;;  %7938 = vmatpush.msra.mxu3 %v7858_v49  ;;  %v8356_v59 = vld [vmem:[#allocation8 + $0x7c0] sm:$0xff] }
0x1b3d   :  { %8128 = vmatpush.msra.mxu2 %v8071_v48  ;;  %v8305_v48 = vld [vmem:[#allocation8 + $0x628] sm:$0xff]  ;;  %v8344_v49 = vld [vmem:[#allocation8 + $0x760] sm:$0xff] }
0x1b3e   :  { %8186 = vmatpush.msrb.mxu0 %v8073_v25  ;;  %7939 = vmatpush.msra.mxu3 %v7855_v33  ;;  %v8032_v33 = vld [vmem:[#allocation8 + $0x410] sm:$0xff]  ;;  %v8352_v25 = vld [vmem:[#allocation8 + $0x7a0] sm:$0xff] }
0x1b3f   :  { %8129 = vmatpush.msra.mxu2 %v8067_v39  ;;  %v8301_v39 = vld [vmem:[#allocation8 + $0x608] sm:$0xff] }
0x1b40   :  { %8187 = vmatpush.msrb.mxu0 %v8069_v62  ;;  %7940 = vmatpush.msra.mxu3 %v7852_v14  ;;  %v8044_v14 = vld [vmem:[#allocation8 + $0x470] sm:$0xff]  ;;  %v8348_v62 = vld [vmem:[#allocation8 + $0x780] sm:$0xff] }
0x1b41   :  { %8130 = vmatpush.msra.mxu2 %v8063_v0  ;;  %v8340_v0 = vld [vmem:[#allocation8 + $0x740] sm:$0xff] }
0x1b42   :  { %8188 = vmatpush.msrb.mxu0 %v8065_v11  ;;  %7941 = vmatpush.msra.mxu3 %v17048_v34  ;;  %v8048_v34 = vld [vmem:[#allocation8 + $0x490] sm:$0xff]  ;;  %v8336_v11 = vld [vmem:[#allocation8 + $0x720] sm:$0xff] }
0x1b43   :  { %8131 = vmatpush.msra.mxu2 %v8059_v36  ;;  %11607 = vmatmul.msk.f32.vlgmr.msra.gmra.mxu3 %vm2051_vm2, %v17044_v47  ;;  %v17068_v16 = vpop.f32.mrf.mxu1  ;;  %v8068_v47 = vld [vmem:[#allocation8 + $0x530] sm:$0xff]  ;;  %v8332_v36 = vld [vmem:[#allocation8 + $0x700] sm:$0xff] }
0x1b44   :  { %8189 = vmatpush.msrb.mxu0 %v8061_v21  ;;  %8001 = vmatpush.msrb.mxu3 %v17039_v6  ;;  %v8357_v6 = vld [vmem:[#allocation8 + $0x7c8] sm:$0xff]  ;;  %v8328_v21 = vld [vmem:[#allocation8 + $0x6e0] sm:$0xff] }
0x1b45   :  { %8132 = vmatpush.msra.mxu2 %v8055_v23  ;;  %v8324_v23 = vld [vmem:[#allocation8 + $0x6c0] sm:$0xff] }
0x1b46   :  { %8190 = vmatpush.msrb.mxu0 %v8057_v35  ;;  %8002 = vmatpush.msrb.mxu3 %v17037_v55  ;;  %v8031_v55 = vld [vmem:[#allocation8 + $0x408] sm:$0xff]  ;;  %v8320_v35 = vld [vmem:[#allocation8 + $0x6a0] sm:$0xff] }
0x1b47   :  { %8133 = vmatpush.msra.mxu2 %v8051_v41  ;;  %v8316_v41 = vld [vmem:[#allocation8 + $0x680] sm:$0xff] }
0x1b48   :  { %8191 = vmatpush.msrb.mxu0 %v8053_v1  ;;  %8003 = vmatpush.msrb.mxu3 %v17035_v15  ;;  %v8084_v15 = vld [vmem:[#allocation8 + $0x5b0] sm:$0xff]  ;;  %v8308_v1 = vld [vmem:[#allocation8 + $0x640] sm:$0xff] }
0x1b49   :  { %8134 = vmatpush.msra.mxu2 %v8047_v50  ;;  %v8304_v50 = vld [vmem:[#allocation8 + $0x620] sm:$0xff] }
0x1b4a   :  { %8192 = vmatpush.msrb.mxu0 %v8049_v22  ;;  %8004 = vmatpush.msrb.mxu3 %v17033_v42  ;;  %v8361_v42 = vld [vmem:[#allocation8 + $0x7e8] sm:$0xff]  ;;  %v8300_v22 = vld [vmem:[#allocation8 + $0x600] sm:$0xff] }
0x1b4b   :  { %8135 = vmatpush.msra.mxu2 %v8043_v9  ;;  %v8114_v29 = vpop.f32.mrf.mxu1  ;;  %11610 = vmatmul.msk.f32.vlgmr.msrb.gmra.mxu3 %vm2051_vm2, %v17055_v43  ;;  %v8329_v43 = vld [vmem:[#allocation8 + $0x6e8] sm:$0xff] }
0x1b4c   :  { %8193 = vmatpush.msrb.mxu0 %v8045_v63  ;;  %8152 = vmatpush.msra.mxu3 %v8092_v19 }
0x1b4d   :  { %8136 = vmatpush.msra.mxu2 %v8039_v58 }
0x1b4e   :  { %8194 = vmatpush.msrb.mxu0 %v8041_v31  ;;  %8153 = vmatpush.msra.mxu3 %v8088_v18 }
0x1b4f   :  { %8137 = vmatpush.msra.mxu2 %v8035_v57 }
0x1b50   :  { %8195 = vmatpush.msrb.mxu0 %v8037_v37  ;;  %8154 = vmatpush.msra.mxu3 %v8084_v15 }
0x1b51   :  { %8138 = vmatpush.msra.mxu2 %v8031_v55 }
0x1b52   :  { %8139 = vmatmul.f32.vlgmr.msra.gmra.mxu2 %v16982_v24  ;;  %8196 = vmatpush.msrb.mxu0 %v8033_v26 }
0x1b53   :  { %8155 = vmatpush.msra.mxu3 %v8080_v7  ;;  %8197 = vmatmul.f32.vlgmr.msrb.gmra.mxu0 %v16982_v24  ;;  %v8117_v28 = vpop.f32.mrf.mxu1 }
0x1b54   :  { %8393 = vmatpush.msra.mxu0 %v8361_v42 }
0x1b55   :  { %8156 = vmatpush.msra.mxu3 %v8076_v40 }
0x1b56   :  { %8394 = vmatpush.msra.mxu0 %v8357_v6 }
0x1b57   :  { %8157 = vmatpush.msra.mxu3 %v8072_v56  ;;  %v8363_v56 = vld [vmem:[#allocation8 + $0x7f8] sm:$0xff] }
0x1b58   :  { %8395 = vmatpush.msra.mxu0 %v8353_v44 }
0x1b59   :  { %8158 = vmatpush.msra.mxu3 %v8068_v47  ;;  %v8359_v47 = vld [vmem:[#allocation8 + $0x7d8] sm:$0xff] }
0x1b5a   :  { %8142 = vmatmul.f32.gmra.mxu2 %v16993_v17  ;;  %8396 = vmatpush.msra.mxu0 %v8349_v20  ;;  %v8355_v20 = vld [vmem:[#allocation8 + $0x7b8] sm:$0xff] }
0x1b5b   :  { %8159 = vmatpush.msra.mxu3 %v8064_v52  ;;  %8200 = vmatmul.f32.gmra.mxu0 %v16993_v17  ;;  %v8120_v3 = vpop.f32.mrf.mxu1  ;;  %v8351_v52 = vld [vmem:[#allocation8 + $0x798] sm:$0xff] }
0x1b5c   :  { %8397 = vmatpush.msra.mxu0 %v8345_v38  ;;  %8227 = vmatpush.msrb.mxu1 %v8120_v3  ;;  %v8347_v38 = vld [vmem:[#allocation8 + $0x778] sm:$0xff] }
0x1b5d   :  { %8160 = vmatpush.msra.mxu3 %v8060_v32  ;;  %v8339_v3 = vld [vmem:[#allocation8 + $0x738] sm:$0xff] }
0x1b5e   :  { %8398 = vmatpush.msra.mxu0 %v8341_v8  ;;  %8228 = vmatpush.msrb.mxu1 %v8117_v28 }
0x1b5f   :  { %8161 = vmatpush.msra.mxu3 %v8056_v30  ;;  %v8343_v30 = vld [vmem:[#allocation8 + $0x758] sm:$0xff] }
0x1b60   :  { %8399 = vmatpush.msra.mxu0 %v8337_v13  ;;  %8229 = vmatpush.msrb.mxu1 %v8114_v29  ;;  %v8335_v13 = vld [vmem:[#allocation8 + $0x718] sm:$0xff] }
0x1b61   :  { %8162 = vmatpush.msra.mxu3 %v8052_v46  ;;  %v8331_v46 = vld [vmem:[#allocation8 + $0x6f8] sm:$0xff] }
0x1b62   :  { %8145 = vmatmul.f32.gmra.mxu2 %v17001_v54  ;;  %8400 = vmatpush.msra.mxu0 %v8333_v53 }
0x1b63   :  { %8163 = vmatpush.msra.mxu3 %v8048_v34  ;;  %8203 = vmatmul.f32.gmra.mxu0 %v17001_v54 }
0x1b64   :  { %8401 = vmatpush.msra.mxu0 %v8329_v43  ;;  %8230 = vmatpush.msrb.mxu1 %v17068_v16  ;;  %v8312_v16 = vld [vmem:[#allocation8 + $0x660] sm:$0xff]  ;;  %v8327_v43 = vld [vmem:[#allocation8 + $0x6d8] sm:$0xff] }
0x1b65   :  { %8164 = vmatpush.msra.mxu3 %v8044_v14  ;;  %11613 = vmatmul.msk.f32.vlgmr.msrb.gmra.mxu1 %vm2051_vm2, %v17085_v12  ;;  %v8323_v14 = vld [vmem:[#allocation8 + $0x6b8] sm:$0xff] }
0x1b66   :  { %8402 = vmatpush.msra.mxu0 %v8325_v51  ;;  %v8319_v51 = vld [vmem:[#allocation8 + $0x698] sm:$0xff] }
0x1b67   :  { %8165 = vmatpush.msra.mxu3 %v8040_v60  ;;  %v8315_v60 = vld [vmem:[#allocation8 + $0x678] sm:$0xff] }
0x1b68   :  { %8403 = vmatpush.msra.mxu0 %v8321_v2 }
0x1b69   :  { %8166 = vmatpush.msra.mxu3 %v8036_v5 }
0x1b6a   :  { %8148 = vmatmul.f32.gmra.mxu2 %v17007_v27  ;;  %8404 = vmatpush.msra.mxu0 %v8317_v61  ;;  %v8311_v61 = vld [vmem:[#allocation8 + $0x658] sm:$0xff] }
0x1b6b   :  { %8167 = vmatpush.msra.mxu3 %v8032_v33  ;;  %8206 = vmatmul.f32.gmra.mxu0 %v17007_v27  ;;  %v8307_v33 = vld [vmem:[#allocation8 + $0x638] sm:$0xff] }
0x1b6c   :  { %8168 = vmatmul.f32.vlgmr.msra.gmra.mxu3 %v16982_v24  ;;  %8405 = vmatpush.msra.mxu0 %v8313_v10  ;;  %v8303_v10 = vld [vmem:[#allocation8 + $0x618] sm:$0xff] }
0x1b6d   :  { %8364 = vmatpush.msrb.mxu3 %v8360_v45  ;;  %v8362_v45 = vld [vmem:[#allocation8 + $0x7f0] sm:$0xff] }
0x1b6e   :  { %8406 = vmatpush.msra.mxu0 %v8309_v4  ;;  %v8631_v4 = vld [vmem:[#allocation8 + $0x9e8] sm:$0xff] }
0x1b6f   :  { %8365 = vmatpush.msrb.mxu3 %v8356_v59 }
0x1b70   :  { %8407 = vmatpush.msra.mxu0 %v8305_v48  ;;  %v17131_v48 = vld [vmem:[%s17417_s17 + $0x3] sm:$0x1] }
0x1b71   :  { %8366 = vmatpush.msrb.mxu3 %v8352_v25  ;;  %v8358_v25 = vld [vmem:[#allocation8 + $0x7d0] sm:$0xff] }
0x1b72   :  { %8408 = vmatpush.msra.mxu0 %v8301_v39  ;;  %v8627_v39 = vld [vmem:[#allocation8 + $0x9c8] sm:$0xff] }
0x1b73   :  { %8367 = vmatpush.msrb.mxu3 %v8348_v62  ;;  %8409 = vmatmul.f32.vlgmr.msra.gmra.mxu0 %v16982_v24  ;;  %v8354_v62 = vld [vmem:[#allocation8 + $0x7b0] sm:$0xff] }
0x1b74   :  { %8171 = vmatmul.f32.gmra.mxu3 %v16993_v17 }
0x1b75   :  { %8368 = vmatpush.msrb.mxu3 %v8344_v49  ;;  %v8350_v49 = vld [vmem:[#allocation8 + $0x790] sm:$0xff] }
0x1b77   :  { %8369 = vmatpush.msrb.mxu3 %v8340_v0  ;;  %v8619_v0 = vld [vmem:[#allocation8 + $0x988] sm:$0xff] }
0x1b79   :  { %8370 = vmatpush.msrb.mxu3 %v8336_v11  ;;  %v8346_v11 = vld [vmem:[#allocation8 + $0x770] sm:$0xff] }
0x1b7b   :  { %8371 = vmatpush.msrb.mxu3 %v8332_v36  ;;  %8412 = vmatmul.f32.gmra.mxu0 %v16993_v17  ;;  %v8615_v36 = vld [vmem:[#allocation8 + $0x968] sm:$0xff] }
0x1b7c   :  { %8174 = vmatmul.f32.gmra.mxu3 %v17001_v54 }
0x1b7d   :  { %8372 = vmatpush.msrb.mxu3 %v8328_v21 }
0x1b7f   :  { %8373 = vmatpush.msrb.mxu3 %v8324_v23  ;;  %v8342_v23 = vld [vmem:[#allocation8 + $0x750] sm:$0xff] }
0x1b81   :  { %8374 = vmatpush.msrb.mxu3 %v8320_v35  ;;  %v8611_v35 = vld [vmem:[#allocation8 + $0x948] sm:$0xff] }
0x1b83   :  { %8375 = vmatpush.msrb.mxu3 %v8316_v41  ;;  %8415 = vmatmul.f32.gmra.mxu0 %v17001_v54  ;;  %v8338_v41 = vld [vmem:[#allocation8 + $0x730] sm:$0xff] }
0x1b84   :  { %8177 = vmatmul.f32.gmra.mxu3 %v17007_v27 }
0x1b85   :  { %8376 = vmatpush.msrb.mxu3 %v8312_v16  ;;  %v8607_v16 = vld [vmem:[#allocation8 + $0x928] sm:$0xff] }
0x1b87   :  { %8377 = vmatpush.msrb.mxu3 %v8308_v1  ;;  %v8334_v1 = vld [vmem:[#allocation8 + $0x710] sm:$0xff] }
0x1b89   :  { %8378 = vmatpush.msrb.mxu3 %v8304_v50  ;;  %v8603_v50 = vld [vmem:[#allocation8 + $0x908] sm:$0xff] }
0x1b8b   :  { %8379 = vmatpush.msrb.mxu3 %v8300_v22  ;;  %8418 = vmatmul.f32.gmra.mxu0 %v17007_v27  ;;  %v8330_v22 = vld [vmem:[#allocation8 + $0x6f0] sm:$0xff] }
0x1b8c   :  { %8380 = vmatmul.f32.vlgmr.msrb.gmra.mxu3 %v16982_v24 }
0x1b8d   :  { %v17106_v63 = vpop.f32.mrf.mxu2 }
0x1b94   :  { %8383 = vmatmul.f32.gmra.mxu3 %v16993_v17 }
0x1b9c   :  { %8386 = vmatmul.f32.gmra.mxu3 %v17001_v54 }
0x1ba0   :  { %v17104_v9 = vpop.f32.mrf.mxu0 }
0x1ba4   :  { %8389 = vmatmul.f32.gmra.mxu3 %v17007_v27 }
0x1ba8   :  { %v17108_v58 = vpop.f32.mrf.mxu0 }
0x1bad   :  { %v17110_v19 = vpop.f32.mrf.mxu2 }
0x1bb0   :  { %v17112_v31 = vpop.f32.mrf.mxu0 }
0x1bb5   :  { %v17114_v57 = vpop.f32.mrf.mxu2 }
0x1bc6   :  { %v17116_v55 = vpop.f32.mrf.mxu3 }
0x1bce   :  { %v17118_v42 = vpop.f32.mrf.mxu3 }
0x1bd0   :  { %v8198_v18 = vpop.f32.mrf.mxu0 }
0x1bd5   :  { %v8140_v29 = vpop.f32.mrf.mxu2 }
0x1bd8   :  { %v8201_v37 = vpop.f32.mrf.mxu0 }
0x1bdd   :  { %v8143_v15 = vpop.f32.mrf.mxu2 }
0x1be0   :  { %v8204_v26 = vpop.f32.mrf.mxu0 }
0x1be5   :  { %v8146_v7 = vpop.f32.mrf.mxu2 }
0x1be8   :  { %v8207_v40 = vpop.f32.mrf.mxu0 }
0x1be9   :  { %8287 = vmatpush.msrb.mxu2 %v8207_v40  ;;  %v8318_v40 = vld [vmem:[#allocation8 + $0x690] sm:$0xff] }
0x1beb   :  { %8288 = vmatpush.msrb.mxu2 %v8204_v26  ;;  %v8322_v26 = vld [vmem:[#allocation8 + $0x6b0] sm:$0xff] }
0x1bed   :  { %v8149_v6 = vpop.f32.mrf.mxu2  ;;  %8289 = vmatpush.msrb.mxu2 %v8201_v37  ;;  %v8326_v37 = vld [vmem:[#allocation8 + $0x6d0] sm:$0xff] }
0x1bee   :  { %8247 = vmatpush.msra.mxu1 %v8149_v6  ;;  %v8587_v6 = vld [vmem:[#allocation8 + $0x888] sm:$0xff] }
0x1bef   :  { %v8169_v28 = vpop.f32.mrf.mxu3  ;;  %8290 = vmatpush.msrb.mxu2 %v8198_v18  ;;  %v8599_v18 = vld [vmem:[#allocation8 + $0x8e8] sm:$0xff] }
0x1bf0   :  { %8248 = vmatpush.msra.mxu1 %v8146_v7  ;;  %11616 = vmatmul.msk.f32.vlgmr.msrb.gmra.mxu2 %vm2051_vm2, %v17085_v12  ;;  %v8410_v44 = vpop.f32.mrf.mxu0  ;;  %v8591_v7 = vld [vmem:[#allocation8 + $0x8a8] sm:$0xff] }
0x1bf1   :  { %8451 = vmatpush.msra.mxu2 %v8363_v56  ;;  %v8314_v56 = vld [vmem:[#allocation8 + $0x670] sm:$0xff] }
0x1bf2   :  { %8249 = vmatpush.msra.mxu1 %v8143_v15  ;;  %v8595_v15 = vld [vmem:[#allocation8 + $0x8c8] sm:$0xff] }
0x1bf3   :  { %8452 = vmatpush.msra.mxu2 %v8359_v47  ;;  %v8310_v47 = vld [vmem:[#allocation8 + $0x650] sm:$0xff] }
0x1bf4   :  { %8250 = vmatpush.msra.mxu1 %v8140_v29 }
0x1bf5   :  { %8453 = vmatpush.msra.mxu2 %v8355_v20  ;;  %11614 = vmatmul.msk.f32.vlgmr.msra.gmra.mxu1 %vm2051_vm2, %v17085_v12  ;;  %v8579_v20 = vld [vmem:[#allocation8 + $0x848] sm:$0xff] }
0x1bf7   :  { %8454 = vmatpush.msra.mxu2 %v8351_v52  ;;  %v8172_v32 = vpop.f32.mrf.mxu3  ;;  %v8306_v52 = vld [vmem:[#allocation8 + $0x630] sm:$0xff] }
0x1bf8   :  { %v8413_v8 = vpop.f32.mrf.mxu0 }
0x1bf9   :  { %8455 = vmatpush.msra.mxu2 %v8347_v38  ;;  %v8575_v38 = vld [vmem:[#allocation8 + $0x828] sm:$0xff] }
0x1bfb   :  { %8456 = vmatpush.msra.mxu2 %v8343_v30  ;;  %v8630_v30 = vld [vmem:[#allocation8 + $0x9e0] sm:$0xff] }
0x1bfd   :  { %8457 = vmatpush.msra.mxu2 %v8339_v3  ;;  %v8626_v3 = vld [vmem:[#allocation8 + $0x9c0] sm:$0xff] }
0x1bff   :  { %8458 = vmatpush.msra.mxu2 %v8335_v13  ;;  %v8175_v53 = vpop.f32.mrf.mxu3  ;;  %v8622_v13 = vld [vmem:[#allocation8 + $0x9a0] sm:$0xff] }
0x1c00   :  { %v8416_v34 = vpop.f32.mrf.mxu0 }
0x1c01   :  { %8459 = vmatpush.msra.mxu2 %v8331_v46  ;;  %v8618_v46 = vld [vmem:[#allocation8 + $0x980] sm:$0xff] }
0x1c03   :  { %8460 = vmatpush.msra.mxu2 %v8327_v43  ;;  %v8606_v43 = vld [vmem:[#allocation8 + $0x920] sm:$0xff] }
0x1c05   :  { %8461 = vmatpush.msra.mxu2 %v8323_v14  ;;  %v8602_v14 = vld [vmem:[#allocation8 + $0x900] sm:$0xff] }
0x1c07   :  { %8462 = vmatpush.msra.mxu2 %v8319_v51  ;;  %v8178_v2 = vpop.f32.mrf.mxu3  ;;  %v8598_v51 = vld [vmem:[#allocation8 + $0x8e0] sm:$0xff] }
0x1c08   :  { %8267 = vmatpush.msrb.mxu1 %v8178_v2  ;;  %v8419_v5 = vpop.f32.mrf.mxu0  ;;  %v8590_v2 = vld [vmem:[#allocation8 + $0x8a0] sm:$0xff] }
0x1c09   :  { %8463 = vmatpush.msra.mxu2 %v8315_v60  ;;  %8517 = vmatpush.msrb.mxu0 %v8419_v5  ;;  %v8594_v60 = vld [vmem:[#allocation8 + $0x8c0] sm:$0xff] }
0x1c0a   :  { %8268 = vmatpush.msrb.mxu1 %v8175_v53  ;;  %v8614_v53 = vld [vmem:[#allocation8 + $0x960] sm:$0xff] }
0x1c0b   :  { %8464 = vmatpush.msra.mxu2 %v8311_v61  ;;  %8518 = vmatpush.msrb.mxu0 %v8416_v34  ;;  %v8610_v34 = vld [vmem:[#allocation8 + $0x940] sm:$0xff] }
0x1c0c   :  { %8269 = vmatpush.msrb.mxu1 %v8172_v32  ;;  %v8302_v32 = vld [vmem:[#allocation8 + $0x610] sm:$0xff]  ;;  %v8586_v5 = vld [vmem:[#allocation8 + $0x880] sm:$0xff] }
0x1c0d   :  { %8465 = vmatpush.msra.mxu2 %v8307_v33  ;;  %8519 = vmatpush.msrb.mxu0 %v8413_v8  ;;  %v8571_v8 = vld [vmem:[#allocation8 + $0x808] sm:$0xff]  ;;  %v8582_v61 = vld [vmem:[#allocation8 + $0x860] sm:$0xff] }
0x1c0e   :  { %8270 = vmatpush.msrb.mxu1 %v8169_v28  ;;  %v8583_v28 = vld [vmem:[#allocation8 + $0x868] sm:$0xff]  ;;  %v8578_v33 = vld [vmem:[#allocation8 + $0x840] sm:$0xff] }
0x1c0f   :  { %8466 = vmatpush.msra.mxu2 %v8303_v10  ;;  %11615 = vmatmul.msk.f32.vlgmr.msrb.gmra.mxu1 %vm2051_vm2, %v17085_v12  ;;  %v17126_v59 = vpop.f32.mrf.mxu3  ;;  %v8623_v12 = vld [vmem:[#allocation8 + $0x9a8] sm:$0xff]  ;;  %v8574_v10 = vld [vmem:[#allocation8 + $0x820] sm:$0xff] }
0x1c10   :  { %8422 = vmatpush.msra.mxu1 %v8362_v45  ;;  %8467 = vmatmul.f32.vlgmr.msra.gmra.mxu2 %v16982_v24  ;;  %v8570_v45 = vld [vmem:[#allocation8 + $0x800] sm:$0xff] }
0x1c11   :  { %8520 = vmatpush.msrb.mxu0 %v8410_v44  ;;  %8663 = vmatpush.msrb.mxu2 %v8631_v4 }
0x1c12   :  { %11619 = vmatmul.msk.f32.vlgmr.msrb.gmra.mxu0 %vm2051_vm2, %v17131_v48  ;;  %8423 = vmatpush.msra.mxu1 %v8358_v25  ;;  %v17156_v25 = vpop.f32.mrf.mxu1 }
0x1c13   :  { %8664 = vmatpush.msrb.mxu2 %v8627_v39 }
0x1c14   :  { %8424 = vmatpush.msra.mxu1 %v8354_v62 }
0x1c15   :  { %8665 = vmatpush.msrb.mxu2 %v8623_v12 }
0x1c16   :  { %8425 = vmatpush.msra.mxu1 %v8350_v49 }
0x1c17   :  { %8666 = vmatpush.msrb.mxu2 %v8619_v0  ;;  %v8384_v21 = vpop.f32.mrf.mxu3 }
0x1c18   :  { %8426 = vmatpush.msra.mxu1 %v8346_v11  ;;  %8470 = vmatmul.f32.gmra.mxu2 %v16993_v17 }
0x1c19   :  { %8667 = vmatpush.msrb.mxu2 %v8615_v36  ;;  %v8633_v36 = vld [vmem:[#allocation8 + $0x9f8] sm:$0xff] }
0x1c1a   :  { %8427 = vmatpush.msra.mxu1 %v8342_v23 }
0x1c1b   :  { %8668 = vmatpush.msrb.mxu2 %v8611_v35 }
0x1c1c   :  { %8428 = vmatpush.msra.mxu1 %v8338_v41  ;;  %v8625_v41 = vld [vmem:[#allocation8 + $0x9b8] sm:$0xff] }
0x1c1d   :  { %8669 = vmatpush.msrb.mxu2 %v8607_v16  ;;  %v8621_v16 = vld [vmem:[#allocation8 + $0x998] sm:$0xff] }
0x1c1e   :  { %8429 = vmatpush.msra.mxu1 %v8334_v1  ;;  %v8617_v1 = vld [vmem:[#allocation8 + $0x978] sm:$0xff] }
0x1c1f   :  { %8670 = vmatpush.msrb.mxu2 %v8603_v50  ;;  %v8387_v29 = vpop.f32.mrf.mxu3  ;;  %v8613_v50 = vld [vmem:[#allocation8 + $0x958] sm:$0xff] }
0x1c20   :  { %8430 = vmatpush.msra.mxu1 %v8330_v22  ;;  %8473 = vmatmul.f32.gmra.mxu2 %v17001_v54 }
0x1c21   :  { %8671 = vmatpush.msrb.mxu2 %v8599_v18 }
0x1c22   :  { %8431 = vmatpush.msra.mxu1 %v8326_v37  ;;  %v8605_v37 = vld [vmem:[#allocation8 + $0x918] sm:$0xff] }
0x1c23   :  { %8672 = vmatpush.msrb.mxu2 %v8595_v15  ;;  %v8601_v15 = vld [vmem:[#allocation8 + $0x8f8] sm:$0xff] }
0x1c24   :  { %8432 = vmatpush.msra.mxu1 %v8322_v26  ;;  %v8597_v26 = vld [vmem:[#allocation8 + $0x8d8] sm:$0xff] }
0x1c25   :  { %8673 = vmatpush.msrb.mxu2 %v8591_v7 }
0x1c26   :  { %8433 = vmatpush.msra.mxu1 %v8318_v40 }
0x1c27   :  { %8674 = vmatpush.msrb.mxu2 %v8587_v6  ;;  %v8390_v44 = vpop.f32.mrf.mxu3  ;;  %v8593_v6 = vld [vmem:[#allocation8 + $0x8b8] sm:$0xff] }
0x1c28   :  { %8434 = vmatpush.msra.mxu1 %v8314_v56  ;;  %8476 = vmatmul.f32.gmra.mxu2 %v17007_v27  ;;  %v8589_v56 = vld [vmem:[#allocation8 + $0x898] sm:$0xff] }
0x1c29   :  { %8497 = vmatpush.msra.mxu3 %v8390_v44  ;;  %8675 = vmatpush.msrb.mxu2 %v8583_v28  ;;  %v8585_v28 = vld [vmem:[#allocation8 + $0x878] sm:$0xff]  ;;  %v8632_v44 = vld [vmem:[#allocation8 + $0x9f0] sm:$0xff] }
0x1c2a   :  { %8435 = vmatpush.msra.mxu1 %v8310_v47  ;;  %v8581_v47 = vld [vmem:[#allocation8 + $0x858] sm:$0xff] }
0x1c2b   :  { %8498 = vmatpush.msra.mxu3 %v8387_v29  ;;  %8676 = vmatpush.msrb.mxu2 %v8579_v20  ;;  %v8609_v29 = vld [vmem:[#allocation8 + $0x938] sm:$0xff] }
0x1c2c   :  { %8436 = vmatpush.msra.mxu1 %v8306_v52 }
0x1c2d   :  { %8499 = vmatpush.msra.mxu3 %v8384_v21  ;;  %8677 = vmatpush.msrb.mxu2 %v8575_v38  ;;  %v8629_v21 = vld [vmem:[#allocation8 + $0x9d8] sm:$0xff]  ;;  %v8628_v38 = vld [vmem:[#allocation8 + $0x9d0] sm:$0xff] }
0x1c2e   :  { %8437 = vmatpush.msra.mxu1 %v8302_v32  ;;  %v8577_v32 = vld [vmem:[#allocation8 + $0x838] sm:$0xff] }
0x1c2f   :  { %8438 = vmatmul.f32.vlgmr.msra.gmra.mxu1 %v16982_v24  ;;  %8500 = vmatpush.msra.mxu3 %v17126_v59 }
0x1c30   :  { %8678 = vmatpush.msrb.mxu2 %v8571_v8  ;;  %11618 = vmatmul.msk.f32.vlgmr.msra.gmra.mxu3 %vm2051_vm2, %v17131_v48  ;;  %v8624_v8 = vld [vmem:[#allocation8 + $0x9b0] sm:$0xff] }
0x1c31   :  { %8634 = vmatpush.msrb.mxu1 %v8630_v30  ;;  %8679 = vmatmul.f32.vlgmr.msrb.gmra.mxu2 %v16982_v24  ;;  %v8573_v30 = vld [vmem:[#allocation8 + $0x818] sm:$0xff] }
0x1c33   :  { %8635 = vmatpush.msrb.mxu1 %v8626_v3  ;;  %v8620_v3 = vld [vmem:[#allocation8 + $0x990] sm:$0xff] }
0x1c35   :  { %8636 = vmatpush.msrb.mxu1 %v8622_v13  ;;  %v17171_v13 = vld [vmem:[%s17417_s17 + $0x4] sm:$0x1] }
0x1c37   :  { %8637 = vmatpush.msrb.mxu1 %v8618_v46  ;;  %v8616_v46 = vld [vmem:[#allocation8 + $0x970] sm:$0xff] }
0x1c38   :  { %8441 = vmatmul.f32.gmra.mxu1 %v16993_v17 }
0x1c39   :  { %8638 = vmatpush.msrb.mxu1 %v8614_v53  ;;  %8682 = vmatmul.f32.gmra.mxu2 %v16993_v17  ;;  %v8897_v53 = vld [vmem:[#allocation8 + $0xbc8] sm:$0xff] }
0x1c3b   :  { %8639 = vmatpush.msrb.mxu1 %v8610_v34 }
0x1c3d   :  { %8640 = vmatpush.msrb.mxu1 %v8606_v43  ;;  %v8612_v43 = vld [vmem:[#allocation8 + $0x950] sm:$0xff] }
0x1c3f   :  { %8641 = vmatpush.msrb.mxu1 %v8602_v14  ;;  %v8893_v14 = vld [vmem:[#allocation8 + $0xba8] sm:$0xff] }
0x1c40   :  { %8444 = vmatmul.f32.gmra.mxu1 %v17001_v54 }
0x1c41   :  { %8642 = vmatpush.msrb.mxu1 %v8598_v51  ;;  %8685 = vmatmul.f32.gmra.mxu2 %v17001_v54  ;;  %v8608_v51 = vld [vmem:[#allocation8 + $0x930] sm:$0xff] }
0x1c43   :  { %8643 = vmatpush.msrb.mxu1 %v8594_v60  ;;  %v8889_v60 = vld [vmem:[#allocation8 + $0xb88] sm:$0xff] }
0x1c45   :  { %8644 = vmatpush.msrb.mxu1 %v8590_v2  ;;  %v8604_v2 = vld [vmem:[#allocation8 + $0x910] sm:$0xff] }
0x1c47   :  { %8645 = vmatpush.msrb.mxu1 %v8586_v5  ;;  %v8885_v5 = vld [vmem:[#allocation8 + $0xb68] sm:$0xff] }
0x1c48   :  { %8447 = vmatmul.f32.gmra.mxu1 %v17007_v27 }
0x1c49   :  { %8646 = vmatpush.msrb.mxu1 %v8582_v61  ;;  %8688 = vmatmul.f32.gmra.mxu2 %v17007_v27  ;;  %v8600_v61 = vld [vmem:[#allocation8 + $0x8f0] sm:$0xff] }
0x1c4b   :  { %8647 = vmatpush.msrb.mxu1 %v8578_v33  ;;  %v8881_v33 = vld [vmem:[#allocation8 + $0xb48] sm:$0xff] }
0x1c4d   :  { %8648 = vmatpush.msrb.mxu1 %v8574_v10 }
0x1c4f   :  { %8649 = vmatpush.msrb.mxu1 %v8570_v45  ;;  %v8596_v45 = vld [vmem:[#allocation8 + $0x8d0] sm:$0xff] }
0x1c50   :  { %8650 = vmatmul.f32.vlgmr.msrb.gmra.mxu1 %v16982_v24 }
0x1c58   :  { %8653 = vmatmul.f32.gmra.mxu1 %v16993_v17 }
0x1c60   :  { %8656 = vmatmul.f32.gmra.mxu1 %v17001_v54 }
0x1c68   :  { %8659 = vmatmul.f32.gmra.mxu1 %v17007_v27 }
0x1c72   :  { %v17158_v62 = vpop.f32.mrf.mxu1 }
0x1c73   :  { %v17154_v4 = vpop.f32.mrf.mxu2 }
0x1c8c   :  { %v17160_v49 = vpop.f32.mrf.mxu1 }
0x1c93   :  { %v8468_v59 = vpop.f32.mrf.mxu2 }
0x1c9b   :  { %v8471_v39 = vpop.f32.mrf.mxu2 }
0x1ca3   :  { %v8474_v12 = vpop.f32.mrf.mxu2 }
0x1cab   :  { %v8477_v0 = vpop.f32.mrf.mxu2 }
0x1cac   :  { %v8439_v11 = vpop.f32.mrf.mxu1  ;;  %8557 = vmatpush.msra.mxu0 %v8477_v0  ;;  %v8588_v0 = vld [vmem:[#allocation8 + $0x890] sm:$0xff] }
0x1cae   :  { %8558 = vmatpush.msra.mxu0 %v8474_v12  ;;  %v8873_v12 = vld [vmem:[#allocation8 + $0xb08] sm:$0xff] }
0x1cb0   :  { %8559 = vmatpush.msra.mxu0 %v8471_v39  ;;  %v8592_v39 = vld [vmem:[#allocation8 + $0x8b0] sm:$0xff] }
0x1cb2   :  { %8560 = vmatpush.msra.mxu0 %v8468_v59  ;;  %v8877_v59 = vld [vmem:[#allocation8 + $0xb28] sm:$0xff] }
0x1cb3   :  { %11621 = vmatmul.msk.f32.vlgmr.msra.gmra.mxu0 %vm2051_vm2, %v17131_v48 }
0x1cb4   :  { %v8680_v23 = vpop.f32.mrf.mxu2  ;;  %8721 = vmatpush.msrb.mxu0 %v8633_v36  ;;  %v8584_v36 = vld [vmem:[#allocation8 + $0x870] sm:$0xff] }
0x1cb5   :  { %v8442_v35 = vpop.f32.mrf.mxu1 }
0x1cb6   :  { %8722 = vmatpush.msrb.mxu0 %v8629_v21  ;;  %v8865_v21 = vld [vmem:[#allocation8 + $0xac8] sm:$0xff] }
0x1cb8   :  { %8723 = vmatpush.msrb.mxu0 %v8625_v41  ;;  %v8861_v41 = vld [vmem:[#allocation8 + $0xaa8] sm:$0xff] }
0x1cba   :  { %8724 = vmatpush.msrb.mxu0 %v8621_v16  ;;  %v8576_v16 = vld [vmem:[#allocation8 + $0x830] sm:$0xff] }
0x1cbc   :  { %v8683_v22 = vpop.f32.mrf.mxu2  ;;  %8725 = vmatpush.msrb.mxu0 %v8617_v1  ;;  %v8857_v1 = vld [vmem:[#allocation8 + $0xa88] sm:$0xff] }
0x1cbd   :  { %v8445_v18 = vpop.f32.mrf.mxu1 }
0x1cbe   :  { %8726 = vmatpush.msrb.mxu0 %v8613_v50  ;;  %v8572_v50 = vld [vmem:[#allocation8 + $0x810] sm:$0xff] }
0x1cc0   :  { %8727 = vmatpush.msrb.mxu0 %v8609_v29  ;;  %v8849_v29 = vld [vmem:[#allocation8 + $0xa48] sm:$0xff] }
0x1cc2   :  { %8728 = vmatpush.msrb.mxu0 %v8605_v37  ;;  %v8896_v37 = vld [vmem:[#allocation8 + $0xbc0] sm:$0xff] }
0x1cc4   :  { %v8686_v7 = vpop.f32.mrf.mxu2  ;;  %8729 = vmatpush.msrb.mxu0 %v8601_v15  ;;  %v8845_v15 = vld [vmem:[#allocation8 + $0xa28] sm:$0xff] }
0x1cc5   :  { %v8448_v40 = vpop.f32.mrf.mxu1 }
0x1cc6   :  { %8537 = vmatpush.msrb.mxu3 %v8448_v40  ;;  %8730 = vmatpush.msrb.mxu0 %v8597_v26  ;;  %v8892_v26 = vld [vmem:[#allocation8 + $0xba0] sm:$0xff] }
0x1cc7   :  { %v8888_v40 = vld [vmem:[#allocation8 + $0xb80] sm:$0xff] }
0x1cc8   :  { %8538 = vmatpush.msrb.mxu3 %v8445_v18  ;;  %8731 = vmatpush.msrb.mxu0 %v8593_v6  ;;  %v8900_v18 = vld [vmem:[#allocation8 + $0xbe0] sm:$0xff] }
0x1cc9   :  { %v8884_v6 = vld [vmem:[#allocation8 + $0xb60] sm:$0xff] }
0x1cca   :  { %8539 = vmatpush.msrb.mxu3 %v8442_v35  ;;  %8732 = vmatpush.msrb.mxu0 %v8589_v56  ;;  %v8580_v35 = vld [vmem:[#allocation8 + $0x850] sm:$0xff]  ;;  %v8880_v56 = vld [vmem:[#allocation8 + $0xb40] sm:$0xff] }
0x1ccc   :  { %8540 = vmatpush.msrb.mxu3 %v8439_v11  ;;  %v8689_v20 = vpop.f32.mrf.mxu2  ;;  %8733 = vmatpush.msrb.mxu0 %v8585_v28  ;;  %v8869_v11 = vld [vmem:[#allocation8 + $0xae8] sm:$0xff]  ;;  %v8876_v28 = vld [vmem:[#allocation8 + $0xb20] sm:$0xff] }
0x1ccd   :  { %11620 = vmatmul.msk.f32.vlgmr.msrb.gmra.mxu3 %vm2051_vm2, %v17131_v48  ;;  %v17166_v52 = vpop.f32.mrf.mxu1  ;;  %8787 = vmatpush.msra.mxu2 %v8689_v20  ;;  %v8901_v48 = vld [vmem:[#allocation8 + $0xbe8] sm:$0xff]  ;;  %v8864_v20 = vld [vmem:[#allocation8 + $0xac0] sm:$0xff] }
0x1cce   :  { %8692 = vmatpush.msra.mxu3 %v8632_v44  ;;  %8734 = vmatpush.msrb.mxu0 %v8581_v47  ;;  %v8872_v44 = vld [vmem:[#allocation8 + $0xb00] sm:$0xff] }
0x1ccf   :  { %8788 = vmatpush.msra.mxu2 %v8686_v7  ;;  %v8841_v7 = vld [vmem:[#allocation8 + $0xa08] sm:$0xff]  ;;  %v8868_v47 = vld [vmem:[#allocation8 + $0xae0] sm:$0xff] }
0x1cd0   :  { %8693 = vmatpush.msra.mxu3 %v8628_v38  ;;  %8735 = vmatpush.msrb.mxu0 %v8577_v32  ;;  %v8856_v38 = vld [vmem:[#allocation8 + $0xa80] sm:$0xff] }
0x1cd1   :  { %8789 = vmatpush.msra.mxu2 %v8683_v22  ;;  %v8853_v22 = vld [vmem:[#allocation8 + $0xa68] sm:$0xff]  ;;  %v8852_v32 = vld [vmem:[#allocation8 + $0xa60] sm:$0xff] }
0x1cd2   :  { %8694 = vmatpush.msra.mxu3 %v8624_v8  ;;  %8736 = vmatpush.msrb.mxu0 %v8573_v30  ;;  %v8848_v8 = vld [vmem:[#allocation8 + $0xa40] sm:$0xff] }
0x1cd3   :  { %8737 = vmatmul.f32.vlgmr.msrb.gmra.mxu0 %v16982_v24  ;;  %8790 = vmatpush.msra.mxu2 %v8680_v23  ;;  %v8844_v30 = vld [vmem:[#allocation8 + $0xa20] sm:$0xff] }
0x1cd4   :  { %8695 = vmatpush.msra.mxu3 %v8620_v3  ;;  %11624 = vmatmul.msk.f32.vlgmr.msra.gmra.mxu2 %vm2051_vm2, %v17171_v13  ;;  %v8840_v3 = vld [vmem:[#allocation8 + $0xa00] sm:$0xff] }
0x1cd5   :  { %8933 = vmatpush.msra.mxu0 %v8901_v48  ;;  %v8654_v34 = vpop.f32.mrf.mxu1  ;;  %v17194_v48 = vpop.f32.mrf.mxu0 }
0x1cd6   :  { %8696 = vmatpush.msra.mxu3 %v8616_v46 }
0x1cd7   :  { %8934 = vmatpush.msra.mxu0 %v8897_v53 }
0x1cd8   :  { %8697 = vmatpush.msra.mxu3 %v8612_v43  ;;  %v17198_v43 = vpop.f32.mrf.mxu3 }
0x1cd9   :  { %8935 = vmatpush.msra.mxu0 %v8893_v14 }
0x1cda   :  { %8698 = vmatpush.msra.mxu3 %v8608_v51 }
0x1cdb   :  { %8936 = vmatpush.msra.mxu0 %v8889_v60 }
0x1cdc   :  { %8699 = vmatpush.msra.mxu3 %v8604_v2  ;;  %8740 = vmatmul.f32.gmra.mxu0 %v16993_v17  ;;  %v8903_v2 = vld [vmem:[#allocation8 + $0xbf8] sm:$0xff] }
0x1cdd   :  { %8937 = vmatpush.msra.mxu0 %v8885_v5  ;;  %v8657_v10 = vpop.f32.mrf.mxu1 }
0x1cde   :  { %8700 = vmatpush.msra.mxu3 %v8600_v61  ;;  %v8899_v61 = vld [vmem:[#allocation8 + $0xbd8] sm:$0xff] }
0x1cdf   :  { %8938 = vmatpush.msra.mxu0 %v8881_v33 }
0x1ce0   :  { %8701 = vmatpush.msra.mxu3 %v8596_v45  ;;  %v8891_v45 = vld [vmem:[#allocation8 + $0xb98] sm:$0xff] }
0x1ce1   :  { %8939 = vmatpush.msra.mxu0 %v8877_v59  ;;  %v8887_v59 = vld [vmem:[#allocation8 + $0xb78] sm:$0xff] }
0x1ce2   :  { %8702 = vmatpush.msra.mxu3 %v8592_v39 }
0x1ce3   :  { %8940 = vmatpush.msra.mxu0 %v8873_v12  ;;  %v8883_v12 = vld [vmem:[#allocation8 + $0xb58] sm:$0xff] }
0x1ce4   :  { %8703 = vmatpush.msra.mxu3 %v8588_v0  ;;  %8743 = vmatmul.f32.gmra.mxu0 %v17001_v54 }
0x1ce5   :  { %8941 = vmatpush.msra.mxu0 %v8869_v11  ;;  %v8660_v23 = vpop.f32.mrf.mxu1  ;;  %v8879_v11 = vld [vmem:[#allocation8 + $0xb38] sm:$0xff] }
0x1ce6   :  { %8704 = vmatpush.msra.mxu3 %v8584_v36  ;;  %8767 = vmatpush.msra.mxu1 %v8660_v23  ;;  %v8875_v36 = vld [vmem:[#allocation8 + $0xb18] sm:$0xff] }
0x1ce7   :  { %8942 = vmatpush.msra.mxu0 %v8865_v21  ;;  %v8871_v21 = vld [vmem:[#allocation8 + $0xaf8] sm:$0xff] }
0x1ce8   :  { %8705 = vmatpush.msra.mxu3 %v8580_v35  ;;  %8768 = vmatpush.msra.mxu1 %v8657_v10  ;;  %v8895_v10 = vld [vmem:[#allocation8 + $0xbb8] sm:$0xff] }
0x1ce9   :  { %8943 = vmatpush.msra.mxu0 %v8861_v41  ;;  %v8867_v35 = vld [vmem:[#allocation8 + $0xad8] sm:$0xff] }
0x1cea   :  { %8706 = vmatpush.msra.mxu3 %v8576_v16  ;;  %8769 = vmatpush.msra.mxu1 %v8654_v34  ;;  %v8863_v16 = vld [vmem:[#allocation8 + $0xab8] sm:$0xff] }
0x1ceb   :  { %8944 = vmatpush.msra.mxu0 %v8857_v1  ;;  %v8859_v1 = vld [vmem:[#allocation8 + $0xa98] sm:$0xff] }
0x1cec   :  { %8707 = vmatpush.msra.mxu3 %v8572_v50  ;;  %8746 = vmatmul.f32.gmra.mxu0 %v17007_v27  ;;  %v8855_v50 = vld [vmem:[#allocation8 + $0xa78] sm:$0xff] }
0x1ced   :  { %8708 = vmatmul.f32.vlgmr.msra.gmra.mxu3 %v16982_v24  ;;  %8770 = vmatpush.msra.mxu1 %v17166_v52  ;;  %v8860_v52 = vld [vmem:[#allocation8 + $0xaa0] sm:$0xff] }
0x1cee   :  { %8945 = vmatpush.msra.mxu0 %v8853_v22  ;;  %11623 = vmatmul.msk.f32.vlgmr.msra.gmra.mxu1 %vm2051_vm2, %v17171_v13 }
0x1cef   :  { %8904 = vmatpush.msrb.mxu3 %v8900_v18  ;;  %v8851_v18 = vld [vmem:[#allocation8 + $0xa58] sm:$0xff] }
0x1cf0   :  { %8946 = vmatpush.msra.mxu0 %v8849_v29 }
0x1cf1   :  { %8905 = vmatpush.msrb.mxu3 %v8896_v37  ;;  %v8847_v37 = vld [vmem:[#allocation8 + $0xa38] sm:$0xff] }
0x1cf2   :  { %8947 = vmatpush.msra.mxu0 %v8845_v15  ;;  %v8843_v15 = vld [vmem:[#allocation8 + $0xa18] sm:$0xff] }
0x1cf3   :  { %8906 = vmatpush.msrb.mxu3 %v8892_v26  ;;  %v8902_v26 = vld [vmem:[#allocation8 + $0xbf0] sm:$0xff] }
0x1cf4   :  { %8948 = vmatpush.msra.mxu0 %v8841_v7  ;;  %v17207_v7 = vld [vmem:[%s17417_s17 + $0x5] sm:$0x1] }
0x1cf5   :  { %8907 = vmatpush.msrb.mxu3 %v8888_v40  ;;  %8949 = vmatmul.f32.vlgmr.msra.gmra.mxu0 %v16982_v24  ;;  %v9171_v40 = vld [vmem:[#allocation8 + $0xde8] sm:$0xff] }
0x1cf6   :  { %8711 = vmatmul.f32.gmra.mxu3 %v16993_v17 }
0x1cf7   :  { %8908 = vmatpush.msrb.mxu3 %v8884_v6 }
0x1cf9   :  { %8909 = vmatpush.msrb.mxu3 %v8880_v56  ;;  %v8898_v56 = vld [vmem:[#allocation8 + $0xbd0] sm:$0xff] }
0x1cfb   :  { %8910 = vmatpush.msrb.mxu3 %v8876_v28  ;;  %v9167_v28 = vld [vmem:[#allocation8 + $0xdc8] sm:$0xff] }
0x1cfd   :  { %8911 = vmatpush.msrb.mxu3 %v8872_v44  ;;  %8952 = vmatmul.f32.gmra.mxu0 %v16993_v17  ;;  %v8894_v44 = vld [vmem:[#allocation8 + $0xbb0] sm:$0xff] }
0x1cfe   :  { %8714 = vmatmul.f32.gmra.mxu3 %v17001_v54 }
0x1cff   :  { %8912 = vmatpush.msrb.mxu3 %v8868_v47  ;;  %v9163_v47 = vld [vmem:[#allocation8 + $0xda8] sm:$0xff] }
0x1d01   :  { %8913 = vmatpush.msrb.mxu3 %v8864_v20  ;;  %v8890_v20 = vld [vmem:[#allocation8 + $0xb90] sm:$0xff] }
0x1d03   :  { %8914 = vmatpush.msrb.mxu3 %v8860_v52  ;;  %v9159_v52 = vld [vmem:[#allocation8 + $0xd88] sm:$0xff] }
0x1d05   :  { %8915 = vmatpush.msrb.mxu3 %v8856_v38  ;;  %8955 = vmatmul.f32.gmra.mxu0 %v17001_v54  ;;  %v9155_v38 = vld [vmem:[#allocation8 + $0xd68] sm:$0xff] }
0x1d06   :  { %8717 = vmatmul.f32.gmra.mxu3 %v17007_v27 }
0x1d07   :  { %8916 = vmatpush.msrb.mxu3 %v8852_v32 }
0x1d09   :  { %8917 = vmatpush.msrb.mxu3 %v8848_v8  ;;  %v8882_v8 = vld [vmem:[#allocation8 + $0xb50] sm:$0xff] }
0x1d0b   :  { %8918 = vmatpush.msrb.mxu3 %v8844_v30  ;;  %v9151_v30 = vld [vmem:[#allocation8 + $0xd48] sm:$0xff] }
0x1d0d   :  { %8919 = vmatpush.msrb.mxu3 %v8840_v3  ;;  %8958 = vmatmul.f32.gmra.mxu0 %v17007_v27  ;;  %v8878_v3 = vld [vmem:[#allocation8 + $0xb30] sm:$0xff] }
0x1d0e   :  { %8920 = vmatmul.f32.vlgmr.msrb.gmra.mxu3 %v16982_v24 }
0x1d16   :  { %8923 = vmatmul.f32.gmra.mxu3 %v16993_v17 }
0x1d1e   :  { %8926 = vmatmul.f32.gmra.mxu3 %v17001_v54 }
0x1d26   :  { %8929 = vmatmul.f32.gmra.mxu3 %v17007_v27 }
0x1d30   :  { %v17196_v46 = vpop.f32.mrf.mxu0 }
0x1d50   :  { %v8738_v53 = vpop.f32.mrf.mxu0  ;;  %v17200_v51 = vpop.f32.mrf.mxu3 }
0x1d59   :  { %v8741_v34 = vpop.f32.mrf.mxu0 }
0x1d61   :  { %v8744_v14 = vpop.f32.mrf.mxu0 }
0x1d69   :  { %v8747_v60 = vpop.f32.mrf.mxu0 }
0x1d6a   :  { %8827 = vmatpush.msrb.mxu2 %v8747_v60  ;;  %v8870_v60 = vld [vmem:[#allocation8 + $0xaf0] sm:$0xff] }
0x1d6c   :  { %8828 = vmatpush.msrb.mxu2 %v8744_v14  ;;  %v9143_v14 = vld [vmem:[#allocation8 + $0xd08] sm:$0xff] }
0x1d6e   :  { %8829 = vmatpush.msrb.mxu2 %v8741_v34  ;;  %v8874_v34 = vld [vmem:[#allocation8 + $0xb10] sm:$0xff] }
0x1d70   :  { %v8709_v5 = vpop.f32.mrf.mxu3  ;;  %8830 = vmatpush.msrb.mxu2 %v8738_v53  ;;  %v9147_v53 = vld [vmem:[#allocation8 + $0xd28] sm:$0xff] }
0x1d71   :  { %11626 = vmatmul.msk.f32.vlgmr.msrb.gmra.mxu2 %vm2051_vm2, %v17171_v13 }
0x1d72   :  { %v8950_v33 = vpop.f32.mrf.mxu0  ;;  %8991 = vmatpush.msra.mxu2 %v8903_v2  ;;  %v9139_v2 = vld [vmem:[#allocation8 + $0xce8] sm:$0xff] }
0x1d74   :  { %8992 = vmatpush.msra.mxu2 %v8899_v61  ;;  %v8866_v61 = vld [vmem:[#allocation8 + $0xad0] sm:$0xff] }
0x1d76   :  { %8993 = vmatpush.msra.mxu2 %v8895_v10  ;;  %v8862_v10 = vld [vmem:[#allocation8 + $0xab0] sm:$0xff] }
0x1d78   :  { %8994 = vmatpush.msra.mxu2 %v8891_v45  ;;  %v9131_v45 = vld [vmem:[#allocation8 + $0xca8] sm:$0xff] }
0x1d79   :  { %v8712_v39 = vpop.f32.mrf.mxu3 }
0x1d7a   :  { %v8953_v0 = vpop.f32.mrf.mxu0  ;;  %8995 = vmatpush.msra.mxu2 %v8887_v59  ;;  %v8858_v59 = vld [vmem:[#allocation8 + $0xa90] sm:$0xff] }
0x1d7c   :  { %8996 = vmatpush.msra.mxu2 %v8883_v12  ;;  %v8854_v12 = vld [vmem:[#allocation8 + $0xa70] sm:$0xff] }
0x1d7e   :  { %8997 = vmatpush.msra.mxu2 %v8879_v11 }
0x1d80   :  { %8998 = vmatpush.msra.mxu2 %v8875_v36  ;;  %v8850_v36 = vld [vmem:[#allocation8 + $0xa50] sm:$0xff] }
0x1d81   :  { %v8715_v23 = vpop.f32.mrf.mxu3 }
0x1d82   :  { %v8956_v41 = vpop.f32.mrf.mxu0  ;;  %8999 = vmatpush.msra.mxu2 %v8871_v21  ;;  %v9119_v21 = vld [vmem:[#allocation8 + $0xc48] sm:$0xff] }
0x1d84   :  { %9000 = vmatpush.msra.mxu2 %v8867_v35  ;;  %v9115_v35 = vld [vmem:[#allocation8 + $0xc28] sm:$0xff] }
0x1d86   :  { %9001 = vmatpush.msra.mxu2 %v8863_v16  ;;  %v9111_v16 = vld [vmem:[#allocation8 + $0xc08] sm:$0xff] }
0x1d88   :  { %9002 = vmatpush.msra.mxu2 %v8859_v1  ;;  %v9170_v1 = vld [vmem:[#allocation8 + $0xde0] sm:$0xff] }
0x1d89   :  { %v8718_v22 = vpop.f32.mrf.mxu3 }
0x1d8a   :  { %8807 = vmatpush.msrb.mxu1 %v8718_v22  ;;  %v8959_v29 = vpop.f32.mrf.mxu0  ;;  %9003 = vmatpush.msra.mxu2 %v8855_v50  ;;  %v9166_v50 = vld [vmem:[#allocation8 + $0xdc0] sm:$0xff] }
0x1d8b   :  { %9057 = vmatpush.msrb.mxu0 %v8959_v29  ;;  %v9162_v22 = vld [vmem:[#allocation8 + $0xda0] sm:$0xff] }
0x1d8c   :  { %8808 = vmatpush.msrb.mxu1 %v8715_v23  ;;  %9004 = vmatpush.msra.mxu2 %v8851_v18  ;;  %v8846_v23 = vld [vmem:[#allocation8 + $0xa30] sm:$0xff]  ;;  %v9158_v18 = vld [vmem:[#allocation8 + $0xd80] sm:$0xff] }
0x1d8d   :  { %9058 = vmatpush.msrb.mxu0 %v8956_v41  ;;  %v8842_v41 = vld [vmem:[#allocation8 + $0xa10] sm:$0xff]  ;;  %v9154_v29 = vld [vmem:[#allocation8 + $0xd60] sm:$0xff] }
0x1d8e   :  { %8809 = vmatpush.msrb.mxu1 %v8712_v39  ;;  %9005 = vmatpush.msra.mxu2 %v8847_v37  ;;  %v9127_v39 = vld [vmem:[#allocation8 + $0xc88] sm:$0xff]  ;;  %v9150_v37 = vld [vmem:[#allocation8 + $0xd40] sm:$0xff] }
0x1d8f   :  { %9059 = vmatpush.msrb.mxu0 %v8953_v0  ;;  %v9123_v0 = vld [vmem:[#allocation8 + $0xc68] sm:$0xff] }
0x1d90   :  { %8810 = vmatpush.msrb.mxu1 %v8709_v5  ;;  %9006 = vmatpush.msra.mxu2 %v8843_v15  ;;  %v9146_v15 = vld [vmem:[#allocation8 + $0xd20] sm:$0xff] }
0x1d91   :  { %11625 = vmatmul.msk.f32.vlgmr.msrb.gmra.mxu1 %vm2051_vm2, %v17171_v13  ;;  %v17211_v6 = vpop.f32.mrf.mxu3  ;;  %9007 = vmatmul.f32.vlgmr.msra.gmra.mxu2 %v16982_v24  ;;  %v8886_v13 = vld [vmem:[#allocation8 + $0xb70] sm:$0xff] }
0x1d92   :  { %8962 = vmatpush.msra.mxu1 %v8902_v26  ;;  %9060 = vmatpush.msrb.mxu0 %v8950_v33  ;;  %v9135_v33 = vld [vmem:[#allocation8 + $0xcc8] sm:$0xff]  ;;  %v9142_v26 = vld [vmem:[#allocation8 + $0xd00] sm:$0xff] }
0x1d93   :  { %11629 = vmatmul.msk.f32.vlgmr.msrb.gmra.mxu0 %vm2051_vm2, %v17207_v7  ;;  %9203 = vmatpush.msrb.mxu2 %v9171_v40  ;;  %v9138_v40 = vld [vmem:[#allocation8 + $0xce0] sm:$0xff] }
0x1d94   :  { %8963 = vmatpush.msra.mxu1 %v8898_v56  ;;  %v9130_v56 = vld [vmem:[#allocation8 + $0xca0] sm:$0xff] }
0x1d95   :  { %9204 = vmatpush.msrb.mxu2 %v9167_v28  ;;  %v9126_v28 = vld [vmem:[#allocation8 + $0xc80] sm:$0xff] }
0x1d96   :  { %8964 = vmatpush.msra.mxu1 %v8894_v44  ;;  %v9122_v44 = vld [vmem:[#allocation8 + $0xc60] sm:$0xff] }
0x1d97   :  { %9205 = vmatpush.msrb.mxu2 %v9163_v47  ;;  %v9118_v47 = vld [vmem:[#allocation8 + $0xc40] sm:$0xff] }
0x1d98   :  { %8965 = vmatpush.msra.mxu1 %v8890_v20  ;;  %v9114_v20 = vld [vmem:[#allocation8 + $0xc20] sm:$0xff] }
0x1d99   :  { %9206 = vmatpush.msrb.mxu2 %v9159_v52  ;;  %v8924_v32 = vpop.f32.mrf.mxu3  ;;  %v9110_v52 = vld [vmem:[#allocation8 + $0xc00] sm:$0xff] }
0x1d9a   :  { %8966 = vmatpush.msra.mxu1 %v8886_v13  ;;  %9010 = vmatmul.f32.gmra.mxu2 %v16993_v17  ;;  %v17234_v13 = vpop.f32.mrf.mxu2 }
0x1d9b   :  { %9207 = vmatpush.msrb.mxu2 %v9155_v38 }
0x1d9c   :  { %8967 = vmatpush.msra.mxu1 %v8882_v8 }
0x1d9d   :  { %9208 = vmatpush.msrb.mxu2 %v9151_v30  ;;  %v17238_v30 = vpop.f32.mrf.mxu1 }
0x1d9e   :  { %8968 = vmatpush.msra.mxu1 %v8878_v3 }
0x1d9f   :  { %9209 = vmatpush.msrb.mxu2 %v9147_v53 }
0x1da0   :  { %8969 = vmatpush.msra.mxu1 %v8874_v34 }
0x1da1   :  { %9210 = vmatpush.msrb.mxu2 %v9143_v14  ;;  %v8927_v5 = vpop.f32.mrf.mxu3 }
0x1da2   :  { %8970 = vmatpush.msra.mxu1 %v8870_v60  ;;  %9013 = vmatmul.f32.gmra.mxu2 %v17001_v54  ;;  %v9173_v60 = vld [vmem:[#allocation8 + $0xdf8] sm:$0xff] }
0x1da3   :  { %9211 = vmatpush.msrb.mxu2 %v9139_v2  ;;  %v9169_v2 = vld [vmem:[#allocation8 + $0xdd8] sm:$0xff] }
0x1da4   :  { %8971 = vmatpush.msra.mxu1 %v8866_v61 }
0x1da5   :  { %9212 = vmatpush.msrb.mxu2 %v9135_v33  ;;  %v9165_v33 = vld [vmem:[#allocation8 + $0xdb8] sm:$0xff] }
0x1da6   :  { %8972 = vmatpush.msra.mxu1 %v8862_v10  ;;  %v9161_v10 = vld [vmem:[#allocation8 + $0xd98] sm:$0xff] }
0x1da7   :  { %9213 = vmatpush.msrb.mxu2 %v9131_v45  ;;  %v9157_v45 = vld [vmem:[#allocation8 + $0xd78] sm:$0xff] }
0x1da8   :  { %8973 = vmatpush.msra.mxu1 %v8858_v59  ;;  %v9153_v59 = vld [vmem:[#allocation8 + $0xd58] sm:$0xff] }
0x1da9   :  { %9214 = vmatpush.msrb.mxu2 %v9127_v39  ;;  %v8930_v11 = vpop.f32.mrf.mxu3 }
0x1daa   :  { %8974 = vmatpush.msra.mxu1 %v8854_v12  ;;  %9016 = vmatmul.f32.gmra.mxu2 %v17007_v27 }
0x1dab   :  { %9037 = vmatpush.msra.mxu3 %v8930_v11  ;;  %9215 = vmatpush.msrb.mxu2 %v9123_v0  ;;  %v9149_v0 = vld [vmem:[#allocation8 + $0xd38] sm:$0xff] }
0x1dac   :  { %8975 = vmatpush.msra.mxu1 %v8850_v36  ;;  %v9145_v11 = vld [vmem:[#allocation8 + $0xd18] sm:$0xff] }
0x1dad   :  { %9038 = vmatpush.msra.mxu3 %v8927_v5  ;;  %9216 = vmatpush.msrb.mxu2 %v9119_v21  ;;  %v9141_v36 = vld [vmem:[#allocation8 + $0xcf8] sm:$0xff] }
0x1dae   :  { %8976 = vmatpush.msra.mxu1 %v8846_v23  ;;  %v9137_v21 = vld [vmem:[#allocation8 + $0xcd8] sm:$0xff] }
0x1daf   :  { %9039 = vmatpush.msra.mxu3 %v8924_v32  ;;  %9217 = vmatpush.msrb.mxu2 %v9115_v35 }
0x1db0   :  { %8977 = vmatpush.msra.mxu1 %v8842_v41  ;;  %v9133_v41 = vld [vmem:[#allocation8 + $0xcb8] sm:$0xff] }
0x1db1   :  { %8978 = vmatmul.f32.vlgmr.msra.gmra.mxu1 %v16982_v24  ;;  %9040 = vmatpush.msra.mxu3 %v17211_v6  ;;  %v9134_v6 = vld [vmem:[#allocation8 + $0xcc0] sm:$0xff] }
0x1db2   :  { %9218 = vmatpush.msrb.mxu2 %v9111_v16  ;;  %11628 = vmatmul.msk.f32.vlgmr.msra.gmra.mxu3 %vm2051_vm2, %v17207_v7  ;;  %v9129_v16 = vld [vmem:[#allocation8 + $0xc98] sm:$0xff] }
0x1db3   :  { %9174 = vmatpush.msrb.mxu1 %v9170_v1  ;;  %9219 = vmatmul.f32.vlgmr.msrb.gmra.mxu2 %v16982_v24  ;;  %v9125_v1 = vld [vmem:[#allocation8 + $0xc78] sm:$0xff] }
0x1db5   :  { %9175 = vmatpush.msrb.mxu1 %v9166_v50  ;;  %v9172_v50 = vld [vmem:[#allocation8 + $0xdf0] sm:$0xff] }
0x1db7   :  { %9176 = vmatpush.msrb.mxu1 %v9162_v22  ;;  %v9121_v22 = vld [vmem:[#allocation8 + $0xc58] sm:$0xff] }
0x1db9   :  { %9177 = vmatpush.msrb.mxu1 %v9158_v18 }
0x1dba   :  { %8981 = vmatmul.f32.gmra.mxu1 %v16993_v17 }
0x1dbb   :  { %9178 = vmatpush.msrb.mxu1 %v9154_v29  ;;  %9222 = vmatmul.f32.gmra.mxu2 %v16993_v17 }
0x1dbd   :  { %9179 = vmatpush.msrb.mxu1 %v9150_v37  ;;  %v9168_v37 = vld [vmem:[#allocation8 + $0xdd0] sm:$0xff] }
0x1dbf   :  { %9180 = vmatpush.msrb.mxu1 %v9146_v15  ;;  %v9117_v15 = vld [vmem:[#allocation8 + $0xc38] sm:$0xff] }
0x1dc1   :  { %9181 = vmatpush.msrb.mxu1 %v9142_v26  ;;  %v9164_v26 = vld [vmem:[#allocation8 + $0xdb0] sm:$0xff] }
0x1dc2   :  { %8984 = vmatmul.f32.gmra.mxu1 %v17001_v54 }
0x1dc3   :  { %9182 = vmatpush.msrb.mxu1 %v9138_v40  ;;  %9225 = vmatmul.f32.gmra.mxu2 %v17001_v54  ;;  %v9113_v40 = vld [vmem:[#allocation8 + $0xc18] sm:$0xff] }
0x1dc5   :  { %9183 = vmatpush.msrb.mxu1 %v9134_v6  ;;  %v9160_v6 = vld [vmem:[#allocation8 + $0xd90] sm:$0xff] }
0x1dc7   :  { %9184 = vmatpush.msrb.mxu1 %v9130_v56  ;;  %v17251_v56 = vld [vmem:[%s17417_s17 + $0x6] sm:$0x1] }
0x1dc9   :  { %9185 = vmatpush.msrb.mxu1 %v9126_v28  ;;  %v9156_v28 = vld [vmem:[#allocation8 + $0xd70] sm:$0xff] }
0x1dca   :  { %8987 = vmatmul.f32.gmra.mxu1 %v17007_v27 }
0x1dcb   :  { %9186 = vmatpush.msrb.mxu1 %v9122_v44  ;;  %9228 = vmatmul.f32.gmra.mxu2 %v17007_v27  ;;  %v9437_v44 = vld [vmem:[#allocation8 + $0xfc8] sm:$0xff] }
0x1dcd   :  { %9187 = vmatpush.msrb.mxu1 %v9118_v47 }
0x1dcf   :  { %9188 = vmatpush.msrb.mxu1 %v9114_v20  ;;  %v9152_v20 = vld [vmem:[#allocation8 + $0xd50] sm:$0xff] }
0x1dd1   :  { %9189 = vmatpush.msrb.mxu1 %v9110_v52  ;;  %v9433_v52 = vld [vmem:[#allocation8 + $0xfa8] sm:$0xff] }
0x1dd2   :  { %9190 = vmatmul.f32.vlgmr.msrb.gmra.mxu1 %v16982_v24 }
0x1dda   :  { %9193 = vmatmul.f32.gmra.mxu1 %v16993_v17 }
0x1de2   :  { %9196 = vmatmul.f32.gmra.mxu1 %v17001_v54 }
0x1dea   :  { %9199 = vmatmul.f32.gmra.mxu1 %v17007_v27 }
0x1df4   :  { %v17236_v38 = vpop.f32.mrf.mxu2 }
0x1e0e   :  { %v17240_v53 = vpop.f32.mrf.mxu1 }
0x1e14   :  { %v9008_v32 = vpop.f32.mrf.mxu2 }
0x1e1d   :  { %v9011_v8 = vpop.f32.mrf.mxu2 }
0x1e25   :  { %v9014_v3 = vpop.f32.mrf.mxu2 }
0x1e2d   :  { %v9017_v34 = vpop.f32.mrf.mxu2 }
0x1e2e   :  { %v8979_v14 = vpop.f32.mrf.mxu1  ;;  %9097 = vmatpush.msra.mxu0 %v9017_v34  ;;  %v9425_v34 = vld [vmem:[#allocation8 + $0xf68] sm:$0xff] }
0x1e30   :  { %9098 = vmatpush.msra.mxu0 %v9014_v3  ;;  %v9144_v3 = vld [vmem:[#allocation8 + $0xd10] sm:$0xff] }
0x1e32   :  { %9099 = vmatpush.msra.mxu0 %v9011_v8  ;;  %v9429_v8 = vld [vmem:[#allocation8 + $0xf88] sm:$0xff] }
0x1e34   :  { %9100 = vmatpush.msra.mxu0 %v9008_v32  ;;  %v9148_v32 = vld [vmem:[#allocation8 + $0xd30] sm:$0xff] }
0x1e35   :  { %11631 = vmatmul.msk.f32.vlgmr.msra.gmra.mxu0 %vm2051_vm2, %v17207_v7 }
0x1e36   :  { %v9220_v5 = vpop.f32.mrf.mxu2  ;;  %9261 = vmatpush.msrb.mxu0 %v9173_v60  ;;  %v9421_v60 = vld [vmem:[#allocation8 + $0xf48] sm:$0xff] }
0x1e37   :  { %v8982_v61 = vpop.f32.mrf.mxu1 }
0x1e38   :  { %9262 = vmatpush.msrb.mxu0 %v9169_v2 }
0x1e3a   :  { %9263 = vmatpush.msrb.mxu0 %v9165_v33  ;;  %v9132_v33 = vld [vmem:[#allocation8 + $0xcb0] sm:$0xff] }
0x1e3c   :  { %9264 = vmatpush.msrb.mxu0 %v9161_v10  ;;  %v9413_v10 = vld [vmem:[#allocation8 + $0xf08] sm:$0xff] }
0x1e3e   :  { %v9223_v39 = vpop.f32.mrf.mxu2  ;;  %9265 = vmatpush.msrb.mxu0 %v9157_v45  ;;  %v9128_v45 = vld [vmem:[#allocation8 + $0xc90] sm:$0xff] }
0x1e3f   :  { %v8985_v12 = vpop.f32.mrf.mxu1 }
0x1e40   :  { %9266 = vmatpush.msrb.mxu0 %v9153_v59  ;;  %v9409_v59 = vld [vmem:[#allocation8 + $0xee8] sm:$0xff] }
0x1e42   :  { %9267 = vmatpush.msrb.mxu0 %v9149_v0 }
0x1e44   :  { %9268 = vmatpush.msrb.mxu0 %v9145_v11  ;;  %v9120_v11 = vld [vmem:[#allocation8 + $0xc50] sm:$0xff] }
0x1e46   :  { %v9226_v23 = vpop.f32.mrf.mxu2  ;;  %9269 = vmatpush.msrb.mxu0 %v9141_v36  ;;  %v9401_v36 = vld [vmem:[#allocation8 + $0xea8] sm:$0xff] }
0x1e47   :  { %v8988_v35 = vpop.f32.mrf.mxu1 }
0x1e48   :  { %9077 = vmatpush.msrb.mxu3 %v8988_v35  ;;  %9270 = vmatpush.msrb.mxu0 %v9137_v21  ;;  %v9116_v21 = vld [vmem:[#allocation8 + $0xc30] sm:$0xff] }
0x1e49   :  { %v9112_v35 = vld [vmem:[#allocation8 + $0xc10] sm:$0xff] }
0x1e4a   :  { %9078 = vmatpush.msrb.mxu3 %v8985_v12  ;;  %9271 = vmatpush.msrb.mxu0 %v9133_v41  ;;  %v9405_v12 = vld [vmem:[#allocation8 + $0xec8] sm:$0xff] }
0x1e4b   :  { %v9393_v41 = vld [vmem:[#allocation8 + $0xe68] sm:$0xff] }
0x1e4c   :  { %9079 = vmatpush.msrb.mxu3 %v8982_v61  ;;  %9272 = vmatpush.msrb.mxu0 %v9129_v16  ;;  %v9417_v61 = vld [vmem:[#allocation8 + $0xf28] sm:$0xff]  ;;  %v9440_v16 = vld [vmem:[#allocation8 + $0xfe0] sm:$0xff] }
0x1e4e   :  { %9080 = vmatpush.msrb.mxu3 %v8979_v14  ;;  %v9229_v18 = vpop.f32.mrf.mxu2  ;;  %9273 = vmatpush.msrb.mxu0 %v9125_v1  ;;  %v9140_v14 = vld [vmem:[#allocation8 + $0xcf0] sm:$0xff]  ;;  %v9389_v1 = vld [vmem:[#allocation8 + $0xe48] sm:$0xff] }
0x1e4f   :  { %11630 = vmatmul.msk.f32.vlgmr.msrb.gmra.mxu3 %vm2051_vm2, %v17207_v7  ;;  %v17246_v29 = vpop.f32.mrf.mxu1  ;;  %9327 = vmatpush.msra.mxu2 %v9229_v18  ;;  %v9441_v7 = vld [vmem:[#allocation8 + $0xfe8] sm:$0xff]  ;;  %v9432_v18 = vld [vmem:[#allocation8 + $0xfa0] sm:$0xff] }
0x1e50   :  { %9232 = vmatpush.msra.mxu3 %v9172_v50  ;;  %9274 = vmatpush.msrb.mxu0 %v9121_v22  ;;  %v9436_v50 = vld [vmem:[#allocation8 + $0xfc0] sm:$0xff]  ;;  %v9385_v22 = vld [vmem:[#allocation8 + $0xe28] sm:$0xff] }
0x1e51   :  { %9328 = vmatpush.msra.mxu2 %v9226_v23  ;;  %v9397_v23 = vld [vmem:[#allocation8 + $0xe88] sm:$0xff] }
0x1e52   :  { %9233 = vmatpush.msra.mxu3 %v9168_v37  ;;  %9275 = vmatpush.msrb.mxu0 %v9117_v15  ;;  %v9381_v37 = vld [vmem:[#allocation8 + $0xe08] sm:$0xff]  ;;  %v9428_v15 = vld [vmem:[#allocation8 + $0xf80] sm:$0xff] }
0x1e53   :  { %9329 = vmatpush.msra.mxu2 %v9223_v39  ;;  %v9124_v39 = vld [vmem:[#allocation8 + $0xc70] sm:$0xff] }
0x1e54   :  { %9234 = vmatpush.msra.mxu3 %v9164_v26  ;;  %9276 = vmatpush.msrb.mxu0 %v9113_v40  ;;  %v9424_v26 = vld [vmem:[#allocation8 + $0xf60] sm:$0xff] }
0x1e55   :  { %9277 = vmatmul.f32.vlgmr.msrb.gmra.mxu0 %v16982_v24  ;;  %9330 = vmatpush.msra.mxu2 %v9220_v5  ;;  %v9136_v5 = vld [vmem:[#allocation8 + $0xcd0] sm:$0xff]  ;;  %v9416_v40 = vld [vmem:[#allocation8 + $0xf20] sm:$0xff] }
0x1e56   :  { %9235 = vmatpush.msra.mxu3 %v9160_v6  ;;  %11634 = vmatmul.msk.f32.vlgmr.msra.gmra.mxu2 %vm2051_vm2, %v17251_v56  ;;  %v9412_v6 = vld [vmem:[#allocation8 + $0xf00] sm:$0xff] }
0x1e57   :  { %9473 = vmatpush.msra.mxu0 %v9441_v7  ;;  %v9194_v47 = vpop.f32.mrf.mxu1  ;;  %v9408_v7 = vld [vmem:[#allocation8 + $0xee0] sm:$0xff] }
0x1e58   :  { %9236 = vmatpush.msra.mxu3 %v9156_v28  ;;  %v9404_v28 = vld [vmem:[#allocation8 + $0xec0] sm:$0xff] }
0x1e59   :  { %9474 = vmatpush.msra.mxu0 %v9437_v44  ;;  %v9400_v44 = vld [vmem:[#allocation8 + $0xea0] sm:$0xff] }
0x1e5a   :  { %9237 = vmatpush.msra.mxu3 %v9152_v20  ;;  %v9392_v20 = vld [vmem:[#allocation8 + $0xe60] sm:$0xff] }
0x1e5b   :  { %9475 = vmatpush.msra.mxu0 %v9433_v52  ;;  %v9388_v52 = vld [vmem:[#allocation8 + $0xe40] sm:$0xff] }
0x1e5c   :  { %9238 = vmatpush.msra.mxu3 %v9148_v32  ;;  %v9384_v32 = vld [vmem:[#allocation8 + $0xe20] sm:$0xff] }
0x1e5d   :  { %9476 = vmatpush.msra.mxu0 %v9429_v8  ;;  %v9380_v8 = vld [vmem:[#allocation8 + $0xe00] sm:$0xff] }
0x1e5e   :  { %9239 = vmatpush.msra.mxu3 %v9144_v3  ;;  %9280 = vmatmul.f32.gmra.mxu0 %v16993_v17  ;;  %v17274_v3 = vpop.f32.mrf.mxu0 }
0x1e5f   :  { %9477 = vmatpush.msra.mxu0 %v9425_v34  ;;  %v9197_v2 = vpop.f32.mrf.mxu1  ;;  %v8027_v34 = vadd.f32 %v17112_v31, %v17116_v55 }
0x1e60   :  { %9240 = vmatpush.msra.mxu3 %v9140_v14 }
0x1e61   :  { %9478 = vmatpush.msra.mxu0 %v9421_v60  ;;  %v8298_v14 = vadd.f32 %v17154_v4, %v8027_v34  ;;  %v9703_v34 = vld [vmem:[#allocation8 + $0x11a8] sm:$0xff] }
0x1e62   :  { %9241 = vmatpush.msra.mxu3 %v9136_v5 }
0x1e63   :  { %9479 = vmatpush.msra.mxu0 %v9417_v61  ;;  %v8568_v60 = vadd.f32 %v17196_v46, %v8298_v14  ;;  %v9430_v14 = vld [vmem:[#allocation8 + $0xf90] sm:$0xff] }
0x1e64   :  { %9242 = vmatpush.msra.mxu3 %v9132_v33  ;;  %v17283_v33 = vpop.f32.mrf.mxu3 }
0x1e65   :  { %9480 = vmatpush.msra.mxu0 %v9413_v10  ;;  %v8007_v10 = vadd.f32 %v17118_v42, %v17110_v19  ;;  %v9439_v19 = vld [vmem:[#allocation8 + $0xfd8] sm:$0xff] }
0x1e66   :  { %9243 = vmatpush.msra.mxu3 %v9128_v45  ;;  %9283 = vmatmul.f32.gmra.mxu0 %v17001_v54 }
0x1e67   :  { %9481 = vmatpush.msra.mxu0 %v9409_v59  ;;  %v9200_v0 = vpop.f32.mrf.mxu1  ;;  %v8297_v45 = vadd.f32 %v17160_v49, %v8007_v10  ;;  %v9435_v49 = vld [vmem:[#allocation8 + $0xfb8] sm:$0xff]  ;;  %v9422_v10 = vld [vmem:[#allocation8 + $0xf50] sm:$0xff] }
0x1e68   :  { %9244 = vmatpush.msra.mxu3 %v9124_v39  ;;  %9307 = vmatpush.msra.mxu1 %v9200_v0  ;;  %v9443_v0 = vld [vmem:[#allocation8 + $0xff8] sm:$0xff] }
0x1e69   :  { %9482 = vmatpush.msra.mxu0 %v9405_v12  ;;  %v8567_v59 = vadd.f32 %v17200_v51, %v8297_v45  ;;  %v9431_v51 = vld [vmem:[#allocation8 + $0xf98] sm:$0xff]  ;;  %v9691_v45 = vld [vmem:[#allocation8 + $0x1148] sm:$0xff] }
0x1e6a   :  { %9245 = vmatpush.msra.mxu3 %v9120_v11  ;;  %9308 = vmatpush.msra.mxu1 %v9197_v2  ;;  %v8838_v2 = vadd.f32 %v17236_v38, %v8568_v60  ;;  %v9699_v60 = vld [vmem:[#allocation8 + $0x1188] sm:$0xff] }
0x1e6b   :  { %9483 = vmatpush.msra.mxu0 %v9401_v36  ;;  %v8837_v31 = vadd.f32 %v17240_v53, %v8567_v59  ;;  %v9427_v53 = vld [vmem:[#allocation8 + $0xf78] sm:$0xff]  ;;  %v9418_v59 = vld [vmem:[#allocation8 + $0xf30] sm:$0xff] }
0x1e6c   :  { %9246 = vmatpush.msra.mxu3 %v9116_v21  ;;  %9309 = vmatpush.msra.mxu1 %v9194_v47  ;;  %v9396_v47 = vld [vmem:[#allocation8 + $0xe80] sm:$0xff]  ;;  %v9423_v21 = vld [vmem:[#allocation8 + $0xf58] sm:$0xff] }
0x1e6d   :  { %9484 = vmatpush.msra.mxu0 %v9397_v23 }
0x1e6e   :  { %9247 = vmatpush.msra.mxu3 %v9112_v35  ;;  %9286 = vmatmul.f32.gmra.mxu0 %v17007_v27  ;;  %v9419_v35 = vld [vmem:[#allocation8 + $0xf38] sm:$0xff] }
0x1e6f   :  { %9248 = vmatmul.f32.vlgmr.msra.gmra.mxu3 %v16982_v24  ;;  %9310 = vmatpush.msra.mxu1 %v17246_v29  ;;  %v9420_v29 = vld [vmem:[#allocation8 + $0xf40] sm:$0xff] }
0x1e70   :  { %9485 = vmatpush.msra.mxu0 %v9393_v41  ;;  %11633 = vmatmul.msk.f32.vlgmr.msra.gmra.mxu1 %vm2051_vm2, %v17251_v56  ;;  %v9415_v41 = vld [vmem:[#allocation8 + $0xf18] sm:$0xff] }
0x1e71   :  { %9444 = vmatpush.msrb.mxu3 %v9440_v16  ;;  %v9411_v16 = vld [vmem:[#allocation8 + $0xef8] sm:$0xff] }
0x1e72   :  { %9486 = vmatpush.msra.mxu0 %v9389_v1 }
0x1e73   :  { %9445 = vmatpush.msrb.mxu3 %v9436_v50  ;;  %v9407_v50 = vld [vmem:[#allocation8 + $0xed8] sm:$0xff] }
0x1e74   :  { %9487 = vmatpush.msra.mxu0 %v9385_v22 }
0x1e75   :  { %9446 = vmatpush.msrb.mxu3 %v9432_v18  ;;  %v9403_v18 = vld [vmem:[#allocation8 + $0xeb8] sm:$0xff] }
0x1e76   :  { %9488 = vmatpush.msra.mxu0 %v9381_v37  ;;  %v9399_v37 = vld [vmem:[#allocation8 + $0xe98] sm:$0xff] }
0x1e77   :  { %9447 = vmatpush.msrb.mxu3 %v9428_v15  ;;  %9489 = vmatmul.f32.vlgmr.msra.gmra.mxu0 %v16982_v24  ;;  %v9395_v15 = vld [vmem:[#allocation8 + $0xe78] sm:$0xff] }
0x1e78   :  { %9251 = vmatmul.f32.gmra.mxu3 %v16993_v17 }
0x1e79   :  { %9448 = vmatpush.msrb.mxu3 %v9424_v26 }
0x1e7b   :  { %9449 = vmatpush.msrb.mxu3 %v9420_v29  ;;  %v9391_v29 = vld [vmem:[#allocation8 + $0xe58] sm:$0xff] }
0x1e7d   :  { %9450 = vmatpush.msrb.mxu3 %v9416_v40 }
0x1e7f   :  { %9451 = vmatpush.msrb.mxu3 %v9412_v6  ;;  %9492 = vmatmul.f32.gmra.mxu0 %v16993_v17  ;;  %v9387_v6 = vld [vmem:[#allocation8 + $0xe38] sm:$0xff] }
0x1e80   :  { %9254 = vmatmul.f32.gmra.mxu3 %v17001_v54 }
0x1e81   :  { %9452 = vmatpush.msrb.mxu3 %v9408_v7  ;;  %v9383_v7 = vld [vmem:[#allocation8 + $0xe18] sm:$0xff] }
0x1e83   :  { %9453 = vmatpush.msrb.mxu3 %v9404_v28  ;;  %v9442_v28 = vld [vmem:[#allocation8 + $0xff0] sm:$0xff] }
0x1e85   :  { %9454 = vmatpush.msrb.mxu3 %v9400_v44  ;;  %v17297_v44 = vld [vmem:[%s17417_s17 + $0x7] sm:$0x1] }
0x1e87   :  { %9455 = vmatpush.msrb.mxu3 %v9396_v47  ;;  %9495 = vmatmul.f32.gmra.mxu0 %v17001_v54  ;;  %v9711_v47 = vld [vmem:[#allocation8 + $0x11e8] sm:$0xff] }
0x1e88   :  { %9257 = vmatmul.f32.gmra.mxu3 %v17007_v27 }
0x1e89   :  { %9456 = vmatpush.msrb.mxu3 %v9392_v20 }
0x1e8b   :  { %9457 = vmatpush.msrb.mxu3 %v9388_v52  ;;  %v9438_v52 = vld [vmem:[#allocation8 + $0xfd0] sm:$0xff] }
0x1e8d   :  { %9458 = vmatpush.msrb.mxu3 %v9384_v32  ;;  %v9707_v32 = vld [vmem:[#allocation8 + $0x11c8] sm:$0xff] }
0x1e8f   :  { %9459 = vmatpush.msrb.mxu3 %v9380_v8  ;;  %9498 = vmatmul.f32.gmra.mxu0 %v17007_v27  ;;  %v9434_v8 = vld [vmem:[#allocation8 + $0xfb0] sm:$0xff] }
0x1e90   :  { %9460 = vmatmul.f32.vlgmr.msrb.gmra.mxu3 %v16982_v24 }
0x1e98   :  { %9463 = vmatmul.f32.gmra.mxu3 %v16993_v17 }
0x1ea0   :  { %9466 = vmatmul.f32.gmra.mxu3 %v17001_v54 }
0x1ea8   :  { %9469 = vmatmul.f32.gmra.mxu3 %v17007_v27 }
0x1eb2   :  { %v9102_v5 = vpop.f32.mrf.mxu0 }
0x1eb3   :  { %v17281_v61 = vadd.f32 %v9102_v5, %v8838_v2  ;;  %v9695_v2 = vld [vmem:[#allocation8 + $0x1168] sm:$0xff] }
0x1ed2   :  { %v9082_v55 = vpop.f32.mrf.mxu3  ;;  %v9278_v4 = vpop.f32.mrf.mxu0 }
0x1ed3   :  { %v17290_v39 = vadd.f32 %v9082_v55, %v8837_v31  ;;  %v9687_v31 = vld [vmem:[#allocation8 + $0x1128] sm:$0xff]  ;;  %v9414_v55 = vld [vmem:[#allocation8 + $0xf10] sm:$0xff] }
0x1edb   :  { %v9281_v46 = vpop.f32.mrf.mxu0 }
0x1ee3   :  { %v9284_v38 = vpop.f32.mrf.mxu0 }
0x1eeb   :  { %v9287_v12 = vpop.f32.mrf.mxu0 }
0x1eec   :  { %9367 = vmatpush.msrb.mxu2 %v9287_v12 }
0x1eee   :  { %9368 = vmatpush.msrb.mxu2 %v9284_v38  ;;  %v9679_v38 = vld [vmem:[#allocation8 + $0x10e8] sm:$0xff] }
0x1ef0   :  { %9369 = vmatpush.msrb.mxu2 %v9281_v46  ;;  %v9410_v46 = vld [vmem:[#allocation8 + $0xef0] sm:$0xff] }
0x1ef2   :  { %v9249_v11 = vpop.f32.mrf.mxu3  ;;  %9370 = vmatpush.msrb.mxu2 %v9278_v4  ;;  %v9683_v4 = vld [vmem:[#allocation8 + $0x1108] sm:$0xff] }
0x1ef3   :  { %11636 = vmatmul.msk.f32.vlgmr.msrb.gmra.mxu2 %vm2051_vm2, %v17251_v56 }
0x1ef4   :  { %v9490_v42 = vpop.f32.mrf.mxu0  ;;  %9531 = vmatpush.msra.mxu2 %v9443_v0  ;;  %v9406_v0 = vld [vmem:[#allocation8 + $0xed0] sm:$0xff] }
0x1ef6   :  { %9532 = vmatpush.msra.mxu2 %v9439_v19  ;;  %v9402_v19 = vld [vmem:[#allocation8 + $0xeb0] sm:$0xff] }
0x1ef8   :  { %9533 = vmatpush.msra.mxu2 %v9435_v49  ;;  %v9398_v49 = vld [vmem:[#allocation8 + $0xe90] sm:$0xff] }
0x1efa   :  { %9534 = vmatpush.msra.mxu2 %v9431_v51  ;;  %v9667_v51 = vld [vmem:[#allocation8 + $0x1088] sm:$0xff] }
0x1efb   :  { %v9252_v36 = vpop.f32.mrf.mxu3 }
0x1efc   :  { %v9493_v23 = vpop.f32.mrf.mxu0  ;;  %9535 = vmatpush.msra.mxu2 %v9427_v53  ;;  %v9394_v53 = vld [vmem:[#allocation8 + $0xe70] sm:$0xff] }
0x1efe   :  { %9536 = vmatpush.msra.mxu2 %v9423_v21 }
0x1f00   :  { %9537 = vmatpush.msra.mxu2 %v9419_v35  ;;  %v9659_v35 = vld [vmem:[#allocation8 + $0x1048] sm:$0xff] }
0x1f02   :  { %9538 = vmatpush.msra.mxu2 %v9415_v41  ;;  %v9386_v41 = vld [vmem:[#allocation8 + $0xe30] sm:$0xff] }
0x1f03   :  { %v9255_v1 = vpop.f32.mrf.mxu3 }
0x1f04   :  { %v9496_v22 = vpop.f32.mrf.mxu0  ;;  %9539 = vmatpush.msra.mxu2 %v9411_v16  ;;  %v9655_v16 = vld [vmem:[#allocation8 + $0x1028] sm:$0xff] }
0x1f06   :  { %9540 = vmatpush.msra.mxu2 %v9407_v50  ;;  %v9651_v50 = vld [vmem:[#allocation8 + $0x1008] sm:$0xff] }
0x1f08   :  { %9541 = vmatpush.msra.mxu2 %v9403_v18  ;;  %v9706_v18 = vld [vmem:[#allocation8 + $0x11c0] sm:$0xff] }
0x1f0a   :  { %9542 = vmatpush.msra.mxu2 %v9399_v37  ;;  %v9702_v37 = vld [vmem:[#allocation8 + $0x11a0] sm:$0xff] }
0x1f0b   :  { %v9258_v26 = vpop.f32.mrf.mxu3 }
0x1f0c   :  { %9347 = vmatpush.msrb.mxu1 %v9258_v26  ;;  %v9499_v40 = vpop.f32.mrf.mxu0  ;;  %9543 = vmatpush.msra.mxu2 %v9395_v15  ;;  %v9698_v15 = vld [vmem:[#allocation8 + $0x1180] sm:$0xff] }
0x1f0d   :  { %9597 = vmatpush.msrb.mxu0 %v9499_v40  ;;  %v9694_v26 = vld [vmem:[#allocation8 + $0x1160] sm:$0xff] }
0x1f0e   :  { %9348 = vmatpush.msrb.mxu1 %v9255_v1  ;;  %9544 = vmatpush.msra.mxu2 %v9391_v29  ;;  %v9382_v1 = vld [vmem:[#allocation8 + $0xe10] sm:$0xff]  ;;  %v9690_v29 = vld [vmem:[#allocation8 + $0x1140] sm:$0xff] }
0x1f0f   :  { %9598 = vmatpush.msrb.mxu0 %v9496_v22  ;;  %v9710_v22 = vld [vmem:[#allocation8 + $0x11e0] sm:$0xff] }
0x1f10   :  { %9349 = vmatpush.msrb.mxu1 %v9252_v36  ;;  %9545 = vmatpush.msra.mxu2 %v9387_v6  ;;  %v9663_v36 = vld [vmem:[#allocation8 + $0x1068] sm:$0xff]  ;;  %v9686_v40 = vld [vmem:[#allocation8 + $0x1120] sm:$0xff] }
0x1f11   :  { %9599 = vmatpush.msrb.mxu0 %v9493_v23  ;;  %v9390_v23 = vld [vmem:[#allocation8 + $0xe50] sm:$0xff]  ;;  %v9682_v6 = vld [vmem:[#allocation8 + $0x1100] sm:$0xff] }
0x1f12   :  { %9350 = vmatpush.msrb.mxu1 %v9249_v11  ;;  %9546 = vmatpush.msra.mxu2 %v9383_v7  ;;  %v9675_v11 = vld [vmem:[#allocation8 + $0x10c8] sm:$0xff]  ;;  %v9678_v7 = vld [vmem:[#allocation8 + $0x10e0] sm:$0xff] }
0x1f13   :  { %11635 = vmatmul.msk.f32.vlgmr.msrb.gmra.mxu1 %vm2051_vm2, %v17251_v56  ;;  %v17301_v20 = vpop.f32.mrf.mxu3  ;;  %9547 = vmatmul.f32.vlgmr.msra.gmra.mxu2 %v16982_v24  ;;  %v9426_v56 = vld [vmem:[#allocation8 + $0xf70] sm:$0xff] }
0x1f14   :  { %9502 = vmatpush.msra.mxu1 %v9442_v28  ;;  %9600 = vmatpush.msrb.mxu0 %v9490_v42  ;;  %v9671_v42 = vld [vmem:[#allocation8 + $0x10a8] sm:$0xff]  ;;  %v9674_v28 = vld [vmem:[#allocation8 + $0x10c0] sm:$0xff] }
0x1f15   :  { %11639 = vmatmul.msk.f32.vlgmr.msrb.gmra.mxu0 %vm2051_vm2, %v17297_v44  ;;  %9743 = vmatpush.msrb.mxu2 %v9711_v47  ;;  %v9670_v47 = vld [vmem:[#allocation8 + $0x10a0] sm:$0xff] }
0x1f16   :  { %9503 = vmatpush.msra.mxu1 %v9438_v52  ;;  %v9662_v52 = vld [vmem:[#allocation8 + $0x1060] sm:$0xff] }
0x1f17   :  { %9744 = vmatpush.msrb.mxu2 %v9707_v32  ;;  %v9658_v32 = vld [vmem:[#allocation8 + $0x1040] sm:$0xff] }
0x1f18   :  { %9504 = vmatpush.msra.mxu1 %v9434_v8  ;;  %v9654_v8 = vld [vmem:[#allocation8 + $0x1020] sm:$0xff] }
0x1f19   :  { %9745 = vmatpush.msrb.mxu2 %v9703_v34  ;;  %v9650_v34 = vld [vmem:[#allocation8 + $0x1000] sm:$0xff] }
0x1f1a   :  { %9505 = vmatpush.msra.mxu1 %v9430_v14  ;;  %v17324_v14 = vpop.f32.mrf.mxu2 }
0x1f1b   :  { %9746 = vmatpush.msrb.mxu2 %v9699_v60  ;;  %v9464_v5 = vpop.f32.mrf.mxu3 }
0x1f1c   :  { %9506 = vmatpush.msra.mxu1 %v9426_v56  ;;  %9550 = vmatmul.f32.gmra.mxu2 %v16993_v17 }
0x1f1d   :  { %9747 = vmatpush.msrb.mxu2 %v9695_v2  ;;  %v17329_v2 = vpop.f32.mrf.mxu1 }
0x1f1e   :  { %9507 = vmatpush.msra.mxu1 %v9422_v10 }
0x1f1f   :  { %9748 = vmatpush.msrb.mxu2 %v9691_v45 }
0x1f20   :  { %9508 = vmatpush.msra.mxu1 %v9418_v59 }
0x1f21   :  { %9749 = vmatpush.msrb.mxu2 %v9687_v31 }
0x1f22   :  { %9509 = vmatpush.msra.mxu1 %v9414_v55 }
0x1f23   :  { %9750 = vmatpush.msrb.mxu2 %v9683_v4  ;;  %v9467_v12 = vpop.f32.mrf.mxu3 }
0x1f24   :  { %9510 = vmatpush.msra.mxu1 %v9410_v46  ;;  %9553 = vmatmul.f32.gmra.mxu2 %v17001_v54  ;;  %v9713_v46 = vld [vmem:[#allocation8 + $0x11f8] sm:$0xff] }
0x1f25   :  { %9751 = vmatpush.msrb.mxu2 %v9679_v38 }
0x1f26   :  { %9511 = vmatpush.msra.mxu1 %v9406_v0  ;;  %v9705_v0 = vld [vmem:[#allocation8 + $0x11b8] sm:$0xff] }
0x1f27   :  { %9752 = vmatpush.msrb.mxu2 %v9675_v11  ;;  %v9697_v11 = vld [vmem:[#allocation8 + $0x1178] sm:$0xff] }
0x1f28   :  { %9512 = vmatpush.msra.mxu1 %v9402_v19  ;;  %v9693_v19 = vld [vmem:[#allocation8 + $0x1158] sm:$0xff] }
0x1f29   :  { %9753 = vmatpush.msrb.mxu2 %v9671_v42 }
0x1f2a   :  { %9513 = vmatpush.msra.mxu1 %v9398_v49 }
0x1f2b   :  { %9754 = vmatpush.msrb.mxu2 %v9667_v51  ;;  %v9470_v21 = vpop.f32.mrf.mxu3  ;;  %v9689_v51 = vld [vmem:[#allocation8 + $0x1138] sm:$0xff] }
0x1f2c   :  { %9514 = vmatpush.msra.mxu1 %v9394_v53  ;;  %9556 = vmatmul.f32.gmra.mxu2 %v17007_v27  ;;  %v9685_v53 = vld [vmem:[#allocation8 + $0x1118] sm:$0xff] }
0x1f2d   :  { %9577 = vmatpush.msra.mxu3 %v9470_v21  ;;  %9755 = vmatpush.msrb.mxu2 %v9663_v36  ;;  %v9681_v36 = vld [vmem:[#allocation8 + $0x10f8] sm:$0xff] }
0x1f2e   :  { %9515 = vmatpush.msra.mxu1 %v9390_v23  ;;  %v9677_v21 = vld [vmem:[#allocation8 + $0x10d8] sm:$0xff] }
0x1f2f   :  { %9578 = vmatpush.msra.mxu3 %v9467_v12  ;;  %9756 = vmatpush.msrb.mxu2 %v9659_v35 }
0x1f30   :  { %9516 = vmatpush.msra.mxu1 %v9386_v41  ;;  %v9673_v41 = vld [vmem:[#allocation8 + $0x10b8] sm:$0xff] }
0x1f31   :  { %9579 = vmatpush.msra.mxu3 %v9464_v5  ;;  %9757 = vmatpush.msrb.mxu2 %v9655_v16  ;;  %v9669_v16 = vld [vmem:[#allocation8 + $0x1098] sm:$0xff] }
0x1f32   :  { %9517 = vmatpush.msra.mxu1 %v9382_v1  ;;  %v9665_v1 = vld [vmem:[#allocation8 + $0x1078] sm:$0xff] }
0x1f33   :  { %9518 = vmatmul.f32.vlgmr.msra.gmra.mxu1 %v16982_v24  ;;  %9580 = vmatpush.msra.mxu3 %v17301_v20  ;;  %v9666_v20 = vld [vmem:[#allocation8 + $0x1080] sm:$0xff] }
0x1f34   :  { %9758 = vmatpush.msrb.mxu2 %v9651_v50  ;;  %11638 = vmatmul.msk.f32.vlgmr.msra.gmra.mxu3 %vm2051_vm2, %v17297_v44  ;;  %v9712_v50 = vld [vmem:[#allocation8 + $0x11f0] sm:$0xff] }
0x1f35   :  { %9714 = vmatpush.msrb.mxu1 %v9710_v22  ;;  %9759 = vmatmul.f32.vlgmr.msrb.gmra.mxu2 %v16982_v24  ;;  %v9661_v22 = vld [vmem:[#allocation8 + $0x1058] sm:$0xff] }
0x1f37   :  { %9715 = vmatpush.msrb.mxu1 %v9706_v18 }
0x1f39   :  { %9716 = vmatpush.msrb.mxu1 %v9702_v37 }
0x1f3b   :  { %9717 = vmatpush.msrb.mxu1 %v9698_v15  ;;  %v9708_v15 = vld [vmem:[#allocation8 + $0x11d0] sm:$0xff] }
0x1f3c   :  { %9521 = vmatmul.f32.gmra.mxu1 %v16993_v17 }
0x1f3d   :  { %9718 = vmatpush.msrb.mxu1 %v9694_v26  ;;  %9762 = vmatmul.f32.gmra.mxu2 %v16993_v17  ;;  %v9657_v26 = vld [vmem:[#allocation8 + $0x1038] sm:$0xff] }
0x1f3f   :  { %9719 = vmatpush.msrb.mxu1 %v9690_v29  ;;  %v9704_v29 = vld [vmem:[#allocation8 + $0x11b0] sm:$0xff] }
0x1f41   :  { %9720 = vmatpush.msrb.mxu1 %v9686_v40  ;;  %v9653_v40 = vld [vmem:[#allocation8 + $0x1018] sm:$0xff] }
0x1f43   :  { %9721 = vmatpush.msrb.mxu1 %v9682_v6  ;;  %v9700_v6 = vld [vmem:[#allocation8 + $0x1190] sm:$0xff] }
0x1f44   :  { %9524 = vmatmul.f32.gmra.mxu1 %v17001_v54 }
0x1f45   :  { %9722 = vmatpush.msrb.mxu1 %v9678_v7  ;;  %9765 = vmatmul.f32.gmra.mxu2 %v17001_v54  ;;  %v17341_v7 = vld [vmem:[%s17417_s17 + $0x8] sm:$0x1] }
0x1f47   :  { %9723 = vmatpush.msrb.mxu1 %v9674_v28 }
0x1f49   :  { %9724 = vmatpush.msrb.mxu1 %v9670_v47  ;;  %v9692_v47 = vld [vmem:[#allocation8 + $0x1150] sm:$0xff] }
0x1f4b   :  { %9725 = vmatpush.msrb.mxu1 %v9666_v20  ;;  %v9688_v20 = vld [vmem:[#allocation8 + $0x1130] sm:$0xff] }
0x1f4c   :  { %9527 = vmatmul.f32.gmra.mxu1 %v17007_v27 }
0x1f4d   :  { %9726 = vmatpush.msrb.mxu1 %v9662_v52  ;;  %9768 = vmatmul.f32.gmra.mxu2 %v17007_v27  ;;  %v9684_v52 = vld [vmem:[#allocation8 + $0x1110] sm:$0xff] }
0x1f4f   :  { %9727 = vmatpush.msrb.mxu1 %v9658_v32  ;;  %v9680_v32 = vld [vmem:[#allocation8 + $0x10f0] sm:$0xff] }
0x1f51   :  { %9728 = vmatpush.msrb.mxu1 %v9654_v8 }
0x1f53   :  { %9729 = vmatpush.msrb.mxu1 %v9650_v34  ;;  %v9676_v34 = vld [vmem:[#allocation8 + $0x10d0] sm:$0xff] }
0x1f54   :  { %9730 = vmatmul.f32.vlgmr.msrb.gmra.mxu1 %v16982_v24 }
0x1f5c   :  { %9733 = vmatmul.f32.gmra.mxu1 %v16993_v17 }
0x1f64   :  { %9736 = vmatmul.f32.gmra.mxu1 %v17001_v54 }
0x1f6c   :  { %9739 = vmatmul.f32.gmra.mxu1 %v17007_v27 }
0x1f76   :  { %v9372_v60 = vpop.f32.mrf.mxu2 }
0x1f77   :  { %v17327_v56 = vadd.f32 %v9372_v60, %v17281_v61  ;;  %v9709_v61 = vld [vmem:[#allocation8 + $0x11d8] sm:$0xff]  ;;  %v9672_v60 = vld [vmem:[#allocation8 + $0x10b0] sm:$0xff] }
0x1f90   :  { %v9352_v5 = vpop.f32.mrf.mxu1 }
0x1f91   :  { %v17332_v10 = vadd.f32 %v9352_v5, %v17290_v39  ;;  %v9701_v39 = vld [vmem:[#allocation8 + $0x1198] sm:$0xff]  ;;  %v9668_v5 = vld [vmem:[#allocation8 + $0x1090] sm:$0xff] }
0x1f96   :  { %v9548_v45 = vpop.f32.mrf.mxu2 }
0x1f9f   :  { %v9551_v59 = vpop.f32.mrf.mxu2 }
0x1fa7   :  { %v9554_v31 = vpop.f32.mrf.mxu2 }
0x1faf   :  { %v9557_v55 = vpop.f32.mrf.mxu2 }
0x1fb0   :  { %v9519_v4 = vpop.f32.mrf.mxu1  ;;  %9637 = vmatpush.msra.mxu0 %v9557_v55  ;;  %v9656_v55 = vld [vmem:[#allocation8 + $0x1030] sm:$0xff] }
0x1fb2   :  { %9638 = vmatpush.msra.mxu0 %v9554_v31  ;;  %v9660_v31 = vld [vmem:[#allocation8 + $0x1050] sm:$0xff] }
0x1fb4   :  { %9639 = vmatpush.msra.mxu0 %v9551_v59 }
0x1fb6   :  { %9640 = vmatpush.msra.mxu0 %v9548_v45  ;;  %v9664_v45 = vld [vmem:[#allocation8 + $0x1070] sm:$0xff] }
0x1fb7   :  { %11641 = vmatmul.msk.f32.vlgmr.msra.gmra.mxu0 %vm2051_vm2, %v17297_v44 }
0x1fb8   :  { %v9760_v38 = vpop.f32.mrf.mxu2  ;;  %9801 = vmatpush.msrb.mxu0 %v9713_v46  ;;  %v9602_v46 = vpop.f32.mrf.mxu0 }
0x1fb9   :  { %v9522_v12 = vpop.f32.mrf.mxu1 }
0x1fba   :  { %9802 = vmatpush.msrb.mxu0 %v9709_v61 }
0x1fbc   :  { %9803 = vmatpush.msrb.mxu0 %v9705_v0 }
0x1fbe   :  { %9804 = vmatpush.msrb.mxu0 %v9701_v39 }
0x1fc0   :  { %v9763_v42 = vpop.f32.mrf.mxu2  ;;  %9805 = vmatpush.msrb.mxu0 %v9697_v11 }
0x1fc1   :  { %v9525_v49 = vpop.f32.mrf.mxu1 }
0x1fc2   :  { %9806 = vmatpush.msrb.mxu0 %v9693_v19 }
0x1fc4   :  { %9807 = vmatpush.msrb.mxu0 %v9689_v51 }
0x1fc6   :  { %9808 = vmatpush.msrb.mxu0 %v9685_v53  ;;  %v7967_v53 = vadd.f32 %v17108_v58, %v17106_v63 }
0x1fc8   :  { %v9766_v23 = vpop.f32.mrf.mxu2  ;;  %9809 = vmatpush.msrb.mxu0 %v9681_v36 }
0x1fc9   :  { %v9528_v35 = vpop.f32.mrf.mxu1 }
0x1fca   :  { %9617 = vmatpush.msrb.mxu3 %v9528_v35  ;;  %9810 = vmatpush.msrb.mxu0 %v9677_v21 }
0x1fcc   :  { %9618 = vmatpush.msrb.mxu3 %v9525_v49  ;;  %9811 = vmatpush.msrb.mxu0 %v9673_v41 }
0x1fce   :  { %9619 = vmatpush.msrb.mxu3 %v9522_v12  ;;  %9812 = vmatpush.msrb.mxu0 %v9669_v16  ;;  %v9582_v12 = vpop.f32.mrf.mxu3 }
0x1fd0   :  { %9620 = vmatpush.msrb.mxu3 %v9519_v4  ;;  %v9769_v18 = vpop.f32.mrf.mxu2  ;;  %9813 = vmatpush.msrb.mxu0 %v9665_v1  ;;  %v9652_v4 = vld [vmem:[#allocation8 + $0x1010] sm:$0xff] }
0x1fd1   :  { %11640 = vmatmul.msk.f32.vlgmr.msrb.gmra.mxu3 %vm2051_vm2, %v17297_v44  ;;  %v9731_v37 = vpop.f32.mrf.mxu1  ;;  %9867 = vmatpush.msra.mxu2 %v9769_v18  ;;  %v9696_v44 = vld [vmem:[#allocation8 + $0x1170] sm:$0xff] }
0x1fd2   :  { %9772 = vmatpush.msra.mxu3 %v9712_v50  ;;  %9814 = vmatpush.msrb.mxu0 %v9661_v22 }
0x1fd3   :  { %9868 = vmatpush.msra.mxu2 %v9766_v23  ;;  %v8295_v23 = vadd.f32 %v17156_v25, %v7967_v53 }
0x1fd4   :  { %9773 = vmatpush.msra.mxu3 %v9708_v15  ;;  %9815 = vmatpush.msrb.mxu0 %v9657_v26 }
0x1fd5   :  { %9869 = vmatpush.msra.mxu2 %v9763_v42  ;;  %v8565_v41 = vadd.f32 %v17198_v43, %v8295_v23 }
0x1fd6   :  { %9774 = vmatpush.msra.mxu3 %v9704_v29  ;;  %9816 = vmatpush.msrb.mxu0 %v9653_v40 }
0x1fd7   :  { %9817 = vmatmul.f32.vlgmr.msrb.gmra.mxu0 %v16982_v24  ;;  %9870 = vmatpush.msra.mxu2 %v9760_v38 }
0x1fd8   :  { %9775 = vmatpush.msra.mxu3 %v9700_v6  ;;  %11644 = vmatmul.msk.f32.vlgmr.msra.gmra.mxu2 %vm2051_vm2, %v17341_v7 }
0x1fd9   :  { %v9734_v28 = vpop.f32.mrf.mxu1 }
0x1fda   :  { %9776 = vmatpush.msra.mxu3 %v9696_v44 }
0x1fdc   :  { %9777 = vmatpush.msra.mxu3 %v9692_v47 }
0x1fde   :  { %9778 = vmatpush.msra.mxu3 %v9688_v20 }
0x1fdf   :  { %9820 = vmatmul.f32.gmra.mxu0 %v16993_v17 }
0x1fe0   :  { %9779 = vmatpush.msra.mxu3 %v9684_v52 }
0x1fe1   :  { %v9737_v8 = vpop.f32.mrf.mxu1 }
0x1fe2   :  { %9780 = vmatpush.msra.mxu3 %v9680_v32 }
0x1fe4   :  { %9781 = vmatpush.msra.mxu3 %v9676_v34 }
0x1fe6   :  { %9782 = vmatpush.msra.mxu3 %v9672_v60 }
0x1fe7   :  { %9823 = vmatmul.f32.gmra.mxu0 %v17001_v54 }
0x1fe8   :  { %9783 = vmatpush.msra.mxu3 %v9668_v5 }
0x1fe9   :  { %v9740_v59 = vpop.f32.mrf.mxu1 }
0x1fea   :  { %9784 = vmatpush.msra.mxu3 %v9664_v45  ;;  %9847 = vmatpush.msra.mxu1 %v9740_v59 }
0x1fec   :  { %9785 = vmatpush.msra.mxu3 %v9660_v31  ;;  %9848 = vmatpush.msra.mxu1 %v9737_v8 }
0x1fee   :  { %9786 = vmatpush.msra.mxu3 %v9656_v55  ;;  %9849 = vmatpush.msra.mxu1 %v9734_v28 }
0x1fef   :  { %9826 = vmatmul.f32.gmra.mxu0 %v17007_v27 }
0x1ff0   :  { %9787 = vmatpush.msra.mxu3 %v9652_v4  ;;  %9850 = vmatpush.msra.mxu1 %v9731_v37 }
0x1ff1   :  { %9788 = vmatmul.f32.vlgmr.msra.gmra.mxu3 %v16982_v24  ;;  %11643 = vmatmul.msk.f32.vlgmr.msra.gmra.mxu1 %vm2051_vm2, %v17341_v7 }
0x1ff9   :  { %9791 = vmatmul.f32.gmra.mxu3 %v16993_v17 }
0x2001   :  { %9794 = vmatmul.f32.gmra.mxu3 %v17001_v54 }
0x2009   :  { %9797 = vmatmul.f32.gmra.mxu3 %v17007_v27 }
0x2034   :  { %v9642_v61 = vpop.f32.mrf.mxu0 }
0x2035   :  { %v9648_v38 = vadd.f32 %v9642_v61, %v17327_v56  ;;  %v7987_v56 = vadd.f32 %v17114_v57, %v17104_v9  ;;  %v8835_v9 = vadd.f32 %v17238_v30, %v8565_v41 }
0x2054   :  { %v9622_v0 = vpop.f32.mrf.mxu3  ;;  %v9818_v39 = vpop.f32.mrf.mxu0 }
0x2055   :  { %v9647_v11 = vadd.f32 %v9622_v0, %v17332_v10  ;;  %v8296_v10 = vadd.f32 %v17158_v62, %v7987_v56  ;;  %v9923_v62 = vpop.permute.xlu2 %9922 }
0x2056   :  { %v9925_v58 = vperm.slane %v9923_v62, 0 }
0x2057   :  { %v8566_v51 = vadd.f32 %v17194_v48, %v8296_v10  ;;  %v9105_v48 = vadd.f32 %v17283_v33, %v8835_v9 }
0x2059   :  { %v8836_v36 = vadd.f32 %v17234_v13, %v8566_v51  ;;  %v9375_v63 = vadd.f32 %v17329_v2, %v9105_v48 }
0x205b   :  { %v9872_v21 = vpop.f32.mrf.mxu2  ;;  %v9106_v35 = vadd.f32 %v17274_v3, %v8836_v36  ;;  %v9645_v22 = vadd.f32 %v9582_v12, %v9375_v63 }
0x205c   :  { %v9821_v19 = vpop.f32.mrf.mxu0 }
0x205d   :  { %v9376_v16 = vadd.f32 %v17324_v14, %v9106_v35 }
0x205f   :  { %v9646_v57 = vadd.f32 %v9602_v46, %v9376_v16 }
0x2061   :  { %v9916_v1 = vadd.f32 %v9872_v21, %v9646_v57 }
0x2063   :  { %v9927_v18 = vadd.f32 %v9925_v58, %v9916_v1 }
0x2064   :  { %v9824_v24 = vpop.f32.mrf.mxu0 }
0x2065   :  { %v11648_v43 = vmul.f32 -1.442695, %v9927_v18 }
0x2067   :  { %11664 = vpow2.f32 %v11648_v43 }
0x206c   :  { %v9827_v42 = vpop.f32.mrf.mxu0 }
0x206d   :  { %9907 = vmatpush.msrb.mxu2 %v9827_v42  ;;  %v11665_v26 = vpop.eup %11664 }
0x206e   :  { %v9852_v13 = vpop.f32.mrf.mxu1  ;;  %v9943_v29 = vadd.f32 1.0, %v11665_v26 }
0x206f   :  { %9908 = vmatpush.msrb.mxu2 %v9824_v24  ;;  %v9915_v3 = vadd.f32 %v9852_v13, %v9645_v22 }
0x2070   :  { %v9970_v46 = vand.u32 2147483647, %v9943_v29  ;;  %v9972_v12 = vand.u32 2147483648, %v9943_v29  ;;  %vm9966_vm7 = vweird.f32 %v9943_v29 }
0x2071   :  { %9909 = vmatpush.msrb.mxu2 %v9821_v19  ;;  %v9926_v15 = vadd.f32 %v9925_v58, %v9915_v3 }
0x2072   :  { %vm17383_vm9 = vcmp.eq.f32.partialorder %v9970_v46, 8.507059e+37 }
0x2073   :  { %9910 = vmatpush.msrb.mxu2 %v9818_v39  ;;  %v11647_v30 = vmul.f32 -1.442695, %v9926_v15 }
0x2074   :  { %v9789_v17 = vpop.f32.mrf.mxu3  ;;  %11646 = vmatmul.msk.f32.vlgmr.msrb.gmra.mxu2 %vm2051_vm2, %v17341_v7 }
0x207c   :  { %v9792_v54 = vpop.f32.mrf.mxu3 }
0x2084   :  { %v9795_v27 = vpop.f32.mrf.mxu3 }
0x208c   :  { %v9798_v49 = vpop.f32.mrf.mxu3 }
0x208d   :  { %9887 = vmatpush.msrb.mxu1 %v9798_v49 }
0x208f   :  { %9888 = vmatpush.msrb.mxu1 %v9795_v27 }
0x2091   :  { %9889 = vmatpush.msrb.mxu1 %v9792_v54  ;;  %v9973_v54 = vor.u32 1.1754944e-38, %v9972_v12 }
0x2093   :  { %9890 = vmatpush.msrb.mxu1 %v9789_v17 }
0x2094   :  { %11645 = vmatmul.msk.f32.vlgmr.msrb.gmra.mxu1 %vm2051_vm2, %v17341_v7 }
0x20f7   :  { %v9912_v50 = vpop.f32.mrf.mxu2 }
0x20f8   :  { %v9918_v25 = vadd.f32 %v9912_v50, %v9648_v38  ;;  %v10018_v50 = vlaneseq }
0x20fa   :  { %v9929_v37 = vadd.f32 %v9925_v58, %v9918_v25 }
0x20fc   :  { %v11650_v14 = vmul.f32 -1.442695, %v9929_v37 }
0x20fe   :  { %11666 = vpow2.f32 %v11650_v14 }
0x20ff   :  { %11668 = vpow2.f32 %v11647_v30 }
0x2100   :  { %11670 = vrcp.f32 %v9943_v29 }
0x2104   :  { %v11667_v33 = vpop.eup %11666 }
0x2105   :  { %v11669_v40 = vpop.eup %11668  ;;  %v9945_v6 = vadd.f32 1.0, %v11667_v33 }
0x2106   :  { %v17375_v2 = vadd.f32 1.0, %v11669_v40  ;;  %v11671_v47 = vpop.eup %11670 }
0x2107   :  { %11672 = vrcp.f32 %v9945_v6  ;;  %v9962_v32 = vmul.f32 %v11671_v47, %v9943_v29  ;;  %vm9967_vm6 = vweird.f32 %v11671_v47  ;;  %v10002_v27 = vand.u32 2147483648, %v9945_v6 }
0x2108   :  { %11674 = vrcp.f32 %v17375_v2  ;;  %vm17379_vm8 = vmor %vm9966_vm7, %vm9967_vm6  ;;  %vm9996_vm12 = vweird.f32 %v9945_v6  ;;  %v10000_v56 = vand.u32 2147483647, %v9945_v6  ;;  %vm9951_vm13 = vweird.f32 %v17375_v2 }
0x2109   :  { %v9963_v60 = vsub.f32 1.0, %v9962_v32  ;;  %v9955_v51 = vand.u32 2147483647, %v17375_v2  ;;  %v9957_v53 = vand.u32 2147483648, %v17375_v2  ;;  %v10003_v16 = vor.u32 1.1754944e-38, %v10002_v27 }
0x210a   :  { %vm10001_vm2 = vcmp.eq.f32.partialorder %v10000_v56, 8.507059e+37 }
0x210b   :  { %v9964_v55 = vmul.f32 %v11671_v47, %v9963_v60  ;;  %v9958_v62 = vor.u32 1.1754944e-38, %v9957_v53  ;;  %vm9956_vm6 = vcmp.eq.f32.partialorder %v9955_v51, 8.507059e+37 }
0x210d   :  { %v11673_v52 = vpop.eup %11672  ;;  %v9965_v38 = vadd.f32 %v11671_v47, %v9964_v55 }
0x210e   :  { %v11675_v8 = vpop.eup %11674  ;;  %v9992_v34 = vmul.f32 %v11673_v52, %v9945_v6  ;;  %vm9997_vm10 = vweird.f32 %v11673_v52 }
0x210f   :  { %v9947_v45 = vmul.f32 %v11675_v8, %v17375_v2  ;;  %v9969_v17 = vsel %vm17379_vm8, %v11671_v47, %v9965_v38  ;;  %vm9952_vm11 = vweird.f32 %v11675_v8  ;;  %vm9998_vm14 = vmor %vm9996_vm12, %vm9997_vm10  ;;  %vm10014_vm8 = vcmask 1042434  }
0x2110   :  { %v9993_v31 = vsub.f32 1.0, %v9992_v34  ;;  %v9974_v41 = vsel %vm17383_vm9, %v9973_v54, %v9969_v17  ;;  %vm9953_vm1 = vmor %vm9951_vm13, %vm9952_vm11  ;;  %vm10020_vm9 = vcmp.lt.s32.totalorder %v10018_v50, 512 }
0x2111   :  { %v9892_v7 = vpop.f32.mrf.mxu1  ;;  %v9948_v4 = vsub.f32 1.0, %v9947_v45  ;;  %v10010_v22 = vrot.slane %v9974_v41, 7 }
0x2112   :  { %v9917_v44 = vadd.f32 %v9892_v7, %v9647_v11  ;;  %v9994_v61 = vmul.f32 %v11673_v52, %v9993_v31 }
0x2113   :  { %v9949_v0 = vmul.f32 %v11675_v8, %v9948_v4 }
0x2114   :  { %v9928_v28 = vadd.f32 %v9925_v58, %v9917_v44  ;;  %v9995_v24 = vadd.f32 %v11673_v52, %v9994_v61 }
0x2115   :  { %v9950_v49 = vadd.f32 %v11675_v8, %v9949_v0 }
0x2116   :  { %v11649_v20 = vmul.f32 -1.442695, %v9928_v28  ;;  %v9999_v21 = vsel %vm9998_vm14, %v11673_v52, %v9995_v24 }
0x2117   :  { %v9954_v9 = vsel %vm9953_vm1, %v11675_v8, %v9950_v49  ;;  %v10004_v48 = vsel %vm10001_vm2, %v10003_v16, %v9999_v21 }
0x2118   :  { %11676 = vpow2.f32 %v11649_v20  ;;  %v9959_v58 = vsel %vm9956_vm6, %v9958_v62, %v9954_v9  ;;  %v10012_v25 = vrot.slane %v10004_v48, 5 }
0x2119   :  { %v10013_v3 = vsel %vm448_vm0, %v9959_v58, %v10010_v22 }
0x211e   :  { %v11677_v5 = vpop.eup %11676 }
0x211f   :  { %v9944_v59 = vadd.f32 1.0, %v11677_v5 }
0x2121   :  { %11678 = vrcp.f32 %v9944_v59  ;;  %v9987_v36 = vand.u32 2147483648, %v9944_v59  ;;  %v9985_v35 = vand.u32 2147483647, %v9944_v59  ;;  %vm9981_vm3 = vweird.f32 %v9944_v59 }
0x2123   :  { %v9988_v1 = vor.u32 1.1754944e-38, %v9987_v36  ;;  %vm9986_vm7 = vcmp.eq.f32.partialorder %v9985_v35, 8.507059e+37 }
0x2127   :  { %v11679_v39 = vpop.eup %11678 }
0x2128   :  { %v9977_v42 = vmul.f32 %v11679_v39, %v9944_v59  ;;  %vm9982_vm15 = vweird.f32 %v11679_v39 }
0x2129   :  { %vm9983_vm5 = vmor %vm9981_vm3, %vm9982_vm15 }
0x212a   :  { %v9978_v10 = vsub.f32 1.0, %v9977_v42 }
0x212c   :  { %v9979_v23 = vmul.f32 %v11679_v39, %v9978_v10 }
0x212e   :  { %v9980_v57 = vadd.f32 %v11679_v39, %v9979_v23 }
0x2130   :  { %v9984_v63 = vsel %vm9983_vm5, %v11679_v39, %v9980_v57 }
0x2131   :  { %v9989_v13 = vsel %vm9986_vm7, %v9988_v1, %v9984_v63 }
0x2132   :  { %v10011_v18 = vrot.slane %v9989_v13, 6 }
0x2134   :  { %v10015_v37 = vsel %vm10014_vm8, %v10011_v18, %v10012_v25 }
0x2135   :  { %v10016_v43 = vsel %vm4735_vm4, %v10013_v3, %v10015_v37 }
0x2136   :  { %10022 = vst.msk [vmem:[%s17419_s19] sm:$0xf] %vm10020_vm9, %v10016_v43 }
0x2137   :  { %10027 = vsyncpa [#allocation4], 1 }
0x2138   :  { %10028 = vsyncpa [#allocation6], 1 }
0x2139   :  { %10029 = vsyncpa [#allocation9], 1 }

</bundles_post_ra>
